<compile_context>
chip_gen: v5e
topology: v5e:2x2
jax: 0.10.0
libtpu: 0.0.40
codegen_flags: <defaults>
</compile_context>

<pallas_src>
import functools

import numpy as np
import jax
import jax.numpy as jnp
from jax.experimental import pallas as pl
from jax.experimental.pallas import tpu as pltpu


_INV_SQRT2 = 0.7071067811865476


def _gelu_exact(x):
    # exact (erf-based) GELU, matches nn.GELU() default; computed in f32
    return 0.5 * x * (1.0 + jax.lax.erf(x * _INV_SQRT2))


# --------------------------- fused Pallas kernel -----------------------------
def _make_fused_kernel(n_conv):
    """Kernel ref order:
       cols1, w1, b1, [sel_l, w_l, b_l for l = 2..n_conv], pool, head_w, head_b, out
    """
    def kernel(*refs):
        cols1_ref, w1_ref, b1_ref = refs[0], refs[1], refs[2]
        tail = 3 + 3 * (n_conv - 1)
        pool_ref, hw_ref, hb_ref = refs[tail], refs[tail + 1], refs[tail + 2]
        out_ref = refs[tail + 3]

        # ---- conv1: plain full-K GEMM on the (tiny) pre-built im2col matrix ----
        y = jnp.dot(cols1_ref[...], w1_ref[...],
                    preferred_element_type=jnp.float32)
        y = _gelu_exact(y + b1_ref[...])            # f32 (B*H1*W1, C1)
        yb = y.astype(jnp.bfloat16)

        # ---- conv2..convN: in-kernel im2col via constant 0/1 selection GEMMs ----
        # y_out = gelu( sum_t (S_t @ y_in) @ W_t + b );  S_t gathers the tap-t
        # source pixel for every output position (all-zero row == zero padding).
        for l in range(n_conv - 1):
            s_ref, w_ref, b_ref = refs[3 + 3 * l], refs[4 + 3 * l], refs[5 + 3 * l]
            taps = s_ref.shape[0]
            acc = jnp.zeros((s_ref.shape[1], w_ref.shape[2]), jnp.float32)
            for t in range(taps):
                gathered = jnp.dot(s_ref[t], yb,
                                   preferred_element_type=jnp.float32)
                acc = acc + jnp.dot(gathered.astype(jnp.bfloat16), w_ref[t],
                                    preferred_element_type=jnp.float32)
            y = _gelu_exact(acc + b_ref[...])
            yb = y.astype(jnp.bfloat16)
            # TODO(synk): nn.Dropout is identity here (inference semantics only).

        # ---- AdaptiveAvgPool2d((1,1)) as a constant per-batch averaging matmul ----
        pooled = jnp.dot(pool_ref[...], y, preferred_element_type=jnp.float32)
        # ---- classification head (Linear) ----
        logits = jnp.dot(pooled, hw_ref[...],
                         preferred_element_type=jnp.float32) + hb_ref[...]
        out_ref[...] = logits

    return kernel


# ------------------------------ host-side glue -------------------------------
def _im2col(x_nhwc, k, stride, pad):
    """Layer-1 im2col (tiny). Returns (B*Ho*Wo, k*k*Cin) with (kh, kw, Cin) order."""
    x = jnp.pad(x_nhwc, ((0, 0), (pad, pad), (pad, pad), (0, 0)))
    B, Hp, Wp, C = x.shape
    Ho = (Hp - k) // stride + 1
    Wo = (Wp - k) // stride + 1
    patches = []
    for di in range(k):
        for dj in range(k):
            patches.append(
                x[:, di:di + stride * Ho:stride, dj:dj + stride * Wo:stride, :])
    cols = jnp.concatenate(patches, axis=-1)          # (B, Ho, Wo, k*k*C)
    return cols.reshape(B * Ho * Wo, k * k * C)


def _build_geometry(B, H, W, kernel_sizes, stride=2):
    """Constant selection matrices (conv2..N) and the pooling matrix."""
    sel = []
    h, w = H, W
    for idx, k in enumerate(kernel_sizes):
        pad = k // 2
        Ho = (h + 2 * pad - k) // stride + 1
        Wo = (w + 2 * pad - k) // stride + 1
        if idx > 0:
            S = np.zeros((k * k, B * Ho * Wo, B * h * w), np.float32)
            for dh in range(k):
                for dw in range(k):
                    t = dh * k + dw
                    for b in range(B):
                        for i in range(Ho):
                            for j in range(Wo):
                                hs = stride * i + dh - pad
                                ws = stride * j + dw - pad
                                if 0 <= hs < h and 0 <= ws < w:
                                    S[t, b * Ho * Wo + i * Wo + j,
                                      b * h * w + hs * w + ws] = 1.0
            sel.append(jnp.asarray(S, jnp.bfloat16))   # 0/1 exact in bf16
        h, w = Ho, Wo
    pool = np.zeros((B, B * h * w), np.float32)
    for b in range(B):
        pool[b, b * h * w:(b + 1) * h * w] = 1.0 / (h * w)
    return {"sel": sel, "pool": jnp.asarray(pool, jnp.float32)}


def _fold_weight_norm(v, g):
    """PyTorch weight_norm (dim=0): W[o] = g[o] * v[o] / ||v[o]||_F."""
    norm = jnp.sqrt(jnp.sum(v * v, axis=(1, 2, 3), keepdims=True))
    return (g.reshape(-1, 1, 1, 1) / norm) * v


def init_params(key, num_classes, in_channels, hidden_dims, kernel_sizes):
    convs = []
    cin = in_channels
    for idx, (hd, k) in enumerate(zip(hidden_dims, kernel_sizes)):
        key, k1, k2, k3 = jax.random.split(key, 4)
        v = jax.random.normal(k1, (hd, cin, k, k), jnp.float32) * 0.05
        g = 1.0 + 0.1 * jax.random.normal(k2, (hd,), jnp.float32)
        b = 0.01 * jax.random.normal(k3, (hd,), jnp.float32)
        w = _fold_weight_norm(v, g)                    # (Cout, Cin, kh, kw)
        w_t = jnp.transpose(w, (2, 3, 1, 0))           # (kh, kw, Cin, Cout)
        if idx == 0:
            w_mat = w_t.reshape(k * k * cin, hd).astype(jnp.bfloat16)   # (K, N)
        else:
            w_mat = w_t.reshape(k * k, cin, hd).astype(jnp.bfloat16)    # (taps, Cin, Cout)
        convs.append({"w": w_mat, "b": b.reshape(1, hd).astype(jnp.float32), "k": int(k)})
        cin = hd
    key, k1, k2 = jax.random.split(key, 3)
    head_w = 0.05 * jax.random.normal(k1, (cin, num_classes), jnp.float32)
    head_b = 0.01 * jax.random.normal(k2, (num_classes,), jnp.float32)
    return {"convs": convs, "head_w": head_w,
            "head_b": head_b.reshape(1, num_classes)}


def block_forward(x_nchw, params, geom):
    n_conv = len(params["convs"])
    B = x_nchw.shape[0]
    num_classes = params["head_w"].shape[1]

    # One cast to bf16 + the (tiny) layer-1 im2col are the only XLA ops.
    x = jnp.transpose(x_nchw, (0, 2, 3, 1)).astype(jnp.bfloat16)   # NCHW -> NHWC
    k0 = params["convs"][0]["k"]
    cols1 = _im2col(x, k0, stride=2, pad=k0 // 2)                  # bf16 (B*H1*W1, K1)

    inputs = [cols1, params["convs"][0]["w"], params["convs"][0]["b"]]
    for l in range(1, n_conv):
        inputs += [geom["sel"][l - 1], params["convs"][l]["w"], params["convs"][l]["b"]]
    inputs += [geom["pool"], params["head_w"], params["head_b"]]

    # No grid / no BlockSpecs: every operand is mapped whole into VMEM
    # (total ~3.5 MiB) and the kernel runs as a single invocation.
    return pl.pallas_call(
        _make_fused_kernel(n_conv),
        out_shape=jax.ShapeDtypeStruct((B, num_classes), jnp.float32),
        compiler_params=pltpu.CompilerParams(vmem_limit_bytes=32 * 1024 * 1024),
    )(*inputs)


if __name__ == "__main__":
    num_classes = 10
    in_channels = 3
    hidden_dims = [64, 128, 256, 512]
    kernel_sizes = [3, 3, 3, 3]
    B, H, W = 2, 16, 16

    key = jax.random.PRNGKey(0)
    key, kx = jax.random.split(key)
    x = jax.random.normal(kx, (B, in_channels, H, W), jnp.float32)  # NCHW like PyTorch

    params = init_params(key, num_classes, in_channels, hidden_dims, kernel_sizes)
    geom = _build_geometry(B, H, W, kernel_sizes)

    fwd = jax.jit(functools.partial(block_forward, params=params, geom=geom))
    out = jax.block_until_ready(fwd(x))

    assert out.shape == (B, num_classes), out.shape
    assert bool(jnp.all(jnp.isfinite(out))), "non-finite output"
    print("KERNEL_OK")
</pallas_src>

<mosaic_0001>
module attributes {stable_mosaic.version = 11 : i64} {
  func.func @kernel(%arg0: memref<128x27xbf16, #tpu.memory_space<vmem>>, %arg1: memref<27x64xbf16, #tpu.memory_space<vmem>>, %arg2: memref<1x64xf32, #tpu.memory_space<vmem>>, %arg3: memref<9x32x128xbf16, #tpu.memory_space<vmem>>, %arg4: memref<9x64x128xbf16, #tpu.memory_space<vmem>>, %arg5: memref<1x128xf32, #tpu.memory_space<vmem>>, %arg6: memref<9x8x32xbf16, #tpu.memory_space<vmem>>, %arg7: memref<9x128x256xbf16, #tpu.memory_space<vmem>>, %arg8: memref<1x256xf32, #tpu.memory_space<vmem>>, %arg9: memref<9x2x8xbf16, #tpu.memory_space<vmem>>, %arg10: memref<9x256x512xbf16, #tpu.memory_space<vmem>>, %arg11: memref<1x512xf32, #tpu.memory_space<vmem>>, %arg12: memref<2x2xf32, #tpu.memory_space<vmem>>, %arg13: memref<512x10xf32, #tpu.memory_space<vmem>>, %arg14: memref<1x10xf32, #tpu.memory_space<vmem>>, %arg15: memref<2x10xf32, #tpu.memory_space<vmem>>) attributes {dimension_semantics = [], scalar_prefetch = 0 : i64, scratch_operands = 0 : i64, tpu.core_type = #tpu.core_type<tc>} {
    %c0 = arith.constant 0 : index
    %c0_0 = arith.constant 0 : index
    %0 = vector.load %arg0[%c0, %c0_0] : memref<128x27xbf16, #tpu.memory_space<vmem>>, vector<128x27xbf16>
    %c0_1 = arith.constant 0 : index
    %c0_2 = arith.constant 0 : index
    %1 = vector.load %arg1[%c0_1, %c0_2] : memref<27x64xbf16, #tpu.memory_space<vmem>>, vector<27x64xbf16>
    %cst = arith.constant dense<0.000000e+00> : vector<128x64xf32>
    %2 = tpu.matmul %0, %1, %cst {dimension_numbers = #tpu.dot_dimension_numbers<[1], [0], [0], [1], [0, 0, 1, 1], [], []>} : vector<128x27xbf16>, vector<27x64xbf16>, vector<128x64xf32> -> vector<128x64xf32>
    %c0_3 = arith.constant 0 : index
    %c0_4 = arith.constant 0 : index
    %3 = vector.load %arg2[%c0_3, %c0_4] : memref<1x64xf32, #tpu.memory_space<vmem>>, vector<1x64xf32>
    %4 = vector.broadcast %3 : vector<1x64xf32> to vector<128x64xf32>
    %5 = arith.addf %2, %4 : vector<128x64xf32>
    %cst_5 = arith.constant 5.000000e-01 : f32
    %6 = vector.broadcast %cst_5 : f32 to vector<128x64xf32>
    %7 = arith.mulf %6, %5 : vector<128x64xf32>
    %cst_6 = arith.constant 0.707106769 : f32
    %8 = vector.broadcast %cst_6 : f32 to vector<128x64xf32>
    %9 = arith.mulf %5, %8 : vector<128x64xf32>
    %10 = math.erf %9 : vector<128x64xf32>
    %cst_7 = arith.constant 1.000000e+00 : f32
    %11 = vector.broadcast %cst_7 : f32 to vector<128x64xf32>
    %12 = arith.addf %11, %10 : vector<128x64xf32>
    %13 = arith.mulf %7, %12 : vector<128x64xf32>
    %14 = arith.truncf %13 : vector<128x64xf32> to vector<128x64xbf16>
    %cst_8 = arith.constant 0.000000e+00 : f32
    %15 = vector.broadcast %cst_8 : f32 to vector<32x128xf32>
    %c0_9 = arith.constant 0 : index
    %c0_10 = arith.constant 0 : index
    %c0_11 = arith.constant 0 : index
    %16 = vector.load %arg3[%c0_9, %c0_10, %c0_11] : memref<9x32x128xbf16, #tpu.memory_space<vmem>>, vector<1x32x128xbf16>
    %17 = vector.shape_cast %16 : vector<1x32x128xbf16> to vector<32x128xbf16>
    %cst_12 = arith.constant dense<0.000000e+00> : vector<32x64xf32>
    %18 = tpu.matmul %17, %14, %cst_12 {dimension_numbers = #tpu.dot_dimension_numbers<[1], [0], [0], [1], [0, 0, 1, 1], [], []>} : vector<32x128xbf16>, vector<128x64xbf16>, vector<32x64xf32> -> vector<32x64xf32>
    %19 = arith.truncf %18 : vector<32x64xf32> to vector<32x64xbf16>
    %c0_13 = arith.constant 0 : index
    %c0_14 = arith.constant 0 : index
    %c0_15 = arith.constant 0 : index
    %20 = vector.load %arg4[%c0_13, %c0_14, %c0_15] : memref<9x64x128xbf16, #tpu.memory_space<vmem>>, vector<1x64x128xbf16>
    %21 = vector.shape_cast %20 : vector<1x64x128xbf16> to vector<64x128xbf16>
    %cst_16 = arith.constant dense<0.000000e+00> : vector<32x128xf32>
    %22 = tpu.matmul %19, %21, %cst_16 {dimension_numbers = #tpu.dot_dimension_numbers<[1], [0], [0], [1], [0, 0, 1, 1], [], []>} : vector<32x64xbf16>, vector<64x128xbf16>, vector<32x128xf32> -> vector<32x128xf32>
    %23 = arith.addf %15, %22 : vector<32x128xf32>
    %c1 = arith.constant 1 : index
    %c0_17 = arith.constant 0 : index
    %c0_18 = arith.constant 0 : index
    %24 = vector.load %arg3[%c1, %c0_17, %c0_18] : memref<9x32x128xbf16, #tpu.memory_space<vmem>>, vector<1x32x128xbf16>
    %25 = vector.shape_cast %24 : vector<1x32x128xbf16> to vector<32x128xbf16>
    %cst_19 = arith.constant dense<0.000000e+00> : vector<32x64xf32>
    %26 = tpu.matmul %25, %14, %cst_19 {dimension_numbers = #tpu.dot_dimension_numbers<[1], [0], [0], [1], [0, 0, 1, 1], [], []>} : vector<32x128xbf16>, vector<128x64xbf16>, vector<32x64xf32> -> vector<32x64xf32>
    %27 = arith.truncf %26 : vector<32x64xf32> to vector<32x64xbf16>
    %c1_20 = arith.constant 1 : index
    %c0_21 = arith.constant 0 : index
    %c0_22 = arith.constant 0 : index
    %28 = vector.load %arg4[%c1_20, %c0_21, %c0_22] : memref<9x64x128xbf16, #tpu.memory_space<vmem>>, vector<1x64x128xbf16>
    %29 = vector.shape_cast %28 : vector<1x64x128xbf16> to vector<64x128xbf16>
    %cst_23 = arith.constant dense<0.000000e+00> : vector<32x128xf32>
    %30 = tpu.matmul %27, %29, %cst_23 {dimension_numbers = #tpu.dot_dimension_numbers<[1], [0], [0], [1], [0, 0, 1, 1], [], []>} : vector<32x64xbf16>, vector<64x128xbf16>, vector<32x128xf32> -> vector<32x128xf32>
    %31 = arith.addf %23, %30 : vector<32x128xf32>
    %c2 = arith.constant 2 : index
    %c0_24 = arith.constant 0 : index
    %c0_25 = arith.constant 0 : index
    %32 = vector.load %arg3[%c2, %c0_24, %c0_25] : memref<9x32x128xbf16, #tpu.memory_space<vmem>>, vector<1x32x128xbf16>
    %33 = vector.shape_cast %32 : vector<1x32x128xbf16> to vector<32x128xbf16>
    %cst_26 = arith.constant dense<0.000000e+00> : vector<32x64xf32>
    %34 = tpu.matmul %33, %14, %cst_26 {dimension_numbers = #tpu.dot_dimension_numbers<[1], [0], [0], [1], [0, 0, 1, 1], [], []>} : vector<32x128xbf16>, vector<128x64xbf16>, vector<32x64xf32> -> vector<32x64xf32>
    %35 = arith.truncf %34 : vector<32x64xf32> to vector<32x64xbf16>
    %c2_27 = arith.constant 2 : index
    %c0_28 = arith.constant 0 : index
    %c0_29 = arith.constant 0 : index
    %36 = vector.load %arg4[%c2_27, %c0_28, %c0_29] : memref<9x64x128xbf16, #tpu.memory_space<vmem>>, vector<1x64x128xbf16>
    %37 = vector.shape_cast %36 : vector<1x64x128xbf16> to vector<64x128xbf16>
    %cst_30 = arith.constant dense<0.000000e+00> : vector<32x128xf32>
    %38 = tpu.matmul %35, %37, %cst_30 {dimension_numbers = #tpu.dot_dimension_numbers<[1], [0], [0], [1], [0, 0, 1, 1], [], []>} : vector<32x64xbf16>, vector<64x128xbf16>, vector<32x128xf32> -> vector<32x128xf32>
    %39 = arith.addf %31, %38 : vector<32x128xf32>
    %c3 = arith.constant 3 : index
    %c0_31 = arith.constant 0 : index
    %c0_32 = arith.constant 0 : index
    %40 = vector.load %arg3[%c3, %c0_31, %c0_32] : memref<9x32x128xbf16, #tpu.memory_space<vmem>>, vector<1x32x128xbf16>
    %41 = vector.shape_cast %40 : vector<1x32x128xbf16> to vector<32x128xbf16>
    %cst_33 = arith.constant dense<0.000000e+00> : vector<32x64xf32>
    %42 = tpu.matmul %41, %14, %cst_33 {dimension_numbers = #tpu.dot_dimension_numbers<[1], [0], [0], [1], [0, 0, 1, 1], [], []>} : vector<32x128xbf16>, vector<128x64xbf16>, vector<32x64xf32> -> vector<32x64xf32>
    %43 = arith.truncf %42 : vector<32x64xf32> to vector<32x64xbf16>
    %c3_34 = arith.constant 3 : index
    %c0_35 = arith.constant 0 : index
    %c0_36 = arith.constant 0 : index
    %44 = vector.load %arg4[%c3_34, %c0_35, %c0_36] : memref<9x64x128xbf16, #tpu.memory_space<vmem>>, vector<1x64x128xbf16>
    %45 = vector.shape_cast %44 : vector<1x64x128xbf16> to vector<64x128xbf16>
    %cst_37 = arith.constant dense<0.000000e+00> : vector<32x128xf32>
    %46 = tpu.matmul %43, %45, %cst_37 {dimension_numbers = #tpu.dot_dimension_numbers<[1], [0], [0], [1], [0, 0, 1, 1], [], []>} : vector<32x64xbf16>, vector<64x128xbf16>, vector<32x128xf32> -> vector<32x128xf32>
    %47 = arith.addf %39, %46 : vector<32x128xf32>
    %c4 = arith.constant 4 : index
    %c0_38 = arith.constant 0 : index
    %c0_39 = arith.constant 0 : index
    %48 = vector.load %arg3[%c4, %c0_38, %c0_39] : memref<9x32x128xbf16, #tpu.memory_space<vmem>>, vector<1x32x128xbf16>
    %49 = vector.shape_cast %48 : vector<1x32x128xbf16> to vector<32x128xbf16>
    %cst_40 = arith.constant dense<0.000000e+00> : vector<32x64xf32>
    %50 = tpu.matmul %49, %14, %cst_40 {dimension_numbers = #tpu.dot_dimension_numbers<[1], [0], [0], [1], [0, 0, 1, 1], [], []>} : vector<32x128xbf16>, vector<128x64xbf16>, vector<32x64xf32> -> vector<32x64xf32>
    %51 = arith.truncf %50 : vector<32x64xf32> to vector<32x64xbf16>
    %c4_41 = arith.constant 4 : index
    %c0_42 = arith.constant 0 : index
    %c0_43 = arith.constant 0 : index
    %52 = vector.load %arg4[%c4_41, %c0_42, %c0_43] : memref<9x64x128xbf16, #tpu.memory_space<vmem>>, vector<1x64x128xbf16>
    %53 = vector.shape_cast %52 : vector<1x64x128xbf16> to vector<64x128xbf16>
    %cst_44 = arith.constant dense<0.000000e+00> : vector<32x128xf32>
    %54 = tpu.matmul %51, %53, %cst_44 {dimension_numbers = #tpu.dot_dimension_numbers<[1], [0], [0], [1], [0, 0, 1, 1], [], []>} : vector<32x64xbf16>, vector<64x128xbf16>, vector<32x128xf32> -> vector<32x128xf32>
    %55 = arith.addf %47, %54 : vector<32x128xf32>
    %c5 = arith.constant 5 : index
    %c0_45 = arith.constant 0 : index
    %c0_46 = arith.constant 0 : index
    %56 = vector.load %arg3[%c5, %c0_45, %c0_46] : memref<9x32x128xbf16, #tpu.memory_space<vmem>>, vector<1x32x128xbf16>
    %57 = vector.shape_cast %56 : vector<1x32x128xbf16> to vector<32x128xbf16>
    %cst_47 = arith.constant dense<0.000000e+00> : vector<32x64xf32>
    %58 = tpu.matmul %57, %14, %cst_47 {dimension_numbers = #tpu.dot_dimension_numbers<[1], [0], [0], [1], [0, 0, 1, 1], [], []>} : vector<32x128xbf16>, vector<128x64xbf16>, vector<32x64xf32> -> vector<32x64xf32>
    %59 = arith.truncf %58 : vector<32x64xf32> to vector<32x64xbf16>
    %c5_48 = arith.constant 5 : index
    %c0_49 = arith.constant 0 : index
    %c0_50 = arith.constant 0 : index
    %60 = vector.load %arg4[%c5_48, %c0_49, %c0_50] : memref<9x64x128xbf16, #tpu.memory_space<vmem>>, vector<1x64x128xbf16>
    %61 = vector.shape_cast %60 : vector<1x64x128xbf16> to vector<64x128xbf16>
    %cst_51 = arith.constant dense<0.000000e+00> : vector<32x128xf32>
    %62 = tpu.matmul %59, %61, %cst_51 {dimension_numbers = #tpu.dot_dimension_numbers<[1], [0], [0], [1], [0, 0, 1, 1], [], []>} : vector<32x64xbf16>, vector<64x128xbf16>, vector<32x128xf32> -> vector<32x128xf32>
    %63 = arith.addf %55, %62 : vector<32x128xf32>
    %c6 = arith.constant 6 : index
    %c0_52 = arith.constant 0 : index
    %c0_53 = arith.constant 0 : index
    %64 = vector.load %arg3[%c6, %c0_52, %c0_53] : memref<9x32x128xbf16, #tpu.memory_space<vmem>>, vector<1x32x128xbf16>
    %65 = vector.shape_cast %64 : vector<1x32x128xbf16> to vector<32x128xbf16>
    %cst_54 = arith.constant dense<0.000000e+00> : vector<32x64xf32>
    %66 = tpu.matmul %65, %14, %cst_54 {dimension_numbers = #tpu.dot_dimension_numbers<[1], [0], [0], [1], [0, 0, 1, 1], [], []>} : vector<32x128xbf16>, vector<128x64xbf16>, vector<32x64xf32> -> vector<32x64xf32>
    %67 = arith.truncf %66 : vector<32x64xf32> to vector<32x64xbf16>
    %c6_55 = arith.constant 6 : index
    %c0_56 = arith.constant 0 : index
    %c0_57 = arith.constant 0 : index
    %68 = vector.load %arg4[%c6_55, %c0_56, %c0_57] : memref<9x64x128xbf16, #tpu.memory_space<vmem>>, vector<1x64x128xbf16>
    %69 = vector.shape_cast %68 : vector<1x64x128xbf16> to vector<64x128xbf16>
    %cst_58 = arith.constant dense<0.000000e+00> : vector<32x128xf32>
    %70 = tpu.matmul %67, %69, %cst_58 {dimension_numbers = #tpu.dot_dimension_numbers<[1], [0], [0], [1], [0, 0, 1, 1], [], []>} : vector<32x64xbf16>, vector<64x128xbf16>, vector<32x128xf32> -> vector<32x128xf32>
    %71 = arith.addf %63, %70 : vector<32x128xf32>
    %c7 = arith.constant 7 : index
    %c0_59 = arith.constant 0 : index
    %c0_60 = arith.constant 0 : index
    %72 = vector.load %arg3[%c7, %c0_59, %c0_60] : memref<9x32x128xbf16, #tpu.memory_space<vmem>>, vector<1x32x128xbf16>
    %73 = vector.shape_cast %72 : vector<1x32x128xbf16> to vector<32x128xbf16>
    %cst_61 = arith.constant dense<0.000000e+00> : vector<32x64xf32>
    %74 = tpu.matmul %73, %14, %cst_61 {dimension_numbers = #tpu.dot_dimension_numbers<[1], [0], [0], [1], [0, 0, 1, 1], [], []>} : vector<32x128xbf16>, vector<128x64xbf16>, vector<32x64xf32> -> vector<32x64xf32>
    %75 = arith.truncf %74 : vector<32x64xf32> to vector<32x64xbf16>
    %c7_62 = arith.constant 7 : index
    %c0_63 = arith.constant 0 : index
    %c0_64 = arith.constant 0 : index
    %76 = vector.load %arg4[%c7_62, %c0_63, %c0_64] : memref<9x64x128xbf16, #tpu.memory_space<vmem>>, vector<1x64x128xbf16>
    %77 = vector.shape_cast %76 : vector<1x64x128xbf16> to vector<64x128xbf16>
    %cst_65 = arith.constant dense<0.000000e+00> : vector<32x128xf32>
    %78 = tpu.matmul %75, %77, %cst_65 {dimension_numbers = #tpu.dot_dimension_numbers<[1], [0], [0], [1], [0, 0, 1, 1], [], []>} : vector<32x64xbf16>, vector<64x128xbf16>, vector<32x128xf32> -> vector<32x128xf32>
    %79 = arith.addf %71, %78 : vector<32x128xf32>
    %c8 = arith.constant 8 : index
    %c0_66 = arith.constant 0 : index
    %c0_67 = arith.constant 0 : index
    %80 = vector.load %arg3[%c8, %c0_66, %c0_67] : memref<9x32x128xbf16, #tpu.memory_space<vmem>>, vector<1x32x128xbf16>
    %81 = vector.shape_cast %80 : vector<1x32x128xbf16> to vector<32x128xbf16>
    %cst_68 = arith.constant dense<0.000000e+00> : vector<32x64xf32>
    %82 = tpu.matmul %81, %14, %cst_68 {dimension_numbers = #tpu.dot_dimension_numbers<[1], [0], [0], [1], [0, 0, 1, 1], [], []>} : vector<32x128xbf16>, vector<128x64xbf16>, vector<32x64xf32> -> vector<32x64xf32>
    %83 = arith.truncf %82 : vector<32x64xf32> to vector<32x64xbf16>
    %c8_69 = arith.constant 8 : index
    %c0_70 = arith.constant 0 : index
    %c0_71 = arith.constant 0 : index
    %84 = vector.load %arg4[%c8_69, %c0_70, %c0_71] : memref<9x64x128xbf16, #tpu.memory_space<vmem>>, vector<1x64x128xbf16>
    %85 = vector.shape_cast %84 : vector<1x64x128xbf16> to vector<64x128xbf16>
    %cst_72 = arith.constant dense<0.000000e+00> : vector<32x128xf32>
    %86 = tpu.matmul %83, %85, %cst_72 {dimension_numbers = #tpu.dot_dimension_numbers<[1], [0], [0], [1], [0, 0, 1, 1], [], []>} : vector<32x64xbf16>, vector<64x128xbf16>, vector<32x128xf32> -> vector<32x128xf32>
    %87 = arith.addf %79, %86 : vector<32x128xf32>
    %c0_73 = arith.constant 0 : index
    %c0_74 = arith.constant 0 : index
    %88 = vector.load %arg5[%c0_73, %c0_74] : memref<1x128xf32, #tpu.memory_space<vmem>>, vector<1x128xf32>
    %89 = vector.broadcast %88 : vector<1x128xf32> to vector<32x128xf32>
    %90 = arith.addf %87, %89 : vector<32x128xf32>
    %cst_75 = arith.constant 5.000000e-01 : f32
    %91 = vector.broadcast %cst_75 : f32 to vector<32x128xf32>
    %92 = arith.mulf %91, %90 : vector<32x128xf32>
    %cst_76 = arith.constant 0.707106769 : f32
    %93 = vector.broadcast %cst_76 : f32 to vector<32x128xf32>
    %94 = arith.mulf %90, %93 : vector<32x128xf32>
    %95 = math.erf %94 : vector<32x128xf32>
    %cst_77 = arith.constant 1.000000e+00 : f32
    %96 = vector.broadcast %cst_77 : f32 to vector<32x128xf32>
    %97 = arith.addf %96, %95 : vector<32x128xf32>
    %98 = arith.mulf %92, %97 : vector<32x128xf32>
    %99 = arith.truncf %98 : vector<32x128xf32> to vector<32x128xbf16>
    %cst_78 = arith.constant 0.000000e+00 : f32
    %100 = vector.broadcast %cst_78 : f32 to vector<8x256xf32>
    %c0_79 = arith.constant 0 : index
    %c0_80 = arith.constant 0 : index
    %c0_81 = arith.constant 0 : index
    %101 = vector.load %arg6[%c0_79, %c0_80, %c0_81] : memref<9x8x32xbf16, #tpu.memory_space<vmem>>, vector<1x8x32xbf16>
    %102 = vector.shape_cast %101 : vector<1x8x32xbf16> to vector<8x32xbf16>
    %cst_82 = arith.constant dense<0.000000e+00> : vector<8x128xf32>
    %103 = tpu.matmul %102, %99, %cst_82 {dimension_numbers = #tpu.dot_dimension_numbers<[1], [0], [0], [1], [0, 0, 1, 1], [], []>} : vector<8x32xbf16>, vector<32x128xbf16>, vector<8x128xf32> -> vector<8x128xf32>
    %104 = arith.truncf %103 : vector<8x128xf32> to vector<8x128xbf16>
    %c0_83 = arith.constant 0 : index
    %c0_84 = arith.constant 0 : index
    %c0_85 = arith.constant 0 : index
    %105 = vector.load %arg7[%c0_83, %c0_84, %c0_85] : memref<9x128x256xbf16, #tpu.memory_space<vmem>>, vector<1x128x256xbf16>
    %106 = vector.shape_cast %105 : vector<1x128x256xbf16> to vector<128x256xbf16>
    %cst_86 = arith.constant dense<0.000000e+00> : vector<8x256xf32>
    %107 = tpu.matmul %104, %106, %cst_86 {dimension_numbers = #tpu.dot_dimension_numbers<[1], [0], [0], [1], [0, 0, 1, 1], [], []>} : vector<8x128xbf16>, vector<128x256xbf16>, vector<8x256xf32> -> vector<8x256xf32>
    %108 = arith.addf %100, %107 : vector<8x256xf32>
    %c1_87 = arith.constant 1 : index
    %c0_88 = arith.constant 0 : index
    %c0_89 = arith.constant 0 : index
    %109 = vector.load %arg6[%c1_87, %c0_88, %c0_89] : memref<9x8x32xbf16, #tpu.memory_space<vmem>>, vector<1x8x32xbf16>
    %110 = vector.shape_cast %109 : vector<1x8x32xbf16> to vector<8x32xbf16>
    %cst_90 = arith.constant dense<0.000000e+00> : vector<8x128xf32>
    %111 = tpu.matmul %110, %99, %cst_90 {dimension_numbers = #tpu.dot_dimension_numbers<[1], [0], [0], [1], [0, 0, 1, 1], [], []>} : vector<8x32xbf16>, vector<32x128xbf16>, vector<8x128xf32> -> vector<8x128xf32>
    %112 = arith.truncf %111 : vector<8x128xf32> to vector<8x128xbf16>
    %c1_91 = arith.constant 1 : index
    %c0_92 = arith.constant 0 : index
    %c0_93 = arith.constant 0 : index
    %113 = vector.load %arg7[%c1_91, %c0_92, %c0_93] : memref<9x128x256xbf16, #tpu.memory_space<vmem>>, vector<1x128x256xbf16>
    %114 = vector.shape_cast %113 : vector<1x128x256xbf16> to vector<128x256xbf16>
    %cst_94 = arith.constant dense<0.000000e+00> : vector<8x256xf32>
    %115 = tpu.matmul %112, %114, %cst_94 {dimension_numbers = #tpu.dot_dimension_numbers<[1], [0], [0], [1], [0, 0, 1, 1], [], []>} : vector<8x128xbf16>, vector<128x256xbf16>, vector<8x256xf32> -> vector<8x256xf32>
    %116 = arith.addf %108, %115 : vector<8x256xf32>
    %c2_95 = arith.constant 2 : index
    %c0_96 = arith.constant 0 : index
    %c0_97 = arith.constant 0 : index
    %117 = vector.load %arg6[%c2_95, %c0_96, %c0_97] : memref<9x8x32xbf16, #tpu.memory_space<vmem>>, vector<1x8x32xbf16>
    %118 = vector.shape_cast %117 : vector<1x8x32xbf16> to vector<8x32xbf16>
    %cst_98 = arith.constant dense<0.000000e+00> : vector<8x128xf32>
    %119 = tpu.matmul %118, %99, %cst_98 {dimension_numbers = #tpu.dot_dimension_numbers<[1], [0], [0], [1], [0, 0, 1, 1], [], []>} : vector<8x32xbf16>, vector<32x128xbf16>, vector<8x128xf32> -> vector<8x128xf32>
    %120 = arith.truncf %119 : vector<8x128xf32> to vector<8x128xbf16>
    %c2_99 = arith.constant 2 : index
    %c0_100 = arith.constant 0 : index
    %c0_101 = arith.constant 0 : index
    %121 = vector.load %arg7[%c2_99, %c0_100, %c0_101] : memref<9x128x256xbf16, #tpu.memory_space<vmem>>, vector<1x128x256xbf16>
    %122 = vector.shape_cast %121 : vector<1x128x256xbf16> to vector<128x256xbf16>
    %cst_102 = arith.constant dense<0.000000e+00> : vector<8x256xf32>
    %123 = tpu.matmul %120, %122, %cst_102 {dimension_numbers = #tpu.dot_dimension_numbers<[1], [0], [0], [1], [0, 0, 1, 1], [], []>} : vector<8x128xbf16>, vector<128x256xbf16>, vector<8x256xf32> -> vector<8x256xf32>
    %124 = arith.addf %116, %123 : vector<8x256xf32>
    %c3_103 = arith.constant 3 : index
    %c0_104 = arith.constant 0 : index
    %c0_105 = arith.constant 0 : index
    %125 = vector.load %arg6[%c3_103, %c0_104, %c0_105] : memref<9x8x32xbf16, #tpu.memory_space<vmem>>, vector<1x8x32xbf16>
    %126 = vector.shape_cast %125 : vector<1x8x32xbf16> to vector<8x32xbf16>
    %cst_106 = arith.constant dense<0.000000e+00> : vector<8x128xf32>
    %127 = tpu.matmul %126, %99, %cst_106 {dimension_numbers = #tpu.dot_dimension_numbers<[1], [0], [0], [1], [0, 0, 1, 1], [], []>} : vector<8x32xbf16>, vector<32x128xbf16>, vector<8x128xf32> -> vector<8x128xf32>
    %128 = arith.truncf %127 : vector<8x128xf32> to vector<8x128xbf16>
    %c3_107 = arith.constant 3 : index
    %c0_108 = arith.constant 0 : index
    %c0_109 = arith.constant 0 : index
    %129 = vector.load %arg7[%c3_107, %c0_108, %c0_109] : memref<9x128x256xbf16, #tpu.memory_space<vmem>>, vector<1x128x256xbf16>
    %130 = vector.shape_cast %129 : vector<1x128x256xbf16> to vector<128x256xbf16>
    %cst_110 = arith.constant dense<0.000000e+00> : vector<8x256xf32>
    %131 = tpu.matmul %128, %130, %cst_110 {dimension_numbers = #tpu.dot_dimension_numbers<[1], [0], [0], [1], [0, 0, 1, 1], [], []>} : vector<8x128xbf16>, vector<128x256xbf16>, vector<8x256xf32> -> vector<8x256xf32>
    %132 = arith.addf %124, %131 : vector<8x256xf32>
    %c4_111 = arith.constant 4 : index
    %c0_112 = arith.constant 0 : index
    %c0_113 = arith.constant 0 : index
    %133 = vector.load %arg6[%c4_111, %c0_112, %c0_113] : memref<9x8x32xbf16, #tpu.memory_space<vmem>>, vector<1x8x32xbf16>
    %134 = vector.shape_cast %133 : vector<1x8x32xbf16> to vector<8x32xbf16>
    %cst_114 = arith.constant dense<0.000000e+00> : vector<8x128xf32>
    %135 = tpu.matmul %134, %99, %cst_114 {dimension_numbers = #tpu.dot_dimension_numbers<[1], [0], [0], [1], [0, 0, 1, 1], [], []>} : vector<8x32xbf16>, vector<32x128xbf16>, vector<8x128xf32> -> vector<8x128xf32>
    %136 = arith.truncf %135 : vector<8x128xf32> to vector<8x128xbf16>
    %c4_115 = arith.constant 4 : index
    %c0_116 = arith.constant 0 : index
    %c0_117 = arith.constant 0 : index
    %137 = vector.load %arg7[%c4_115, %c0_116, %c0_117] : memref<9x128x256xbf16, #tpu.memory_space<vmem>>, vector<1x128x256xbf16>
    %138 = vector.shape_cast %137 : vector<1x128x256xbf16> to vector<128x256xbf16>
    %cst_118 = arith.constant dense<0.000000e+00> : vector<8x256xf32>
    %139 = tpu.matmul %136, %138, %cst_118 {dimension_numbers = #tpu.dot_dimension_numbers<[1], [0], [0], [1], [0, 0, 1, 1], [], []>} : vector<8x128xbf16>, vector<128x256xbf16>, vector<8x256xf32> -> vector<8x256xf32>
    %140 = arith.addf %132, %139 : vector<8x256xf32>
    %c5_119 = arith.constant 5 : index
    %c0_120 = arith.constant 0 : index
    %c0_121 = arith.constant 0 : index
    %141 = vector.load %arg6[%c5_119, %c0_120, %c0_121] : memref<9x8x32xbf16, #tpu.memory_space<vmem>>, vector<1x8x32xbf16>
    %142 = vector.shape_cast %141 : vector<1x8x32xbf16> to vector<8x32xbf16>
    %cst_122 = arith.constant dense<0.000000e+00> : vector<8x128xf32>
    %143 = tpu.matmul %142, %99, %cst_122 {dimension_numbers = #tpu.dot_dimension_numbers<[1], [0], [0], [1], [0, 0, 1, 1], [], []>} : vector<8x32xbf16>, vector<32x128xbf16>, vector<8x128xf32> -> vector<8x128xf32>
    %144 = arith.truncf %143 : vector<8x128xf32> to vector<8x128xbf16>
    %c5_123 = arith.constant 5 : index
    %c0_124 = arith.constant 0 : index
    %c0_125 = arith.constant 0 : index
    %145 = vector.load %arg7[%c5_123, %c0_124, %c0_125] : memref<9x128x256xbf16, #tpu.memory_space<vmem>>, vector<1x128x256xbf16>
    %146 = vector.shape_cast %145 : vector<1x128x256xbf16> to vector<128x256xbf16>
    %cst_126 = arith.constant dense<0.000000e+00> : vector<8x256xf32>
    %147 = tpu.matmul %144, %146, %cst_126 {dimension_numbers = #tpu.dot_dimension_numbers<[1], [0], [0], [1], [0, 0, 1, 1], [], []>} : vector<8x128xbf16>, vector<128x256xbf16>, vector<8x256xf32> -> vector<8x256xf32>
    %148 = arith.addf %140, %147 : vector<8x256xf32>
    %c6_127 = arith.constant 6 : index
    %c0_128 = arith.constant 0 : index
    %c0_129 = arith.constant 0 : index
    %149 = vector.load %arg6[%c6_127, %c0_128, %c0_129] : memref<9x8x32xbf16, #tpu.memory_space<vmem>>, vector<1x8x32xbf16>
    %150 = vector.shape_cast %149 : vector<1x8x32xbf16> to vector<8x32xbf16>
    %cst_130 = arith.constant dense<0.000000e+00> : vector<8x128xf32>
    %151 = tpu.matmul %150, %99, %cst_130 {dimension_numbers = #tpu.dot_dimension_numbers<[1], [0], [0], [1], [0, 0, 1, 1], [], []>} : vector<8x32xbf16>, vector<32x128xbf16>, vector<8x128xf32> -> vector<8x128xf32>
    %152 = arith.truncf %151 : vector<8x128xf32> to vector<8x128xbf16>
    %c6_131 = arith.constant 6 : index
    %c0_132 = arith.constant 0 : index
    %c0_133 = arith.constant 0 : index
    %153 = vector.load %arg7[%c6_131, %c0_132, %c0_133] : memref<9x128x256xbf16, #tpu.memory_space<vmem>>, vector<1x128x256xbf16>
    %154 = vector.shape_cast %153 : vector<1x128x256xbf16> to vector<128x256xbf16>
    %cst_134 = arith.constant dense<0.000000e+00> : vector<8x256xf32>
    %155 = tpu.matmul %152, %154, %cst_134 {dimension_numbers = #tpu.dot_dimension_numbers<[1], [0], [0], [1], [0, 0, 1, 1], [], []>} : vector<8x128xbf16>, vector<128x256xbf16>, vector<8x256xf32> -> vector<8x256xf32>
    %156 = arith.addf %148, %155 : vector<8x256xf32>
    %c7_135 = arith.constant 7 : index
    %c0_136 = arith.constant 0 : index
    %c0_137 = arith.constant 0 : index
    %157 = vector.load %arg6[%c7_135, %c0_136, %c0_137] : memref<9x8x32xbf16, #tpu.memory_space<vmem>>, vector<1x8x32xbf16>
    %158 = vector.shape_cast %157 : vector<1x8x32xbf16> to vector<8x32xbf16>
    %cst_138 = arith.constant dense<0.000000e+00> : vector<8x128xf32>
    %159 = tpu.matmul %158, %99, %cst_138 {dimension_numbers = #tpu.dot_dimension_numbers<[1], [0], [0], [1], [0, 0, 1, 1], [], []>} : vector<8x32xbf16>, vector<32x128xbf16>, vector<8x128xf32> -> vector<8x128xf32>
    %160 = arith.truncf %159 : vector<8x128xf32> to vector<8x128xbf16>
    %c7_139 = arith.constant 7 : index
    %c0_140 = arith.constant 0 : index
    %c0_141 = arith.constant 0 : index
    %161 = vector.load %arg7[%c7_139, %c0_140, %c0_141] : memref<9x128x256xbf16, #tpu.memory_space<vmem>>, vector<1x128x256xbf16>
    %162 = vector.shape_cast %161 : vector<1x128x256xbf16> to vector<128x256xbf16>
    %cst_142 = arith.constant dense<0.000000e+00> : vector<8x256xf32>
    %163 = tpu.matmul %160, %162, %cst_142 {dimension_numbers = #tpu.dot_dimension_numbers<[1], [0], [0], [1], [0, 0, 1, 1], [], []>} : vector<8x128xbf16>, vector<128x256xbf16>, vector<8x256xf32> -> vector<8x256xf32>
    %164 = arith.addf %156, %163 : vector<8x256xf32>
    %c8_143 = arith.constant 8 : index
    %c0_144 = arith.constant 0 : index
    %c0_145 = arith.constant 0 : index
    %165 = vector.load %arg6[%c8_143, %c0_144, %c0_145] : memref<9x8x32xbf16, #tpu.memory_space<vmem>>, vector<1x8x32xbf16>
    %166 = vector.shape_cast %165 : vector<1x8x32xbf16> to vector<8x32xbf16>
    %cst_146 = arith.constant dense<0.000000e+00> : vector<8x128xf32>
    %167 = tpu.matmul %166, %99, %cst_146 {dimension_numbers = #tpu.dot_dimension_numbers<[1], [0], [0], [1], [0, 0, 1, 1], [], []>} : vector<8x32xbf16>, vector<32x128xbf16>, vector<8x128xf32> -> vector<8x128xf32>
    %168 = arith.truncf %167 : vector<8x128xf32> to vector<8x128xbf16>
    %c8_147 = arith.constant 8 : index
    %c0_148 = arith.constant 0 : index
    %c0_149 = arith.constant 0 : index
    %169 = vector.load %arg7[%c8_147, %c0_148, %c0_149] : memref<9x128x256xbf16, #tpu.memory_space<vmem>>, vector<1x128x256xbf16>
    %170 = vector.shape_cast %169 : vector<1x128x256xbf16> to vector<128x256xbf16>
    %cst_150 = arith.constant dense<0.000000e+00> : vector<8x256xf32>
    %171 = tpu.matmul %168, %170, %cst_150 {dimension_numbers = #tpu.dot_dimension_numbers<[1], [0], [0], [1], [0, 0, 1, 1], [], []>} : vector<8x128xbf16>, vector<128x256xbf16>, vector<8x256xf32> -> vector<8x256xf32>
    %172 = arith.addf %164, %171 : vector<8x256xf32>
    %c0_151 = arith.constant 0 : index
    %c0_152 = arith.constant 0 : index
    %173 = vector.load %arg8[%c0_151, %c0_152] : memref<1x256xf32, #tpu.memory_space<vmem>>, vector<1x256xf32>
    %174 = vector.broadcast %173 : vector<1x256xf32> to vector<8x256xf32>
    %175 = arith.addf %172, %174 : vector<8x256xf32>
    %cst_153 = arith.constant 5.000000e-01 : f32
    %176 = vector.broadcast %cst_153 : f32 to vector<8x256xf32>
    %177 = arith.mulf %176, %175 : vector<8x256xf32>
    %cst_154 = arith.constant 0.707106769 : f32
    %178 = vector.broadcast %cst_154 : f32 to vector<8x256xf32>
    %179 = arith.mulf %175, %178 : vector<8x256xf32>
    %180 = math.erf %179 : vector<8x256xf32>
    %cst_155 = arith.constant 1.000000e+00 : f32
    %181 = vector.broadcast %cst_155 : f32 to vector<8x256xf32>
    %182 = arith.addf %181, %180 : vector<8x256xf32>
    %183 = arith.mulf %177, %182 : vector<8x256xf32>
    %184 = arith.truncf %183 : vector<8x256xf32> to vector<8x256xbf16>
    %cst_156 = arith.constant 0.000000e+00 : f32
    %185 = vector.broadcast %cst_156 : f32 to vector<2x512xf32>
    %c0_157 = arith.constant 0 : index
    %c0_158 = arith.constant 0 : index
    %c0_159 = arith.constant 0 : index
    %186 = vector.load %arg9[%c0_157, %c0_158, %c0_159] : memref<9x2x8xbf16, #tpu.memory_space<vmem>>, vector<1x2x8xbf16>
    %187 = vector.shape_cast %186 : vector<1x2x8xbf16> to vector<2x8xbf16>
    %cst_160 = arith.constant dense<0.000000e+00> : vector<2x256xf32>
    %188 = tpu.matmul %187, %184, %cst_160 {dimension_numbers = #tpu.dot_dimension_numbers<[1], [0], [0], [1], [0, 0, 1, 1], [], []>} : vector<2x8xbf16>, vector<8x256xbf16>, vector<2x256xf32> -> vector<2x256xf32>
    %189 = arith.truncf %188 : vector<2x256xf32> to vector<2x256xbf16>
    %c0_161 = arith.constant 0 : index
    %c0_162 = arith.constant 0 : index
    %c0_163 = arith.constant 0 : index
    %190 = vector.load %arg10[%c0_161, %c0_162, %c0_163] : memref<9x256x512xbf16, #tpu.memory_space<vmem>>, vector<1x256x512xbf16>
    %191 = vector.shape_cast %190 : vector<1x256x512xbf16> to vector<256x512xbf16>
    %cst_164 = arith.constant dense<0.000000e+00> : vector<2x512xf32>
    %192 = tpu.matmul %189, %191, %cst_164 {dimension_numbers = #tpu.dot_dimension_numbers<[1], [0], [0], [1], [0, 0, 1, 1], [], []>} : vector<2x256xbf16>, vector<256x512xbf16>, vector<2x512xf32> -> vector<2x512xf32>
    %193 = arith.addf %185, %192 : vector<2x512xf32>
    %c1_165 = arith.constant 1 : index
    %c0_166 = arith.constant 0 : index
    %c0_167 = arith.constant 0 : index
    %194 = vector.load %arg9[%c1_165, %c0_166, %c0_167] : memref<9x2x8xbf16, #tpu.memory_space<vmem>>, vector<1x2x8xbf16>
    %195 = vector.shape_cast %194 : vector<1x2x8xbf16> to vector<2x8xbf16>
    %cst_168 = arith.constant dense<0.000000e+00> : vector<2x256xf32>
    %196 = tpu.matmul %195, %184, %cst_168 {dimension_numbers = #tpu.dot_dimension_numbers<[1], [0], [0], [1], [0, 0, 1, 1], [], []>} : vector<2x8xbf16>, vector<8x256xbf16>, vector<2x256xf32> -> vector<2x256xf32>
    %197 = arith.truncf %196 : vector<2x256xf32> to vector<2x256xbf16>
    %c1_169 = arith.constant 1 : index
    %c0_170 = arith.constant 0 : index
    %c0_171 = arith.constant 0 : index
    %198 = vector.load %arg10[%c1_169, %c0_170, %c0_171] : memref<9x256x512xbf16, #tpu.memory_space<vmem>>, vector<1x256x512xbf16>
    %199 = vector.shape_cast %198 : vector<1x256x512xbf16> to vector<256x512xbf16>
    %cst_172 = arith.constant dense<0.000000e+00> : vector<2x512xf32>
    %200 = tpu.matmul %197, %199, %cst_172 {dimension_numbers = #tpu.dot_dimension_numbers<[1], [0], [0], [1], [0, 0, 1, 1], [], []>} : vector<2x256xbf16>, vector<256x512xbf16>, vector<2x512xf32> -> vector<2x512xf32>
    %201 = arith.addf %193, %200 : vector<2x512xf32>
    %c2_173 = arith.constant 2 : index
    %c0_174 = arith.constant 0 : index
    %c0_175 = arith.constant 0 : index
    %202 = vector.load %arg9[%c2_173, %c0_174, %c0_175] : memref<9x2x8xbf16, #tpu.memory_space<vmem>>, vector<1x2x8xbf16>
    %203 = vector.shape_cast %202 : vector<1x2x8xbf16> to vector<2x8xbf16>
    %cst_176 = arith.constant dense<0.000000e+00> : vector<2x256xf32>
    %204 = tpu.matmul %203, %184, %cst_176 {dimension_numbers = #tpu.dot_dimension_numbers<[1], [0], [0], [1], [0, 0, 1, 1], [], []>} : vector<2x8xbf16>, vector<8x256xbf16>, vector<2x256xf32> -> vector<2x256xf32>
    %205 = arith.truncf %204 : vector<2x256xf32> to vector<2x256xbf16>
    %c2_177 = arith.constant 2 : index
    %c0_178 = arith.constant 0 : index
    %c0_179 = arith.constant 0 : index
    %206 = vector.load %arg10[%c2_177, %c0_178, %c0_179] : memref<9x256x512xbf16, #tpu.memory_space<vmem>>, vector<1x256x512xbf16>
    %207 = vector.shape_cast %206 : vector<1x256x512xbf16> to vector<256x512xbf16>
    %cst_180 = arith.constant dense<0.000000e+00> : vector<2x512xf32>
    %208 = tpu.matmul %205, %207, %cst_180 {dimension_numbers = #tpu.dot_dimension_numbers<[1], [0], [0], [1], [0, 0, 1, 1], [], []>} : vector<2x256xbf16>, vector<256x512xbf16>, vector<2x512xf32> -> vector<2x512xf32>
    %209 = arith.addf %201, %208 : vector<2x512xf32>
    %c3_181 = arith.constant 3 : index
    %c0_182 = arith.constant 0 : index
    %c0_183 = arith.constant 0 : index
    %210 = vector.load %arg9[%c3_181, %c0_182, %c0_183] : memref<9x2x8xbf16, #tpu.memory_space<vmem>>, vector<1x2x8xbf16>
    %211 = vector.shape_cast %210 : vector<1x2x8xbf16> to vector<2x8xbf16>
    %cst_184 = arith.constant dense<0.000000e+00> : vector<2x256xf32>
    %212 = tpu.matmul %211, %184, %cst_184 {dimension_numbers = #tpu.dot_dimension_numbers<[1], [0], [0], [1], [0, 0, 1, 1], [], []>} : vector<2x8xbf16>, vector<8x256xbf16>, vector<2x256xf32> -> vector<2x256xf32>
    %213 = arith.truncf %212 : vector<2x256xf32> to vector<2x256xbf16>
    %c3_185 = arith.constant 3 : index
    %c0_186 = arith.constant 0 : index
    %c0_187 = arith.constant 0 : index
    %214 = vector.load %arg10[%c3_185, %c0_186, %c0_187] : memref<9x256x512xbf16, #tpu.memory_space<vmem>>, vector<1x256x512xbf16>
    %215 = vector.shape_cast %214 : vector<1x256x512xbf16> to vector<256x512xbf16>
    %cst_188 = arith.constant dense<0.000000e+00> : vector<2x512xf32>
    %216 = tpu.matmul %213, %215, %cst_188 {dimension_numbers = #tpu.dot_dimension_numbers<[1], [0], [0], [1], [0, 0, 1, 1], [], []>} : vector<2x256xbf16>, vector<256x512xbf16>, vector<2x512xf32> -> vector<2x512xf32>
    %217 = arith.addf %209, %216 : vector<2x512xf32>
    %c4_189 = arith.constant 4 : index
    %c0_190 = arith.constant 0 : index
    %c0_191 = arith.constant 0 : index
    %218 = vector.load %arg9[%c4_189, %c0_190, %c0_191] : memref<9x2x8xbf16, #tpu.memory_space<vmem>>, vector<1x2x8xbf16>
    %219 = vector.shape_cast %218 : vector<1x2x8xbf16> to vector<2x8xbf16>
    %cst_192 = arith.constant dense<0.000000e+00> : vector<2x256xf32>
    %220 = tpu.matmul %219, %184, %cst_192 {dimension_numbers = #tpu.dot_dimension_numbers<[1], [0], [0], [1], [0, 0, 1, 1], [], []>} : vector<2x8xbf16>, vector<8x256xbf16>, vector<2x256xf32> -> vector<2x256xf32>
    %221 = arith.truncf %220 : vector<2x256xf32> to vector<2x256xbf16>
    %c4_193 = arith.constant 4 : index
    %c0_194 = arith.constant 0 : index
    %c0_195 = arith.constant 0 : index
    %222 = vector.load %arg10[%c4_193, %c0_194, %c0_195] : memref<9x256x512xbf16, #tpu.memory_space<vmem>>, vector<1x256x512xbf16>
    %223 = vector.shape_cast %222 : vector<1x256x512xbf16> to vector<256x512xbf16>
    %cst_196 = arith.constant dense<0.000000e+00> : vector<2x512xf32>
    %224 = tpu.matmul %221, %223, %cst_196 {dimension_numbers = #tpu.dot_dimension_numbers<[1], [0], [0], [1], [0, 0, 1, 1], [], []>} : vector<2x256xbf16>, vector<256x512xbf16>, vector<2x512xf32> -> vector<2x512xf32>
    %225 = arith.addf %217, %224 : vector<2x512xf32>
    %c5_197 = arith.constant 5 : index
    %c0_198 = arith.constant 0 : index
    %c0_199 = arith.constant 0 : index
    %226 = vector.load %arg9[%c5_197, %c0_198, %c0_199] : memref<9x2x8xbf16, #tpu.memory_space<vmem>>, vector<1x2x8xbf16>
    %227 = vector.shape_cast %226 : vector<1x2x8xbf16> to vector<2x8xbf16>
    %cst_200 = arith.constant dense<0.000000e+00> : vector<2x256xf32>
    %228 = tpu.matmul %227, %184, %cst_200 {dimension_numbers = #tpu.dot_dimension_numbers<[1], [0], [0], [1], [0, 0, 1, 1], [], []>} : vector<2x8xbf16>, vector<8x256xbf16>, vector<2x256xf32> -> vector<2x256xf32>
    %229 = arith.truncf %228 : vector<2x256xf32> to vector<2x256xbf16>
    %c5_201 = arith.constant 5 : index
    %c0_202 = arith.constant 0 : index
    %c0_203 = arith.constant 0 : index
    %230 = vector.load %arg10[%c5_201, %c0_202, %c0_203] : memref<9x256x512xbf16, #tpu.memory_space<vmem>>, vector<1x256x512xbf16>
    %231 = vector.shape_cast %230 : vector<1x256x512xbf16> to vector<256x512xbf16>
    %cst_204 = arith.constant dense<0.000000e+00> : vector<2x512xf32>
    %232 = tpu.matmul %229, %231, %cst_204 {dimension_numbers = #tpu.dot_dimension_numbers<[1], [0], [0], [1], [0, 0, 1, 1], [], []>} : vector<2x256xbf16>, vector<256x512xbf16>, vector<2x512xf32> -> vector<2x512xf32>
    %233 = arith.addf %225, %232 : vector<2x512xf32>
    %c6_205 = arith.constant 6 : index
    %c0_206 = arith.constant 0 : index
    %c0_207 = arith.constant 0 : index
    %234 = vector.load %arg9[%c6_205, %c0_206, %c0_207] : memref<9x2x8xbf16, #tpu.memory_space<vmem>>, vector<1x2x8xbf16>
    %235 = vector.shape_cast %234 : vector<1x2x8xbf16> to vector<2x8xbf16>
    %cst_208 = arith.constant dense<0.000000e+00> : vector<2x256xf32>
    %236 = tpu.matmul %235, %184, %cst_208 {dimension_numbers = #tpu.dot_dimension_numbers<[1], [0], [0], [1], [0, 0, 1, 1], [], []>} : vector<2x8xbf16>, vector<8x256xbf16>, vector<2x256xf32> -> vector<2x256xf32>
    %237 = arith.truncf %236 : vector<2x256xf32> to vector<2x256xbf16>
    %c6_209 = arith.constant 6 : index
    %c0_210 = arith.constant 0 : index
    %c0_211 = arith.constant 0 : index
    %238 = vector.load %arg10[%c6_209, %c0_210, %c0_211] : memref<9x256x512xbf16, #tpu.memory_space<vmem>>, vector<1x256x512xbf16>
    %239 = vector.shape_cast %238 : vector<1x256x512xbf16> to vector<256x512xbf16>
    %cst_212 = arith.constant dense<0.000000e+00> : vector<2x512xf32>
    %240 = tpu.matmul %237, %239, %cst_212 {dimension_numbers = #tpu.dot_dimension_numbers<[1], [0], [0], [1], [0, 0, 1, 1], [], []>} : vector<2x256xbf16>, vector<256x512xbf16>, vector<2x512xf32> -> vector<2x512xf32>
    %241 = arith.addf %233, %240 : vector<2x512xf32>
    %c7_213 = arith.constant 7 : index
    %c0_214 = arith.constant 0 : index
    %c0_215 = arith.constant 0 : index
    %242 = vector.load %arg9[%c7_213, %c0_214, %c0_215] : memref<9x2x8xbf16, #tpu.memory_space<vmem>>, vector<1x2x8xbf16>
    %243 = vector.shape_cast %242 : vector<1x2x8xbf16> to vector<2x8xbf16>
    %cst_216 = arith.constant dense<0.000000e+00> : vector<2x256xf32>
    %244 = tpu.matmul %243, %184, %cst_216 {dimension_numbers = #tpu.dot_dimension_numbers<[1], [0], [0], [1], [0, 0, 1, 1], [], []>} : vector<2x8xbf16>, vector<8x256xbf16>, vector<2x256xf32> -> vector<2x256xf32>
    %245 = arith.truncf %244 : vector<2x256xf32> to vector<2x256xbf16>
    %c7_217 = arith.constant 7 : index
    %c0_218 = arith.constant 0 : index
    %c0_219 = arith.constant 0 : index
    %246 = vector.load %arg10[%c7_217, %c0_218, %c0_219] : memref<9x256x512xbf16, #tpu.memory_space<vmem>>, vector<1x256x512xbf16>
    %247 = vector.shape_cast %246 : vector<1x256x512xbf16> to vector<256x512xbf16>
    %cst_220 = arith.constant dense<0.000000e+00> : vector<2x512xf32>
    %248 = tpu.matmul %245, %247, %cst_220 {dimension_numbers = #tpu.dot_dimension_numbers<[1], [0], [0], [1], [0, 0, 1, 1], [], []>} : vector<2x256xbf16>, vector<256x512xbf16>, vector<2x512xf32> -> vector<2x512xf32>
    %249 = arith.addf %241, %248 : vector<2x512xf32>
    %c8_221 = arith.constant 8 : index
    %c0_222 = arith.constant 0 : index
    %c0_223 = arith.constant 0 : index
    %250 = vector.load %arg9[%c8_221, %c0_222, %c0_223] : memref<9x2x8xbf16, #tpu.memory_space<vmem>>, vector<1x2x8xbf16>
    %251 = vector.shape_cast %250 : vector<1x2x8xbf16> to vector<2x8xbf16>
    %cst_224 = arith.constant dense<0.000000e+00> : vector<2x256xf32>
    %252 = tpu.matmul %251, %184, %cst_224 {dimension_numbers = #tpu.dot_dimension_numbers<[1], [0], [0], [1], [0, 0, 1, 1], [], []>} : vector<2x8xbf16>, vector<8x256xbf16>, vector<2x256xf32> -> vector<2x256xf32>
    %253 = arith.truncf %252 : vector<2x256xf32> to vector<2x256xbf16>
    %c8_225 = arith.constant 8 : index
    %c0_226 = arith.constant 0 : index
    %c0_227 = arith.constant 0 : index
    %254 = vector.load %arg10[%c8_225, %c0_226, %c0_227] : memref<9x256x512xbf16, #tpu.memory_space<vmem>>, vector<1x256x512xbf16>
    %255 = vector.shape_cast %254 : vector<1x256x512xbf16> to vector<256x512xbf16>
    %cst_228 = arith.constant dense<0.000000e+00> : vector<2x512xf32>
    %256 = tpu.matmul %253, %255, %cst_228 {dimension_numbers = #tpu.dot_dimension_numbers<[1], [0], [0], [1], [0, 0, 1, 1], [], []>} : vector<2x256xbf16>, vector<256x512xbf16>, vector<2x512xf32> -> vector<2x512xf32>
    %257 = arith.addf %249, %256 : vector<2x512xf32>
    %c0_229 = arith.constant 0 : index
    %c0_230 = arith.constant 0 : index
    %258 = vector.load %arg11[%c0_229, %c0_230] : memref<1x512xf32, #tpu.memory_space<vmem>>, vector<1x512xf32>
    %259 = vector.broadcast %258 : vector<1x512xf32> to vector<2x512xf32>
    %260 = arith.addf %257, %259 : vector<2x512xf32>
    %cst_231 = arith.constant 5.000000e-01 : f32
    %261 = vector.broadcast %cst_231 : f32 to vector<2x512xf32>
    %262 = arith.mulf %261, %260 : vector<2x512xf32>
    %cst_232 = arith.constant 0.707106769 : f32
    %263 = vector.broadcast %cst_232 : f32 to vector<2x512xf32>
    %264 = arith.mulf %260, %263 : vector<2x512xf32>
    %265 = math.erf %264 : vector<2x512xf32>
    %cst_233 = arith.constant 1.000000e+00 : f32
    %266 = vector.broadcast %cst_233 : f32 to vector<2x512xf32>
    %267 = arith.addf %266, %265 : vector<2x512xf32>
    %268 = arith.mulf %262, %267 : vector<2x512xf32>
    %c0_234 = arith.constant 0 : index
    %c0_235 = arith.constant 0 : index
    %269 = vector.load %arg12[%c0_234, %c0_235] : memref<2x2xf32, #tpu.memory_space<vmem>>, vector<2x2xf32>
    %cst_236 = arith.constant dense<0.000000e+00> : vector<2x512xf32>
    %270 = tpu.matmul %269, %268, %cst_236 {dimension_numbers = #tpu.dot_dimension_numbers<[1], [0], [0], [1], [0, 0, 1, 1], [], []>} : vector<2x2xf32>, vector<2x512xf32>, vector<2x512xf32> -> vector<2x512xf32>
    %c0_237 = arith.constant 0 : index
    %c0_238 = arith.constant 0 : index
    %271 = vector.load %arg13[%c0_237, %c0_238] : memref<512x10xf32, #tpu.memory_space<vmem>>, vector<512x10xf32>
    %cst_239 = arith.constant dense<0.000000e+00> : vector<2x10xf32>
    %272 = tpu.matmul %270, %271, %cst_239 {dimension_numbers = #tpu.dot_dimension_numbers<[1], [0], [0], [1], [0, 0, 1, 1], [], []>} : vector<2x512xf32>, vector<512x10xf32>, vector<2x10xf32> -> vector<2x10xf32>
    %c0_240 = arith.constant 0 : index
    %c0_241 = arith.constant 0 : index
    %273 = vector.load %arg14[%c0_240, %c0_241] : memref<1x10xf32, #tpu.memory_space<vmem>>, vector<1x10xf32>
    %274 = vector.broadcast %273 : vector<1x10xf32> to vector<2x10xf32>
    %275 = arith.addf %272, %274 : vector<2x10xf32>
    %c0_242 = arith.constant 0 : index
    %c0_243 = arith.constant 0 : index
    %276 = vector.load %arg15[%c0_242, %c0_243] : memref<2x10xf32, #tpu.memory_space<vmem>>, vector<2x10xf32>
    tpu.vector_store %arg15[%c0_242, %c0_243], %275 {strides = array<i32>} : memref<2x10xf32, #tpu.memory_space<vmem>>, vector<2x10xf32>,
    return
  }
}

</mosaic_0001>

<bundles_post_ra>
// kernel: block_forward.1
= control target key start
LH: loop header
LB: loop body
LE: loop exit
PB: predicated region body
PF: predicated region fallthrough
CT: control target
= control target key end

     0   :  { %20 = vsyncpa [#allocation3], 0  ;;  %s15041_s0 = inlined_call_operand.vmem [shape: bf16[128,27], index: 0, kind: input, shape index: {}]   ;;  %s15042_s1 = inlined_call_operand.hbm [shape: bf16[27,64], index: 1, kind: input, shape index: {}]   ;;  %s15043_s2 = inlined_call_operand.hbm [shape: f32[1,64], index: 2, kind: input, shape index: {}]   ;;  %s15044_s3 = inlined_call_operand.hbm [shape: bf16[9,32,128], index: 3, kind: input, shape index: {}]   ;;  %s15045_s4 = inlined_call_operand.hbm [shape: bf16[9,64,128], index: 4, kind: input, shape index: {}]   ;;  %s15046_s5 = inlined_call_operand.hbm [shape: f32[1,128], index: 5, kind: input, shape index: {}]   ;;  %s15047_s6 = inlined_call_operand.hbm [shape: bf16[9,8,32], index: 6, kind: input, shape index: {}]   ;;  %s15048_s7 = inlined_call_operand.hbm [shape: bf16[9,128,256], index: 7, kind: input, shape index: {}]   ;;  %s15049_s8 = inlined_call_operand.hbm [shape: f32[1,256], index: 8, kind: input, shape index: {}]   ;;  %s15050_s9 = inlined_call_operand.hbm [shape: bf16[9,2,8], index: 9, kind: input, shape index: {}]   ;;  %s15051_s10 = inlined_call_operand.hbm [shape: bf16[9,256,512], index: 10, kind: input, shape index: {}]   ;;  %s15052_s11 = inlined_call_operand.hbm [shape: f32[1,512], index: 11, kind: input, shape index: {}]   ;;  %s15053_s12 = inlined_call_operand.hbm [shape: f32[2,2], index: 12, kind: input, shape index: {}]   ;;  %s15054_s13 = inlined_call_operand.hbm [shape: f32[512,10], index: 13, kind: input, shape index: {}]   ;;  %s15055_s14 = inlined_call_operand.hbm [shape: f32[1,10], index: 14, kind: input, shape index: {}]   ;;  %s15056_s15 = inlined_call_operand.hbm [shape: f32[2,10], index: 15, kind: output, shape index: {}]  }
   0x1   :  { %21 = vsyncpa [#allocation6], 0 }
   0x2   :  { %22 = vsyncpa [#allocation9], 0 }
   0x3   :  { %23 = vsyncpa [#allocation12], 0 }
   0x4   :  { %24 = vsyncpa [#allocation15], 0 }
   0x5   :  { %25 = vsyncpa [#allocation18], 0 }
   0x6   :  { %26 = vsyncpa [#allocation21], 0 }
   0x7   :  { %27 = vsyncpa [#allocation24], 0  ;;  %s49_s20 = sshll.u32 %s15043_s2, 4  ;;  %s50_s20 = int_to_ptr.hbm [resolvable:$true] %s49_s20 }
   0x8   :  { %28 = vsyncpa [#allocation4], 0  ;;  %s13249_s21 = smov [#allocation5]   ;;  %s72_s25 = sshll.u32 %s15045_s4, 4  ;;  %s73_s25 = int_to_ptr.hbm [resolvable:$true] %s72_s25 }
   0x9   :  { %s51_s22 = sshll.u32 %s13249_s21, 4  ;;  %s13250_s26 = smov [#allocation8]   ;;  %s52_s22 = int_to_ptr.vmem [resolvable:$true] %s51_s22 }
   0xa   :  { %54 = dma.hbm_to_vmem [thread:$0]  %s50_s20, 16, %s52_s22, [#allocation6]  }
   0xb   :  { %s74_s27 = sshll.u32 %s13250_s26, 4  ;;  %s96_s30 = sshll.u32 %s15047_s6, 4  ;;  %s75_s27 = int_to_ptr.vmem [resolvable:$true] %s74_s27  ;;  %s97_s30 = int_to_ptr.hbm [resolvable:$true] %s96_s30 }
   0xc   :  { %s13251_s2 = smov 64   ;;  %s13252_s16 = smov 4  }
   0xd   :  { %80 = dma.hbm_to_vmem [thread:$0]  %s73_s25, 4608, %s75_s27, [#allocation9], %s13251_s2, %s13251_s2, %s13252_s16  }
   0xe   :  { %s123_s19 = sshll.u32 %s15049_s8, 4  ;;  %s13253_s4 = smov [#allocation11]   ;;  %s124_s19 = int_to_ptr.hbm [resolvable:$true] %s123_s19 }
   0xf   :  { %s98_s20 = sshll.u32 %s13253_s4, 4  ;;  %s13254_s6 = smov [#allocation14]   ;;  %s99_s20 = int_to_ptr.vmem [resolvable:$true] %s98_s20 }
  0x10   :  { %104 = dma.hbm_to_vmem [thread:$0]  %s97_s30, 576, %s99_s20, [#allocation12], %s13251_s2, %s13251_s2, %s13252_s16  }
  0x11   :  { %s125_s21 = sshll.u32 %s13254_s6, 4  ;;  %s146_s24 = sshll.u32 %s15051_s10, 4  ;;  %s126_s21 = int_to_ptr.vmem [resolvable:$true] %s125_s21  ;;  %s147_s24 = int_to_ptr.hbm [resolvable:$true] %s146_s24 }
  0x12   :  { %128 = dma.hbm_to_vmem [thread:$0]  %s124_s19, 32, %s126_s21, [#allocation15]  }
  0x13   :  { %s13255_s25 = smov [#allocation17]   ;;  %s171_s28 = sshll.u32 %s15053_s12, 4  ;;  %s172_s28 = int_to_ptr.hbm [resolvable:$true] %s171_s28 }
  0x14   :  { %s148_s26 = sshll.u32 %s13255_s25, 4  ;;  %s13256_s29 = smov 256   ;;  %s149_s26 = int_to_ptr.vmem [resolvable:$true] %s148_s26 }
  0x15   :  { %s13257_s17 = smov 16   ;;  %s13258_s30 = smov [#allocation20]  }
  0x16   :  { %154 = dma.hbm_to_vmem [thread:$0]  %s147_s24, 73728, %s149_s26, [#allocation18], %s13256_s29, %s13256_s29, %s13257_s17  }
  0x17   :  { %s173_s18 = sshll.u32 %s13258_s30, 4  ;;  %s35_s10 = sshll.u32 %s15042_s1, 4  ;;  %s174_s18 = int_to_ptr.vmem [resolvable:$true] %s173_s18  ;;  %s36_s10 = int_to_ptr.hbm [resolvable:$true] %s35_s10 }
  0x18   :  { %176 = dma.hbm_to_vmem [thread:$0]  %s172_s28, 32, %s174_s18, [#allocation21]  }
  0x19   :  { %s59_s21 = sshll.u32 %s15044_s3, 4  ;;  %s13259_s22 = smov [#allocation2]   ;;  %s60_s21 = int_to_ptr.hbm [resolvable:$true] %s59_s21 }
  0x1a   :  { %s37_s12 = sshll.u32 %s13259_s22, 4  ;;  %s13260_s23 = smov [#allocation7]   ;;  %s38_s12 = int_to_ptr.vmem [resolvable:$true] %s37_s12 }
  0x1b   :  { %43 = dma.hbm_to_vmem [thread:$0]  %s36_s10, 256, %s38_s12, [#allocation3], %s13251_s2, %s13251_s2, %s13252_s16  }
  0x1c   :  { %s61_s24 = sshll.u32 %s13260_s23, 4  ;;  %s86_s1 = sshll.u32 %s15046_s5, 4  ;;  %s62_s24 = int_to_ptr.vmem [resolvable:$true] %s61_s24  ;;  %s87_s1 = int_to_ptr.hbm [resolvable:$true] %s86_s1 }
  0x1d   :  { %67 = dma.hbm_to_vmem [thread:$0]  %s60_s21, 2304, %s62_s24, [#allocation6], %s13251_s2, %s13251_s2, %s13252_s16  }
  0x1e   :  { %s109_s27 = sshll.u32 %s15048_s7, 4  ;;  %s13261_s28 = smov [#allocation10]   ;;  %s110_s27 = int_to_ptr.hbm [resolvable:$true] %s109_s27 }
  0x1f   :  { %s88_s29 = sshll.u32 %s13261_s28, 4  ;;  %s13262_s30 = smov [#allocation13]   ;;  %s89_s29 = int_to_ptr.vmem [resolvable:$true] %s88_s29 }
  0x20   :  { %91 = dma.hbm_to_vmem [thread:$0]  %s87_s1, 16, %s89_s29, [#allocation9]  }
  0x21   :  { %s111_s18 = sshll.u32 %s13262_s30, 4  ;;  %s13263_s4 = smov 128   ;;  %s112_s18 = int_to_ptr.vmem [resolvable:$true] %s111_s18 }
  0x22   :  { %s13264_s5 = smov 8   ;;  %s133_s19 = sshll.u32 %s15050_s9, 4  ;;  %s134_s19 = int_to_ptr.hbm [resolvable:$true] %s133_s19 }
  0x23   :  { %117 = dma.hbm_to_vmem [thread:$0]  %s110_s27, 18432, %s112_s18, [#allocation12], %s13263_s4, %s13263_s4, %s13264_s5  }
  0x24   :  { %s13265_s2 = smov [#allocation16]   ;;  %s13266_s7 = smov 1  }
  0x25   :  { %s135_s16 = sshll.u32 %s13265_s2, 4  ;;  %s160_s22 = sshll.u32 %s15052_s11, 4  ;;  %s136_s16 = int_to_ptr.vmem [resolvable:$true] %s135_s16  ;;  %s161_s22 = int_to_ptr.hbm [resolvable:$true] %s160_s22 }
  0x26   :  { %141 = dma.hbm_to_vmem [thread:$0]  %s134_s19, 144, %s136_s16, [#allocation15], %s13257_s17, %s13257_s17, %s13266_s7  }
  0x27   :  { %s13267_s12 = smov [#allocation19]   ;;  %s181_s9 = sshll.u32 %s15054_s13, 4  ;;  %s182_s9 = int_to_ptr.hbm [resolvable:$true] %s181_s9 }
  0x28   :  { %s162_s23 = sshll.u32 %s13267_s12, 4  ;;  %s13268_s26 = smov [#allocation22]   ;;  %s163_s23 = int_to_ptr.vmem [resolvable:$true] %s162_s23 }
  0x29   :  { %165 = dma.hbm_to_vmem [thread:$0]  %s161_s22, 64, %s163_s23, [#allocation18]  }
  0x2a   :  { %s183_s1 = sshll.u32 %s13268_s26, 4  ;;  %s195_s17 = sshll.u32 %s15055_s14, 4  ;;  %s184_s1 = int_to_ptr.vmem [resolvable:$true] %s183_s1  ;;  %s196_s17 = int_to_ptr.hbm [resolvable:$true] %s195_s17 }
  0x2b   :  { %189 = dma.hbm_to_vmem [thread:$0]  %s182_s9, 8192, %s184_s1, [#allocation21], %s13263_s4, %s13263_s4, %s13264_s5  }
  0x2c   :  { %s13269_s11 = smov [#allocation23]  }
  0x2d   :  { %s197_s27 = sshll.u32 %s13269_s11, 4  ;;  %s198_s27 = int_to_ptr.vmem [resolvable:$true] %s197_s27 }
  0x2e   :  { %200 = dma.hbm_to_vmem [thread:$0]  %s196_s17, 16, %s198_s27, [#allocation24]  }
  0x2f   :  { %13231 = dma.done.wait [#allocation3], 256  }
  0x30   :  { %13232 = vsyncadd [#allocation3], 4294967040 }
  0x31   :  { %13233 = dma.done.wait [#allocation6], 2320  }
  0x32   :  { %13234 = vsyncadd [#allocation6], 4294964976 }
  0x33   :  { %13235 = dma.done.wait [#allocation9], 4624  }
  0x34   :  { %13236 = vsyncadd [#allocation9], 4294962672 }
  0x35   :  { %13237 = dma.done.wait [#allocation12], 19008  }
  0x36   :  { %13238 = vsyncadd [#allocation12], 4294948288 }
  0x37   :  { %13239 = dma.done.wait [#allocation15], 176  }
  0x38   :  { %13240 = vsyncadd [#allocation15], 4294967120 }
  0x39   :  { %13241 = dma.done.wait [#allocation18], 73792  }
  0x3a   :  { %13242 = vsyncadd [#allocation18], 4294893504 }
  0x3b   :  { %13243 = dma.done.wait [#allocation21], 8224  }
  0x3c   :  { %13244 = vsyncadd [#allocation21], 4294959072 }
  0x3d   :  { %13245 = dma.done.wait [#allocation24], 16  }
  0x3e   :  { %13246 = vsyncadd [#allocation24], 4294967280  ;;  %vm358_vm0 = vcmask 1044480   ;;  %vm359_vm1 = vcmask 1045504   ;;  %v13270_v0 = vmov 65535   ;;  %v12017_v7 = vld [vmem:[#allocation2] sm:$0xff] }
  0x3f   :  { %v360_v1 = vsel %vm358_vm0, 4294967295, %v13270_v0  ;;  %v8824_v2 = vld [vmem:[#allocation2 + $0x8] sm:$0xf]  ;;  %v12018_v3 = vld [vmem:[#allocation2 + $0x8] sm:$0x30]  ;;  %v12009_v8 = vld [vmem:[%s15041_s0] sm:$0xff] }
  0x40   :  { %v361_v4 = vsel %vm359_vm1, %v360_v1, 0  ;;  %v8825_v5 = vor.u32 %v12018_v3, %v8824_v2  ;;  %vm333_vm2 = vcmask 220160   ;;  %v12010_v9 = vld [vmem:[%s15041_s0 + $0x8] sm:$0xff]  ;;  %v12011_v10 = vld [vmem:[%s15041_s0 + $0x10] sm:$0xff]  ;;  %v12012_v11 = vld [vmem:[%s15041_s0 + $0x18] sm:$0xff]  ;;  %s8769_s24 = sshll.u32 %s15056_s15, 4  ;;  %s8770_s24 = int_to_ptr.hbm [resolvable:$true] %s8769_s24 }
  0x41   :  { %v12013_v12 = vld [vmem:[%s15041_s0 + $0x20] sm:$0xff]  ;;  %v12014_v13 = vld [vmem:[%s15041_s0 + $0x28] sm:$0xff]  ;;  %v12015_v14 = vld [vmem:[%s15041_s0 + $0x30] sm:$0xff] }
  0x42   :  { %v363_v6 = vand.u32 %v8825_v5, %v361_v4  ;;  %v12016_v15 = vld [vmem:[%s15041_s0 + $0x38] sm:$0xff]  ;;  %v13433_v19 = vld [vmem:[#allocation5] ss:$0 sm:$0xff]  ;;  %s13271_s0 = smov [#allocation25]  }
  0x43   :  { %s8767_s22 = sshll.u32 %s13271_s0, 4  ;;  %s8768_s22 = int_to_ptr.vmem [resolvable:$true] %s8767_s22 }
  0x44   :  { %371 = vmatpush.bf16.msra.mxu0 %v363_v6 }
  0x48   :  { %372 = vmatpush.bf16.msra.mxu0 %v12017_v7 }
  0x4b   :  { %8826 = vmatmul.msk.bf16.vlgmr.msra.gmra.mxu0 %vm333_vm2, %v12009_v8 }
  0x5b   :  { %8827 = vmatmul.msk.bf16.gmra.mxu0 %vm333_vm2, %v12010_v9 }
  0x6b   :  { %8828 = vmatmul.msk.bf16.gmra.mxu0 %vm333_vm2, %v12011_v10 }
  0x7b   :  { %8829 = vmatmul.msk.bf16.gmra.mxu0 %vm333_vm2, %v12012_v11 }
  0x8b   :  { %8830 = vmatmul.msk.bf16.gmra.mxu0 %vm333_vm2, %v12013_v12 }
  0x9b   :  { %8831 = vmatmul.msk.bf16.gmra.mxu0 %vm333_vm2, %v12014_v13 }
  0xab   :  { %8832 = vmatmul.msk.bf16.gmra.mxu0 %vm333_vm2, %v12015_v14 }
  0xbb   :  { %8833 = vmatmul.msk.bf16.gmra.mxu0 %vm333_vm2, %v12016_v15 }
  0xc8   :  { %v374_v16 = vpop.f32.mrf.mxu0 }
  0xc9   :  { %v13436_v20 = vadd.f32 %v13433_v19, %v374_v16 }
  0xcb   :  { %15106 = vst [vmem:[#allocation35_spill] sm:$0xff] %v13436_v20  ;;  %v13439_v22 = vmul.f32 0.70710677, %v13436_v20 }
  0xcd   :  { %15107 = vst [vmem:[#allocation36_spill] sm:$0xff] %v13439_v22  ;;  %v446_v24 = vmul.f32 %v13439_v22, %v13439_v22 }
  0xcf   :  { %v13449_v26 = vmin.f32 %v446_v24, 16.0 }
  0xd0   :  { %v376_v17 = vpop.f32.mrf.mxu0 }
  0xd1   :  { %v13442_v23 = vadd.f32 %v13433_v19, %v376_v17  ;;  %v459_v29 = vmul.f32 3.8918573e-05, %v13449_v26  ;;  %v448_v49 = vmul.f32 2.1237322e-06, %v13449_v26 }
  0xd3   :  { %15108 = vst [vmem:[#allocation37_spill] sm:$0xff] %v13442_v23  ;;  %v13447_v25 = vmul.f32 0.70710677, %v13442_v23  ;;  %v460_v32 = vadd.f32 0.001143296, %v459_v29 }
  0xd4   :  { %v449_v55 = vadd.f32 0.00028619796, %v448_v49 }
  0xd5   :  { %15109 = vst [vmem:[#allocation38_spill] sm:$0xff] %v13447_v25  ;;  %v486_v28 = vmul.f32 %v13447_v25, %v13447_v25  ;;  %v461_v36 = vmul.f32 %v460_v32, %v13449_v26 }
  0xd6   :  { %v450_v63 = vmul.f32 %v449_v55, %v13449_v26 }
  0xd7   :  { %v13457_v31 = vmin.f32 %v486_v28, 16.0  ;;  %v462_v40 = vadd.f32 0.014752088, %v461_v36 }
  0xd8   :  { %v379_v18 = vpop.f32.mrf.mxu0  ;;  %v451_v9 = vadd.f32 0.0036580483, %v450_v63 }
  0xd9   :  { %v13455_v30 = vadd.f32 %v13433_v19, %v379_v18  ;;  %v499_v34 = vmul.f32 3.8918573e-05, %v13457_v31  ;;  %v463_v44 = vmul.f32 %v462_v40, %v13449_v26  ;;  %v488_v56 = vmul.f32 2.1237322e-06, %v13457_v31 }
  0xda   :  { %v452_v18 = vmul.f32 %v451_v9, %v13449_v26 }
  0xdb   :  { %15110 = vst [vmem:[#allocation39_spill] sm:$0xff] %v13455_v30  ;;  %v13460_v33 = vmul.f32 0.70710677, %v13455_v30  ;;  %v500_v39 = vadd.f32 0.001143296, %v499_v34 }
  0xdc   :  { %v464_v50 = vadd.f32 0.112945676, %v463_v44  ;;  %v489_v0 = vadd.f32 0.00028619796, %v488_v56 }
  0xdd   :  { %v526_v38 = vmul.f32 %v13460_v33, %v13460_v33  ;;  %v501_v43 = vmul.f32 %v500_v39, %v13457_v31  ;;  %v453_v39 = vadd.f32 0.05243302, %v452_v18 }
  0xde   :  { %v465_v57 = vmul.f32 %v464_v50, %v13449_v26  ;;  %v490_v10 = vmul.f32 %v489_v0, %v13457_v31 }
  0xdf   :  { %v13472_v42 = vmin.f32 %v526_v38, 16.0  ;;  %v502_v48 = vadd.f32 0.014752088, %v501_v43  ;;  %v454_v55 = vmul.f32 %v453_v39, %v13449_v26 }
  0xe0   :  { %v381_v21 = vpop.f32.mrf.mxu0  ;;  %v466_v3 = vadd.f32 0.4994258, %v465_v57 }
  0xe1   :  { %v13465_v37 = vadd.f32 %v13433_v19, %v381_v21  ;;  %v539_v46 = vmul.f32 3.8918573e-05, %v13472_v42  ;;  %v503_v54 = vmul.f32 %v502_v48, %v13457_v31  ;;  %v528_v1 = vmul.f32 2.1237322e-06, %v13472_v42 }
  0xe2   :  { %v467_v12 = vmul.f32 %v466_v3, %v13449_v26  ;;  %v491_v21 = vadd.f32 0.0036580483, %v490_v10 }
  0xe3   :  { %15111 = vst [vmem:[#allocation40_spill] sm:$0xff] %v13465_v37  ;;  %v13470_v41 = vmul.f32 0.70710677, %v13465_v37  ;;  %v540_v53 = vadd.f32 0.001143296, %v539_v46 }
  0xe4   :  { %v504_v61 = vadd.f32 0.112945676, %v503_v54  ;;  %v529_v11 = vadd.f32 0.00028619796, %v528_v1  ;;  %v492_v40 = vmul.f32 %v491_v21, %v13457_v31 }
  0xe5   :  { %15112 = vst [vmem:[#allocation41_spill] sm:$0xff] %v13470_v41  ;;  %v566_v45 = vmul.f32 %v13470_v41, %v13470_v41  ;;  %v541_v60 = vmul.f32 %v540_v53, %v13472_v42 }
  0xe6   :  { %v505_v7 = vmul.f32 %v504_v61, %v13457_v31  ;;  %v530_v24 = vmul.f32 %v529_v11, %v13472_v42  ;;  %v493_v56 = vadd.f32 0.05243302, %v492_v40 }
  0xe7   :  { %v13480_v51 = vmin.f32 %v566_v45, 16.0  ;;  %v542_v6 = vadd.f32 0.014752088, %v541_v60 }
  0xe8   :  { %v384_v27 = vpop.f32.mrf.mxu0  ;;  %v506_v16 = vadd.f32 0.4994258, %v505_v7  ;;  %v531_v43 = vadd.f32 0.0036580483, %v530_v24 }
  0xe9   :  { %v13483_v52 = vadd.f32 %v13433_v19, %v384_v27  ;;  %v579_v58 = vmul.f32 3.8918573e-05, %v13480_v51  ;;  %v543_v15 = vmul.f32 %v542_v6, %v13472_v42  ;;  %v13514_v27 = vadd.f32 1.0, %v467_v12 }
  0xea   :  { %v568_v34 = vmul.f32 2.1237322e-06, %v13480_v51  ;;  %v507_v36 = vmul.f32 %v506_v16, %v13457_v31  ;;  %v532_v57 = vmul.f32 %v531_v43, %v13472_v42 }
  0xeb   :  { %15113 = vst [vmem:[#allocation42_spill] sm:$0xff] %v13483_v52  ;;  %v13490_v59 = vmul.f32 0.70710677, %v13483_v52  ;;  %v580_v4 = vadd.f32 0.001143296, %v579_v58  ;;  %12819 = vrcp.f32 %v13514_v27  ;;  %v480_v40 = vand.u32 2147483648, %v13514_v27 }
  0xec   :  { %15116 = vst [vmem:[#allocation45_spill] sm:$0xff] %v13514_v27  ;;  %v544_v32 = vadd.f32 0.112945676, %v543_v15  ;;  %v569_v49 = vadd.f32 0.00028619796, %v568_v34  ;;  %v13530_v50 = vadd.f32 1.0, %v507_v36  ;;  %vm474_vm3 = vweird.f32 %v13514_v27 }
  0xed   :  { %v606_v5 = vmul.f32 %v13490_v59, %v13490_v59  ;;  %v581_v13 = vmul.f32 %v580_v4, %v13480_v51  ;;  %v455_v4 = vadd.f32 0.18741608, %v454_v55  ;;  %v533_v6 = vadd.f32 0.05243302, %v532_v57 }
  0xee   :  { %v545_v48 = vmul.f32 %v544_v32, %v13472_v42  ;;  %15118 = vst [vmem:[#allocation47_spill] sm:$0xff] %v13530_v50  ;;  %v570_v63 = vmul.f32 %v569_v49, %v13480_v51  ;;  %12821 = vrcp.f32 %v13530_v50  ;;  %vm514_vm5 = vweird.f32 %v13530_v50 }
  0xef   :  { %v13507_v14 = vmin.f32 %v606_v5, 16.0  ;;  %v582_v28 = vadd.f32 0.014752088, %v581_v13  ;;  %v494_v5 = vmul.f32 %v493_v56, %v13457_v31  ;;  %v456_v21 = vmul.f32 %v455_v4, %v13449_v26 }
  0xf0   :  { %v386_v35 = vpop.f32.mrf.mxu0  ;;  %v546_v61 = vadd.f32 0.4994258, %v545_v48  ;;  %v571_v13 = vadd.f32 0.0036580483, %v570_v63 }
  0xf1   :  { %v13494_v62 = vadd.f32 %v13433_v19, %v386_v35  ;;  %v619_v29 = vmul.f32 3.8918573e-05, %v13507_v14  ;;  %v583_v44 = vmul.f32 %v582_v28, %v13480_v51  ;;  %v13543_v0 = vpop.eup %12819  ;;  %v608_v1 = vmul.f32 2.1237322e-06, %v13507_v14 }
  0xf2   :  { %15120 = vst [vmem:[#allocation49_spill] sm:$0xff] %v13543_v0  ;;  %v470_v12 = vmul.f32 %v13543_v0, %v13514_v27  ;;  %v547_v15 = vmul.f32 %v546_v61, %v13472_v42  ;;  %v495_v24 = vadd.f32 0.18741608, %v494_v5  ;;  %v534_v28 = vmul.f32 %v533_v6, %v13472_v42 }
  0xf3   :  { %15114 = vst [vmem:[#allocation43_spill] sm:$0xff] %v13494_v62  ;;  %v13502_v8 = vmul.f32 0.70710677, %v13494_v62  ;;  %v620_v45 = vadd.f32 0.001143296, %v619_v29  ;;  %v572_v43 = vmul.f32 %v571_v13, %v13480_v51  ;;  %vm475_vm4 = vweird.f32 %v13543_v0 }
  0xf4   :  { %v584_v58 = vadd.f32 0.112945676, %v583_v44  ;;  %v609_v16 = vadd.f32 0.00028619796, %v608_v1  ;;  %v13564_v29 = vpop.eup %12821  ;;  %v471_v39 = vsub.f32 1.0, %v470_v12  ;;  %v13571_v44 = vadd.f32 1.0, %v547_v15  ;;  %vm13619_vm6 = vmor %vm474_vm3, %vm475_vm4 }
  0xf5   :  { %15115 = vst [vmem:[#allocation44_spill] sm:$0xff] %v13502_v8  ;;  %v646_v17 = vmul.f32 %v13502_v8, %v13502_v8  ;;  %v621_v60 = vmul.f32 %v620_v45, %v13507_v14  ;;  %v13576_v49 = vadd.f32 1.1283791, %v456_v21  ;;  %v510_v55 = vmul.f32 %v13564_v29, %v13530_v50 }
  0xf6   :  { %v585_v9 = vmul.f32 %v584_v58, %v13480_v51  ;;  %15122 = vst [vmem:[#allocation51_spill] sm:$0xff] %v13564_v29  ;;  %v610_v45 = vmul.f32 %v609_v16, %v13507_v14  ;;  %v535_v56 = vadd.f32 0.18741608, %v534_v28  ;;  %v472_v61 = vmul.f32 %v13543_v0, %v471_v39 }
  0xf7   :  { %v13521_v38 = vmin.f32 %v646_v17, 16.0  ;;  %v622_v10 = vadd.f32 0.014752088, %v621_v60  ;;  %15123 = vst [vmem:[#allocation52_spill] sm:$0xff] %v13571_v44  ;;  %v13586_v1 = vor.u32 1.1754944e-38, %v480_v40  ;;  %12823 = vrcp.f32 %v13571_v44 }
  0xf8   :  { %v389_v47 = vpop.f32.mrf.mxu0  ;;  %v586_v32 = vadd.f32 0.4994258, %v585_v9  ;;  %15124 = vst [vmem:[#allocation53_spill] sm:$0xff] %v13576_v49  ;;  %vm515_vm7 = vweird.f32 %v13564_v29  ;;  %vm554_vm9 = vweird.f32 %v13571_v44 }
  0xf9   :  { %v13527_v46 = vadd.f32 %v13433_v19, %v389_v47  ;;  %v659_v53 = vmul.f32 3.8918573e-05, %v13521_v38  ;;  %v623_v34 = vmul.f32 %v622_v10, %v13507_v14  ;;  %15125 = vst [vmem:[#allocation54_spill] sm:$0xff] %v13586_v1  ;;  %v511_v10 = vsub.f32 1.0, %v510_v55  ;;  %vm13666_vm8 = vmor %vm514_vm5, %vm515_vm7 }
  0xfa   :  { %v587_v57 = vmul.f32 %v586_v32, %v13480_v51 }
  0xfb   :  { %15117 = vst [vmem:[#allocation46_spill] sm:$0xff] %v13527_v46  ;;  %v13540_v47 = vmul.f32 0.70710677, %v13527_v46  ;;  %v624_v58 = vadd.f32 0.112945676, %v623_v34  ;;  %v512_v39 = vmul.f32 %v13564_v29, %v511_v10 }
  0xfc   :  { %v13595_v12 = vadd.f32 1.0, %v587_v57 }
  0xfd   :  { %v686_v11 = vmul.f32 %v13540_v47, %v13540_v47  ;;  %v625_v13 = vmul.f32 %v624_v58, %v13507_v14 }
  0xfe   :  { %12825 = vrcp.f32 %v13595_v12  ;;  %vm594_vm12 = vweird.f32 %v13595_v12 }
  0xff   :  { %v13567_v36 = vmin.f32 %v686_v11, 16.0  ;;  %v536_v11 = vmul.f32 %v535_v56, %v13472_v42 }
 0x100   :  { %v391_v2 = vpop.f32.mrf.mxu0 }
 0x101   :  { %v13534_v54 = vadd.f32 %v13433_v19, %v391_v2  ;;  %v660_v2 = vadd.f32 0.001143296, %v659_v53  ;;  %v496_v53 = vmul.f32 %v495_v24, %v13457_v31  ;;  %v699_v60 = vmul.f32 3.8918573e-05, %v13567_v36 }
 0x102   :  { %v611_v31 = vadd.f32 0.0036580483, %v610_v45  ;;  %v648_v24 = vmul.f32 2.1237322e-06, %v13521_v38  ;;  %v688_v32 = vmul.f32 2.1237322e-06, %v13567_v36 }
 0x103   :  { %15119 = vst [vmem:[#allocation48_spill] sm:$0xff] %v13534_v54  ;;  %v13548_v3 = vmul.f32 0.70710677, %v13534_v54  ;;  %v661_v17 = vmul.f32 %v660_v2, %v13521_v38  ;;  %v573_v2 = vadd.f32 0.05243302, %v572_v43  ;;  %v13613_v43 = vpop.eup %12823  ;;  %v15130_v45 = vmov 0 }
 0x104   :  { %v13592_v9 = vadd.f32 1.1283791, %v496_v53  ;;  %v700_v15 = vadd.f32 0.001143296, %v699_v60  ;;  %v612_v42 = vmul.f32 %v611_v31, %v13507_v14  ;;  %v537_v40 = vadd.f32 1.1283791, %v536_v11 }
 0x105   :  { %15121 = vst [vmem:[#allocation50_spill] sm:$0xff] %v13548_v3  ;;  %v726_v18 = vmul.f32 %v13548_v3, %v13548_v3  ;;  %v662_v26 = vadd.f32 0.014752088, %v661_v17  ;;  %v13603_v17 = vadd.f32 %v13543_v0, %v472_v61  ;;  %v574_v21 = vmul.f32 %v573_v2, %v13480_v51 }
 0x106   :  { %15126 = vst [vmem:[#allocation55_spill] sm:$0xff] %v13592_v9  ;;  %v15131_v45 = vsel %vm13619_vm6, 4294967295, %v15130_v45  ;;  %v701_v53 = vmul.f32 %v700_v15, %v13567_v36  ;;  %v649_v60 = vadd.f32 0.00028619796, %v648_v24  ;;  %v613_v61 = vadd.f32 0.05243302, %v612_v42 }
 0x107   :  { %v13574_v48 = vmin.f32 %v726_v18, 16.0  ;;  %v663_v5 = vmul.f32 %v662_v26, %v13521_v38  ;;  %15128 = vst [vmem:[#allocation57_spill] sm:$0xff] %v13603_v17  ;;  %v520_v18 = vand.u32 2147483648, %v13530_v50  ;;  %v626_v26 = vadd.f32 0.4994258, %v625_v13 }
 0x108   :  { %v13518_v35 = vpop.f32.mrf.mxu0  ;;  %15129 = vst [vmem:[#allocation58_spill] sm:$0xff] %v13613_v43  ;;  %v575_v58 = vadd.f32 0.18741608, %v574_v21  ;;  %v689_v31 = vadd.f32 0.00028619796, %v688_v32  ;;  %v550_v10 = vmul.f32 %v13613_v43, %v13571_v44  ;;  %v13647_v15 = vadd.f32 %v13564_v29, %v512_v39 }
 0x109   :  { %v739_v6 = vmul.f32 3.8918573e-05, %v13574_v48  ;;  %v13600_v16 = vadd.f32 %v13433_v19, %v13518_v35  ;;  %v664_v28 = vadd.f32 0.112945676, %v663_v5  ;;  %15132 = vst [vmem:[#allocation59_spill] sm:$0xff] %v15131_v45  ;;  %v13632_v57 = vor.u32 1.1754944e-38, %v520_v18 }
 0x10a   :  { %15137 = vst [vmem:[#allocation64_spill] sm:$0xff] %v13647_v15  ;;  %v627_v18 = vmul.f32 %v626_v26, %v13507_v14  ;;  %v702_v21 = vadd.f32 0.014752088, %v701_v53  ;;  %v576_v42 = vmul.f32 %v575_v58, %v13480_v51  ;;  %v15140_v53 = vmov 0 }
 0x10b   :  { %15127 = vst [vmem:[#allocation56_spill] sm:$0xff] %v13600_v16  ;;  %v740_v34 = vadd.f32 0.001143296, %v739_v6  ;;  %v13626_v55 = vmul.f32 0.70710677, %v13600_v16  ;;  %v665_v2 = vmul.f32 %v664_v28, %v13521_v38  ;;  %v13638_v6 = vmul.f32 %v537_v40, %v13460_v33 }
 0x10c   :  { %15134 = vst [vmem:[#allocation61_spill] sm:$0xff] %v13632_v57  ;;  %v650_v28 = vmul.f32 %v649_v60, %v13521_v38  ;;  %v690_v40 = vmul.f32 %v689_v31, %v13567_v36  ;;  %v15141_v53 = vsel %vm13666_vm8, 4294967295, %v15140_v53  ;;  %v551_v51 = vsub.f32 1.0, %v550_v10 }
 0x10d   :  { %15133 = vst [vmem:[#allocation60_spill] sm:$0xff] %v13626_v55  ;;  %v741_v5 = vmul.f32 %v740_v34, %v13574_v48  ;;  %v766_v24 = vmul.f32 %v13626_v55, %v13626_v55  ;;  %v614_v34 = vmul.f32 %v613_v61, %v13507_v14  ;;  %v666_v39 = vadd.f32 0.4994258, %v665_v2 }
 0x10e   :  { %15135 = vst [vmem:[#allocation62_spill] sm:$0xff] %v13638_v6  ;;  %v728_v58 = vmul.f32 2.1237322e-06, %v13574_v48  ;;  %v13679_v2 = vadd.f32 1.0, %v627_v18  ;;  %v703_v31 = vmul.f32 %v702_v21, %v13567_v36  ;;  %v13685_v10 = vadd.f32 1.1283791, %v576_v42 }
 0x10f   :  { %v742_v26 = vadd.f32 0.014752088, %v741_v5  ;;  %15142 = vst [vmem:[#allocation67_spill] sm:$0xff] %v15141_v53  ;;  %v13682_v5 = vmin.f32 %v766_v24, 16.0  ;;  %v615_v63 = vadd.f32 0.18741608, %v614_v34  ;;  %v667_v61 = vmul.f32 %v666_v39, %v13521_v38 }
 0x110   :  { %v13551_v7 = vpop.f32.mrf.mxu0  ;;  %15143 = vst [vmem:[#allocation68_spill] sm:$0xff] %v13679_v2  ;;  %v691_v18 = vadd.f32 0.0036580483, %v690_v40  ;;  %v552_v21 = vmul.f32 %v13613_v43, %v551_v51  ;;  %v729_v24 = vadd.f32 0.00028619796, %v728_v58  ;;  %12827 = vrcp.f32 %v13679_v2 }
 0x111   :  { %v13644_v11 = vadd.f32 %v13433_v19, %v13551_v7  ;;  %v13658_v7 = vpop.eup %12825  ;;  %15144 = vst [vmem:[#allocation69_spill] sm:$0xff] %v13685_v10  ;;  %v743_v35 = vmul.f32 %v742_v26, %v13574_v48  ;;  %v704_v23 = vadd.f32 0.112945676, %v703_v31  ;;  %v779_v34 = vmul.f32 3.8918573e-05, %v13682_v5 }
 0x112   :  { %15139 = vst [vmem:[#allocation66_spill] sm:$0xff] %v13658_v7  ;;  %v590_v56 = vmul.f32 %v13658_v7, %v13595_v12  ;;  %vm555_vm10 = vweird.f32 %v13613_v43  ;;  %v616_v58 = vmul.f32 %v615_v63, %v13507_v14  ;;  %v692_v30 = vmul.f32 %v691_v18, %v13567_v36 }
 0x113   :  { %15136 = vst [vmem:[#allocation63_spill] sm:$0xff] %v13644_v11  ;;  %v13673_v60 = vmul.f32 0.70710677, %v13644_v11  ;;  %v744_v37 = vadd.f32 0.112945676, %v743_v35  ;;  %v13712_v31 = vadd.f32 %v13613_v43, %v552_v21  ;;  %v730_v52 = vmul.f32 %v729_v24, %v13574_v48  ;;  %vm13734_vm11 = vmor %vm554_vm9, %vm555_vm10 }
 0x114   :  { %v591_v39 = vsub.f32 1.0, %v590_v56  ;;  %v705_v14 = vmul.f32 %v704_v23, %v13567_v36  ;;  %v780_v63 = vadd.f32 0.001143296, %v779_v34  ;;  %v768_v18 = vmul.f32 2.1237322e-06, %v13682_v5 }
 0x115   :  { %v806_v42 = vmul.f32 %v13673_v60, %v13673_v60  ;;  %15146 = vst [vmem:[#allocation71_spill] sm:$0xff] %v13712_v31  ;;  %v693_v23 = vadd.f32 0.05243302, %v692_v30  ;;  %v745_v34 = vmul.f32 %v744_v37, %v13574_v48  ;;  %vm595_vm13 = vweird.f32 %v13658_v7 }
 0x116   :  { %v13728_v24 = vpop.eup %12827  ;;  %v781_v30 = vmul.f32 %v780_v63, %v13682_v5  ;;  %v769_v22 = vadd.f32 0.00028619796, %v768_v18  ;;  %vm13790_vm14 = vmor %vm594_vm12, %vm595_vm13  ;;  %vm634_vm15 = vweird.f32 %v13679_v2 }
 0x117   :  { %v13715_v62 = vmin.f32 %v806_v42, 16.0  ;;  %15148 = vst [vmem:[#allocation73_spill] sm:$0xff] %v13728_v24  ;;  %v15149_v42 = vmov 0  ;;  %v630_v49 = vmul.f32 %v13728_v24, %v13679_v2  ;;  %v746_v63 = vadd.f32 0.4994258, %v745_v34 }
 0x118   :  { %v399_v4 = vpop.f32.mrf.mxu0  ;;  %v15150_v42 = vsel %vm13734_vm11, 4294967295, %v15149_v42  ;;  %v782_v0 = vadd.f32 0.014752088, %v781_v30  ;;  %v770_v34 = vmul.f32 %v769_v22, %v13682_v5  ;;  %v15157_v22 = vmov 0 }
 0x119   :  { %v13656_v32 = vadd.f32 %v13433_v19, %v399_v4  ;;  %v651_v4 = vadd.f32 0.0036580483, %v650_v28  ;;  %v600_v28 = vand.u32 2147483648, %v13595_v12  ;;  %15151 = vst [vmem:[#allocation74_spill] sm:$0xff] %v15150_v42  ;;  %v15158_v22 = vsel %vm13790_vm14, 4294967295, %v15157_v22 }
 0x11a   :  { %15159 = vst [vmem:[#allocation80_spill] sm:$0xff] %v15158_v22  ;;  %vm635_vm0 = vweird.f32 %v13728_v24 }
 0x11b   :  { %15138 = vst [vmem:[#allocation65_spill] sm:$0xff] %v13656_v32  ;;  %v13690_v33 = vmul.f32 0.70710677, %v13656_v32  ;;  %v652_v40 = vmul.f32 %v651_v4, %v13521_v38  ;;  %v13721_v46 = vor.u32 1.1754944e-38, %v600_v28  ;;  %v617_v28 = vadd.f32 1.1283791, %v616_v58  ;;  %vm13839_vm2 = vmor %vm634_vm15, %vm635_vm0 }
 0x11c   :  { %v706_v58 = vadd.f32 0.4994258, %v705_v14  ;;  %v694_v14 = vmul.f32 %v693_v23, %v13567_v36 }
 0x11d   :  { %v846_v26 = vmul.f32 %v13690_v33, %v13690_v33  ;;  %15147 = vst [vmem:[#allocation72_spill] sm:$0xff] %v13721_v46  ;;  %v653_v35 = vadd.f32 0.05243302, %v652_v40  ;;  %v731_v40 = vadd.f32 0.0036580483, %v730_v52  ;;  %v13761_v54 = vmul.f32 %v617_v28, %v13490_v59 }
 0x11e   :  { %v631_v28 = vsub.f32 1.0, %v630_v49 }
 0x11f   :  { %v13726_v21 = vmin.f32 %v846_v26, 16.0  ;;  %v819_v26 = vmul.f32 3.8918573e-05, %v13715_v62  ;;  %15154 = vst [vmem:[#allocation77_spill] sm:$0xff] %v13761_v54  ;;  %v732_v9 = vmul.f32 %v731_v40, %v13574_v48  ;;  %v695_v40 = vadd.f32 0.18741608, %v694_v14 }
 0x120   :  { %v401_v13 = vpop.f32.mrf.mxu0 }
 0x121   :  { %v13698_v20 = vadd.f32 %v13433_v19, %v401_v13  ;;  %v13708_v13 = vadd.f32 1.0, %v667_v61  ;;  %v592_v61 = vmul.f32 %v13658_v7, %v591_v39  ;;  %v654_v39 = vmul.f32 %v653_v35, %v13521_v38 }
 0x122   :  { %v859_v52 = vmul.f32 3.8918573e-05, %v13726_v21  ;;  %v820_v25 = vadd.f32 0.001143296, %v819_v26  ;;  %v733_v30 = vadd.f32 0.05243302, %v732_v9 }
 0x123   :  { %15145 = vst [vmem:[#allocation70_spill] sm:$0xff] %v13698_v20  ;;  %v13718_v56 = vmul.f32 0.70710677, %v13698_v20  ;;  %12829 = vrcp.f32 %v13708_v13  ;;  %v13758_v6 = vadd.f32 %v13658_v7, %v592_v61  ;;  %v707_v61 = vmul.f32 %v706_v58, %v13567_v36 }
 0x124   :  { %v655_v23 = vadd.f32 0.18741608, %v654_v39  ;;  %v821_v17 = vmul.f32 %v820_v25, %v13715_v62  ;;  %vm674_vm1 = vweird.f32 %v13708_v13 }
 0x125   :  { %v886_v4 = vmul.f32 %v13718_v56, %v13718_v56  ;;  %15153 = vst [vmem:[#allocation76_spill] sm:$0xff] %v13758_v6  ;;  %v13795_v39 = vadd.f32 1.0, %v707_v61  ;;  %v632_v61 = vmul.f32 %v13728_v24, %v631_v28 }
 0x126   :  { %v822_v31 = vadd.f32 0.014752088, %v821_v17 }
 0x127   :  { %v13766_v1 = vmin.f32 %v886_v4, 16.0  ;;  %v747_v4 = vmul.f32 %v746_v63, %v13574_v48  ;;  %v656_v63 = vmul.f32 %v655_v23, %v13521_v38  ;;  %12831 = vrcp.f32 %v13795_v39 }
 0x128   :  { %v404_v51 = vpop.f32.mrf.mxu0  ;;  %v734_v38 = vmul.f32 %v733_v30, %v13574_v48  ;;  %v808_v23 = vmul.f32 2.1237322e-06, %v13715_v62  ;;  %v13822_v17 = vadd.f32 %v13728_v24, %v632_v61  ;;  %v823_v30 = vmul.f32 %v822_v31, %v13715_v62 }
 0x129   :  { %v13751_v37 = vadd.f32 %v13433_v19, %v404_v51  ;;  %v13768_v18 = vpop.eup %12829  ;;  %v860_v51 = vadd.f32 0.001143296, %v859_v52  ;;  %v899_v49 = vmul.f32 3.8918573e-05, %v13766_v1  ;;  %v783_v52 = vmul.f32 %v782_v0, %v13682_v5 }
 0x12a   :  { %15155 = vst [vmem:[#allocation78_spill] sm:$0xff] %v13768_v18  ;;  %v670_v58 = vmul.f32 %v13768_v18, %v13708_v13  ;;  %v696_v0 = vmul.f32 %v695_v40, %v13567_v36  ;;  %v680_v40 = vand.u32 2147483648, %v13708_v13  ;;  %v809_v61 = vadd.f32 0.00028619796, %v808_v23 }
 0x12b   :  { %15152 = vst [vmem:[#allocation75_spill] sm:$0xff] %v13751_v37  ;;  %v13773_v59 = vmul.f32 0.70710677, %v13751_v37  ;;  %v861_v16 = vmul.f32 %v860_v51, %v13726_v21  ;;  %v900_v43 = vadd.f32 0.001143296, %v899_v49  ;;  %vm675_vm3 = vweird.f32 %v13768_v18 }
 0x12c   :  { %v671_v57 = vsub.f32 1.0, %v670_v58  ;;  %v784_v51 = vadd.f32 0.112945676, %v783_v52  ;;  %15160 = vst [vmem:[#allocation81_spill] sm:$0xff] %v13822_v17  ;;  %v13828_v58 = vadd.f32 1.1283791, %v656_v63  ;;  %v810_v10 = vmul.f32 %v809_v61, %v13715_v62  ;;  %vm13888_vm4 = vmor %vm674_vm1, %vm675_vm3 }
 0x12d   :  { %v926_v26 = vmul.f32 %v13773_v59, %v13773_v59  ;;  %v862_v36 = vadd.f32 0.014752088, %v861_v16  ;;  %v697_v49 = vadd.f32 1.1283791, %v696_v0  ;;  %v901_v52 = vmul.f32 %v900_v43, %v13766_v1  ;;  %v13845_v0 = vpop.eup %12831 }
 0x12e   :  { %15161 = vst [vmem:[#allocation82_spill] sm:$0xff] %v13828_v58  ;;  %v735_v16 = vadd.f32 0.18741608, %v734_v38  ;;  %v672_v63 = vmul.f32 %v13768_v18, %v671_v57 }
 0x12f   :  { %v13798_v14 = vmin.f32 %v926_v26, 16.0  ;;  %v13812_v26 = vadd.f32 1.0, %v747_v4  ;;  %v863_v43 = vmul.f32 %v862_v36, %v13726_v21  ;;  %v13857_v57 = vmul.f32 %v697_v49, %v13540_v47 }
 0x130   :  { %v406_v35 = vpop.f32.mrf.mxu0  ;;  %v902_v23 = vadd.f32 0.014752088, %v901_v52  ;;  %v736_v53 = vmul.f32 %v735_v16, %v13574_v48  ;;  %v710_v48 = vmul.f32 %v13845_v0, %v13795_v39 }
 0x131   :  { %v13780_v45 = vadd.f32 %v13433_v19, %v406_v35  ;;  %v771_v35 = vadd.f32 0.0036580483, %v770_v34  ;;  %v939_v42 = vmul.f32 3.8918573e-05, %v13798_v14  ;;  %12833 = vrcp.f32 %v13812_v26  ;;  %15166 = vst [vmem:[#allocation85_spill] sm:$0xff] %v13857_v57 }
 0x132   :  { %v864_v41 = vadd.f32 0.112945676, %v863_v43  ;;  %v15170_v43 = vmov 0  ;;  %v711_v47 = vsub.f32 1.0, %v710_v48  ;;  %vm754_vm5 = vweird.f32 %v13812_v26 }
 0x133   :  { %15156 = vst [vmem:[#allocation79_spill] sm:$0xff] %v13780_v45  ;;  %v13801_v25 = vmul.f32 0.70710677, %v13780_v45  ;;  %v772_v28 = vmul.f32 %v771_v35, %v13682_v5  ;;  %v940_v34 = vadd.f32 0.001143296, %v939_v42  ;;  %v785_v42 = vmul.f32 %v784_v51, %v13682_v5 }
 0x134   :  { %v15171_v43 = vsel %vm13888_vm4, 4294967295, %v15170_v43 }
 0x135   :  { %v966_v9 = vmul.f32 %v13801_v25, %v13801_v25  ;;  %v941_v35 = vmul.f32 %v940_v34, %v13798_v14  ;;  %v773_v31 = vadd.f32 0.05243302, %v772_v28  ;;  %v13852_v34 = vor.u32 1.1754944e-38, %v680_v40  ;;  %15172 = vst [vmem:[#allocation89_spill] sm:$0xff] %v15171_v43 }
 0x136   :  { %v824_v28 = vadd.f32 0.112945676, %v823_v30  ;;  %v786_v54 = vadd.f32 0.4994258, %v785_v42  ;;  %v13863_v40 = vadd.f32 %v13768_v18, %v672_v63  ;;  %v848_v30 = vmul.f32 2.1237322e-06, %v13726_v21 }
 0x137   :  { %v13826_v4 = vmin.f32 %v966_v9, 16.0  ;;  %v15162_v9 = vmov 0  ;;  %15165 = vst [vmem:[#allocation84_spill] sm:$0xff] %v13852_v34  ;;  %v13859_v29 = vpop.eup %12833  ;;  %v942_v38 = vadd.f32 0.014752088, %v941_v35  ;;  %v774_v51 = vmul.f32 %v773_v31, %v13682_v5 }
 0x138   :  { %v15163_v9 = vsel %vm13839_vm2, 4294967295, %v15162_v9  ;;  %v409_v36 = vpop.f32.mrf.mxu0  ;;  %15167 = vst [vmem:[#allocation86_spill] sm:$0xff] %v13863_v40  ;;  %v825_v16 = vmul.f32 %v824_v28, %v13715_v62  ;;  %v903_v42 = vmul.f32 %v902_v23, %v13766_v1  ;;  %v13879_v35 = vadd.f32 1.1283791, %v736_v53 }
 0x139   :  { %15164 = vst [vmem:[#allocation83_spill] sm:$0xff] %v15163_v9  ;;  %v979_v15 = vmul.f32 3.8918573e-05, %v13826_v4  ;;  %v13871_v52 = vadd.f32 %v13433_v19, %v409_v36  ;;  %v787_v63 = vmul.f32 %v786_v54, %v13682_v5  ;;  %v943_v31 = vmul.f32 %v942_v38, %v13798_v14 }
 0x13a   :  { %15169 = vst [vmem:[#allocation88_spill] sm:$0xff] %v13879_v35  ;;  %v775_v36 = vadd.f32 0.18741608, %v774_v51  ;;  %v811_v28 = vadd.f32 0.0036580483, %v810_v10  ;;  %v865_v23 = vmul.f32 %v864_v41, %v13726_v21  ;;  %vm755_vm7 = vweird.f32 %v13859_v29 }
 0x13b   :  { %v980_v11 = vadd.f32 0.001143296, %v979_v15  ;;  %15168 = vst [vmem:[#allocation87_spill] sm:$0xff] %v13871_v52  ;;  %v750_v15 = vmul.f32 %v13859_v29, %v13812_v26  ;;  %v888_v53 = vmul.f32 2.1237322e-06, %v13766_v1  ;;  %v13901_v51 = vadd.f32 1.0, %v787_v63  ;;  %vm13957_vm9 = vmor %vm754_vm5, %vm755_vm7 }
 0x13c   :  { %v13899_v49 = vmul.f32 0.70710677, %v13871_v52  ;;  %v826_v32 = vadd.f32 0.4994258, %v825_v16  ;;  %v904_v17 = vadd.f32 0.112945676, %v903_v42  ;;  %v812_v48 = vmul.f32 %v811_v28, %v13715_v62 }
 0x13d   :  { %v981_v61 = vmul.f32 %v980_v11, %v13826_v4  ;;  %v849_v11 = vadd.f32 0.00028619796, %v848_v30  ;;  %v751_v44 = vsub.f32 1.0, %v750_v15  ;;  %v944_v10 = vadd.f32 0.112945676, %v943_v31 }
 0x13e   :  { %v1006_v24 = vmul.f32 %v13899_v49, %v13899_v49  ;;  %v776_v30 = vmul.f32 %v775_v36, %v13682_v5  ;;  %v889_v54 = vadd.f32 0.00028619796, %v888_v53  ;;  %v712_v42 = vmul.f32 %v13845_v0, %v711_v47 }
 0x13f   :  { %v982_v38 = vadd.f32 0.014752088, %v981_v61  ;;  %v866_v61 = vadd.f32 0.4994258, %v865_v23  ;;  %v850_v15 = vmul.f32 %v849_v11, %v13726_v21  ;;  %v827_v63 = vmul.f32 %v826_v32, %v13715_v62 }
 0x140   :  { %v905_v31 = vmul.f32 %v904_v17, %v13766_v1  ;;  %v411_v5 = vpop.f32.mrf.mxu0  ;;  %v752_v36 = vmul.f32 %v13859_v29, %v751_v44  ;;  %12835 = vrcp.f32 %v13901_v51  ;;  %v945_v28 = vmul.f32 %v944_v10, %v13798_v14 }
 0x141   :  { %v983_v41 = vmul.f32 %v982_v38, %v13826_v4  ;;  %v13919_v23 = vmin.f32 %v1006_v24, 16.0  ;;  %v13921_v53 = vadd.f32 1.1283791, %v776_v30  ;;  %v867_v47 = vmul.f32 %v866_v61, %v13726_v21 }
 0x142   :  { %v890_v11 = vmul.f32 %v889_v54, %v13766_v1  ;;  %v813_v32 = vadd.f32 0.05243302, %v812_v48  ;;  %v928_v17 = vmul.f32 2.1237322e-06, %v13798_v14  ;;  %v13928_v44 = vadd.f32 %v13433_v19, %v411_v5 }
 0x143   :  { %v984_v16 = vadd.f32 0.112945676, %v983_v41  ;;  %15173 = vst [vmem:[#allocation90_spill] sm:$0xff] %v13921_v53  ;;  %v851_v41 = vadd.f32 0.0036580483, %v850_v15  ;;  %v13931_v46 = vadd.f32 %v13845_v0, %v712_v42  ;;  %v13933_v24 = vadd.f32 1.0, %v827_v63 }
 0x144   :  { %15174 = vst [vmem:[#allocation91_spill] sm:$0xff] %v13928_v44  ;;  %v906_v10 = vadd.f32 0.4994258, %v905_v31  ;;  %v968_v30 = vmul.f32 2.1237322e-06, %v13826_v4  ;;  %v13937_v61 = vadd.f32 %v13859_v29, %v752_v36  ;;  %v13942_v19 = vadd.f32 1.0, %v867_v47 }
 0x145   :  { %v985_v38 = vmul.f32 %v984_v16, %v13826_v4  ;;  %v946_v54 = vadd.f32 0.4994258, %v945_v28  ;;  %v1008_v48 = vmul.f32 2.1237322e-06, %v13919_v23  ;;  %v1019_v15 = vmul.f32 3.8918573e-05, %v13919_v23 }
 0x146   :  { %v800_v16 = vand.u32 2147483648, %v13901_v51  ;;  %v891_v5 = vadd.f32 0.0036580483, %v890_v11  ;;  %v13944_v9 = vpop.eup %12835  ;;  %v814_v63 = vmul.f32 %v813_v32, %v13715_v62  ;;  %v929_v31 = vadd.f32 0.00028619796, %v928_v17 }
 0x147   :  { %v986_v42 = vadd.f32 0.4994258, %v985_v38  ;;  %v1020_v6 = vadd.f32 0.001143296, %v1019_v15  ;;  %v13948_v36 = vmul.f32 0.70710677, %v13928_v44  ;;  %12837 = vrcp.f32 %v13933_v24 }
 0x148   :  { %v852_v28 = vmul.f32 %v851_v41, %v13726_v21  ;;  %v907_v7 = vmul.f32 %v906_v10, %v13766_v1  ;;  %v969_v22 = vadd.f32 0.00028619796, %v968_v30  ;;  %v947_v11 = vmul.f32 %v946_v54, %v13798_v14 }
 0x149   :  { %v1009_v38 = vadd.f32 0.00028619796, %v1008_v48  ;;  %v1021_v32 = vmul.f32 %v1020_v6, %v13919_v23  ;;  %v1046_v17 = vmul.f32 %v13948_v36, %v13948_v36  ;;  %v790_v10 = vmul.f32 %v13944_v9, %v13901_v51 }
 0x14a   :  { %v987_v15 = vmul.f32 %v986_v42, %v13826_v4  ;;  %v815_v57 = vadd.f32 0.18741608, %v814_v63  ;;  %12839 = vrcp.f32 %v13942_v19  ;;  %v892_v6 = vmul.f32 %v891_v5, %v13766_v1 }
 0x14b   :  { %v930_v54 = vmul.f32 %v929_v31, %v13798_v14  ;;  %v13976_v48 = vadd.f32 1.0, %v907_v7  ;;  %v970_v20 = vmul.f32 %v969_v22, %v13826_v4  ;;  %v1022_v58 = vadd.f32 0.014752088, %v1021_v32 }
 0x14c   :  { %v13979_v41 = vmin.f32 %v1046_v17, 16.0  ;;  %v13981_v8 = vor.u32 1.1754944e-38, %v800_v16  ;;  %v853_v2 = vadd.f32 0.05243302, %v852_v28  ;;  %v13983_v30 = vadd.f32 1.0, %v947_v11 }
 0x14d   :  { %v1010_v42 = vmul.f32 %v1009_v38, %v13919_v23  ;;  %v13986_v63 = vpop.eup %12837  ;;  %v791_v27 = vsub.f32 1.0, %v790_v10  ;;  %v13988_v5 = vadd.f32 1.0, %v987_v15  ;;  %v1023_v7 = vmul.f32 %v1022_v58, %v13919_v23 }
 0x14e   :  { %v1048_v31 = vmul.f32 2.1237322e-06, %v13979_v41  ;;  %v816_v22 = vmul.f32 %v815_v57, %v13715_v62  ;;  %v893_v32 = vadd.f32 0.05243302, %v892_v6  ;;  %v931_v17 = vadd.f32 0.0036580483, %v930_v54 }
 0x14f   :  { %v1059_v16 = vmul.f32 3.8918573e-05, %v13979_v41  ;;  %12841 = vrcp.f32 %v13976_v48  ;;  %v971_v28 = vadd.f32 0.0036580483, %v970_v20  ;;  %v1024_v11 = vadd.f32 0.112945676, %v1023_v7 }
 0x150   :  { %v1049_v38 = vadd.f32 0.00028619796, %v1048_v31  ;;  %v13995_v37 = vpop.eup %12839  ;;  %v854_v10 = vmul.f32 %v853_v2, %v13726_v21  ;;  %12843 = vrcp.f32 %v13983_v30  ;;  %v1011_v58 = vadd.f32 0.0036580483, %v1010_v42 }
 0x151   :  { %v1060_v15 = vadd.f32 0.001143296, %v1059_v16  ;;  %vm794_vm10 = vweird.f32 %v13901_v51  ;;  %v830_v62 = vmul.f32 %v13986_v63, %v13933_v24  ;;  %12845 = vrcp.f32 %v13988_v5 }
 0x152   :  { %v1025_v57 = vmul.f32 %v1024_v11, %v13919_v23  ;;  %v1050_v20 = vmul.f32 %v1049_v38, %v13979_v41  ;;  %v792_v6 = vmul.f32 %v13944_v9, %v791_v27  ;;  %vm795_vm12 = vweird.f32 %v13944_v9 }
 0x153   :  { %v932_v2 = vmul.f32 %v931_v17, %v13798_v14  ;;  %v1061_v54 = vmul.f32 %v1060_v15, %v13979_v41  ;;  %v840_v42 = vand.u32 2147483648, %v13933_v24  ;;  %v894_v7 = vmul.f32 %v893_v32, %v13766_v1  ;;  %vm14043_vm13 = vmor %vm794_vm10, %vm795_vm12 }
 0x154   :  { %v972_v31 = vmul.f32 %v971_v28, %v13826_v4  ;;  %v1026_v16 = vadd.f32 0.4994258, %v1025_v57  ;;  %v855_v34 = vadd.f32 0.18741608, %v854_v10  ;;  %v870_v11 = vmul.f32 %v13995_v37, %v13942_v19 }
 0x155   :  { %v1012_v38 = vmul.f32 %v1011_v58, %v13919_v23  ;;  %v1062_v27 = vadd.f32 0.014752088, %v1061_v54  ;;  %v14015_v40 = vpop.eup %12841  ;;  %v14017_v18 = vadd.f32 1.1283791, %v816_v22  ;;  %v831_v17 = vsub.f32 1.0, %v830_v62 }
 0x156   :  { %v1027_v15 = vmul.f32 %v1026_v16, %v13919_v23  ;;  %v1051_v43 = vadd.f32 0.0036580483, %v1050_v20  ;;  %v14020_v50 = vpop.eup %12843  ;;  %v14023_v32 = vadd.f32 %v13944_v9, %v792_v6  ;;  %v933_v10 = vadd.f32 0.05243302, %v932_v2 }
 0x157   :  { %v1063_v57 = vmul.f32 %v1062_v27, %v13979_v41  ;;  %v14027_v58 = vpop.eup %12845  ;;  %v14029_v54 = vor.u32 1.1754944e-38, %v840_v42  ;;  %v895_v22 = vadd.f32 0.18741608, %v894_v7  ;;  %v973_v45 = vadd.f32 0.05243302, %v972_v31 }
 0x158   :  { %v14031_v62 = vadd.f32 1.0, %v1027_v15  ;;  %v856_v20 = vmul.f32 %v855_v34, %v13726_v21  ;;  %v871_v16 = vsub.f32 1.0, %v870_v11  ;;  %v1013_v35 = vadd.f32 0.05243302, %v1012_v38 }
 0x159   :  { %v1064_v3 = vadd.f32 0.112945676, %v1063_v57  ;;  %v832_v6 = vmul.f32 %v13986_v63, %v831_v17  ;;  %v950_v2 = vmul.f32 %v14020_v50, %v13983_v30  ;;  %v1052_v27 = vmul.f32 %v1051_v43, %v13979_v41 }
 0x15a   :  { %12847 = vrcp.f32 %v14031_v62  ;;  %v880_v21 = vand.u32 2147483648, %v13942_v19  ;;  %v910_v34 = vmul.f32 %v14015_v40, %v13976_v48  ;;  %v934_v7 = vmul.f32 %v933_v10, %v13798_v14 }
 0x15b   :  { %v990_v31 = vmul.f32 %v14027_v58, %v13988_v5  ;;  %v896_v11 = vmul.f32 %v895_v22, %v13766_v1  ;;  %v974_v38 = vmul.f32 %v973_v45, %v13826_v4  ;;  %v1065_v17 = vmul.f32 %v1064_v3, %v13979_v41 }
 0x15c   :  { %v14060_v15 = vadd.f32 1.1283791, %v856_v20  ;;  %v872_v57 = vmul.f32 %v13995_v37, %v871_v16  ;;  %v1014_v28 = vmul.f32 %v1013_v35, %v13919_v23  ;;  %v14066_v44 = vadd.f32 %v13986_v63, %v832_v6 }
 0x15d   :  { %v951_v52 = vsub.f32 1.0, %v950_v2  ;;  %v1053_v53 = vadd.f32 0.05243302, %v1052_v27  ;;  %v1066_v43 = vadd.f32 0.4994258, %v1065_v17  ;;  %v14068_v55 = vor.u32 1.1754944e-38, %v880_v21 }
 0x15e   :  { %v911_v1 = vsub.f32 1.0, %v910_v34  ;;  %v935_v45 = vadd.f32 0.18741608, %v934_v7  ;;  %v991_v22 = vsub.f32 1.0, %v990_v31  ;;  %v14072_v20 = vadd.f32 1.1283791, %v896_v11 }
 0x15f   :  { %v975_v10 = vadd.f32 0.18741608, %v974_v38  ;;  %v1067_v35 = vmul.f32 %v1066_v43, %v13979_v41  ;;  %v14077_v6 = vadd.f32 %v13995_v37, %v872_v57  ;;  %v1015_v27 = vadd.f32 0.18741608, %v1014_v28 }
 0x160   :  { %v14070_v3 = vpop.eup %12847  ;;  %v952_v34 = vmul.f32 %v14020_v50, %v951_v52  ;;  %v1054_v7 = vmul.f32 %v1053_v53, %v13979_v41  ;;  %v912_v43 = vmul.f32 %v14015_v40, %v911_v1  ;;  %v936_v11 = vmul.f32 %v935_v45, %v13798_v14 }
 0x161   :  { %v1030_v21 = vmul.f32 %v14070_v3, %v14031_v62  ;;  %v14086_v31 = vadd.f32 1.0, %v1067_v35  ;;  %v992_v38 = vmul.f32 %v14027_v58, %v991_v22  ;;  %vm954_vm3 = vweird.f32 %v13983_v30 }
 0x162   :  { %v958_v17 = vand.u32 2147483647, %v13983_v30  ;;  %v976_v57 = vmul.f32 %v975_v10, %v13826_v4  ;;  %vm955_vm7 = vweird.f32 %v14020_v50  ;;  %v1016_v52 = vmul.f32 %v1015_v27, %v13919_v23 }
 0x163   :  { %v1031_v28 = vsub.f32 1.0, %v1030_v21  ;;  %12849 = vrcp.f32 %v14086_v31  ;;  %vm1035_vm10 = vweird.f32 %v14070_v3  ;;  %v953_v53 = vadd.f32 %v14020_v50, %v952_v34  ;;  %vm14123_vm15 = vmor %vm954_vm3, %vm955_vm7 }
 0x164   :  { %vm995_vm1 = vweird.f32 %v14027_v58  ;;  %v1040_v4 = vand.u32 2147483648, %v14031_v62  ;;  %v1055_v10 = vadd.f32 0.18741608, %v1054_v7  ;;  %v993_v1 = vadd.f32 %v14027_v58, %v992_v38 }
 0x165   :  { %v1032_v14 = vmul.f32 %v14070_v3, %v1031_v28  ;;  %vm1034_vm5 = vweird.f32 %v14031_v62  ;;  %v1038_v23 = vand.u32 2147483647, %v14031_v62  ;;  %v913_v22 = vadd.f32 %v14015_v40, %v912_v43 }
 0x166   :  { %v960_v35 = vand.u32 2147483648, %v13983_v30  ;;  %v977_v27 = vadd.f32 1.1283791, %v976_v57  ;;  %v1000_v21 = vand.u32 2147483648, %v13988_v5  ;;  %vm14115_vm12 = vmor %vm1034_vm5, %vm1035_vm10  ;;  %vm994_vm0 = vweird.f32 %v13988_v5 }
 0x167   :  { %v1033_v45 = vadd.f32 %v14070_v3, %v1032_v14  ;;  %v998_v62 = vand.u32 2147483647, %v13988_v5  ;;  %v1017_v43 = vadd.f32 1.1283791, %v1016_v52  ;;  %v937_v57 = vadd.f32 1.1283791, %v936_v11  ;;  %vm14139_vm3 = vmor %vm994_vm0, %vm995_vm1 }
 0x168   :  { %vm14133_vm10 = vcmp.eq.f32.partialorder %v958_v17, 8.507059e+37  ;;  %v1041_v5 = vor.u32 1.1754944e-38, %v1040_v4  ;;  %v1056_v52 = vmul.f32 %v1055_v10, %v13979_v41  ;;  %v15187_v34 = vand.u32 2147483647, %v13942_v19 }
 0x169   :  { %v1037_v38 = vsel %vm14115_vm12, %v14070_v3, %v1033_v45  ;;  %v12850_v28 = vpop.eup %12849  ;;  %vm15190_vm12 = vweird.f32 %v14015_v40  ;;  %vm15191_vm5 = vweird.f32 %v13976_v48  ;;  %v957_v17 = vsel %vm14123_vm15, %v14020_v50, %v953_v53  ;;  %v15229_v50 = vld [vmem:[#allocation87_spill] sm:$0xff] }
 0x16a   :  { %vm14146_vm7 = vcmp.eq.f32.partialorder %v15187_v34, 8.507059e+37  ;;  %vm14154_vm6 = vmor %vm15191_vm5, %vm15190_vm12  ;;  %v997_v41 = vsel %vm14139_vm3, %v14027_v58, %v993_v1  ;;  %vm1039_vm0 = vcmp.eq.f32.partialorder %v1038_v23, 8.507059e+37  ;;  %v1070_v4 = vmul.f32 %v12850_v28, %v14086_v31 }
 0x16b   :  { %v917_v10 = vsel %vm14154_vm6, %v14015_v40, %v913_v22  ;;  %v961_v45 = vor.u32 1.1754944e-38, %v960_v35  ;;  %v1001_v34 = vor.u32 1.1754944e-38, %v1000_v21  ;;  %v1042_v2 = vsel %vm1039_vm0, %v1041_v5, %v1037_v38 }
 0x16c   :  { %v15194_v16 = vand.u32 2147483647, %v13901_v51  ;;  %v978_v58 = vmul.f32 %v977_v27, %v13801_v25  ;;  %vm999_vm15 = vcmp.eq.f32.partialorder %v998_v62, 8.507059e+37  ;;  %v1018_v53 = vmul.f32 %v1017_v43, %v13899_v49  ;;  %v15232_v25 = vld [vmem:[#allocation50_spill] sm:$0xff]  ;;  %v15234_v51 = vld [vmem:[#allocation79_spill] sm:$0xff]  ;;  %v15287_v62 = vld [vmem:[#allocation49_spill] sm:$0xff] }
 0x16d   :  { %v1071_v1 = vsub.f32 1.0, %v1070_v4  ;;  %v962_v23 = vsel %vm14133_vm10, %v961_v45, %v957_v17  ;;  %v1002_v7 = vsel %vm999_vm15, %v1001_v34, %v997_v41  ;;  %v1057_v40 = vadd.f32 1.1283791, %v1056_v52  ;;  %v15249_v4 = vld [vmem:[#allocation68_spill] sm:$0xff] }
 0x16e   :  { %vm14171_vm5 = vcmp.eq.f32.partialorder %v15194_v16, 8.507059e+37  ;;  %v1080_v22 = vand.u32 2147483648, %v14086_v31  ;;  %v15197_v35 = vand.u32 2147483647, %v13812_v26  ;;  %vm15200_vm3 = vweird.f32 %v13986_v63 }
 0x16f   :  { %vm15201_vm12 = vweird.f32 %v13933_v24  ;;  %v1043_v49 = vmul.f32 %v1042_v2, %v1018_v53  ;;  %v1072_v16 = vmul.f32 %v12850_v28, %v1071_v1  ;;  %vm1075_vm10 = vweird.f32 %v12850_v28 }
 0x170   :  { %vm14182_vm6 = vcmp.eq.f32.partialorder %v15197_v35, 8.507059e+37  ;;  %vm14190_vm0 = vmor %vm15201_vm12, %vm15200_vm3  ;;  %v1078_v27 = vand.u32 2147483647, %v14086_v31  ;;  %vm15204_vm15 = vweird.f32 %v13995_v37  ;;  %vm15205_vm1 = vweird.f32 %v13942_v19 }
 0x171   :  { %v837_v21 = vsel %vm14190_vm0, %v13986_v63, %v14066_v44  ;;  %vm14203_vm11 = vmor %vm15205_vm1, %vm15204_vm15  ;;  %v15208_v43 = vand.u32 2147483647, %v13976_v48  ;;  %v15209_v2 = vand.u32 2147483648, %v13976_v48  ;;  %v938_v14 = vmul.f32 %v937_v57, %v13773_v59 }
 0x172   :  { %v877_v44 = vsel %vm14203_vm11, %v13995_v37, %v14077_v6  ;;  %v1003_v63 = vmul.f32 %v1002_v7, %v978_v58  ;;  %v1073_v30 = vadd.f32 %v12850_v28, %v1072_v16  ;;  %vm1074_vm1 = vweird.f32 %v14086_v31  ;;  %v15230_v7 = vld [vmem:[#allocation91_spill] sm:$0xff] }
 0x173   :  { %vm919_vm3 = vcmp.eq.f32.partialorder %v15208_v43, 8.507059e+37  ;;  %v921_v38 = vor.u32 1.1754944e-38, %v15209_v2  ;;  %v898_v19 = vmul.f32 %v14072_v20, %v13718_v56  ;;  %v963_v52 = vmul.f32 %v962_v23, %v938_v14  ;;  %vm1076_vm12 = vmor %vm1074_vm1, %vm1075_vm10 }
 0x174   :  { %v1081_v11 = vor.u32 1.1754944e-38, %v1080_v22  ;;  %v15210_v48 = vand.u32 2147483647, %v13708_v13  ;;  %v15213_v57 = vand.u32 2147483647, %v13795_v39  ;;  %v8848_v6 = vclamps-f32 %v1043_v49, 1.0 }
 0x175   :  { %v922_v5 = vsel %vm919_vm3, %v921_v38, %v917_v10  ;;  %v1058_v31 = vmul.f32 %v1057_v40, %v13948_v36  ;;  %v1077_v56 = vsel %vm1076_vm12, %v12850_v28, %v1073_v30  ;;  %vm1079_vm15 = vcmp.eq.f32.partialorder %v1078_v27, 8.507059e+37  ;;  %v15233_v49 = vld [vmem:[#allocation88_spill] sm:$0xff]  ;;  %v15235_v27 = vld [vmem:[#allocation47_spill] sm:$0xff] }
 0x176   :  { %vm14221_vm0 = vcmp.eq.f32.partialorder %v15210_v48, 8.507059e+37  ;;  %vm14227_vm11 = vcmp.eq.f32.partialorder %v15213_v57, 8.507059e+37  ;;  %v15216_v20 = vand.u32 2147483647, %v13933_v24  ;;  %v858_v13 = vmul.f32 %v14060_v15, %v13690_v33  ;;  %v15244_v48 = vld [vmem:[#allocation75_spill] sm:$0xff] }
 0x177   :  { %v882_v17 = vsel %vm14146_vm7, %v14068_v55, %v877_v44  ;;  %v1082_v41 = vsel %vm1079_vm15, %v1081_v11, %v1077_v56  ;;  %vm15217_vm3 = vweird.f32 %v13845_v0  ;;  %vm15218_vm1 = vweird.f32 %v13795_v39  ;;  %v15273_v44 = vld [vmem:[#allocation67_spill] sm:$0xff]  ;;  %v15297_v56 = vld [vmem:[#allocation46_spill] sm:$0xff] }
 0x178   :  { %vm839_vm10 = vcmp.eq.f32.partialorder %v15216_v20, 8.507059e+37  ;;  %vm14243_vm8 = vmor %vm15218_vm1, %vm15217_vm3  ;;  %v923_v24 = vmul.f32 %v922_v5, %v898_v19  ;;  %v8847_v28 = vclamps-f32 %v1003_v63, 1.0  ;;  %v1083_v10 = vmul.f32 %v1082_v41, %v1058_v31  ;;  %v15241_v63 = vld [vmem:[#allocation86_spill] sm:$0xff]  ;;  %v15243_v19 = vld [vmem:[#allocation84_spill] sm:$0xff] }
 0x179   :  { %v842_v36 = vsel %vm839_vm10, %v14029_v54, %v837_v21  ;;  %v717_v33 = vsel %vm14243_vm8, %v13845_v0, %v13931_v46  ;;  %v15221_v55 = vand.u32 2147483648, %v13812_v26  ;;  %v15222_v3 = vsel %vm14043_vm13, %v13944_v9, %v14023_v32  ;;  %v15227_v32 = vld [vmem:[#allocation60_spill] sm:$0xff] }
 0x17a   :  { %v802_v54 = vsel %vm14171_vm5, %v13981_v8, %v15222_v3  ;;  %v818_v45 = vmul.f32 %v14017_v18, %v13673_v60  ;;  %v15223_v34 = vand.u32 2147483647, %v13595_v12  ;;  %v883_v46 = vmul.f32 %v882_v17, %v858_v13  ;;  %v15228_v60 = vld [vmem:[#allocation90_spill] sm:$0xff] }
 0x17b   :  { %v761_v15 = vor.u32 1.1754944e-38, %v15221_v55  ;;  %v8846_v26 = vclamps-f32 %v963_v52, 1.0  ;;  %v1100_v0 = vadd.f32 1.0, %v8848_v6  ;;  %v8849_v42 = vclamps-f32 %v1083_v10, 1.0  ;;  %v15245_v6 = vld [vmem:[#allocation45_spill] sm:$0xff] }
 0x17c   :  { %vm14266_vm7 = vcmp.eq.f32.partialorder %v15223_v34, 8.507059e+37  ;;  %v15226_v9 = vsel %vm13957_vm9, %v13859_v29, %v13937_v61  ;;  %v778_v18 = vmul.f32 %v15228_v60, %v15227_v32  ;;  %v843_v12 = vmul.f32 %v842_v36, %v818_v45  ;;  %v15262_v60 = vld [vmem:[#allocation73_spill] sm:$0xff] }
 0x17d   :  { %v762_v8 = vsel %vm14182_vm6, %v761_v15, %v15226_v9  ;;  %v428_v53 = vmul.f32 0.5, %v15229_v50  ;;  %v8845_v1 = vclamps-f32 %v923_v24, 1.0  ;;  %v1099_v23 = vadd.f32 1.0, %v8847_v28  ;;  %v15252_v24 = vld [vmem:[#allocation44_spill] sm:$0xff]  ;;  %v15253_v28 = vld [vmem:[#allocation82_spill] sm:$0xff]  ;;  %v15255_v15 = vld [vmem:[#allocation85_spill] sm:$0xff] }
 0x17e   :  { %v429_v40 = vmul.f32 0.5, %v15230_v7  ;;  %v1101_v22 = vadd.f32 1.0, %v8849_v42  ;;  %v15231_v35 = vand.u32 2147483648, %v13795_v39  ;;  %v738_v29 = vmul.f32 %v15233_v49, %v15232_v25  ;;  %v15240_v39 = vld [vmem:[#allocation78_spill] sm:$0xff]  ;;  %v15260_v9 = vld [vmem:[#allocation72_spill] sm:$0xff] }
 0x17f   :  { %v803_v61 = vmul.f32 %v802_v54, %v778_v18  ;;  %v427_v16 = vmul.f32 0.5, %v15234_v51  ;;  %v15236_v21 = vand.u32 2147483647, %v15235_v27  ;;  %v8844_v43 = vclamps-f32 %v883_v46, 1.0  ;;  %v15263_v18 = vld [vmem:[#allocation81_spill] sm:$0xff] }
 0x180   :  { %v721_v47 = vor.u32 1.1754944e-38, %v15231_v35  ;;  %v1098_v2 = vadd.f32 1.0, %v8846_v26  ;;  %v1116_v38 = vmul.f32 %v1100_v0, %v428_v53  ;;  %v1117_v14 = vmul.f32 %v1101_v22, %v429_v40  ;;  %v15257_v26 = vld [vmem:[#allocation66_spill] sm:$0xff]  ;;  %v15258_v0 = vld [vmem:[#allocation76_spill] sm:$0xff] }
 0x181   :  { %vm14288_vm8 = vcmp.eq.f32.partialorder %v15236_v21, 8.507059e+37  ;;  %v15242_v30 = vsel %vm13888_vm4, %v15240_v39, %v15241_v63  ;;  %v763_v11 = vmul.f32 %v762_v8, %v738_v29  ;;  %v426_v57 = vmul.f32 0.5, %v15244_v48  ;;  %v15269_v29 = vld [vmem:[#allocation41_spill] sm:$0xff]  ;;  %v15275_v39 = vld [vmem:[#allocation51_spill] sm:$0xff]  ;;  %v15276_v63 = vld [vmem:[#allocation64_spill] sm:$0xff] }
 0x182   :  { %v682_v5 = vsel %vm14221_vm0, %v15243_v19, %v15242_v30  ;;  %v722_v52 = vsel %vm14227_vm11, %v721_v47, %v717_v33  ;;  %v15246_v31 = vand.u32 2147483647, %v15245_v6  ;;  %v8843_v20 = vclamps-f32 %v843_v12, 1.0  ;;  %v15254_v33 = vld [vmem:[#allocation70_spill] sm:$0xff]  ;;  %v15266_v47 = vld [vmem:[#allocation52_spill] sm:$0xff]  ;;  %v15272_v21 = vld [vmem:[#allocation77_spill] sm:$0xff] }
 0x183   :  { %v1097_v13 = vadd.f32 1.0, %v8845_v1  ;;  %v1115_v17 = vmul.f32 %v1099_v23, %v427_v16  ;;  %v14309_v41 = vpack.c.bf16 %v1117_v14, %v1116_v38  ;;  %v15250_v59 = vand.u32 2147483647, %v15249_v4  ;;  %v15265_v1 = vld [vmem:[#allocation65_spill] sm:$0xff]  ;;  %v15271_v16 = vld [vmem:[#allocation63_spill] sm:$0xff] }
 0x184   :  { %vm14305_vm9 = vcmp.eq.f32.partialorder %v15246_v31, 8.507059e+37  ;;  %v15251_v37 = vand.u32 2147483648, %v15249_v4  ;;  %v658_v10 = vmul.f32 %v15253_v28, %v15252_v24  ;;  %v425_v55 = vmul.f32 0.5, %v15254_v33  ;;  %v15278_v19 = vld [vmem:[#allocation61_spill] sm:$0xff]  ;;  %v15282_v48 = vld [vmem:[#allocation71_spill] sm:$0xff] }
 0x185   :  { %vm639_vm4 = vcmp.eq.f32.partialorder %v15250_v59, 8.507059e+37  ;;  %v723_v3 = vmul.f32 %v722_v52, %v15255_v15  ;;  %v8842_v54 = vclamps-f32 %v803_v61, 1.0  ;;  %v1096_v45 = vadd.f32 1.0, %v8844_v43  ;;  %1142 = vmatpush.bf16.msra.mxu1 %v14309_v41  ;;  %1188 = vmatpush.bf16.msra.mxu2 %v14309_v41  ;;  %v15270_v61 = vld [vmem:[#allocation69_spill] sm:$0xff]  ;;  %v15279_v52 = vld [vmem:[#allocation74_spill] sm:$0xff]  ;;  %v15292_v15 = vld [vmem:[#allocation55_spill] sm:$0xff] }
 0x186   :  { %v641_v36 = vor.u32 1.1754944e-38, %v15251_v37  ;;  %v1114_v34 = vmul.f32 %v1098_v2, %v426_v57  ;;  %v15259_v42 = vsel %vm13790_vm14, %v15257_v26, %v15258_v0  ;;  %v15264_v12 = vsel %vm13839_vm2, %v15262_v60, %v15263_v18  ;;  %1734 = vmatpush.bf16.msrb.mxu0 %v14309_v41  ;;  %v15288_v24 = vld [vmem:[#allocation57_spill] sm:$0xff] }
 0x187   :  { %v602_v8 = vsel %vm14266_vm7, %v15260_v9, %v15259_v42  ;;  %v683_v53 = vmul.f32 %v682_v5, %v658_v10  ;;  %v424_v23 = vmul.f32 0.5, %v15265_v1  ;;  %v8841_v7 = vclamps-f32 %v763_v11, 1.0  ;;  %v15281_v11 = vld [vmem:[#allocation58_spill] sm:$0xff]  ;;  %v15295_v9 = vld [vmem:[#allocation36_spill] sm:$0xff] }
 0x188   :  { %v642_v50 = vsel %vm639_vm4, %v641_v36, %v15264_v12  ;;  %v1095_v40 = vadd.f32 1.0, %v8843_v20  ;;  %v1113_v22 = vmul.f32 %v1097_v13, %v425_v55  ;;  %v14336_v35 = vpack.c.bf16 %v1115_v17, %v1114_v34  ;;  %v15284_v20 = vld [vmem:[#allocation56_spill] sm:$0xff]  ;;  %v15285_v36 = vld [vmem:[#allocation59_spill] sm:$0xff]  ;;  %v15290_v10 = vld [vmem:[#allocation54_spill] sm:$0xff] }
 0x189   :  { %v15267_v25 = vand.u32 2147483647, %v15266_v47  ;;  %v15268_v58 = vand.u32 2147483648, %v15266_v47  ;;  %v578_v51 = vmul.f32 %v15270_v61, %v15269_v29  ;;  %v423_v27 = vmul.f32 0.5, %v15271_v16  ;;  %v15291_v55 = vld [vmem:[#allocation38_spill] sm:$0xff] }
 0x18a   :  { %v643_v43 = vmul.f32 %v642_v50, %v15272_v21  ;;  %v8840_v2 = vclamps-f32 %v723_v3, 1.0  ;;  %v1094_v38 = vadd.f32 1.0, %v8842_v54  ;;  %v1112_v14 = vmul.f32 %v1096_v45, %v424_v23  ;;  %1143 = vmatpush.bf16.msra.mxu1 %v14336_v35  ;;  %1189 = vmatpush.bf16.msra.mxu2 %v14336_v35  ;;  %v15293_v54 = vld [vmem:[#allocation48_spill] sm:$0xff]  ;;  %v15294_v34 = vld [vmem:[#allocation62_spill] sm:$0xff] }
 0x18b   :  { %vm559_vm14 = vcmp.eq.f32.partialorder %v15267_v25, 8.507059e+37  ;;  %v561_v49 = vor.u32 1.1754944e-38, %v15268_v58  ;;  %vm15274_vm2 = vnez %v15273_v44  ;;  %vm15280_vm13 = vnez %v15279_v52  ;;  %1735 = vmatpush.bf16.msrb.mxu0 %v14336_v35  ;;  %v15299_v58 = vld [vmem:[#allocation42_spill] sm:$0xff]  ;;  %v15301_v44 = vld [vmem:[#allocation39_spill] sm:$0xff] }
 0x18c   :  { %v15277_v30 = vsel %vm15274_vm2, %v15275_v39, %v15276_v63  ;;  %v15283_v57 = vsel %vm15280_vm13, %v15281_v11, %v15282_v48  ;;  %v603_v31 = vmul.f32 %v602_v8, %v578_v51  ;;  %v422_v13 = vmul.f32 0.5, %v15284_v20  ;;  %v15296_v8 = vld [vmem:[#allocation53_spill] sm:$0xff]  ;;  %v15303_v48 = vld [vmem:[#allocation35_spill] sm:$0xff] }
 0x18d   :  { %v522_v5 = vsel %vm14288_vm8, %v15278_v19, %v15277_v30  ;;  %v562_v6 = vsel %vm559_vm14, %v561_v49, %v15283_v57  ;;  %v8839_v17 = vclamps-f32 %v683_v53, 1.0  ;;  %v1093_v4 = vadd.f32 1.0, %v8841_v7 }
 0x18e   :  { %v1111_v59 = vmul.f32 %v1095_v40, %v423_v27  ;;  %v14363_v37 = vpack.c.bf16 %v1113_v22, %v1112_v14  ;;  %vm15286_vm5 = vnez %v15285_v36  ;;  %v498_v3 = vmul.f32 %v15292_v15, %v15291_v55  ;;  %v15298_v22 = vld [vmem:[#allocation43_spill] sm:$0xff]  ;;  %v12035_v36 = vld [vmem:[#allocation8 + $0x50] sm:$0xff] }
 0x18f   :  { %v15289_v28 = vsel %vm15286_vm5, %v15287_v62, %v15288_v24  ;;  %v421_v45 = vmul.f32 0.5, %v15293_v54  ;;  %v563_v46 = vmul.f32 %v562_v6, %v15294_v34  ;;  %v8838_v26 = vclamps-f32 %v643_v43, 1.0  ;;  %v15300_v43 = vld [vmem:[#allocation40_spill] sm:$0xff]  ;;  %v12041_v55 = vld [vmem:[#allocation8 + $0x70] sm:$0xff] }
 0x190   :  { %v482_v33 = vsel %vm14305_vm9, %v15290_v10, %v15289_v28  ;;  %v1092_v0 = vadd.f32 1.0, %v8840_v2  ;;  %v1110_v42 = vmul.f32 %v1094_v38, %v422_v13  ;;  %1144 = vmatpush.bf16.msra.mxu1 %v14363_v37  ;;  %1190 = vmatpush.bf16.msra.mxu2 %v14363_v37  ;;  %v458_v32 = vmul.f32 %v15296_v8, %v15295_v9  ;;  %v12034_v62 = vld [vmem:[#allocation8 + $0x48] sm:$0xff]  ;;  %v12033_v24 = vld [vmem:[#allocation8 + $0x40] sm:$0xff]  ;;  %v12020_v28 = vld [vmem:[#allocation7 + $0x8] sm:$0xff] }
 0x191   :  { %v523_v60 = vmul.f32 %v522_v5, %v498_v3  ;;  %v420_v18 = vmul.f32 0.5, %v15297_v56  ;;  %1736 = vmatpush.bf16.msrb.mxu0 %v14363_v37  ;;  %v8837_v12 = vclamps-f32 %v603_v31, 1.0  ;;  %v1091_v50 = vadd.f32 1.0, %v8839_v17  ;;  %v15302_v5 = vld [vmem:[#allocation37_spill] sm:$0xff]  ;;  %v12036_v17 = vld [vmem:[#allocation8 + $0x58] sm:$0xff]  ;;  %v12039_v54 = vld [vmem:[#allocation8 + $0x60] sm:$0xff] }
 0x192   :  { %v1109_v53 = vmul.f32 %v1093_v4, %v421_v45  ;;  %v14383_v1 = vpack.c.bf16 %v1111_v59, %v1110_v42  ;;  %v483_v23 = vmul.f32 %v482_v33, %v458_v32  ;;  %v8836_v7 = vclamps-f32 %v563_v46, 1.0  ;;  %v12025_v4 = vld [vmem:[#allocation7 + $0x10] sm:$0xff]  ;;  %v12019_v59 = vld [vmem:[#allocation7] sm:$0xff]  ;;  %v12026_v10 = vld [vmem:[#allocation7 + $0x18] sm:$0xff] }
 0x193   :  { %v1090_v40 = vadd.f32 1.0, %v8838_v26  ;;  %v419_v47 = vmul.f32 0.5, %v15298_v22  ;;  %v1108_v25 = vmul.f32 %v1092_v0, %v420_v18  ;;  %v418_v49 = vmul.f32 0.5, %v15299_v58  ;;  %v12042_v33 = vld [vmem:[#allocation8 + $0x78] sm:$0xff]  ;;  %v12031_v15 = vld [vmem:[#allocation7 + $0x20] sm:$0xff]  ;;  %v12040_v3 = vld [vmem:[#allocation8 + $0x68] sm:$0xff] }
 0x194   :  { %1145 = vmatpush.bf16.msra.mxu1 %v14383_v1  ;;  %1191 = vmatpush.bf16.msra.mxu2 %v14383_v1  ;;  %v8835_v29 = vclamps-f32 %v523_v60, 1.0  ;;  %v1089_v61 = vadd.f32 1.0, %v8837_v12  ;;  %v8834_v27 = vclamps-f32 %v483_v23, 1.0  ;;  %v1088_v21 = vadd.f32 1.0, %v8836_v7  ;;  %v12030_v45 = vld [vmem:[#allocation8 + $0x38] sm:$0xff]  ;;  %v12029_v34 = vld [vmem:[#allocation8 + $0x30] sm:$0xff] }
 0x195   :  { %1737 = vmatpush.bf16.msrb.mxu0 %v14383_v1  ;;  %v1107_v51 = vmul.f32 %v1091_v50, %v419_v47  ;;  %v14390_v16 = vpack.c.bf16 %v1109_v53, %v1108_v25  ;;  %v417_v2 = vmul.f32 0.5, %v15300_v43  ;;  %v1106_v38 = vmul.f32 %v1090_v40, %v418_v49  ;;  %1253 = vmatpush.bf16.msra.mxu3 %v12030_v45  ;;  %v12028_v46 = vld [vmem:[#allocation8 + $0x28] sm:$0xff]  ;;  %v12032_v26 = vld [vmem:[#allocation7 + $0x28] sm:$0xff]  ;;  %v12027_v0 = vld [vmem:[#allocation8 + $0x20] sm:$0xff] }
 0x196   :  { %v1087_v14 = vadd.f32 1.0, %v8835_v29  ;;  %v416_v39 = vmul.f32 0.5, %v15301_v44  ;;  %v1086_v19 = vadd.f32 1.0, %v8834_v27  ;;  %v415_v52 = vmul.f32 0.5, %v15302_v5  ;;  %v12024_v42 = vld [vmem:[#allocation8 + $0x18] sm:$0xff]  ;;  %v12023_v9 = vld [vmem:[#allocation8 + $0x10] sm:$0xff] }
 0x197   :  { %v1105_v63 = vmul.f32 %v1089_v61, %v417_v2  ;;  %v14397_v30 = vpack.c.bf16 %v1107_v51, %v1106_v38  ;;  %v414_v57 = vmul.f32 0.5, %v15303_v48  ;;  %v12022_v8 = vld [vmem:[#allocation8 + $0x8] sm:$0xff]  ;;  %v12021_v32 = vld [vmem:[#allocation8] sm:$0xff]  ;;  %vm1242_vm6 = vcmask 523264   ;;  %v12044_v2 = vld [vmem:[#allocation7 + $0x48] sm:$0xff] }
 0x198   :  { %1146 = vmatpush.bf16.msra.mxu1 %v14390_v16  ;;  %1192 = vmatpush.bf16.msra.mxu2 %v14390_v16  ;;  %v1104_v11 = vmul.f32 %v1088_v21, %v416_v39  ;;  %v1103_v6 = vmul.f32 %v1087_v14, %v415_v52  ;;  %v12043_v21 = vld [vmem:[#allocation7 + $0x40] sm:$0xff]  ;;  %v12037_v43 = vld [vmem:[#allocation7 + $0x30] sm:$0xff]  ;;  %v12038_v38 = vld [vmem:[#allocation7 + $0x38] sm:$0xff] }
 0x199   :  { %1738 = vmatpush.bf16.msrb.mxu0 %v14390_v16  ;;  %v1102_v20 = vmul.f32 %v1086_v19, %v414_v57  ;;  %1254 = vmatpush.bf16.msra.mxu3 %v12029_v34  ;;  %v12047_v52 = vld [vmem:[#allocation8 + $0x90] sm:$0xff] }
 0x19a   :  { %v14404_v31 = vpack.c.bf16 %v1105_v63, %v1104_v11  ;;  %v12048_v63 = vld [vmem:[#allocation8 + $0x98] sm:$0xff]  ;;  %v12046_v11 = vld [vmem:[#allocation8 + $0x88] sm:$0xff] }
 0x19b   :  { %v14409_v13 = vpack.c.bf16 %v1103_v6, %v1102_v20  ;;  %v12045_v20 = vld [vmem:[#allocation8 + $0x80] sm:$0xff] }
 0x19c   :  { %1147 = vmatpush.bf16.msra.mxu1 %v14397_v30  ;;  %1193 = vmatpush.bf16.msra.mxu2 %v14397_v30 }
 0x19d   :  { %1739 = vmatpush.bf16.msrb.mxu0 %v14397_v30  ;;  %1255 = vmatpush.bf16.msra.mxu3 %v12028_v46 }
 0x1a0   :  { %1148 = vmatpush.bf16.msra.mxu1 %v14404_v31  ;;  %1194 = vmatpush.bf16.msra.mxu2 %v14404_v31 }
 0x1a1   :  { %1740 = vmatpush.bf16.msrb.mxu0 %v14404_v31  ;;  %1256 = vmatpush.bf16.msra.mxu3 %v12027_v0 }
 0x1a4   :  { %1149 = vmatpush.bf16.msra.mxu1 %v14409_v13  ;;  %1195 = vmatpush.bf16.msra.mxu2 %v14409_v13 }
 0x1a5   :  { %1741 = vmatpush.bf16.msrb.mxu0 %v14409_v13  ;;  %1302 = vmatpush.bf16.msrb.mxu3 %v12024_v42 }
 0x1a7   :  { %1196 = vmatmul.bf16.vlgmr.msra.gmra.mxu2 %v12025_v4  ;;  %1150 = vmatmul.bf16.vlgmr.msra.gmra.mxu1 %v12019_v59 }
 0x1a8   :  { %1334 = vmatpush.bf16.msrb.mxu1 %v14309_v41  ;;  %1398 = vmatpush.bf16.msrb.mxu2 %v12036_v17 }
 0x1a9   :  { %1934 = vmatpush.bf16.msra.mxu0 %v14309_v41  ;;  %1303 = vmatpush.bf16.msrb.mxu3 %v12023_v9 }
 0x1ac   :  { %1335 = vmatpush.bf16.msrb.mxu1 %v14336_v35  ;;  %1399 = vmatpush.bf16.msrb.mxu2 %v12035_v36 }
 0x1ad   :  { %1935 = vmatpush.bf16.msra.mxu0 %v14336_v35  ;;  %1304 = vmatpush.bf16.msrb.mxu3 %v12022_v8 }
 0x1b0   :  { %1336 = vmatpush.bf16.msrb.mxu1 %v14363_v37  ;;  %1400 = vmatpush.bf16.msrb.mxu2 %v12034_v62 }
 0x1b1   :  { %1936 = vmatpush.bf16.msra.mxu0 %v14363_v37  ;;  %1305 = vmatpush.bf16.msrb.mxu3 %v12021_v32 }
 0x1b4   :  { %1337 = vmatpush.bf16.msrb.mxu1 %v14383_v1  ;;  %1401 = vmatpush.bf16.msrb.mxu2 %v12033_v24 }
 0x1b5   :  { %1937 = vmatpush.bf16.msra.mxu0 %v14383_v1 }
 0x1b7   :  { %1155 = vmatmul.bf16.gmra.mxu1 %v12020_v28  ;;  %1201 = vmatmul.bf16.gmra.mxu2 %v12026_v10 }
 0x1b8   :  { %1534 = vmatpush.bf16.msra.mxu2 %v14309_v41  ;;  %1338 = vmatpush.bf16.msrb.mxu1 %v14390_v16 }
 0x1b9   :  { %1938 = vmatpush.bf16.msra.mxu0 %v14390_v16 }
 0x1bc   :  { %1535 = vmatpush.bf16.msra.mxu2 %v14336_v35  ;;  %1339 = vmatpush.bf16.msrb.mxu1 %v14397_v30 }
 0x1bd   :  { %1939 = vmatpush.bf16.msra.mxu0 %v14397_v30 }
 0x1c0   :  { %1536 = vmatpush.bf16.msra.mxu2 %v14363_v37  ;;  %1340 = vmatpush.bf16.msrb.mxu1 %v14404_v31 }
 0x1c1   :  { %1940 = vmatpush.bf16.msra.mxu0 %v14404_v31 }
 0x1c4   :  { %1537 = vmatpush.bf16.msra.mxu2 %v14383_v1  ;;  %1341 = vmatpush.bf16.msrb.mxu1 %v14409_v13 }
 0x1c5   :  { %1941 = vmatpush.bf16.msra.mxu0 %v14409_v13 }
 0x1c7   :  { %1342 = vmatmul.bf16.vlgmr.msrb.gmra.mxu1 %v12031_v15 }
 0x1c8   :  { %1498 = vmatpush.bf16.msra.mxu1 %v12042_v33  ;;  %1538 = vmatpush.bf16.msra.mxu2 %v14390_v16 }
 0x1cc   :  { %1499 = vmatpush.bf16.msra.mxu1 %v12041_v55  ;;  %1539 = vmatpush.bf16.msra.mxu2 %v14397_v30  ;;  %v12055_v55 = vld [vmem:[#allocation7 + $0x60] sm:$0xff] }
 0x1cd   :  { %1742 = vmatmul.bf16.vlgmr.msrb.gmra.mxu0 %v12055_v55 }
 0x1d0   :  { %1500 = vmatpush.bf16.msra.mxu1 %v12040_v3  ;;  %1540 = vmatpush.bf16.msra.mxu2 %v14404_v31 }
 0x1d4   :  { %1501 = vmatpush.bf16.msra.mxu1 %v12039_v54  ;;  %1541 = vmatpush.bf16.msra.mxu2 %v14409_v13 }
 0x1d7   :  { %1347 = vmatmul.bf16.gmra.mxu1 %v12032_v26  ;;  %v12056_v26 = vld [vmem:[#allocation7 + $0x68] sm:$0xff] }
 0x1d8   :  { %1634 = vmatpush.bf16.msrb.mxu1 %v14309_v41 }
 0x1dc   :  { %1635 = vmatpush.bf16.msrb.mxu1 %v14336_v35 }
 0x1dd   :  { %1747 = vmatmul.bf16.gmra.mxu0 %v12056_v26 }
 0x1e0   :  { %1636 = vmatpush.bf16.msrb.mxu1 %v14363_v37 }
 0x1e4   :  { %1637 = vmatpush.bf16.msrb.mxu1 %v14383_v1 }
 0x1e8   :  { %1638 = vmatpush.bf16.msrb.mxu1 %v14390_v16 }
 0x1ec   :  { %1639 = vmatpush.bf16.msrb.mxu1 %v14397_v30 }
 0x1f0   :  { %1640 = vmatpush.bf16.msrb.mxu1 %v14404_v31 }
 0x1f4   :  { %1641 = vmatpush.bf16.msrb.mxu1 %v14409_v13 }
 0x224   :  { %v1151_v60 = vpop.f32.mrf.mxu1 }
 0x22a   :  { %v1197_v56 = vpop.f32.mrf.mxu2 }
 0x22c   :  { %v1153_v18 = vpop.f32.mrf.mxu1 }
 0x22d   :  { %v1161_v49 = vpack.c.bf16 %v1153_v18, %v1151_v60  ;;  %v12067_v60 = vld [vmem:[#allocation7 + $0x80] sm:$0xff]  ;;  %v12060_v18 = vld [vmem:[#allocation8 + $0xd8] sm:$0xff] }
 0x22e   :  { %1942 = vmatmul.bf16.vlgmr.msra.gmra.mxu0 %v12067_v60 }
 0x232   :  { %v1199_v12 = vpop.f32.mrf.mxu2 }
 0x233   :  { %v1207_v50 = vpack.c.bf16 %v1199_v12, %v1197_v56  ;;  %v12062_v56 = vld [vmem:[#allocation7 + $0x78] sm:$0xff] }
 0x234   :  { %v1156_v53 = vpop.f32.mrf.mxu1 }
 0x235   :  { %8882 = vmatmul.msk.bf16.vlgmr.msra.gmra.mxu3 %vm1242_vm6, %v1207_v50 }
 0x236   :  { %1434 = vmatpush.bf16.msra.mxu3 %v14309_v41 }
 0x23a   :  { %1435 = vmatpush.bf16.msra.mxu3 %v14336_v35  ;;  %v1202_v23 = vpop.f32.mrf.mxu2 }
 0x23c   :  { %v1158_v7 = vpop.f32.mrf.mxu1 }
 0x23d   :  { %v1162_v27 = vpack.c.bf16 %v1158_v7, %v1156_v53 }
 0x23e   :  { %1436 = vmatpush.bf16.msra.mxu3 %v14363_v37 }
 0x242   :  { %1437 = vmatpush.bf16.msra.mxu3 %v14383_v1  ;;  %v1204_v40 = vpop.f32.mrf.mxu2 }
 0x243   :  { %v1208_v22 = vpack.c.bf16 %v1204_v40, %v1202_v23  ;;  %v12053_v23 = vld [vmem:[#allocation8 + $0xb0] sm:$0xff] }
 0x244   :  { %v1343_v47 = vpop.f32.mrf.mxu1 }
 0x245   :  { %8883 = vmatmul.msk.bf16.gmra.mxu3 %vm1242_vm6, %v1208_v22 }
 0x246   :  { %1438 = vmatpush.bf16.msra.mxu3 %v14390_v16 }
 0x24a   :  { %1439 = vmatpush.bf16.msra.mxu3 %v14397_v30  ;;  %v1743_v12 = vpop.f32.mrf.mxu0 }
 0x24c   :  { %v1345_v25 = vpop.f32.mrf.mxu1 }
 0x24d   :  { %v1353_v58 = vpack.c.bf16 %v1345_v25, %v1343_v47  ;;  %v12052_v47 = vld [vmem:[#allocation8 + $0xa8] sm:$0xff] }
 0x24e   :  { %1440 = vmatpush.bf16.msra.mxu3 %v14404_v31 }
 0x24f   :  { %8926 = vmatmul.msk.bf16.vlgmr.msrb.gmra.mxu2 %vm1242_vm6, %v1353_v58 }
 0x252   :  { %1441 = vmatpush.bf16.msra.mxu3 %v14409_v13  ;;  %v1745_v50 = vpop.f32.mrf.mxu0 }
 0x253   :  { %v1753_v53 = vpack.c.bf16 %v1745_v50, %v1743_v12 }
 0x254   :  { %v1348_v29 = vpop.f32.mrf.mxu1 }
 0x255   :  { %8900 = vmatmul.msk.bf16.vlgmr.msrb.gmra.mxu3 %vm1242_vm6, %v1161_v49  ;;  %v12051_v49 = vld [vmem:[#allocation8 + $0xa0] sm:$0xff] }
 0x256   :  { %1598 = vmatpush.bf16.msrb.mxu3 %v12048_v63 }
 0x25a   :  { %1599 = vmatpush.bf16.msrb.mxu3 %v12047_v52  ;;  %v1748_v58 = vpop.f32.mrf.mxu0 }
 0x25c   :  { %v1350_v61 = vpop.f32.mrf.mxu1 }
 0x25d   :  { %v1354_v51 = vpack.c.bf16 %v1350_v61, %v1348_v29 }
 0x25e   :  { %1600 = vmatpush.bf16.msrb.mxu3 %v12046_v11  ;;  %v12069_v11 = vld [vmem:[#allocation8 + $0x100] sm:$0xff] }
 0x25f   :  { %8927 = vmatmul.msk.bf16.gmra.mxu2 %vm1242_vm6, %v1354_v51 }
 0x262   :  { %1601 = vmatpush.bf16.msrb.mxu3 %v12045_v20  ;;  %v1750_v51 = vpop.f32.mrf.mxu0 }
 0x265   :  { %8901 = vmatmul.msk.bf16.gmra.mxu3 %vm1242_vm6, %v1162_v27  ;;  %v12072_v27 = vld [vmem:[#allocation8 + $0x118] sm:$0xff] }
 0x26f   :  { %1542 = vmatmul.bf16.vlgmr.msra.gmra.mxu2 %v12043_v21  ;;  %v1754_v21 = vpack.c.bf16 %v1750_v51, %v1748_v58 }
 0x275   :  { %1442 = vmatmul.bf16.vlgmr.msra.gmra.mxu3 %v12037_v43 }
 0x276   :  { %1798 = vmatpush.bf16.msra.mxu3 %v12060_v18 }
 0x27f   :  { %1547 = vmatmul.bf16.gmra.mxu2 %v12044_v2 }
 0x285   :  { %1447 = vmatmul.bf16.gmra.mxu3 %v12038_v38  ;;  %v12071_v38 = vld [vmem:[#allocation8 + $0x110] sm:$0xff] }
 0x2b8   :  { %v1258_v14 = vpop.f32.mrf.mxu3 }
 0x2c0   :  { %v14460_v44 = vpop.f32.mrf.mxu3 }
 0x2c8   :  { %v1263_v39 = vpop.f32.mrf.mxu3 }
 0x2d0   :  { %v14462_v19 = vpop.f32.mrf.mxu3 }
 0x2d2   :  { %v1403_v5 = vpop.f32.mrf.mxu2 }
 0x2d8   :  { %v1307_v48 = vpop.f32.mrf.mxu3 }
 0x2d9   :  { %v1308_v57 = vadd.f32 %v1307_v48, %v1258_v14 }
 0x2da   :  { %v14464_v6 = vpop.f32.mrf.mxu2 }
 0x2db   :  { %v14466_v17 = vadd.f32 %v1403_v5, %v1308_v57  ;;  %v1943_v5 = vpop.f32.mrf.mxu0  ;;  %v12066_v57 = vld [vmem:[#allocation8 + $0xf8] sm:$0xff] }
 0x2e0   :  { %v14468_v4 = vpop.f32.mrf.mxu3 }
 0x2e2   :  { %v1408_v59 = vpop.f32.mrf.mxu2 }
 0x2e3   :  { %v1945_v48 = vpop.f32.mrf.mxu0 }
 0x2e4   :  { %v1953_v20 = vpack.c.bf16 %v1945_v48, %v1943_v5 }
 0x2e8   :  { %v1312_v36 = vpop.f32.mrf.mxu3 }
 0x2e9   :  { %v1313_v62 = vadd.f32 %v1312_v36, %v1263_v39  ;;  %v12070_v39 = vld [vmem:[#allocation8 + $0x108] sm:$0xff] }
 0x2ea   :  { %v14470_v24 = vpop.f32.mrf.mxu2  ;;  %v12064_v36 = vld [vmem:[#allocation8 + $0xe8] sm:$0xff] }
 0x2eb   :  { %v14472_v28 = vadd.f32 %v1408_v59, %v1313_v62 }
 0x2f0   :  { %v14474_v10 = vpop.f32.mrf.mxu3 }
 0x2f2   :  { %v1543_v33 = vpop.f32.mrf.mxu2 }
 0x2f8   :  { %v1443_v15 = vpop.f32.mrf.mxu3 }
 0x2fa   :  { %v1545_v3 = vpop.f32.mrf.mxu2 }
 0x2fb   :  { %v1553_v54 = vpack.c.bf16 %v1545_v3, %v1543_v33 }
 0x2fd   :  { %8978 = vmatmul.msk.bf16.vlgmr.msrb.gmra.mxu3 %vm1242_vm6, %v1553_v54 }
 0x300   :  { %v1445_v45 = vpop.f32.mrf.mxu3 }
 0x301   :  { %v1453_v34 = vpack.c.bf16 %v1445_v45, %v1443_v15 }
 0x302   :  { %v1548_v46 = vpop.f32.mrf.mxu2 }
 0x303   :  { %8952 = vmatmul.msk.bf16.vlgmr.msra.gmra.mxu1 %vm1242_vm6, %v1453_v34 }
 0x304   :  { %1834 = vmatpush.bf16.msra.mxu1 %v14309_v41  ;;  %v12049_v41 = vld [vmem:[#allocation7 + $0x50] sm:$0xff] }
 0x308   :  { %1835 = vmatpush.bf16.msra.mxu1 %v14336_v35  ;;  %v1448_v0 = vpop.f32.mrf.mxu3  ;;  %v12068_v35 = vld [vmem:[#allocation7 + $0x88] sm:$0xff] }
 0x309   :  { %1947 = vmatmul.bf16.gmra.mxu0 %v12068_v35 }
 0x30a   :  { %v1550_v42 = vpop.f32.mrf.mxu2 }
 0x30b   :  { %v1554_v9 = vpack.c.bf16 %v1550_v42, %v1548_v46 }
 0x30c   :  { %1836 = vmatpush.bf16.msra.mxu1 %v14363_v37  ;;  %v12050_v37 = vld [vmem:[#allocation7 + $0x58] sm:$0xff] }
 0x30d   :  { %8979 = vmatmul.msk.bf16.gmra.mxu3 %vm1242_vm6, %v1554_v9 }
 0x310   :  { %1837 = vmatpush.bf16.msra.mxu1 %v14383_v1  ;;  %v1450_v8 = vpop.f32.mrf.mxu3  ;;  %v12061_v1 = vld [vmem:[#allocation7 + $0x70] sm:$0xff] }
 0x311   :  { %v1454_v32 = vpack.c.bf16 %v1450_v8, %v1448_v0 }
 0x313   :  { %8953 = vmatmul.msk.bf16.gmra.mxu1 %vm1242_vm6, %v1454_v32 }
 0x314   :  { %1838 = vmatpush.bf16.msra.mxu1 %v14390_v16  ;;  %v12059_v16 = vld [vmem:[#allocation8 + $0xd0] sm:$0xff] }
 0x315   :  { %1799 = vmatpush.bf16.msra.mxu3 %v12059_v16  ;;  %v1310_v16 = vadd.f32 %v14468_v4, %v14460_v44  ;;  %v1315_v44 = vadd.f32 %v14474_v10, %v14462_v19 }
 0x318   :  { %1839 = vmatpush.bf16.msra.mxu1 %v14397_v30  ;;  %v12058_v30 = vld [vmem:[#allocation8 + $0xc8] sm:$0xff] }
 0x319   :  { %1800 = vmatpush.bf16.msra.mxu3 %v12058_v30  ;;  %v1414_v30 = vadd.f32 %v14464_v6, %v1310_v16 }
 0x31c   :  { %1840 = vmatpush.bf16.msra.mxu1 %v14404_v31  ;;  %v12057_v31 = vld [vmem:[#allocation8 + $0xc0] sm:$0xff] }
 0x31d   :  { %1801 = vmatpush.bf16.msra.mxu3 %v12057_v31 }
 0x320   :  { %1841 = vmatpush.bf16.msra.mxu1 %v14409_v13  ;;  %v12054_v13 = vld [vmem:[#allocation8 + $0xb8] sm:$0xff]  ;;  %9030 = vmatmul.msk.bf16.vlgmr.msra.gmra.mxu3 %vm1242_vm6, %v1753_v53 }
 0x321   :  { %1698 = vmatpush.bf16.msrb.mxu2 %v12054_v13  ;;  %1998 = vmatpush.bf16.msrb.mxu3 %v12072_v27 }
 0x323   :  { %1642 = vmatmul.bf16.vlgmr.msrb.gmra.mxu1 %v12049_v41 }
 0x325   :  { %1699 = vmatpush.bf16.msrb.mxu2 %v12053_v23  ;;  %1999 = vmatpush.bf16.msrb.mxu3 %v12071_v38 }
 0x329   :  { %1700 = vmatpush.bf16.msrb.mxu2 %v12052_v47  ;;  %2000 = vmatpush.bf16.msrb.mxu3 %v12070_v39 }
 0x32d   :  { %1701 = vmatpush.bf16.msrb.mxu2 %v12051_v49  ;;  %2001 = vmatpush.bf16.msrb.mxu3 %v12069_v11 }
 0x330   :  { %9031 = vmatmul.msk.bf16.gmra.mxu3 %vm1242_vm6, %v1754_v21 }
 0x331   :  { %1898 = vmatpush.bf16.msra.mxu2 %v12066_v57 }
 0x333   :  { %1647 = vmatmul.bf16.gmra.mxu1 %v12050_v37 }
 0x340   :  { %9082 = vmatmul.msk.bf16.vlgmr.msrb.gmra.mxu3 %vm1242_vm6, %v1953_v20 }
 0x343   :  { %1842 = vmatmul.bf16.vlgmr.msra.gmra.mxu1 %v12061_v1 }
 0x353   :  { %1847 = vmatmul.bf16.gmra.mxu1 %v12062_v56 }
 0x380   :  { %v1503_v7 = vpop.f32.mrf.mxu1  ;;  %v1603_v40 = vpop.f32.mrf.mxu3 }
 0x381   :  { %v1513_v22 = vadd.f32 %v1503_v7, %v14466_v17  ;;  %v12065_v17 = vld [vmem:[#allocation8 + $0xf0] sm:$0xff] }
 0x382   :  { %1899 = vmatpush.bf16.msra.mxu2 %v12065_v17 }
 0x383   :  { %v14490_v25 = vadd.f32 %v1603_v40, %v1513_v22  ;;  %v12817_v22 = vld [vmem:[#allocation10] ss:$0 sm:$0xff] }
 0x386   :  { %v1948_v62 = vpop.f32.mrf.mxu0  ;;  %1900 = vmatpush.bf16.msra.mxu2 %v12064_v36 }
 0x388   :  { %v14492_v29 = vpop.f32.mrf.mxu1  ;;  %v14494_v61 = vpop.f32.mrf.mxu3 }
 0x389   :  { %v1514_v13 = vadd.f32 %v14492_v29, %v1414_v30 }
 0x38b   :  { %v1614_v7 = vadd.f32 %v14494_v61, %v1514_v13  ;;  %v1416_v61 = vadd.f32 %v14470_v24, %v1315_v44 }
 0x38e   :  { %v1950_v15 = vpop.f32.mrf.mxu0 }
 0x38f   :  { %v1954_v3 = vpack.c.bf16 %v1950_v15, %v1948_v62 }
 0x390   :  { %v1508_v43 = vpop.f32.mrf.mxu1  ;;  %v1608_v2 = vpop.f32.mrf.mxu3 }
 0x391   :  { %v1515_v14 = vadd.f32 %v1508_v43, %v14472_v28  ;;  %v12063_v28 = vld [vmem:[#allocation8 + $0xe0] sm:$0xff]  ;;  %9083 = vmatmul.msk.bf16.gmra.mxu3 %vm1242_vm6, %v1954_v3 }
 0x392   :  { %1901 = vmatpush.bf16.msra.mxu2 %v12063_v28 }
 0x393   :  { %v14498_v63 = vadd.f32 %v1608_v2, %v1515_v14 }
 0x398   :  { %v14500_v52 = vpop.f32.mrf.mxu1  ;;  %v1610_v32 = vpop.f32.mrf.mxu3 }
 0x399   :  { %v1516_v38 = vadd.f32 %v14500_v52, %v1416_v61 }
 0x39b   :  { %v1616_v57 = vadd.f32 %v1610_v32, %v1516_v38 }
 0x3a0   :  { %v1643_v59 = vpop.f32.mrf.mxu1 }
 0x3a3   :  { %v1803_v60 = vpop.f32.mrf.mxu3 }
 0x3a8   :  { %v1645_v33 = vpop.f32.mrf.mxu1 }
 0x3a9   :  { %v1653_v55 = vpack.c.bf16 %v1645_v33, %v1643_v59 }
 0x3ab   :  { %9004 = vmatmul.msk.bf16.vlgmr.msrb.gmra.mxu2 %vm1242_vm6, %v1653_v55  ;;  %v1805_v41 = vpop.f32.mrf.mxu3 }
 0x3b0   :  { %v1648_v54 = vpop.f32.mrf.mxu1 }
 0x3b3   :  { %v1808_v37 = vpop.f32.mrf.mxu3 }
 0x3b8   :  { %v1650_v45 = vpop.f32.mrf.mxu1 }
 0x3b9   :  { %v1654_v34 = vpack.c.bf16 %v1650_v45, %v1648_v54 }
 0x3bb   :  { %9005 = vmatmul.msk.bf16.gmra.mxu2 %vm1242_vm6, %v1654_v34  ;;  %v1810_v18 = vpop.f32.mrf.mxu3 }
 0x3c0   :  { %v1843_v46 = vpop.f32.mrf.mxu1 }
 0x3c3   :  { %v2003_v50 = vpop.f32.mrf.mxu3 }
 0x3c8   :  { %v1845_v26 = vpop.f32.mrf.mxu1 }
 0x3c9   :  { %v1853_v0 = vpack.c.bf16 %v1845_v26, %v1843_v46 }
 0x3cb   :  { %9056 = vmatmul.msk.bf16.vlgmr.msra.gmra.mxu2 %vm1242_vm6, %v1853_v0  ;;  %v2005_v51 = vpop.f32.mrf.mxu3 }
 0x3d0   :  { %v1848_v42 = vpop.f32.mrf.mxu1 }
 0x3d8   :  { %v1850_v9 = vpop.f32.mrf.mxu1 }
 0x3d9   :  { %v1854_v8 = vpack.c.bf16 %v1850_v9, %v1848_v42  ;;  %v9148_v9 = vld [vmem:[#allocation13 + $0xf0] sm:$0xf] }
 0x3db   :  { %9057 = vmatmul.msk.bf16.gmra.mxu2 %vm1242_vm6, %v1854_v8  ;;  %v12104_v8 = vld [vmem:[#allocation13 + $0xf4] sm:$0xf0] }
 0x414   :  { %v2008_v5 = vpop.f32.mrf.mxu3 }
 0x41c   :  { %v2010_v0 = vpop.f32.mrf.mxu3 }
 0x42e   :  { %v1703_v35 = vpop.f32.mrf.mxu2 }
 0x42f   :  { %v1713_v31 = vadd.f32 %v1703_v35, %v14490_v25 }
 0x431   :  { %v1813_v53 = vadd.f32 %v1803_v60, %v1713_v31  ;;  %v9149_v60 = vor.u32 %v12104_v8, %v9148_v9 }
 0x433   :  { %2354 = vmatpush.bf16.msrb.mxu0 %v9149_v60 }
 0x436   :  { %v1705_v1 = vpop.f32.mrf.mxu2 }
 0x437   :  { %v1714_v47 = vadd.f32 %v1705_v1, %v1614_v7  ;;  %v12102_v7 = vld [vmem:[#allocation13 + $0xe4] sm:$0xf0] }
 0x439   :  { %v1814_v4 = vadd.f32 %v1805_v41, %v1714_v47 }
 0x43e   :  { %v1708_v56 = vpop.f32.mrf.mxu2 }
 0x43f   :  { %v1715_v21 = vadd.f32 %v1708_v56, %v14498_v63 }
 0x441   :  { %v1815_v39 = vadd.f32 %v1808_v37, %v1715_v21 }
 0x446   :  { %v1710_v12 = vpop.f32.mrf.mxu2 }
 0x447   :  { %v1716_v17 = vadd.f32 %v1710_v12, %v1616_v57 }
 0x449   :  { %v1816_v15 = vadd.f32 %v1810_v18, %v1716_v17 }
 0x44e   :  { %v1903_v23 = vpop.f32.mrf.mxu2 }
 0x44f   :  { %v1913_v40 = vadd.f32 %v1903_v23, %v1813_v53  ;;  %v9140_v53 = vld [vmem:[#allocation13 + $0xe0] sm:$0xf] }
 0x451   :  { %v2013_v58 = vadd.f32 %v2003_v50, %v1913_v40 }
 0x453   :  { %v14514_v49 = vadd.f32 %v12817_v22, %v2013_v58  ;;  %v9132_v58 = vld [vmem:[#allocation13 + $0xd0] sm:$0xf] }
 0x455   :  { %v14519_v6 = vmul.f32 0.70710677, %v14514_v49 }
 0x456   :  { %v1905_v25 = vpop.f32.mrf.mxu2 }
 0x457   :  { %v2033_v29 = vmul.f32 %v14519_v6, %v14519_v6  ;;  %v1914_v27 = vadd.f32 %v1905_v25, %v1814_v4  ;;  %v9141_v25 = vor.u32 %v12102_v7, %v9140_v53 }
 0x459   :  { %v14525_v43 = vmin.f32 %v2033_v29, 16.0  ;;  %v2014_v2 = vadd.f32 %v2005_v51, %v1914_v27  ;;  %v12100_v51 = vld [vmem:[#allocation13 + $0xd4] sm:$0xf0]  ;;  %2355 = vmatpush.bf16.msrb.mxu0 %v9141_v25 }
 0x45b   :  { %v2046_v19 = vmul.f32 3.8918573e-05, %v14525_v43  ;;  %v14529_v10 = vadd.f32 %v12817_v22, %v2014_v2  ;;  %v2035_v41 = vmul.f32 2.1237322e-06, %v14525_v43  ;;  %v9133_v2 = vor.u32 %v12100_v51, %v9132_v58 }
 0x45d   :  { %v2047_v14 = vadd.f32 0.001143296, %v2046_v19  ;;  %v14532_v11 = vmul.f32 0.70710677, %v14529_v10  ;;  %v2036_v50 = vadd.f32 0.00028619796, %v2035_v41  ;;  %2356 = vmatpush.bf16.msrb.mxu0 %v9133_v2 }
 0x45e   :  { %v1908_v48 = vpop.f32.mrf.mxu2 }
 0x45f   :  { %v2048_v24 = vmul.f32 %v2047_v14, %v14525_v43  ;;  %v1915_v63 = vadd.f32 %v1908_v48, %v1815_v39  ;;  %v2073_v20 = vmul.f32 %v14532_v11, %v14532_v11  ;;  %v2037_v29 = vmul.f32 %v2036_v50, %v14525_v43 }
 0x461   :  { %v2049_v52 = vadd.f32 0.014752088, %v2048_v24  ;;  %v2015_v59 = vadd.f32 %v2008_v5, %v1915_v63  ;;  %v14537_v36 = vmin.f32 %v2073_v20, 16.0  ;;  %v2038_v24 = vadd.f32 0.0036580483, %v2037_v29 }
 0x462   :  { %v9124_v20 = vld [vmem:[#allocation13 + $0xc0] sm:$0xf] }
 0x463   :  { %v2050_v62 = vmul.f32 %v2049_v52, %v14525_v43  ;;  %v14540_v28 = vadd.f32 %v12817_v22, %v2015_v59  ;;  %v2086_v33 = vmul.f32 3.8918573e-05, %v14537_v36  ;;  %v2075_v1 = vmul.f32 2.1237322e-06, %v14537_v36 }
 0x465   :  { %v2051_v55 = vadd.f32 0.112945676, %v2050_v62  ;;  %v2087_v3 = vadd.f32 0.001143296, %v2086_v33  ;;  %v14544_v54 = vmul.f32 0.70710677, %v14540_v28 }
 0x466   :  { %v1910_v45 = vpop.f32.mrf.mxu2  ;;  %v2076_v23 = vadd.f32 0.00028619796, %v2075_v1  ;;  %v12098_v62 = vld [vmem:[#allocation13 + $0xc4] sm:$0xf0] }
 0x467   :  { %v1916_v34 = vadd.f32 %v1910_v45, %v1816_v15  ;;  %v2052_v46 = vmul.f32 %v2051_v55, %v14525_v43  ;;  %v2088_v26 = vmul.f32 %v2087_v3, %v14537_v36  ;;  %v2113_v42 = vmul.f32 %v14544_v54, %v14544_v54  ;;  %v9116_v3 = vld [vmem:[#allocation13 + $0xb0] sm:$0xf]  ;;  %v12096_v45 = vld [vmem:[#allocation13 + $0xb4] sm:$0xf0]  ;;  %v12094_v1 = vld [vmem:[#allocation13 + $0xa4] sm:$0xf0] }
 0x468   :  { %v2077_v19 = vmul.f32 %v2076_v23, %v14537_v36 }
 0x469   :  { %v2016_v32 = vadd.f32 %v2010_v0, %v1916_v34  ;;  %v2089_v35 = vadd.f32 0.014752088, %v2088_v26  ;;  %v14551_v37 = vmin.f32 %v2113_v42, 16.0  ;;  %v2053_v18 = vadd.f32 0.4994258, %v2052_v46 }
 0x46a   :  { %v2078_v33 = vadd.f32 0.0036580483, %v2077_v19  ;;  %v9125_v26 = vor.u32 %v12098_v62, %v9124_v20  ;;  %v2039_v0 = vmul.f32 %v2038_v24, %v14525_v43 }
 0x46b   :  { %v14554_v56 = vadd.f32 %v12817_v22, %v2016_v32  ;;  %v2090_v16 = vmul.f32 %v2089_v35, %v14537_v36  ;;  %v2115_v12 = vmul.f32 2.1237322e-06, %v14551_v37  ;;  %v2126_v30 = vmul.f32 3.8918573e-05, %v14551_v37  ;;  %v9108_v35 = vld [vmem:[#allocation13 + $0xa0] sm:$0xf] }
 0x46c   :  { %v2054_v40 = vmul.f32 %v2053_v18, %v14525_v43  ;;  %v2079_v9 = vmul.f32 %v2078_v33, %v14537_v36  ;;  %2357 = vmatpush.bf16.msrb.mxu0 %v9125_v26  ;;  %v9117_v32 = vor.u32 %v12096_v45, %v9116_v3  ;;  %v9109_v7 = vor.u32 %v12094_v1, %v9108_v35 }
 0x46d   :  { %v14560_v31 = vmul.f32 0.70710677, %v14554_v56  ;;  %v2091_v13 = vadd.f32 0.112945676, %v2090_v16  ;;  %v2116_v47 = vadd.f32 0.00028619796, %v2115_v12 }
 0x46e   :  { %v2127_v44 = vadd.f32 0.001143296, %v2126_v30  ;;  %v14570_v38 = vadd.f32 1.0, %v2054_v40  ;;  %v2040_v30 = vadd.f32 0.05243302, %v2039_v0 }
 0x46f   :  { %v2092_v22 = vmul.f32 %v2091_v13, %v14537_v36  ;;  %v2153_v4 = vmul.f32 %v14560_v31, %v14560_v31  ;;  %v2117_v39 = vmul.f32 %v2116_v47, %v14551_v37  ;;  %v2080_v13 = vadd.f32 0.05243302, %v2079_v9  ;;  %v12092_v47 = vld [vmem:[#allocation13 + $0x94] sm:$0xf0] }
 0x470   :  { %v2128_v61 = vmul.f32 %v2127_v44, %v14551_v37  ;;  %12851 = vrcp.f32 %v14570_v38  ;;  %2358 = vmatpush.bf16.msrb.mxu0 %v9117_v32  ;;  %v2041_v29 = vmul.f32 %v2040_v30, %v14525_v43  ;;  %vm2061_vm12 = vweird.f32 %v14570_v38 }
 0x471   :  { %v2093_v27 = vadd.f32 0.4994258, %v2092_v22  ;;  %v14568_v21 = vmin.f32 %v2153_v4, 16.0  ;;  %v2118_v55 = vadd.f32 0.0036580483, %v2117_v39 }
 0x472   :  { %v2129_v5 = vadd.f32 0.014752088, %v2128_v61  ;;  %v9100_v22 = vld [vmem:[#allocation13 + $0x90] sm:$0xf]  ;;  %v2042_v20 = vadd.f32 0.18741608, %v2041_v29 }
 0x473   :  { %v2094_v14 = vmul.f32 %v2093_v27, %v14537_v36  ;;  %v2155_v48 = vmul.f32 2.1237322e-06, %v14568_v21  ;;  %v2166_v57 = vmul.f32 3.8918573e-05, %v14568_v21  ;;  %v2119_v60 = vmul.f32 %v2118_v55, %v14551_v37 }
 0x474   :  { %v2130_v17 = vmul.f32 %v2129_v5, %v14551_v37  ;;  %v2081_v27 = vmul.f32 %v2080_v13, %v14537_v36  ;;  %2359 = vmatpush.bf16.msrb.mxu0 %v9109_v7  ;;  %v9101_v61 = vor.u32 %v12092_v47, %v9100_v22  ;;  %v2065_v26 = vand.u32 2147483647, %v14570_v38 }
 0x475   :  { %v14577_v63 = vadd.f32 1.0, %v2094_v14  ;;  %v2156_v52 = vadd.f32 0.00028619796, %v2155_v48  ;;  %v2167_v59 = vadd.f32 0.001143296, %v2166_v57 }
 0x476   :  { %v2131_v15 = vadd.f32 0.112945676, %v2130_v17  ;;  %v14589_v12 = vpop.eup %12851  ;;  %v2120_v40 = vadd.f32 0.05243302, %v2119_v60  ;;  %v9092_v14 = vld [vmem:[#allocation13 + $0x80] sm:$0xf] }
 0x477   :  { %12853 = vrcp.f32 %v14577_v63  ;;  %v2157_v34 = vmul.f32 %v2156_v52, %v14568_v21  ;;  %v2168_v46 = vmul.f32 %v2167_v59, %v14568_v21  ;;  %v2057_v58 = vmul.f32 %v14589_v12, %v14570_v38  ;;  %v12090_v48 = vld [vmem:[#allocation13 + $0x84] sm:$0xf0] }
 0x478   :  { %v2132_v42 = vmul.f32 %v2131_v15, %v14551_v37  ;;  %v2121_v2 = vmul.f32 %v2120_v40, %v14551_v37  ;;  %v2082_v17 = vadd.f32 0.18741608, %v2081_v27  ;;  %2360 = vmatpush.bf16.msrb.mxu0 %v9101_v61  ;;  %v9093_v52 = vor.u32 %v12090_v48, %v9092_v14 }
 0x479   :  { %v2169_v8 = vadd.f32 0.014752088, %v2168_v46  ;;  %v2158_v18 = vadd.f32 0.0036580483, %v2157_v34  ;;  %v2058_v39 = vsub.f32 1.0, %v2057_v58  ;;  %v2043_v34 = vmul.f32 %v2042_v20, %v14525_v43 }
 0x47a   :  { %v2133_v41 = vadd.f32 0.4994258, %v2132_v42  ;;  %v2122_v59 = vadd.f32 0.18741608, %v2121_v2  ;;  %v2083_v46 = vmul.f32 %v2082_v17, %v14537_v36  ;;  %vm2062_vm0 = vweird.f32 %v14589_v12 }
 0x47b   :  { %v2170_v16 = vmul.f32 %v2169_v8, %v14568_v21  ;;  %v2159_v44 = vmul.f32 %v2158_v18, %v14568_v21  ;;  %v2059_v55 = vmul.f32 %v14589_v12, %v2058_v39  ;;  %vm14627_vm10 = vmor %vm2061_vm12, %vm2062_vm0  ;;  %vm2101_vm3 = vweird.f32 %v14577_v63  ;;  %v12101_v18 = vld [vmem:[#allocation13 + $0xe4] sm:$0xf] }
 0x47c   :  { %v2134_v53 = vmul.f32 %v2133_v41, %v14551_v37  ;;  %2361 = vmatpush.bf16.msrb.mxu0 %v9093_v52  ;;  %v2123_v0 = vmul.f32 %v2122_v59, %v14551_v37  ;;  %v2067_v37 = vand.u32 2147483648, %v14570_v38  ;;  %v2084_v35 = vadd.f32 1.1283791, %v2083_v46  ;;  %v9196_v41 = vld [vmem:[#allocation13 + $0x50] sm:$0xf] }
 0x47d   :  { %v14591_v50 = vpop.eup %12853  ;;  %v2171_v23 = vadd.f32 0.112945676, %v2170_v16  ;;  %v2160_v5 = vadd.f32 0.05243302, %v2159_v44  ;;  %v2060_v9 = vadd.f32 %v14589_v12, %v2059_v55  ;;  %v2107_v1 = vand.u32 2147483648, %v14577_v63 }
 0x47e   :  { %v14596_v51 = vadd.f32 1.0, %v2134_v53  ;;  %v2097_v25 = vmul.f32 %v14591_v50, %v14577_v63  ;;  %vm2102_vm11 = vweird.f32 %v14591_v50  ;;  %v2105_v16 = vand.u32 2147483647, %v14577_v63 }
 0x47f   :  { %v2172_v4 = vmul.f32 %v2171_v23, %v14568_v21  ;;  %v2161_v15 = vmul.f32 %v2160_v5, %v14568_v21  ;;  %vm14634_vm1 = vmor %vm2101_vm3, %vm2102_vm11  ;;  %v2124_v30 = vadd.f32 1.1283791, %v2123_v0  ;;  %v2044_v23 = vadd.f32 1.1283791, %v2043_v34 }
 0x480   :  { %12855 = vrcp.f32 %v14596_v51  ;;  %v2098_v57 = vsub.f32 1.0, %v2097_v25  ;;  %v2147_v43 = vand.u32 2147483648, %v14596_v51  ;;  %v2145_v60 = vand.u32 2147483647, %v14596_v51 }
 0x481   :  { %v2173_v19 = vadd.f32 0.4994258, %v2172_v4  ;;  %v2162_v8 = vadd.f32 0.18741608, %v2161_v15  ;;  %vm2141_vm7 = vweird.f32 %v14596_v51  ;;  %v2064_v38 = vsel %vm14627_vm10, %v14589_v12, %v2060_v9  ;;  %v9212_v9 = vld [vmem:[#allocation13 + $0x70] sm:$0xf] }
 0x482   :  { %v2099_v3 = vmul.f32 %v14591_v50, %v2098_v57  ;;  %v2148_v7 = vor.u32 1.1754944e-38, %v2147_v43  ;;  %vm2146_vm9 = vcmp.eq.f32.partialorder %v2145_v60, 8.507059e+37  ;;  %vm2066_vm4 = vcmp.eq.f32.partialorder %v2065_v26, 8.507059e+37  ;;  %v12088_v43 = vld [vmem:[#allocation13 + $0x74] sm:$0xf0] }
 0x483   :  { %v2174_v24 = vmul.f32 %v2173_v19, %v14568_v21  ;;  %v2163_v40 = vmul.f32 %v2162_v8, %v14568_v21  ;;  %v2068_v58 = vor.u32 1.1754944e-38, %v2067_v37  ;;  %v2085_v4 = vmul.f32 %v2084_v35, %v14532_v11  ;;  %v12084_v37 = vld [vmem:[#allocation13 + $0x54] sm:$0xf0]  ;;  %v12103_v35 = vld [vmem:[#allocation13 + $0xf4] sm:$0xf] }
 0x484   :  { %v2100_v32 = vadd.f32 %v14591_v50, %v2099_v3  ;;  %vm2106_vm14 = vcmp.eq.f32.partialorder %v2105_v16, 8.507059e+37  ;;  %v2125_v12 = vmul.f32 %v2124_v30, %v14544_v54  ;;  %v2045_v14 = vmul.f32 %v2044_v23, %v14519_v6  ;;  %v9142_v30 = vld [vmem:[#allocation13 + $0xe8] sm:$0xf0] }
 0x485   :  { %v14607_v62 = vadd.f32 1.0, %v2174_v24  ;;  %v2069_v29 = vsel %vm2066_vm4, %v2068_v58, %v2064_v38  ;;  %v2164_v27 = vadd.f32 1.1283791, %v2163_v40  ;;  %v2027_v6 = vmul.f32 0.5, %v14540_v28  ;;  %v12082_v38 = vld [vmem:[#allocation13 + $0x44] sm:$0xf0] }
 0x486   :  { %v12856_v33 = vpop.eup %12855  ;;  %v2104_v22 = vsel %vm14634_vm1, %v14591_v50, %v2100_v32  ;;  %v2070_v11 = vmul.f32 %v2069_v29, %v2045_v14  ;;  %v2028_v3 = vmul.f32 0.5, %v14554_v56  ;;  %v2026_v34 = vmul.f32 0.5, %v14529_v10  ;;  %v9204_v10 = vld [vmem:[#allocation13 + $0x60] sm:$0xf]  ;;  %v12086_v32 = vld [vmem:[#allocation13 + $0x64] sm:$0xf0] }
 0x487   :  { %v2137_v45 = vmul.f32 %v12856_v33, %v14596_v51  ;;  %12857 = vrcp.f32 %v14607_v62  ;;  %vm2142_vm15 = vweird.f32 %v12856_v33  ;;  %v2108_v51 = vor.u32 1.1754944e-38, %v2107_v1  ;;  %v9150_v1 = vld [vmem:[#allocation13 + $0xf8] sm:$0xf0]  ;;  %v9180_v58 = vld [vmem:[#allocation13 + $0x30] sm:$0xf] }
 0x488   :  { %vm2143_vm8 = vmor %vm2141_vm7, %vm2142_vm15  ;;  %v2187_v61 = vand.u32 2147483648, %v14607_v62  ;;  %v2185_v19 = vand.u32 2147483647, %v14607_v62  ;;  %vm2181_vm13 = vweird.f32 %v14607_v62  ;;  %v2165_v57 = vmul.f32 %v2164_v27, %v14560_v31  ;;  %v9134_v40 = vld [vmem:[#allocation13 + $0xd8] sm:$0xf0] }
 0x489   :  { %v2138_v42 = vsub.f32 1.0, %v2137_v45  ;;  %v2109_v21 = vsel %vm2106_vm14, %v2108_v51, %v2104_v22  ;;  %v9084_v59 = vclamps-f32 %v2070_v11, 1.0  ;;  %v2025_v31 = vmul.f32 0.5, %v14514_v49  ;;  %v2203_v49 = vld [vmem:[#allocation11] sm:$0xf] }
 0x48a   :  { %v2110_v39 = vmul.f32 %v2109_v21, %v2085_v4  ;;  %v2188_v54 = vor.u32 1.1754944e-38, %v2187_v61  ;;  %vm2186_vm6 = vcmp.eq.f32.partialorder %v2185_v19, 8.507059e+37  ;;  %v9213_v28 = vor.u32 %v12088_v43, %v9212_v9  ;;  %v12087_v22 = vld [vmem:[#allocation13 + $0x74] sm:$0xf]  ;;  %v12085_v4 = vld [vmem:[#allocation13 + $0x64] sm:$0xf] }
 0x48b   :  { %v2139_v36 = vmul.f32 %v12856_v33, %v2138_v42  ;;  %v2193_v45 = vadd.f32 1.0, %v9084_v59  ;;  %vm2204_vm12 = vcmask 261120   ;;  %v9205_v60 = vor.u32 %v12086_v32, %v9204_v10  ;;  %v12097_v29 = vld [vmem:[#allocation13 + $0xc4] sm:$0xf]  ;;  %v9126_v21 = vld [vmem:[#allocation13 + $0xc8] sm:$0xf0] }
 0x48c   :  { %v9085_v17 = vclamps-f32 %v2110_v39, 1.0  ;;  %v9153_v16 = vor.u32 %v12103_v35, %v9150_v1  ;;  %v9145_v23 = vor.u32 %v12101_v18, %v9142_v30  ;;  %v12083_v61 = vld [vmem:[#allocation13 + $0x54] sm:$0xf]  ;;  %v9172_v19 = vld [vmem:[#allocation13 + $0x20] sm:$0xf]  ;;  %v9129_v14 = vor.u32 %v12097_v29, %v9126_v21 }
 0x48d   :  { %v2140_v13 = vadd.f32 %v12856_v33, %v2139_v36  ;;  %v12858_v53 = vpop.eup %12857  ;;  %v2197_v8 = vmul.f32 %v2193_v45, %v2025_v31  ;;  %v2239_v36 = vld [vmem:[#allocation11 + $0x4] sm:$0xf]  ;;  %v12078_v39 = vld [vmem:[#allocation13 + $0x24] sm:$0xf0]  ;;  %v9118_v11 = vld [vmem:[#allocation13 + $0xb8] sm:$0xf0] }
 0x48e   :  { %v2177_v47 = vmul.f32 %v12858_v53, %v14607_v62  ;;  %vm2182_vm2 = vweird.f32 %v12858_v53  ;;  %v2194_v15 = vadd.f32 1.0, %v9085_v17  ;;  %2367 = vmatpush.bf16.msra.mxu3 %v9153_v16  ;;  %v12093_v59 = vld [vmem:[#allocation13 + $0xa4] sm:$0xf]  ;;  %v12091_v45 = vld [vmem:[#allocation13 + $0x94] sm:$0xf]  ;;  %vm3593_vm4 = vcmask 64512  }
 0x48f   :  { %v2144_v63 = vsel %vm2143_vm8, %v12856_v33, %v2140_v13  ;;  %vm2183_vm5 = vmor %vm2181_vm13, %vm2182_vm2  ;;  %v9197_v13 = vor.u32 %v12084_v37, %v9196_v41  ;;  %v12089_v31 = vld [vmem:[#allocation13 + $0x84] sm:$0xf]  ;;  %v9277_v9 = vld [vmem:[#allocation13 + $0x170] sm:$0xf] }
 0x490   :  { %v2149_v44 = vsel %vm2146_vm9, %v2148_v7, %v2144_v63  ;;  %v2178_v25 = vsub.f32 1.0, %v2177_v47  ;;  %v2198_v0 = vmul.f32 %v2194_v15, %v2026_v34  ;;  %v12099_v7 = vld [vmem:[#allocation13 + $0xd4] sm:$0xf]  ;;  %v9214_v63 = vld [vmem:[#allocation13 + $0x78] sm:$0xf0]  ;;  %vm3597_vm9 = vcmask 1043456  }
 0x491   :  { %v2150_v50 = vmul.f32 %v2149_v44, %v2125_v12  ;;  %v9137_v51 = vor.u32 %v12099_v7, %v9134_v40  ;;  %v9217_v44 = vor.u32 %v12087_v22, %v9214_v63  ;;  %v9206_v12 = vld [vmem:[#allocation13 + $0x68] sm:$0xf0]  ;;  %v9102_v34 = vld [vmem:[#allocation13 + $0x98] sm:$0xf0]  ;;  %v12120_v43 = vld [vmem:[#allocation13 + $0x174] sm:$0xf0] }
 0x492   :  { %v2179_v2 = vmul.f32 %v12858_v53, %v2178_v25  ;;  %v14665_v56 = vpack.c.bf16 %v2198_v0, %v2197_v8  ;;  %2368 = vmatpush.bf16.msra.mxu3 %v9145_v23  ;;  %v12080_v25 = vld [vmem:[#allocation13 + $0x34] sm:$0xf0]  ;;  %v9209_v27 = vor.u32 %v12085_v4, %v9206_v12  ;;  %v9094_v0 = vld [vmem:[#allocation13 + $0x88] sm:$0xf0]  ;;  %v9269_v10 = vld [vmem:[#allocation13 + $0x160] sm:$0xf] }
 0x493   :  { %v9086_v48 = vclamps-f32 %v2150_v50, 1.0  ;;  %v9198_v50 = vld [vmem:[#allocation13 + $0x58] sm:$0xf0]  ;;  %v9097_v8 = vor.u32 %v12089_v31, %v9094_v0  ;;  %v12118_v32 = vld [vmem:[#allocation13 + $0x164] sm:$0xf0] }
 0x494   :  { %v2180_v5 = vadd.f32 %v12858_v53, %v2179_v2  ;;  %v9181_v2 = vor.u32 %v12080_v25, %v9180_v58  ;;  %v9253_v37 = vld [vmem:[#allocation13 + $0x140] sm:$0xf]  ;;  %v12114_v35 = vld [vmem:[#allocation13 + $0x144] sm:$0xf0]  ;;  %v9245_v18 = vld [vmem:[#allocation13 + $0x130] sm:$0xf] }
 0x495   :  { %v2195_v33 = vadd.f32 1.0, %v9086_v48  ;;  %v12081_v48 = vld [vmem:[#allocation13 + $0x44] sm:$0xf]  ;;  %v9254_v1 = vor.u32 %v12114_v35, %v9253_v37  ;;  %v12112_v16 = vld [vmem:[#allocation13 + $0x134] sm:$0xf0] }
 0x496   :  { %v2184_v24 = vsel %vm2183_vm5, %v12858_v53, %v2180_v5  ;;  %v9188_v53 = vld [vmem:[#allocation13 + $0x40] sm:$0xf]  ;;  %2369 = vmatpush.bf16.msra.mxu3 %v9137_v51  ;;  %v12095_v5 = vld [vmem:[#allocation13 + $0xb4] sm:$0xf]  ;;  %v9246_v30 = vor.u32 %v12112_v16, %v9245_v18  ;;  %v9174_v7 = vld [vmem:[#allocation13 + $0x28] sm:$0xf0] }
 0x497   :  { %v2189_v20 = vsel %vm2186_vm6, %v2188_v54, %v2184_v24  ;;  %v2199_v46 = vmul.f32 %v2195_v33, %v2027_v6  ;;  %v9189_v47 = vor.u32 %v12082_v38, %v9188_v53  ;;  %v9201_v54 = vor.u32 %v12083_v61, %v9198_v50  ;;  %v9110_v33 = vld [vmem:[#allocation13 + $0xa8] sm:$0xf0]  ;;  %v9156_v6 = vld [vmem:[#allocation13] sm:$0xf]  ;;  %v9182_v53 = vld [vmem:[#allocation13 + $0x38] sm:$0xf0] }
 0x498   :  { %v2190_v52 = vmul.f32 %v2189_v20, %v2165_v57  ;;  %v9190_v57 = vld [vmem:[#allocation13 + $0x48] sm:$0xf0]  ;;  %v9173_v24 = vor.u32 %v12078_v39, %v9172_v19  ;;  %v9164_v20 = vld [vmem:[#allocation13 + $0x10] sm:$0xf]  ;;  %v9121_v17 = vor.u32 %v12095_v5, %v9118_v11  ;;  %v12077_v38 = vld [vmem:[#allocation13 + $0x24] sm:$0xf] }
 0x499   :  { %v9177_v40 = vor.u32 %v12077_v38, %v9174_v7  ;;  %v9237_v22 = vld [vmem:[#allocation13 + $0x120] sm:$0xf]  ;;  %v12110_v63 = vld [vmem:[#allocation13 + $0x124] sm:$0xf0]  ;;  %v12075_v58 = vld [vmem:[#allocation13 + $0x14] sm:$0xf] }
 0x49a   :  { %v9087_v55 = vclamps-f32 %v2190_v52, 1.0  ;;  %2370 = vmatpush.bf16.msra.mxu3 %v9129_v14  ;;  %v12076_v52 = vld [vmem:[#allocation13 + $0x14] sm:$0xf0]  ;;  %v9166_v51 = vld [vmem:[#allocation13 + $0x18] sm:$0xf0] }
 0x49b   :  { %v9165_v15 = vor.u32 %v12076_v52, %v9164_v20  ;;  %v9229_v4 = vld [vmem:[#allocation13 + $0x110] sm:$0xf]  ;;  %v12108_v12 = vld [vmem:[#allocation13 + $0x114] sm:$0xf0]  ;;  %v12073_v29 = vld [vmem:[#allocation13 + $0x4] sm:$0xf] }
 0x49c   :  { %v2196_v62 = vadd.f32 1.0, %v9087_v55  ;;  %v9193_v55 = vor.u32 %v12081_v48, %v9190_v57  ;;  %v9230_v25 = vor.u32 %v12108_v12, %v9229_v4  ;;  %v9158_v21 = vld [vmem:[#allocation13 + $0x8] sm:$0xf0]  ;;  %v9221_v61 = vld [vmem:[#allocation13 + $0x100] sm:$0xf] }
 0x49d   :  { %v12106_v50 = vld [vmem:[#allocation13 + $0x104] sm:$0xf0]  ;;  %v12135_v19 = vld [vmem:[#allocation13 + $0x1f4] sm:$0xf]  ;;  %v9344_v14 = vld [vmem:[#allocation13 + $0x1f8] sm:$0xf0] }
 0x49e   :  { %v2200_v26 = vmul.f32 %v2196_v62, %v2028_v3  ;;  %2371 = vmatpush.bf16.msra.mxu3 %v9121_v17  ;;  %v9113_v3 = vor.u32 %v12093_v59, %v9110_v33  ;;  %v12074_v62 = vld [vmem:[#allocation13 + $0x4] sm:$0xf0]  ;;  %v9347_v5 = vor.u32 %v12135_v19, %v9344_v14  ;;  %v9336_v48 = vld [vmem:[#allocation13 + $0x1e8] sm:$0xf0]  ;;  %v12119_v57 = vld [vmem:[#allocation13 + $0x174] sm:$0xf] }
 0x49f   :  { %v12131_v17 = vld [vmem:[#allocation13 + $0x1d4] sm:$0xf]  ;;  %v9328_v52 = vld [vmem:[#allocation13 + $0x1d8] sm:$0xf0]  ;;  %v9320_v31 = vld [vmem:[#allocation13 + $0x1c8] sm:$0xf0] }
 0x4a0   :  { %v14660_v42 = vpack.c.bf16 %v2200_v26, %v2199_v46  ;;  %v9157_v46 = vor.u32 %v12074_v62, %v9156_v6  ;;  %v9105_v26 = vor.u32 %v12091_v45, %v9102_v34  ;;  %v9271_v62 = vld [vmem:[#allocation13 + $0x168] sm:$0xf0]  ;;  %v9331_v34 = vor.u32 %v12131_v17, %v9328_v52  ;;  %v12125_v35 = vld [vmem:[#allocation13 + $0x1a4] sm:$0xf]  ;;  %v12111_v16 = vld [vmem:[#allocation13 + $0x134] sm:$0xf] }
 0x4a1   :  { %v2487_v38 = vld [vmem:[#allocation11 + $0x8] sm:$0xf]  ;;  %v12168_v4 = vld [vmem:[#allocation13 + $0x2f4] sm:$0xf0]  ;;  %v12107_v12 = vld [vmem:[#allocation13 + $0x114] sm:$0xf] }
 0x4a2   :  { %2214 = vmatpush.bf16.msrb.mxu1 %v14660_v42  ;;  %2249 = vmatpush.bf16.msrb.mxu2 %v14660_v42  ;;  %v9223_v19 = vld [vmem:[#allocation13 + $0x108] sm:$0xf0]  ;;  %v9407_v14 = vld [vmem:[#allocation13 + $0x270] sm:$0xf]  ;;  %v12134_v17 = vld [vmem:[#allocation13 + $0x1e4] sm:$0xf0] }
 0x4a3   :  { %2497 = vmatpush.bf16.msra.mxu0 %v14660_v42  ;;  %2372 = vmatpush.bf16.msra.mxu3 %v9113_v3  ;;  %v12117_v3 = vld [vmem:[#allocation13 + $0x164] sm:$0xf]  ;;  %v9399_v52 = vld [vmem:[#allocation13 + $0x260] sm:$0xf] }
 0x4a4   :  { %v9274_v0 = vor.u32 %v12117_v3, %v9271_v62  ;;  %v9326_v3 = vld [vmem:[#allocation13 + $0x1d0] sm:$0xf] }
 0x4a6   :  { %2215 = vmatpush.bf16.msrb.mxu1 %v14665_v56  ;;  %2250 = vmatpush.bf16.msrb.mxu2 %v14665_v56 }
 0x4a7   :  { %2498 = vmatpush.bf16.msra.mxu0 %v14665_v56  ;;  %2373 = vmatpush.bf16.msra.mxu3 %v9105_v26  ;;  %v12129_v26 = vld [vmem:[#allocation13 + $0x1c4] sm:$0xf] }
 0x4a9   :  { %9088 = vmatmul.msk.bf16.vlgmr.msrb.gmra.mxu1 %vm2204_vm12, %v2203_v49  ;;  %9089 = vmatmul.msk.bf16.vlgmr.msrb.gmra.mxu2 %vm2204_vm12, %v2239_v36  ;;  %v9270_v49 = vor.u32 %v12118_v32, %v9269_v10  ;;  %v9261_v36 = vld [vmem:[#allocation13 + $0x150] sm:$0xf]  ;;  %v9312_v10 = vld [vmem:[#allocation13 + $0x1b8] sm:$0xf0] }
 0x4aa   :  { %2460 = vmatpush.bf16.msra.mxu1 %v9213_v28  ;;  %2473 = vmatpush.bf16.msra.mxu2 %v9217_v44  ;;  %v9278_v28 = vor.u32 %v12120_v43, %v9277_v9  ;;  %v9169_v44 = vor.u32 %v12075_v58, %v9166_v51  ;;  %v12115_v9 = vld [vmem:[#allocation13 + $0x154] sm:$0xf]  ;;  %v9263_v43 = vld [vmem:[#allocation13 + $0x158] sm:$0xf0]  ;;  %v9288_v58 = vld [vmem:[#allocation13 + $0x188] sm:$0xf0] }
 0x4ab   :  { %2374 = vmatpush.bf16.msra.mxu3 %v9097_v8  ;;  %v9323_v8 = vor.u32 %v12129_v26, %v9320_v31 }
 0x4ae   :  { %2461 = vmatpush.bf16.msra.mxu1 %v9205_v60  ;;  %2474 = vmatpush.bf16.msra.mxu2 %v9209_v27  ;;  %v12116_v60 = vld [vmem:[#allocation13 + $0x154] sm:$0xf0]  ;;  %v9161_v27 = vor.u32 %v12073_v29, %v9158_v21 }
 0x4af   :  { %2602 = vmatpush.bf16.msrb.mxu3 %v9278_v28  ;;  %v9262_v41 = vor.u32 %v12116_v60, %v9261_v36  ;;  %v12127_v28 = vld [vmem:[#allocation13 + $0x1b4] sm:$0xf]  ;;  %v12113_v36 = vld [vmem:[#allocation13 + $0x144] sm:$0xf]  ;;  %v9255_v60 = vld [vmem:[#allocation13 + $0x148] sm:$0xf0] }
 0x4b0   :  { %v9315_v37 = vor.u32 %v12127_v28, %v9312_v10  ;;  %v9258_v18 = vor.u32 %v12113_v36, %v9255_v60  ;;  %v12130_v28 = vld [vmem:[#allocation13 + $0x1c4] sm:$0xf0]  ;;  %v9383_v10 = vld [vmem:[#allocation13 + $0x240] sm:$0xf] }
 0x4b1   :  { %v9432_v60 = vld [vmem:[#allocation13 + $0x2a0] sm:$0xf] }
 0x4b2   :  { %2462 = vmatpush.bf16.msra.mxu1 %v9197_v13  ;;  %2475 = vmatpush.bf16.msra.mxu2 %v9201_v54  ;;  %v12079_v13 = vld [vmem:[#allocation13 + $0x34] sm:$0xf]  ;;  %v12133_v54 = vld [vmem:[#allocation13 + $0x1e4] sm:$0xf] }
 0x4b3   :  { %2603 = vmatpush.bf16.msrb.mxu3 %v9270_v49  ;;  %v9185_v23 = vor.u32 %v12079_v13, %v9182_v53  ;;  %v9339_v20 = vor.u32 %v12133_v54, %v9336_v48  ;;  %v9266_v49 = vor.u32 %v12115_v9, %v9263_v43  ;;  %v12123_v53 = vld [vmem:[#allocation13 + $0x194] sm:$0xf]  ;;  %v9456_v54 = vld [vmem:[#allocation13 + $0x2d0] sm:$0xf]  ;;  %v12164_v48 = vld [vmem:[#allocation13 + $0x2d4] sm:$0xf0] }
 0x4b4   :  { %v12160_v9 = vld [vmem:[#allocation13 + $0x2b4] sm:$0xf0] }
 0x4b6   :  { %2463 = vmatpush.bf16.msra.mxu1 %v9189_v47  ;;  %2476 = vmatpush.bf16.msra.mxu2 %v9193_v55  ;;  %v9238_v47 = vor.u32 %v12110_v63, %v9237_v22  ;;  %v9342_v55 = vld [vmem:[#allocation13 + $0x1f0] sm:$0xf]  ;;  %v9239_v22 = vld [vmem:[#allocation13 + $0x128] sm:$0xf0] }
 0x4b7   :  { %2604 = vmatpush.bf16.msrb.mxu3 %v9262_v41  ;;  %v2631_v41 = vld [vmem:[#allocation11 + $0xc] sm:$0xf] }
 0x4ba   :  { %2464 = vmatpush.bf16.msra.mxu1 %v9181_v2  ;;  %2477 = vmatpush.bf16.msra.mxu2 %v9185_v23  ;;  %v9222_v2 = vor.u32 %v12106_v50, %v9221_v61  ;;  %v9296_v23 = vld [vmem:[#allocation13 + $0x198] sm:$0xf0]  ;;  %v9464_v61 = vld [vmem:[#allocation13 + $0x2e0] sm:$0xf]  ;;  %v12166_v50 = vld [vmem:[#allocation13 + $0x2e4] sm:$0xf0] }
 0x4bb   :  { %2605 = vmatpush.bf16.msrb.mxu3 %v9254_v1  ;;  %v9304_v1 = vld [vmem:[#allocation13 + $0x1a8] sm:$0xf0]  ;;  %v9299_v63 = vor.u32 %v12123_v53, %v9296_v23  ;;  %v9424_v53 = vld [vmem:[#allocation13 + $0x290] sm:$0xf]  ;;  %v12156_v23 = vld [vmem:[#allocation13 + $0x294] sm:$0xf0] }
 0x4bc   :  { %v9307_v13 = vor.u32 %v12125_v35, %v9304_v1  ;;  %v9310_v35 = vld [vmem:[#allocation13 + $0x1b0] sm:$0xf]  ;;  %v12128_v1 = vld [vmem:[#allocation13 + $0x1b4] sm:$0xf0] }
 0x4be   :  { %2465 = vmatpush.bf16.msra.mxu1 %v9173_v24  ;;  %2478 = vmatpush.bf16.msra.mxu2 %v9177_v40  ;;  %v9279_v24 = vld [vmem:[#allocation13 + $0x178] sm:$0xf0]  ;;  %v12109_v40 = vld [vmem:[#allocation13 + $0x124] sm:$0xf] }
 0x4bf   :  { %2606 = vmatpush.bf16.msrb.mxu3 %v9246_v30  ;;  %v9282_v33 = vor.u32 %v12119_v57, %v9279_v24  ;;  %v9247_v30 = vld [vmem:[#allocation13 + $0x138] sm:$0xf0]  ;;  %v9242_v51 = vor.u32 %v12109_v40, %v9239_v22  ;;  %v9457_v24 = vor.u32 %v12164_v48, %v9456_v54  ;;  %v12126_v40 = vld [vmem:[#allocation13 + $0x1a4] sm:$0xf0]  ;;  %v9367_v22 = vld [vmem:[#allocation13 + $0x220] sm:$0xf] }
 0x4c0   :  { %v9250_v7 = vor.u32 %v12111_v16, %v9247_v30  ;;  %v9311_v16 = vor.u32 %v12128_v1, %v9310_v35  ;;  %v12144_v30 = vld [vmem:[#allocation13 + $0x234] sm:$0xf0]  ;;  %v12141_v35 = vld [vmem:[#allocation13 + $0x224] sm:$0xf]  ;;  %v9369_v1 = vld [vmem:[#allocation13 + $0x228] sm:$0xf0] }
 0x4c2   :  { %2466 = vmatpush.bf16.msra.mxu1 %v9165_v15  ;;  %2479 = vmatpush.bf16.msra.mxu2 %v9169_v44  ;;  %v12136_v15 = vld [vmem:[#allocation13 + $0x1f4] sm:$0xf0]  ;;  %v9472_v44 = vld [vmem:[#allocation13 + $0x2f0] sm:$0xf] }
 0x4c3   :  { %2607 = vmatpush.bf16.msrb.mxu3 %v9238_v47  ;;  %v9343_v45 = vor.u32 %v12136_v15, %v9342_v55  ;;  %v12121_v47 = vld [vmem:[#allocation13 + $0x184] sm:$0xf]  ;;  %v9473_v21 = vor.u32 %v12168_v4, %v9472_v44  ;;  %v9448_v15 = vld [vmem:[#allocation13 + $0x2c0] sm:$0xf]  ;;  %v12154_v44 = vld [vmem:[#allocation13 + $0x284] sm:$0xf0] }
 0x4c4   :  { %v9291_v29 = vor.u32 %v12121_v47, %v9288_v58  ;;  %v12142_v47 = vld [vmem:[#allocation13 + $0x224] sm:$0xf0] }
 0x4c5   :  { %v9368_v58 = vor.u32 %v12142_v47, %v9367_v22  ;;  %v9529_v47 = vld [vmem:[#allocation13 + $0x360] sm:$0xf] }
 0x4c6   :  { %2467 = vmatpush.bf16.msra.mxu1 %v9157_v46  ;;  %2480 = vmatpush.bf16.msra.mxu2 %v9161_v27 }
 0x4c7   :  { %2608 = vmatpush.bf16.msrb.mxu3 %v9230_v25  ;;  %v9231_v25 = vld [vmem:[#allocation13 + $0x118] sm:$0xf0] }
 0x4c8   :  { %v9234_v27 = vor.u32 %v12107_v12, %v9231_v25  ;;  %v9294_v12 = vld [vmem:[#allocation13 + $0x190] sm:$0xf]  ;;  %v12124_v25 = vld [vmem:[#allocation13 + $0x194] sm:$0xf0] }
 0x4ca   :  { %2641 = vmatpush.bf16.msrb.mxu1 %v14660_v42  ;;  %2746 = vmatpush.bf16.msrb.mxu2 %v9343_v45  ;;  %v12132_v45 = vld [vmem:[#allocation13 + $0x1d4] sm:$0xf0] }
 0x4cb   :  { %2609 = vmatpush.bf16.msrb.mxu3 %v9222_v2  ;;  %v12105_v2 = vld [vmem:[#allocation13 + $0x104] sm:$0xf]  ;;  %v9327_v26 = vor.u32 %v12132_v45, %v9326_v3  ;;  %v12151_v45 = vld [vmem:[#allocation13 + $0x274] sm:$0xf] }
 0x4ce   :  { %2642 = vmatpush.bf16.msrb.mxu1 %v14665_v56 }
 0x526   :  { %v2217_v39 = vpop.f32.mrf.mxu1 }
 0x527   :  { %v2221_v11 = vpack.c.bf16 %v2217_v39, %v2217_v39  ;;  %v12152_v39 = vld [vmem:[#allocation13 + $0x274] sm:$0xf0] }
 0x528   :  { %v9408_v57 = vor.u32 %v12152_v39, %v9407_v14  ;;  %v12138_v39 = vld [vmem:[#allocation13 + $0x204] sm:$0xf0] }
 0x529   :  { %2468 = vmatmul.bf16.vlgmr.msra.gmra.mxu1 %v2221_v11  ;;  %2481 = vmatmul.bf16.vlgmr.msra.gmra.mxu2 %v2221_v11  ;;  %v9226_v11 = vor.u32 %v12105_v2, %v9223_v19  ;;  %v12122_v2 = vld [vmem:[#allocation13 + $0x184] sm:$0xf0]  ;;  %v9351_v19 = vld [vmem:[#allocation13 + $0x200] sm:$0xf] }
 0x52a   :  { %2759 = vmatpush.bf16.msra.mxu1 %v9347_v5  ;;  %v9465_v5 = vor.u32 %v12166_v50, %v9464_v61  ;;  %v9286_v50 = vld [vmem:[#allocation13 + $0x180] sm:$0xf] }
 0x52b   :  { %v9287_v14 = vor.u32 %v12122_v2, %v9286_v50  ;;  %v9505_v2 = vld [vmem:[#allocation13 + $0x330] sm:$0xf] }
 0x52c   :  { %v2252_v59 = vpop.f32.mrf.mxu2 }
 0x52d   :  { %v2256_v6 = vpack.c.bf16 %v2252_v59, %v2252_v59 }
 0x52e   :  { %2760 = vmatpush.bf16.msra.mxu1 %v9339_v20  ;;  %v2219_v46 = vpop.f32.mrf.mxu1  ;;  %v9334_v20 = vld [vmem:[#allocation13 + $0x1e0] sm:$0xf] }
 0x52f   :  { %2362 = vmatmul.bf16.vlgmr.msrb.gmra.mxu0 %v2256_v6  ;;  %2375 = vmatmul.bf16.vlgmr.msra.gmra.mxu3 %v2256_v6  ;;  %v9335_v59 = vor.u32 %v12134_v17, %v9334_v20  ;;  %v12162_v6 = vld [vmem:[#allocation13 + $0x2c4] sm:$0xf0]  ;;  %v12148_v46 = vld [vmem:[#allocation13 + $0x254] sm:$0xf0] }
 0x530   :  { %2785 = vmatpush.bf16.msra.mxu3 %v14660_v42  ;;  %2615 = vmatpush.bf16.msrb.mxu0 %v9282_v33  ;;  %v12150_v33 = vld [vmem:[#allocation13 + $0x264] sm:$0xf0]  ;;  %v9449_v62 = vor.u32 %v12162_v6, %v9448_v15 }
 0x531   :  { %v9400_v55 = vor.u32 %v12150_v33, %v9399_v52  ;;  %2747 = vmatpush.bf16.msrb.mxu2 %v9335_v59 }
 0x532   :  { %2761 = vmatpush.bf16.msra.mxu1 %v9331_v34  ;;  %v9391_v34 = vld [vmem:[#allocation13 + $0x250] sm:$0xf] }
 0x533   :  { %v9392_v31 = vor.u32 %v12148_v46, %v9391_v34  ;;  %v9409_v34 = vld [vmem:[#allocation13 + $0x278] sm:$0xf0]  ;;  %v12149_v46 = vld [vmem:[#allocation13 + $0x264] sm:$0xf] }
 0x534   :  { %2786 = vmatpush.bf16.msra.mxu3 %v14665_v56  ;;  %v2254_v32 = vpop.f32.mrf.mxu2  ;;  %2616 = vmatpush.bf16.msrb.mxu0 %v9274_v0  ;;  %v9440_v0 = vld [vmem:[#allocation13 + $0x2b0] sm:$0xf] }
 0x535   :  { %2748 = vmatpush.bf16.msrb.mxu2 %v9327_v26  ;;  %v9441_v43 = vor.u32 %v12160_v9, %v9440_v0  ;;  %v9412_v26 = vor.u32 %v12151_v45, %v9409_v34  ;;  %v12147_v9 = vld [vmem:[#allocation13 + $0x254] sm:$0xf]  ;;  %v9481_v45 = vld [vmem:[#allocation13 + $0x300] sm:$0xf]  ;;  %v12170_v34 = vld [vmem:[#allocation13 + $0x304] sm:$0xf0] }
 0x536   :  { %2762 = vmatpush.bf16.msra.mxu1 %v9323_v8  ;;  %v9318_v8 = vld [vmem:[#allocation13 + $0x1c0] sm:$0xf] }
 0x537   :  { %v9319_v32 = vor.u32 %v12130_v28, %v9318_v8 }
 0x538   :  { %2617 = vmatpush.bf16.msrb.mxu0 %v9266_v49  ;;  %v12146_v49 = vld [vmem:[#allocation13 + $0x244] sm:$0xf0] }
 0x539   :  { %9283 = vmatmul.msk.bf16.vlgmr.msrb.gmra.mxu1 %vm2204_vm12, %v2631_v41  ;;  %v9384_v36 = vor.u32 %v12146_v49, %v9383_v10  ;;  %v12158_v41 = vld [vmem:[#allocation13 + $0x2a4] sm:$0xf0]  ;;  %2749 = vmatpush.bf16.msrb.mxu2 %v9319_v32  ;;  %v12145_v10 = vld [vmem:[#allocation13 + $0x244] sm:$0xf]  ;;  %v9385_v32 = vld [vmem:[#allocation13 + $0x248] sm:$0xf0] }
 0x53a   :  { %2763 = vmatpush.bf16.msra.mxu1 %v9315_v37  ;;  %v9433_v37 = vor.u32 %v12158_v41, %v9432_v60  ;;  %v9388_v49 = vor.u32 %v12145_v10, %v9385_v32  ;;  %v9377_v60 = vld [vmem:[#allocation13 + $0x238] sm:$0xf0]  ;;  %v2775_v41 = vld [vmem:[#allocation11 + $0x10] sm:$0xf]  ;;  %v12155_v10 = vld [vmem:[#allocation13 + $0x294] sm:$0xf] }
 0x53b   :  { %v9426_v32 = vld [vmem:[#allocation13 + $0x298] sm:$0xf0] }
 0x53c   :  { %2618 = vmatpush.bf16.msrb.mxu0 %v9258_v18  ;;  %v9375_v18 = vld [vmem:[#allocation13 + $0x230] sm:$0xf] }
 0x53d   :  { %2750 = vmatpush.bf16.msrb.mxu2 %v9311_v16  ;;  %v12139_v16 = vld [vmem:[#allocation13 + $0x214] sm:$0xf] }
 0x53e   :  { %2764 = vmatpush.bf16.msra.mxu1 %v9307_v13  ;;  %v9376_v13 = vor.u32 %v12144_v30, %v9375_v18  ;;  %v9372_v18 = vor.u32 %v12141_v35, %v9369_v1  ;;  %v9361_v30 = vld [vmem:[#allocation13 + $0x218] sm:$0xf0]  ;;  %v12153_v1 = vld [vmem:[#allocation13 + $0x284] sm:$0xf] }
 0x53f   :  { %9218 = vmatmul.msk.bf16.vlgmr.msra.gmra.mxu0 %vm2204_vm12, %v2487_v38  ;;  %v9425_v38 = vor.u32 %v12156_v23, %v9424_v53  ;;  %v12137_v53 = vld [vmem:[#allocation13 + $0x204] sm:$0xf]  ;;  %v9353_v23 = vld [vmem:[#allocation13 + $0x208] sm:$0xf0] }
 0x540   :  { %2619 = vmatpush.bf16.msrb.mxu0 %v9250_v7  ;;  %v9302_v7 = vld [vmem:[#allocation13 + $0x1a0] sm:$0xf] }
 0x542   :  { %2765 = vmatpush.bf16.msra.mxu1 %v9299_v63  ;;  %v9303_v63 = vor.u32 %v12126_v40, %v9302_v7  ;;  %v12184_v7 = vld [vmem:[#allocation13 + $0x374] sm:$0xf0]  ;;  %v9356_v40 = vor.u32 %v12137_v53, %v9353_v23 }
 0x544   :  { %2620 = vmatpush.bf16.msrb.mxu0 %v9242_v51  ;;  %v9416_v51 = vld [vmem:[#allocation13 + $0x280] sm:$0xf]  ;;  %2751 = vmatpush.bf16.msrb.mxu2 %v9303_v63  ;;  %v2919_v63 = vld [vmem:[#allocation11 + $0x14] sm:$0xf] }
 0x545   :  { %v9417_v4 = vor.u32 %v12154_v44, %v9416_v51  ;;  %v9521_v44 = vld [vmem:[#allocation13 + $0x350] sm:$0xf] }
 0x546   :  { %2766 = vmatpush.bf16.msra.mxu1 %v9291_v29  ;;  %v9359_v29 = vld [vmem:[#allocation13 + $0x210] sm:$0xf] }
 0x548   :  { %2621 = vmatpush.bf16.msrb.mxu0 %v9234_v27  ;;  %v12140_v27 = vld [vmem:[#allocation13 + $0x214] sm:$0xf0] }
 0x549   :  { %v9360_v61 = vor.u32 %v12140_v27, %v9359_v29  ;;  %v12178_v29 = vld [vmem:[#allocation13 + $0x344] sm:$0xf0]  ;;  %v12167_v27 = vld [vmem:[#allocation13 + $0x2f4] sm:$0xf] }
 0x54a   :  { %3034 = vmatpush.bf16.msrb.mxu1 %v9473_v21  ;;  %v9295_v21 = vor.u32 %v12124_v25, %v9294_v12  ;;  %v9513_v25 = vld [vmem:[#allocation13 + $0x340] sm:$0xf] }
 0x54c   :  { %2622 = vmatpush.bf16.msrb.mxu0 %v9226_v11  ;;  %2752 = vmatpush.bf16.msrb.mxu2 %v9295_v21  ;;  %v9514_v21 = vor.u32 %v12178_v29, %v9513_v25 }
 0x54e   :  { %3035 = vmatpush.bf16.msrb.mxu1 %v9465_v5  ;;  %v9352_v5 = vor.u32 %v12138_v39, %v9351_v19  ;;  %v12176_v19 = vld [vmem:[#allocation13 + $0x334] sm:$0xf0]  ;;  %v12165_v39 = vld [vmem:[#allocation13 + $0x2e4] sm:$0xf] }
 0x550   :  { %2890 = vmatpush.bf16.msra.mxu0 %v9408_v57  ;;  %2753 = vmatpush.bf16.msrb.mxu2 %v9287_v14  ;;  %v9506_v14 = vor.u32 %v12176_v19, %v9505_v2  ;;  %v9515_v2 = vld [vmem:[#allocation13 + $0x348] sm:$0xf0] }
 0x552   :  { %3036 = vmatpush.bf16.msrb.mxu1 %v9457_v24 }
 0x554   :  { %2891 = vmatpush.bf16.msra.mxu0 %v9400_v55  ;;  %2903 = vmatpush.bf16.msra.mxu2 %v9412_v26  ;;  %v12159_v26 = vld [vmem:[#allocation13 + $0x2b4] sm:$0xf] }
 0x556   :  { %3037 = vmatpush.bf16.msrb.mxu1 %v9449_v62 }
 0x558   :  { %2892 = vmatpush.bf16.msra.mxu0 %v9392_v31  ;;  %v9401_v31 = vld [vmem:[#allocation13 + $0x268] sm:$0xf0] }
 0x559   :  { %v9404_v0 = vor.u32 %v12149_v46, %v9401_v31  ;;  %v9482_v46 = vor.u32 %v12170_v34, %v9481_v45  ;;  %v9442_v31 = vld [vmem:[#allocation13 + $0x2b8] sm:$0xf0]  ;;  %v12171_v34 = vld [vmem:[#allocation13 + $0x314] sm:$0xf] }
 0x55a   :  { %3038 = vmatpush.bf16.msrb.mxu1 %v9441_v43  ;;  %v9393_v43 = vld [vmem:[#allocation13 + $0x258] sm:$0xf0] }
 0x55b   :  { %2904 = vmatpush.bf16.msra.mxu2 %v9404_v0  ;;  %v9396_v28 = vor.u32 %v12147_v9, %v9393_v43  ;;  %v9445_v0 = vor.u32 %v12159_v26, %v9442_v31  ;;  %v12157_v43 = vld [vmem:[#allocation13 + $0x2a4] sm:$0xf]  ;;  %v9586_v26 = vld [vmem:[#allocation13 + $0x3d0] sm:$0xf] }
 0x55c   :  { %2893 = vmatpush.bf16.msra.mxu0 %v9384_v36  ;;  %v12143_v36 = vld [vmem:[#allocation13 + $0x234] sm:$0xf] }
 0x55e   :  { %3039 = vmatpush.bf16.msrb.mxu1 %v9433_v37  ;;  %v9380_v37 = vor.u32 %v12143_v36, %v9377_v60 }
 0x55f   :  { %2905 = vmatpush.bf16.msra.mxu2 %v9396_v28 }
 0x560   :  { %2894 = vmatpush.bf16.msra.mxu0 %v9376_v13  ;;  %v9364_v13 = vor.u32 %v12139_v16, %v9361_v30 }
 0x562   :  { %3040 = vmatpush.bf16.msrb.mxu1 %v9425_v38  ;;  %v9537_v38 = vld [vmem:[#allocation13 + $0x370] sm:$0xf] }
 0x563   :  { %2906 = vmatpush.bf16.msra.mxu2 %v9388_v49  ;;  %v9538_v22 = vor.u32 %v12184_v7, %v9537_v38  ;;  %v9429_v49 = vor.u32 %v12155_v10, %v9426_v32  ;;  %v12169_v10 = vld [vmem:[#allocation13 + $0x304] sm:$0xf]  ;;  %v9483_v32 = vld [vmem:[#allocation13 + $0x308] sm:$0xf0] }
 0x564   :  { %2895 = vmatpush.bf16.msra.mxu0 %v9368_v58  ;;  %v12182_v58 = vld [vmem:[#allocation13 + $0x364] sm:$0xf0] }
 0x565   :  { %v9530_v51 = vor.u32 %v12182_v58, %v9529_v47  ;;  %v12181_v47 = vld [vmem:[#allocation13 + $0x364] sm:$0xf] }
 0x566   :  { %3041 = vmatpush.bf16.msrb.mxu1 %v9417_v4  ;;  %v12180_v4 = vld [vmem:[#allocation13 + $0x354] sm:$0xf0] }
 0x567   :  { %2907 = vmatpush.bf16.msra.mxu2 %v9380_v37  ;;  %v9522_v12 = vor.u32 %v12180_v4, %v9521_v44  ;;  %v9523_v4 = vld [vmem:[#allocation13 + $0x358] sm:$0xf0] }
 0x568   :  { %2896 = vmatpush.bf16.msra.mxu0 %v9360_v61  ;;  %v9474_v61 = vld [vmem:[#allocation13 + $0x2f8] sm:$0xf0] }
 0x569   :  { %v9477_v50 = vor.u32 %v12167_v27, %v9474_v61  ;;  %v3063_v27 = vld [vmem:[#allocation11 + $0x18] sm:$0xf]  ;;  %v3207_v61 = vld [vmem:[#allocation11 + $0x1c] sm:$0xf] }
 0x56b   :  { %2908 = vmatpush.bf16.msra.mxu2 %v9372_v18  ;;  %v9418_v18 = vld [vmem:[#allocation13 + $0x288] sm:$0xf0] }
 0x56c   :  { %2897 = vmatpush.bf16.msra.mxu0 %v9352_v5  ;;  %v9466_v5 = vld [vmem:[#allocation13 + $0x2e8] sm:$0xf0]  ;;  %v9421_v16 = vor.u32 %v12153_v1, %v9418_v18 }
 0x56f   :  { %2909 = vmatpush.bf16.msra.mxu2 %v9364_v13 }
 0x573   :  { %2910 = vmatpush.bf16.msra.mxu2 %v9356_v40 }
 0x5a6   :  { %v2469_v11 = vpop.f32.mrf.mxu1 }
 0x5ac   :  { %v2363_v54 = vpop.f32.mrf.mxu0  ;;  %v2482_v48 = vpop.f32.mrf.mxu2 }
 0x5ad   :  { %v14678_v57 = vadd.f32 %v2469_v11, %v2363_v54  ;;  %v9469_v11 = vor.u32 %v12165_v39, %v9466_v5  ;;  %v9497_v54 = vld [vmem:[#allocation13 + $0x320] sm:$0xf]  ;;  %v9602_v39 = vld [vmem:[#allocation13 + $0x3f0] sm:$0xf] }
 0x5ae   :  { %v2471_v24 = vpop.f32.mrf.mxu1 }
 0x5af   :  { %v12163_v24 = vld [vmem:[#allocation13 + $0x2d4] sm:$0xf] }
 0x5b2   :  { %v2376_v20 = vpop.f32.mrf.mxu3 }
 0x5b3   :  { %v14680_v17 = vadd.f32 %v2482_v48, %v2376_v20  ;;  %v12174_v48 = vld [vmem:[#allocation13 + $0x324] sm:$0xf0] }
 0x5b4   :  { %v2365_v52 = vpop.f32.mrf.mxu0  ;;  %v2484_v59 = vpop.f32.mrf.mxu2  ;;  %v9498_v20 = vor.u32 %v12174_v48, %v9497_v54  ;;  %v12199_v54 = vld [vmem:[#allocation13 + $0x3f4] sm:$0xf]  ;;  %v9604_v48 = vld [vmem:[#allocation13 + $0x3f8] sm:$0xf0] }
 0x5b5   :  { %v9458_v52 = vld [vmem:[#allocation13 + $0x2d8] sm:$0xf0]  ;;  %v9489_v59 = vld [vmem:[#allocation13 + $0x310] sm:$0xf] }
 0x5b6   :  { %v2644_v33 = vpop.f32.mrf.mxu1 }
 0x5b7   :  { %v2648_v55 = vpack.c.bf16 %v2644_v33, %v2644_v33  ;;  %v12172_v33 = vld [vmem:[#allocation13 + $0x314] sm:$0xf0] }
 0x5b9   :  { %2767 = vmatmul.bf16.vlgmr.msra.gmra.mxu1 %v2648_v55  ;;  %2754 = vmatmul.bf16.vlgmr.msrb.gmra.mxu2 %v2648_v55  ;;  %v9461_v55 = vor.u32 %v12163_v24, %v9458_v52  ;;  %v12173_v52 = vld [vmem:[#allocation13 + $0x324] sm:$0xf] }
 0x5ba   :  { %3217 = vmatpush.bf16.msra.mxu1 %v14660_v42  ;;  %v2378_v15 = vpop.f32.mrf.mxu3  ;;  %3178 = vmatpush.bf16.msrb.mxu2 %v9538_v22 }
 0x5bb   :  { %v9490_v15 = vor.u32 %v12172_v33, %v9489_v59  ;;  %v9499_v59 = vld [vmem:[#allocation13 + $0x328] sm:$0xf0]  ;;  %v9594_v33 = vld [vmem:[#allocation13 + $0x3e0] sm:$0xf] }
 0x5bc   :  { %v2500_v6 = vpop.f32.mrf.mxu0 }
 0x5bd   :  { %v2504_v3 = vpack.c.bf16 %v2500_v6, %v2500_v6  ;;  %v12161_v6 = vld [vmem:[#allocation13 + $0x2c4] sm:$0xf] }
 0x5be   :  { %3218 = vmatpush.bf16.msra.mxu1 %v14665_v56  ;;  %v2646_v62 = vpop.f32.mrf.mxu1  ;;  %3179 = vmatpush.bf16.msrb.mxu2 %v9530_v51  ;;  %v9531_v51 = vld [vmem:[#allocation13 + $0x368] sm:$0xf0] }
 0x5bf   :  { %2610 = vmatmul.bf16.vlgmr.msrb.gmra.mxu3 %v2504_v3  ;;  %2623 = vmatmul.bf16.vlgmr.msrb.gmra.mxu0 %v2504_v3  ;;  %v9450_v3 = vld [vmem:[#allocation13 + $0x2c8] sm:$0xf0]  ;;  %v9534_v44 = vor.u32 %v12181_v47, %v9531_v51  ;;  %v9554_v51 = vld [vmem:[#allocation13 + $0x390] sm:$0xf] }
 0x5c0   :  { %2929 = vmatpush.bf16.msrb.mxu3 %v14660_v42  ;;  %3073 = vmatpush.bf16.msrb.mxu0 %v14660_v42  ;;  %v9453_v62 = vor.u32 %v12161_v6, %v9450_v3  ;;  %v12197_v6 = vld [vmem:[#allocation13 + $0x3e4] sm:$0xf]  ;;  %v9596_v3 = vld [vmem:[#allocation13 + $0x3e8] sm:$0xf0] }
 0x5c1   :  { %v9599_v45 = vor.u32 %v12197_v6, %v9596_v3  ;;  %v9564_v47 = vld [vmem:[#allocation13 + $0x3a8] sm:$0xf0] }
 0x5c2   :  { %3180 = vmatpush.bf16.msrb.mxu2 %v9522_v12 }
 0x5c4   :  { %2930 = vmatpush.bf16.msrb.mxu3 %v14665_v56  ;;  %3074 = vmatpush.bf16.msrb.mxu0 %v14665_v56  ;;  %v2502_v8 = vpop.f32.mrf.mxu0 }
 0x5c5   :  { %v9434_v8 = vld [vmem:[#allocation13 + $0x2a8] sm:$0xf0] }
 0x5c6   :  { %3181 = vmatpush.bf16.msrb.mxu2 %v9514_v21  ;;  %v9437_v28 = vor.u32 %v12157_v43, %v9434_v8  ;;  %v9588_v43 = vld [vmem:[#allocation13 + $0x3d8] sm:$0xf0] }
 0x5ca   :  { %3182 = vmatpush.bf16.msrb.mxu2 %v9506_v14  ;;  %v9507_v14 = vld [vmem:[#allocation13 + $0x338] sm:$0xf0] }
 0x5ce   :  { %3183 = vmatpush.bf16.msrb.mxu2 %v9498_v20  ;;  %v9607_v20 = vor.u32 %v12199_v54, %v9604_v48 }
 0x5cf   :  { %9348 = vmatmul.msk.bf16.vlgmr.msra.gmra.mxu3 %vm2204_vm12, %v2775_v41 }
 0x5d0   :  { %3047 = vmatpush.bf16.msra.mxu3 %v9477_v50  ;;  %v12177_v50 = vld [vmem:[#allocation13 + $0x344] sm:$0xf] }
 0x5d1   :  { %v9518_v19 = vor.u32 %v12177_v50, %v9515_v2 }
 0x5d2   :  { %3184 = vmatpush.bf16.msrb.mxu2 %v9490_v15  ;;  %v12198_v15 = vld [vmem:[#allocation13 + $0x3e4] sm:$0xf0] }
 0x5d4   :  { %3048 = vmatpush.bf16.msra.mxu3 %v9469_v11  ;;  %v12200_v11 = vld [vmem:[#allocation13 + $0x3f4] sm:$0xf0] }
 0x5d5   :  { %v9603_v24 = vor.u32 %v12200_v11, %v9602_v39  ;;  %v12214_v11 = vld [vmem:[#allocation13 + $0x464] sm:$0xf0] }
 0x5d6   :  { %3185 = vmatpush.bf16.msrb.mxu2 %v9482_v46  ;;  %v9491_v46 = vld [vmem:[#allocation13 + $0x318] sm:$0xf0] }
 0x5d7   :  { %v9494_v31 = vor.u32 %v12171_v34, %v9491_v46 }
 0x5d8   :  { %3049 = vmatpush.bf16.msra.mxu3 %v9461_v55  ;;  %v9502_v55 = vor.u32 %v12173_v52, %v9499_v59  ;;  %v12215_v59 = vld [vmem:[#allocation13 + $0x474] sm:$0xf] }
 0x5dc   :  { %3050 = vmatpush.bf16.msra.mxu3 %v9453_v62  ;;  %v9595_v62 = vor.u32 %v12198_v15, %v9594_v33  ;;  %v9669_v33 = vld [vmem:[#allocation13 + $0x478] sm:$0xf0] }
 0x5dd   :  { %v9672_v6 = vor.u32 %v12215_v59, %v9669_v33 }
 0x5df   :  { %9413 = vmatmul.msk.bf16.vlgmr.msrb.gmra.mxu3 %vm2204_vm12, %v2919_v63  ;;  %v9539_v63 = vld [vmem:[#allocation13 + $0x378] sm:$0xf0] }
 0x5e0   :  { %3051 = vmatpush.bf16.msra.mxu3 %v9445_v0  ;;  %v12196_v0 = vld [vmem:[#allocation13 + $0x3d4] sm:$0xf0] }
 0x5e1   :  { %v9587_v8 = vor.u32 %v12196_v0, %v9586_v26 }
 0x5e4   :  { %3052 = vmatpush.bf16.msra.mxu3 %v9437_v28 }
 0x5e8   :  { %3053 = vmatpush.bf16.msra.mxu3 %v9429_v49  ;;  %v9578_v49 = vld [vmem:[#allocation13 + $0x3c0] sm:$0xf] }
 0x5ec   :  { %3054 = vmatpush.bf16.msra.mxu3 %v9421_v16  ;;  %v9570_v16 = vld [vmem:[#allocation13 + $0x3b0] sm:$0xf] }
 0x5f0   :  { %3322 = vmatpush.bf16.msrb.mxu3 %v9603_v24 }
 0x5f4   :  { %3323 = vmatpush.bf16.msrb.mxu3 %v9595_v62  ;;  %v12213_v62 = vld [vmem:[#allocation13 + $0x464] sm:$0xf] }
 0x5f8   :  { %3324 = vmatpush.bf16.msrb.mxu3 %v9587_v8  ;;  %v3351_v8 = vld [vmem:[#allocation11 + $0x20] sm:$0xf] }
 0x636   :  { %v2768_v9 = vpop.f32.mrf.mxu1 }
 0x63c   :  { %v2624_v36 = vpop.f32.mrf.mxu0  ;;  %v2755_v60 = vpop.f32.mrf.mxu2 }
 0x63d   :  { %v2629_v41 = vadd.f32 %v2624_v36, %v14680_v17  ;;  %v12183_v17 = vld [vmem:[#allocation13 + $0x374] sm:$0xf]  ;;  %v9486_v36 = vor.u32 %v12169_v10, %v9483_v32  ;;  %v9651_v10 = vld [vmem:[#allocation13 + $0x450] sm:$0xf]  ;;  %v12212_v32 = vld [vmem:[#allocation13 + $0x454] sm:$0xf0] }
 0x63e   :  { %v2770_v37 = vpop.f32.mrf.mxu1  ;;  %v9542_v58 = vor.u32 %v12183_v17, %v9539_v63  ;;  %v12189_v17 = vld [vmem:[#allocation13 + $0x3a4] sm:$0xf] }
 0x63f   :  { %v14691_v35 = vadd.f32 %v2768_v9, %v2629_v41  ;;  %v12195_v9 = vld [vmem:[#allocation13 + $0x3d4] sm:$0xf]  ;;  %v12193_v41 = vld [vmem:[#allocation13 + $0x3c4] sm:$0xf]  ;;  %v9580_v37 = vld [vmem:[#allocation13 + $0x3c8] sm:$0xf0] }
 0x640   :  { %v9591_v28 = vor.u32 %v12195_v9, %v9588_v43  ;;  %v9583_v18 = vor.u32 %v12193_v41, %v9580_v37  ;;  %v9643_v37 = vld [vmem:[#allocation13 + $0x440] sm:$0xf] }
 0x642   :  { %v2611_v30 = vpop.f32.mrf.mxu3 }
 0x643   :  { %v2628_v13 = vadd.f32 %v2611_v30, %v14678_v57  ;;  %v12179_v57 = vld [vmem:[#allocation13 + $0x354] sm:$0xf]  ;;  %v12192_v30 = vld [vmem:[#allocation13 + $0x3b4] sm:$0xf0] }
 0x644   :  { %v2626_v53 = vpop.f32.mrf.mxu0  ;;  %v2757_v23 = vpop.f32.mrf.mxu2  ;;  %v9526_v25 = vor.u32 %v12179_v57, %v9523_v4  ;;  %v12187_v57 = vld [vmem:[#allocation13 + $0x394] sm:$0xf] }
 0x645   :  { %v14694_v38 = vadd.f32 %v2755_v60, %v2628_v13  ;;  %v12194_v60 = vld [vmem:[#allocation13 + $0x3c4] sm:$0xf0]  ;;  %v12191_v13 = vld [vmem:[#allocation13 + $0x3b4] sm:$0xf]  ;;  %v9571_v53 = vor.u32 %v12192_v30, %v9570_v16  ;;  %v9572_v23 = vld [vmem:[#allocation13 + $0x3b8] sm:$0xf0] }
 0x646   :  { %v9579_v1 = vor.u32 %v12194_v60, %v9578_v49  ;;  %v12211_v49 = vld [vmem:[#allocation13 + $0x454] sm:$0xf]  ;;  %v9653_v60 = vld [vmem:[#allocation13 + $0x458] sm:$0xf0]  ;;  %v9645_v30 = vld [vmem:[#allocation13 + $0x448] sm:$0xf0] }
 0x647   :  { %v9656_v41 = vor.u32 %v12211_v49, %v9653_v60 }
 0x648   :  { %3325 = vmatpush.bf16.msrb.mxu3 %v9579_v1  ;;  %v12210_v1 = vld [vmem:[#allocation13 + $0x444] sm:$0xf0] }
 0x649   :  { %v9644_v16 = vor.u32 %v12210_v1, %v9643_v37 }
 0x64a   :  { %v2613_v7 = vpop.f32.mrf.mxu3 }
 0x64b   :  { %v9575_v7 = vor.u32 %v12191_v13, %v9572_v23  ;;  %v12208_v23 = vld [vmem:[#allocation13 + $0x434] sm:$0xf0] }
 0x64c   :  { %3326 = vmatpush.bf16.msrb.mxu3 %v9571_v53  ;;  %v9635_v53 = vld [vmem:[#allocation13 + $0x430] sm:$0xf] }
 0x652   :  { %v2788_v40 = vpop.f32.mrf.mxu3 }
 0x653   :  { %v2792_v22 = vpack.c.bf16 %v2788_v40, %v2788_v40  ;;  %v9562_v40 = vld [vmem:[#allocation13 + $0x3a0] sm:$0xf] }
 0x655   :  { %2898 = vmatmul.bf16.vlgmr.msra.gmra.mxu0 %v2792_v22  ;;  %2911 = vmatmul.bf16.vlgmr.msra.gmra.mxu2 %v2792_v22  ;;  %v12190_v22 = vld [vmem:[#allocation13 + $0x3a4] sm:$0xf0] }
 0x656   :  { %3361 = vmatpush.bf16.msra.mxu2 %v14660_v42  ;;  %3191 = vmatpush.bf16.msra.mxu0 %v9542_v58  ;;  %v9563_v63 = vor.u32 %v12190_v22, %v9562_v40  ;;  %v9567_v58 = vor.u32 %v12189_v17, %v9564_v47  ;;  %v9636_v40 = vor.u32 %v12208_v23, %v9635_v53  ;;  %v9637_v22 = vld [vmem:[#allocation13 + $0x438] sm:$0xf0]  ;;  %v12206_v47 = vld [vmem:[#allocation13 + $0x424] sm:$0xf0] }
 0x658   :  { %3327 = vmatpush.bf16.msrb.mxu3 %v9563_v63  ;;  %v9627_v63 = vld [vmem:[#allocation13 + $0x420] sm:$0xf] }
 0x65a   :  { %3362 = vmatpush.bf16.msra.mxu2 %v14665_v56  ;;  %v2790_v12 = vpop.f32.mrf.mxu3  ;;  %3192 = vmatpush.bf16.msra.mxu0 %v9534_v44  ;;  %v12175_v56 = vld [vmem:[#allocation13 + $0x334] sm:$0xf]  ;;  %v12188_v44 = vld [vmem:[#allocation13 + $0x394] sm:$0xf0] }
 0x65b   :  { %v9510_v5 = vor.u32 %v12175_v56, %v9507_v14  ;;  %v9555_v4 = vor.u32 %v12188_v44, %v9554_v51  ;;  %v9556_v12 = vld [vmem:[#allocation13 + $0x398] sm:$0xf0]  ;;  %v9667_v56 = vld [vmem:[#allocation13 + $0x470] sm:$0xf]  ;;  %v12216_v14 = vld [vmem:[#allocation13 + $0x474] sm:$0xf0]  ;;  %v9628_v51 = vor.u32 %v12206_v47, %v9627_v63 }
 0x65c   :  { %v9668_v39 = vor.u32 %v12216_v14, %v9667_v56  ;;  %v9629_v44 = vld [vmem:[#allocation13 + $0x428] sm:$0xf0] }
 0x65d   :  { %3328 = vmatpush.bf16.msrb.mxu3 %v9555_v4  ;;  %v9619_v4 = vld [vmem:[#allocation13 + $0x410] sm:$0xf] }
 0x65e   :  { %3193 = vmatpush.bf16.msra.mxu0 %v9526_v25  ;;  %v9559_v25 = vor.u32 %v12187_v57, %v9556_v12  ;;  %v12204_v12 = vld [vmem:[#allocation13 + $0x414] sm:$0xf0] }
 0x662   :  { %v2932_v29 = vpop.f32.mrf.mxu3  ;;  %3194 = vmatpush.bf16.msra.mxu0 %v9518_v19 }
 0x663   :  { %v2936_v21 = vpack.c.bf16 %v2932_v29, %v2932_v29  ;;  %v9546_v29 = vld [vmem:[#allocation13 + $0x380] sm:$0xf] }
 0x665   :  { %3042 = vmatmul.bf16.vlgmr.msrb.gmra.mxu1 %v2936_v21  ;;  %3055 = vmatmul.bf16.vlgmr.msra.gmra.mxu3 %v2936_v21  ;;  %v12186_v21 = vld [vmem:[#allocation13 + $0x384] sm:$0xf0] }
 0x666   :  { %9478 = vmatmul.msk.bf16.vlgmr.msrb.gmra.mxu0 %vm2204_vm12, %v3063_v27  ;;  %3335 = vmatpush.bf16.msrb.mxu1 %v9607_v20  ;;  %v12185_v27 = vld [vmem:[#allocation13 + $0x384] sm:$0xf] }
 0x667   :  { %3195 = vmatpush.bf16.msra.mxu0 %v9510_v5  ;;  %v9659_v5 = vld [vmem:[#allocation13 + $0x460] sm:$0xf] }
 0x668   :  { %v9660_v24 = vor.u32 %v12214_v11, %v9659_v5 }
 0x66a   :  { %v2934_v42 = vpop.f32.mrf.mxu3  ;;  %3336 = vmatpush.bf16.msrb.mxu1 %v9599_v45  ;;  %v9661_v45 = vld [vmem:[#allocation13 + $0x468] sm:$0xf0] }
 0x66b   :  { %3196 = vmatpush.bf16.msra.mxu0 %v9502_v55  ;;  %v9547_v42 = vor.u32 %v12186_v21, %v9546_v29  ;;  %v9664_v34 = vor.u32 %v12213_v62, %v9661_v45  ;;  %v9620_v29 = vor.u32 %v12204_v12, %v9619_v4  ;;  %v9621_v21 = vld [vmem:[#allocation13 + $0x418] sm:$0xf0]  ;;  %v3494_v62 = vld [vmem:[#allocation14] sm:$0x3] }
 0x66c   :  { %v3496_v45 = vperm.slane %v3494_v62, 0 }
 0x66d   :  { %3329 = vmatpush.bf16.msrb.mxu3 %v9547_v42  ;;  %v9611_v42 = vld [vmem:[#allocation13 + $0x400] sm:$0xf] }
 0x66e   :  { %3337 = vmatpush.bf16.msrb.mxu1 %v9591_v28 }
 0x66f   :  { %3197 = vmatpush.bf16.msra.mxu0 %v9494_v31 }
 0x672   :  { %3338 = vmatpush.bf16.msrb.mxu1 %v9583_v18  ;;  %v12209_v18 = vld [vmem:[#allocation13 + $0x444] sm:$0xf] }
 0x673   :  { %3198 = vmatpush.bf16.msra.mxu0 %v9486_v36  ;;  %v9652_v36 = vor.u32 %v12212_v32, %v9651_v10  ;;  %v9648_v13 = vor.u32 %v12209_v18, %v9645_v30 }
 0x675   :  { %9543 = vmatmul.msk.bf16.vlgmr.msra.gmra.mxu1 %vm2204_vm12, %v3207_v61  ;;  %v9548_v61 = vld [vmem:[#allocation13 + $0x388] sm:$0xf0] }
 0x676   :  { %3339 = vmatpush.bf16.msrb.mxu1 %v9575_v7  ;;  %v9551_v2 = vor.u32 %v12185_v27, %v9548_v61  ;;  %v12207_v7 = vld [vmem:[#allocation13 + $0x434] sm:$0xf]  ;;  %v12202_v61 = vld [vmem:[#allocation13 + $0x404] sm:$0xf0] }
 0x677   :  { %3466 = vmatpush.bf16.msrb.mxu0 %v9668_v39  ;;  %v9640_v17 = vor.u32 %v12207_v7, %v9637_v22 }
 0x67a   :  { %3340 = vmatpush.bf16.msrb.mxu1 %v9567_v58  ;;  %v12205_v58 = vld [vmem:[#allocation13 + $0x424] sm:$0xf] }
 0x67b   :  { %3467 = vmatpush.bf16.msrb.mxu0 %v9660_v24  ;;  %v9632_v57 = vor.u32 %v12205_v58, %v9629_v44 }
 0x67e   :  { %3341 = vmatpush.bf16.msrb.mxu1 %v9559_v25  ;;  %v12203_v25 = vld [vmem:[#allocation13 + $0x414] sm:$0xf] }
 0x67f   :  { %3468 = vmatpush.bf16.msrb.mxu0 %v9652_v36  ;;  %v9624_v27 = vor.u32 %v12203_v25, %v9621_v21 }
 0x682   :  { %3342 = vmatpush.bf16.msrb.mxu1 %v9551_v2  ;;  %v9612_v2 = vor.u32 %v12202_v61, %v9611_v42 }
 0x683   :  { %3469 = vmatpush.bf16.msrb.mxu0 %v9644_v16 }
 0x687   :  { %3470 = vmatpush.bf16.msrb.mxu0 %v9636_v40 }
 0x68b   :  { %3471 = vmatpush.bf16.msrb.mxu0 %v9628_v51 }
 0x68f   :  { %3472 = vmatpush.bf16.msrb.mxu0 %v9620_v29 }
 0x693   :  { %3473 = vmatpush.bf16.msrb.mxu0 %v9612_v2 }
 0x6d2   :  { %v2899_v50 = vpop.f32.mrf.mxu0 }
 0x6d3   :  { %v2916_v19 = vadd.f32 %v2899_v50, %v14694_v38  ;;  %v12201_v50 = vld [vmem:[#allocation13 + $0x404] sm:$0xf] }
 0x6d8   :  { %v2912_v54 = vpop.f32.mrf.mxu2 }
 0x6d9   :  { %v2917_v48 = vadd.f32 %v2912_v54, %v14691_v35 }
 0x6da   :  { %v2901_v20 = vpop.f32.mrf.mxu0 }
 0x6e0   :  { %v2914_v52 = vpop.f32.mrf.mxu2 }
 0x6e2   :  { %v3043_v55 = vpop.f32.mrf.mxu1 }
 0x6e3   :  { %v14702_v15 = vadd.f32 %v3043_v55, %v2916_v19  ;;  %v3076_v38 = vpop.f32.mrf.mxu0  ;;  %v9613_v19 = vld [vmem:[#allocation13 + $0x408] sm:$0xf0] }
 0x6e4   :  { %v3080_v3 = vpack.c.bf16 %v3076_v38, %v3076_v38  ;;  %v9616_v56 = vor.u32 %v12201_v50, %v9613_v19 }
 0x6e6   :  { %3186 = vmatmul.bf16.vlgmr.msrb.gmra.mxu2 %v3080_v3  ;;  %3199 = vmatmul.bf16.vlgmr.msra.gmra.mxu0 %v3080_v3 }
 0x6e7   :  { %3479 = vmatpush.bf16.msrb.mxu2 %v9672_v6 }
 0x6e8   :  { %v3056_v35 = vpop.f32.mrf.mxu3 }
 0x6e9   :  { %v3061_v46 = vadd.f32 %v3056_v35, %v2917_v48 }
 0x6ea   :  { %v3045_v26 = vpop.f32.mrf.mxu1 }
 0x6eb   :  { %v3078_v31 = vpop.f32.mrf.mxu0  ;;  %3480 = vmatpush.bf16.msrb.mxu2 %v9664_v34  ;;  %v3497_v26 = vperm.slane %v3494_v62, 1 }
 0x6ef   :  { %3481 = vmatpush.bf16.msrb.mxu2 %v9656_v41 }
 0x6f0   :  { %v3058_v0 = vpop.f32.mrf.mxu3 }
 0x6f2   :  { %v3220_v9 = vpop.f32.mrf.mxu1 }
 0x6f3   :  { %v3224_v43 = vpack.c.bf16 %v3220_v9, %v3220_v9  ;;  %3482 = vmatpush.bf16.msrb.mxu2 %v9648_v13 }
 0x6f5   :  { %3330 = vmatmul.bf16.vlgmr.msrb.gmra.mxu3 %v3224_v43  ;;  %3343 = vmatmul.bf16.vlgmr.msrb.gmra.mxu1 %v3224_v43 }
 0x6f6   :  { %9608 = vmatmul.msk.bf16.vlgmr.msra.gmra.mxu2 %vm2204_vm12, %v3351_v8 }
 0x6f7   :  { %3483 = vmatpush.bf16.msrb.mxu2 %v9640_v17 }
 0x6fa   :  { %v3222_v28 = vpop.f32.mrf.mxu1 }
 0x6fb   :  { %3484 = vmatpush.bf16.msrb.mxu2 %v9632_v57 }
 0x6ff   :  { %3485 = vmatpush.bf16.msrb.mxu2 %v9624_v27 }
 0x703   :  { %3486 = vmatpush.bf16.msrb.mxu2 %v9616_v56 }
 0x763   :  { %v3200_v14 = vpop.f32.mrf.mxu0 }
 0x764   :  { %v3205_v39 = vadd.f32 %v3200_v14, %v3061_v46 }
 0x769   :  { %v3187_v5 = vpop.f32.mrf.mxu2 }
 0x76a   :  { %v3204_v11 = vadd.f32 %v3187_v5, %v14702_v15 }
 0x76b   :  { %v3202_v54 = vpop.f32.mrf.mxu0 }
 0x771   :  { %v3189_v48 = vpop.f32.mrf.mxu2 }
 0x772   :  { %v3344_v24 = vpop.f32.mrf.mxu1 }
 0x773   :  { %v3349_v20 = vadd.f32 %v3344_v24, %v3205_v39 }
 0x778   :  { %v3331_v52 = vpop.f32.mrf.mxu3 }
 0x779   :  { %v3348_v59 = vadd.f32 %v3331_v52, %v3204_v11  ;;  %v3364_v33 = vpop.f32.mrf.mxu2 }
 0x77a   :  { %v3368_v55 = vpack.c.bf16 %v3364_v33, %v3364_v33  ;;  %v3346_v38 = vpop.f32.mrf.mxu1 }
 0x77c   :  { %3474 = vmatmul.bf16.vlgmr.msrb.gmra.mxu0 %v3368_v55  ;;  %3487 = vmatmul.bf16.vlgmr.msrb.gmra.mxu2 %v3368_v55 }
 0x780   :  { %v3333_v6 = vpop.f32.mrf.mxu3 }
 0x781   :  { %v3366_v3 = vpop.f32.mrf.mxu2 }
 0x7f9   :  { %v3475_v34 = vpop.f32.mrf.mxu0 }
 0x7fa   :  { %v3492_v35 = vadd.f32 %v3475_v34, %v3348_v59 }
 0x7fc   :  { %v14706_v46 = vadd.f32 %v3496_v45, %v3492_v35 }
 0x7fe   :  { %v14709_v15 = vmul.f32 0.70710677, %v14706_v46 }
 0x7ff   :  { %v3488_v31 = vpop.f32.mrf.mxu2 }
 0x800   :  { %v3506_v0 = vmul.f32 %v14709_v15, %v14709_v15  ;;  %v3493_v9 = vadd.f32 %v3488_v31, %v3349_v20  ;;  %v12343_v31 = vld [vmem:[#allocation17 + $0x3ec] sm:$0xf0] }
 0x801   :  { %v3477_v43 = vpop.f32.mrf.mxu0 }
 0x802   :  { %v3507_v8 = vmin.f32 %v3506_v0, 16.0  ;;  %v14713_v28 = vadd.f32 %v3497_v26, %v3493_v9  ;;  %v9921_v26 = vld [vmem:[#allocation17 + $0x3e0] sm:$0xf] }
 0x804   :  { %v3508_v10 = vmul.f32 2.1237322e-06, %v3507_v8  ;;  %v3519_v32 = vmul.f32 3.8918573e-05, %v3507_v8  ;;  %v14716_v49 = vmul.f32 0.70710677, %v14713_v28 }
 0x806   :  { %v3509_v36 = vadd.f32 0.00028619796, %v3508_v10  ;;  %v3520_v60 = vadd.f32 0.001143296, %v3519_v32  ;;  %v3546_v41 = vmul.f32 %v14716_v49, %v14716_v49 }
 0x807   :  { %v3490_v37 = vpop.f32.mrf.mxu2 }
 0x808   :  { %v3510_v1 = vmul.f32 %v3509_v36, %v3507_v8  ;;  %v3521_v18 = vmul.f32 %v3520_v60, %v3507_v8  ;;  %v3547_v16 = vmin.f32 %v3546_v41, 16.0  ;;  %v9905_v36 = vld [vmem:[#allocation17 + $0x3c0] sm:$0xf]  ;;  %v12339_v60 = vld [vmem:[#allocation17 + $0x3cc] sm:$0xf0] }
 0x80a   :  { %v3522_v30 = vadd.f32 0.014752088, %v3521_v18  ;;  %v3511_v13 = vadd.f32 0.0036580483, %v3510_v1  ;;  %v3548_v53 = vmul.f32 2.1237322e-06, %v3547_v16  ;;  %v9906_v1 = vor.u32 %v12339_v60, %v9905_v36 }
 0x80b   :  { %v3559_v23 = vmul.f32 3.8918573e-05, %v3547_v16  ;;  %v12297_v36 = vld [vmem:[#allocation17 + $0x284] sm:$0xf]  ;;  %v9747_v60 = vld [vmem:[#allocation17 + $0x290] sm:$0xf0] }
 0x80c   :  { %v3523_v7 = vmul.f32 %v3522_v30, %v3507_v8  ;;  %v3549_v40 = vadd.f32 0.00028619796, %v3548_v53  ;;  %v3512_v63 = vmul.f32 %v3511_v13, %v3507_v8  ;;  %v3502_v13 = vmul.f32 0.5, %v14706_v46 }
 0x80d   :  { %v3560_v22 = vadd.f32 0.001143296, %v3559_v23 }
 0x80e   :  { %v3524_v17 = vadd.f32 0.112945676, %v3523_v7  ;;  %v3550_v47 = vmul.f32 %v3549_v40, %v3547_v16  ;;  %v3513_v12 = vadd.f32 0.05243302, %v3512_v63 }
 0x80f   :  { %v3561_v58 = vmul.f32 %v3560_v22, %v3547_v16 }
 0x810   :  { %v3525_v51 = vmul.f32 %v3524_v17, %v3507_v8  ;;  %v3551_v44 = vadd.f32 0.0036580483, %v3550_v47  ;;  %v3514_v61 = vmul.f32 %v3513_v12, %v3507_v8  ;;  %v9873_v47 = vld [vmem:[#allocation17 + $0x380] sm:$0xf] }
 0x811   :  { %v3562_v57 = vadd.f32 0.014752088, %v3561_v58  ;;  %v12331_v58 = vld [vmem:[#allocation17 + $0x38c] sm:$0xf0] }
 0x812   :  { %v3526_v4 = vadd.f32 0.4994258, %v3525_v51  ;;  %v3552_v21 = vmul.f32 %v3551_v44, %v3547_v16  ;;  %v3515_v56 = vadd.f32 0.18741608, %v3514_v61  ;;  %v9874_v46 = vor.u32 %v12331_v58, %v9873_v47  ;;  %v12341_v61 = vld [vmem:[#allocation17 + $0x3e4] sm:$0xf] }
 0x813   :  { %v3563_v25 = vmul.f32 %v3562_v57, %v3547_v16  ;;  %v12309_v57 = vld [vmem:[#allocation17 + $0x2e4] sm:$0xf] }
 0x814   :  { %v3527_v29 = vmul.f32 %v3526_v4, %v3507_v8  ;;  %v3553_v2 = vadd.f32 0.05243302, %v3552_v21  ;;  %v3516_v54 = vmul.f32 %v3515_v56, %v3507_v8  ;;  %v9922_v8 = vor.u32 %v12343_v31, %v9921_v26  ;;  %v9795_v4 = vld [vmem:[#allocation17 + $0x2f0] sm:$0xf0]  ;;  %v12327_v21 = vld [vmem:[#allocation17 + $0x36c] sm:$0xf0] }
 0x815   :  { %v3564_v27 = vadd.f32 0.112945676, %v3563_v25  ;;  %v12311_v56 = vld [vmem:[#allocation17 + $0x2ec] sm:$0xf0]  ;;  %v12333_v26 = vld [vmem:[#allocation17 + $0x3a4] sm:$0xf] }
 0x816   :  { %v3528_v42 = vadd.f32 1.0, %v3527_v29  ;;  %v3554_v39 = vmul.f32 %v3553_v2, %v3547_v16  ;;  %v3517_v59 = vadd.f32 1.1283791, %v3516_v54  ;;  %4127 = vmatpush.bf16.msra.mxu2 %v9922_v8  ;;  %v9857_v29 = vld [vmem:[#allocation17 + $0x360] sm:$0xf] }
 0x817   :  { %v3565_v50 = vmul.f32 %v3564_v27, %v3547_v16  ;;  %v9923_v2 = vld [vmem:[#allocation17 + $0x3f0] sm:$0xf0]  ;;  %v9761_v8 = vld [vmem:[#allocation17 + $0x2a0] sm:$0xf]  ;;  %v12325_v58 = vld [vmem:[#allocation17 + $0x364] sm:$0xf] }
 0x818   :  { %12859 = vrcp.f32 %v3528_v42  ;;  %v3555_v24 = vadd.f32 0.18741608, %v3554_v39  ;;  %v3540_v52 = vand.u32 2147483648, %v3528_v42  ;;  %v3538_v55 = vand.u32 2147483647, %v3528_v42 }
 0x819   :  { %v3566_v19 = vadd.f32 0.4994258, %v3565_v50  ;;  %vm3534_vm11 = vweird.f32 %v3528_v42  ;;  %v3518_v34 = vmul.f32 %v3517_v59, %v14709_v15  ;;  %v12335_v15 = vld [vmem:[#allocation17 + $0x3ac] sm:$0xf0]  ;;  %v9798_v50 = vor.u32 %v12309_v57, %v9795_v4  ;;  %v9907_v59 = vld [vmem:[#allocation17 + $0x3d0] sm:$0xf0] }
 0x81a   :  { %v3556_v38 = vmul.f32 %v3555_v24, %v3547_v16  ;;  %v3541_v62 = vor.u32 1.1754944e-38, %v3540_v52  ;;  %vm3539_vm10 = vcmp.eq.f32.partialorder %v3538_v55, 8.507059e+37  ;;  %4128 = vmatpush.bf16.msra.mxu2 %v9906_v1  ;;  %v9858_v39 = vor.u32 %v12327_v21, %v9857_v29  ;;  %v12323_v52 = vld [vmem:[#allocation17 + $0x34c] sm:$0xf0]  ;;  %v9729_v4 = vld [vmem:[#allocation17 + $0x260] sm:$0xf] }
 0x81b   :  { %v3567_v14 = vmul.f32 %v3566_v19, %v3547_v16  ;;  %v9889_v16 = vld [vmem:[#allocation17 + $0x3a0] sm:$0xf]  ;;  %v9926_v54 = vor.u32 %v12341_v61, %v9923_v2  ;;  %v12307_v55 = vld [vmem:[#allocation17 + $0x2cc] sm:$0xf0]  ;;  %v12340_v29 = vld [vmem:[#allocation17 + $0x3d4] sm:$0xf0] }
 0x81c   :  { %v3557_v9 = vadd.f32 1.1283791, %v3556_v38  ;;  %v9890_v22 = vor.u32 %v12335_v15, %v9889_v16  ;;  %v9793_v19 = vld [vmem:[#allocation17 + $0x2e0] sm:$0xf]  ;;  %v12289_v21 = vld [vmem:[#allocation17 + $0x244] sm:$0xf] }
 0x81d   :  { %v3568_v5 = vadd.f32 1.0, %v3567_v14  ;;  %v9794_v24 = vor.u32 %v12311_v56, %v9793_v19  ;;  %v9809_v15 = vld [vmem:[#allocation17 + $0x300] sm:$0xf]  ;;  %v12321_v61 = vld [vmem:[#allocation17 + $0x344] sm:$0xf] }
 0x81e   :  { %v12860_v11 = vpop.eup %12859  ;;  %v3558_v7 = vmul.f32 %v3557_v9, %v14716_v49  ;;  %4129 = vmatpush.bf16.msra.mxu2 %v9890_v22  ;;  %v3503_v49 = vmul.f32 0.5, %v14713_v28  ;;  %v12319_v9 = vld [vmem:[#allocation17 + $0x32c] sm:$0xf0]  ;;  %v12293_v22 = vld [vmem:[#allocation17 + $0x264] sm:$0xf] }
 0x81f   :  { %v3530_v48 = vmul.f32 %v12860_v11, %v3528_v42  ;;  %12861 = vrcp.f32 %v3568_v5  ;;  %vm3535_vm0 = vweird.f32 %v12860_v11  ;;  %v3580_v32 = vand.u32 2147483648, %v3568_v5  ;;  %v3592_v42 = vld [vmem:[#allocation16] sm:$0x1]  ;;  %v9713_v56 = vld [vmem:[#allocation17 + $0x240] sm:$0xf] }
 0x820   :  { %vm3536_vm15 = vmor %vm3534_vm11, %vm3535_vm0  ;;  %v3578_v37 = vand.u32 2147483647, %v3568_v5  ;;  %vm3574_vm1 = vweird.f32 %v3568_v5  ;;  %vm8519_vm11 = vcmask 1041408  }
 0x821   :  { %v3531_v20 = vsub.f32 1.0, %v3530_v48  ;;  %v3581_v23 = vor.u32 1.1754944e-38, %v3580_v32  ;;  %v12337_v48 = vld [vmem:[#allocation17 + $0x3c4] sm:$0xf] }
 0x822   :  { %vm3579_vm8 = vcmp.eq.f32.partialorder %v3578_v37, 8.507059e+37  ;;  %4130 = vmatpush.bf16.msra.mxu2 %v9874_v46 }
 0x823   :  { %v3532_v33 = vmul.f32 %v12860_v11, %v3531_v20  ;;  %v9841_v20 = vld [vmem:[#allocation17 + $0x340] sm:$0xf] }
 0x825   :  { %v12862_v6 = vpop.eup %12861  ;;  %v3533_v3 = vadd.f32 %v12860_v11, %v3532_v33  ;;  %v9777_v33 = vld [vmem:[#allocation17 + $0x2c0] sm:$0xf] }
 0x826   :  { %v3570_v45 = vmul.f32 %v12862_v6, %v3568_v5  ;;  %vm3575_vm3 = vweird.f32 %v12862_v6  ;;  %v12305_v5 = vld [vmem:[#allocation17 + $0x2c4] sm:$0xf]  ;;  %4131 = vmatpush.bf16.msra.mxu2 %v9858_v39  ;;  %v9778_v31 = vor.u32 %v12307_v55, %v9777_v33  ;;  %v9697_v33 = vld [vmem:[#allocation17 + $0x220] sm:$0xf]  ;;  %v12287_v55 = vld [vmem:[#allocation17 + $0x22c] sm:$0xf0] }
 0x827   :  { %v3537_v35 = vsel %vm3536_vm15, %v12860_v11, %v3533_v3  ;;  %vm3576_vm7 = vmor %vm3574_vm1, %vm3575_vm3  ;;  %v9779_v11 = vld [vmem:[#allocation17 + $0x2d0] sm:$0xf0]  ;;  %v12301_v3 = vld [vmem:[#allocation17 + $0x2a4] sm:$0xf] }
 0x828   :  { %v3542_v0 = vsel %vm3539_vm10, %v3541_v62, %v3537_v35  ;;  %v3571_v43 = vsub.f32 1.0, %v3570_v45  ;;  %v9782_v38 = vor.u32 %v12305_v5, %v9779_v11  ;;  %v9763_v62 = vld [vmem:[#allocation17 + $0x2b0] sm:$0xf0]  ;;  %v9910_v35 = vor.u32 %v12337_v48, %v9907_v59  ;;  %v9897_v5 = vld [vmem:[#allocation17 + $0x3a8] sm:$0xf] }
 0x829   :  { %v3543_v10 = vmul.f32 %v3542_v0, %v3518_v34  ;;  %v3697_v45 = vld [vmem:[#allocation16 + $0x1] sm:$0x1]  ;;  %v9842_v34 = vor.u32 %v12323_v52, %v9841_v20  ;;  %v9825_v0 = vld [vmem:[#allocation17 + $0x320] sm:$0xf]  ;;  %v9766_v32 = vor.u32 %v12301_v3, %v9763_v62  ;;  %v12336_v11 = vld [vmem:[#allocation17 + $0x3b4] sm:$0xf0] }
 0x82a   :  { %v3572_v41 = vmul.f32 %v12862_v6, %v3571_v43  ;;  %v9891_v43 = vld [vmem:[#allocation17 + $0x3b0] sm:$0xf0]  ;;  %v9826_v37 = vor.u32 %v12319_v9, %v9825_v0  ;;  %v9898_v59 = vor.u32 %v12336_v11, %v9897_v5  ;;  %v9881_v3 = vld [vmem:[#allocation17 + $0x388] sm:$0xf]  ;;  %v12332_v62 = vld [vmem:[#allocation17 + $0x394] sm:$0xf0] }
 0x82b   :  { %v9673_v18 = vclamps-f32 %v3543_v10, 1.0  ;;  %v12303_v10 = vld [vmem:[#allocation17 + $0x2ac] sm:$0xf0]  ;;  %4132 = vmatpush.bf16.msra.mxu2 %v9842_v34  ;;  %v9894_v1 = vor.u32 %v12333_v26, %v9891_v43  ;;  %v9827_v20 = vld [vmem:[#allocation17 + $0x330] sm:$0xf0]  ;;  %vm8515_vm10 = vcmask 15360  }
 0x82c   :  { %v3573_v30 = vadd.f32 %v12862_v6, %v3572_v41  ;;  %v12329_v41 = vld [vmem:[#allocation17 + $0x384] sm:$0xf]  ;;  %v9762_v16 = vor.u32 %v12303_v10, %v9761_v8  ;;  %v9683_v34 = vld [vmem:[#allocation17 + $0x210] sm:$0xf0]  ;;  %v9803_v26 = vld [vmem:[#allocation17 + $0x2f8] sm:$0xf0]  ;;  %v9698_v8 = vor.u32 %v12287_v55, %v9697_v33 }
 0x82d   :  { %v3586_v53 = vadd.f32 1.0, %v9673_v18  ;;  %v9875_v18 = vld [vmem:[#allocation17 + $0x390] sm:$0xf0]  ;;  %v12313_v0 = vld [vmem:[#allocation17 + $0x304] sm:$0xf] }
 0x82e   :  { %v3577_v40 = vsel %vm3576_vm7, %v12862_v6, %v3573_v30  ;;  %v12315_v30 = vld [vmem:[#allocation17 + $0x30c] sm:$0xf0]  ;;  %v9878_v47 = vor.u32 %v12329_v41, %v9875_v18  ;;  %v9811_v9 = vld [vmem:[#allocation17 + $0x310] sm:$0xf0]  ;;  %v12342_v43 = vld [vmem:[#allocation17 + $0x3ec] sm:$0xf] }
 0x82f   :  { %v3588_v17 = vmul.f32 %v3586_v53, %v3502_v13  ;;  %v3582_v63 = vsel %vm3579_vm8, %v3581_v23, %v3577_v40  ;;  %v9745_v13 = vld [vmem:[#allocation17 + $0x280] sm:$0xf]  ;;  %v12299_v53 = vld [vmem:[#allocation17 + $0x28c] sm:$0xf0]  ;;  %v9750_v23 = vor.u32 %v12297_v36, %v9747_v60  ;;  %v12344_v40 = vld [vmem:[#allocation17 + $0x3f4] sm:$0xf0]  ;;  %4133 = vmatpush.bf16.msra.mxu2 %v9826_v37 }
 0x830   :  { %v3583_v51 = vmul.f32 %v3582_v63, %v3558_v7  ;;  %v9929_v7 = vld [vmem:[#allocation17 + $0x3e8] sm:$0xf]  ;;  %v9810_v63 = vor.u32 %v12315_v30, %v9809_v15  ;;  %v9931_v10 = vld [vmem:[#allocation17 + $0x3f8] sm:$0xf0]  ;;  %v9681_v36 = vld [vmem:[#allocation17 + $0x200] sm:$0xf] }
 0x831   :  { %v3590_v44 = vpack.c.bf16 %v3588_v17, %v3588_v17  ;;  %v9731_v17 = vld [vmem:[#allocation17 + $0x270] sm:$0xf0]  ;;  %v9930_v57 = vor.u32 %v12344_v40, %v9929_v7  ;;  %v12283_v60 = vld [vmem:[#allocation17 + $0x20c] sm:$0xf0]  ;;  %v9801_v37 = vld [vmem:[#allocation17 + $0x2e8] sm:$0xf]  ;;  %v9934_v7 = vor.u32 %v12342_v43, %v9931_v10 }
 0x832   :  { %v9674_v12 = vclamps-f32 %v3583_v51, 1.0  ;;  %v9859_v51 = vld [vmem:[#allocation17 + $0x370] sm:$0xf0]  ;;  %v9734_v46 = vor.u32 %v12293_v22, %v9731_v17  ;;  %v9865_v18 = vld [vmem:[#allocation17 + $0x368] sm:$0xf] }
 0x833   :  { %v14724_v25 = vsel %vm3597_vm9, %v3590_v44, 0  ;;  %v9746_v44 = vor.u32 %v12299_v53, %v9745_v13  ;;  %4134 = vmatpush.bf16.msra.mxu2 %v9810_v63  ;;  %v12328_v15 = vld [vmem:[#allocation17 + $0x374] sm:$0xf0]  ;;  %v12306_v30 = vld [vmem:[#allocation17 + $0x2cc] sm:$0xf]  ;;  %v9814_v53 = vor.u32 %v12313_v0, %v9811_v9 }
 0x834   :  { %v3587_v27 = vadd.f32 1.0, %v9674_v12  ;;  %3611 = vmatpush.bf16.msra.mxu3 %v14724_v25  ;;  %v12295_v12 = vld [vmem:[#allocation17 + $0x26c] sm:$0xf0]  ;;  %v9787_v13 = vld [vmem:[#allocation17 + $0x2d8] sm:$0xf0]  ;;  %v9866_v63 = vor.u32 %v12328_v15, %v9865_v18 }
 0x835   :  { %v9730_v2 = vor.u32 %v12295_v12, %v9729_v4  ;;  %v12338_v40 = vld [vmem:[#allocation17 + $0x3cc] sm:$0xf]  ;;  %v9915_v22 = vld [vmem:[#allocation17 + $0x3d8] sm:$0xf0]  ;;  %v9721_v18 = vld [vmem:[#allocation17 + $0x248] sm:$0xf] }
 0x836   :  { %v3589_v14 = vmul.f32 %v3587_v27, %v3503_v49  ;;  %v9913_v49 = vld [vmem:[#allocation17 + $0x3c8] sm:$0xf]  ;;  %v9715_v27 = vld [vmem:[#allocation17 + $0x250] sm:$0xf0]  ;;  %v12302_v4 = vld [vmem:[#allocation17 + $0x2ac] sm:$0xf] }
 0x837   :  { %9675 = vmatmul.msk.bf16.vlgmr.msra.gmra.mxu3 %vm3593_vm4, %v3592_v42  ;;  %4179 = vmatpush.bf16.msrb.mxu2 %v9930_v57  ;;  %v9914_v19 = vor.u32 %v12340_v29, %v9913_v49  ;;  %v9718_v39 = vor.u32 %v12289_v21, %v9715_v27  ;;  %v12324_v57 = vld [vmem:[#allocation17 + $0x354] sm:$0xf0]  ;;  %v9771_v12 = vld [vmem:[#allocation17 + $0x2b8] sm:$0xf0]  ;;  %v12334_v49 = vld [vmem:[#allocation17 + $0x3ac] sm:$0xf] }
 0x838   :  { %3708 = vmatpush.bf16.msrb.mxu3 %v14724_v25  ;;  %v3591_v28 = vpack.c.bf16 %v3589_v14, %v3589_v14  ;;  %v12291_v14 = vld [vmem:[#allocation17 + $0x24c] sm:$0xf0]  ;;  %v9899_v21 = vld [vmem:[#allocation17 + $0x3b8] sm:$0xf0]  ;;  %v12318_v33 = vld [vmem:[#allocation17 + $0x32c] sm:$0xf] }
 0x839   :  { %v9714_v52 = vor.u32 %v12291_v14, %v9713_v56  ;;  %v9902_v56 = vor.u32 %v12334_v49, %v9899_v21  ;;  %v9883_v5 = vld [vmem:[#allocation17 + $0x398] sm:$0xf0]  ;;  %v12314_v43 = vld [vmem:[#allocation17 + $0x30c] sm:$0xf]  ;;  %v12277_v49 = vld [vmem:[#allocation17 + $0x1e4] sm:$0xf] }
 0x83a   :  { %v14731_v6 = vsel %vm3597_vm9, %v3591_v28, 0  ;;  %v12285_v28 = vld [vmem:[#allocation17 + $0x224] sm:$0xf]  ;;  %v9835_v55 = vld [vmem:[#allocation17 + $0x338] sm:$0xf0] }
 0x83b   :  { %3624 = vmatpush.bf16.msra.mxu1 %v14731_v6  ;;  %3721 = vmatpush.bf16.msra.mxu0 %v14731_v6  ;;  %v12290_v15 = vld [vmem:[#allocation17 + $0x24c] sm:$0xf] }
 0x83c   :  { %4140 = vmatpush.bf16.msra.mxu3 %v9798_v50  ;;  %v9843_v50 = vld [vmem:[#allocation17 + $0x350] sm:$0xf0]  ;;  %4180 = vmatpush.bf16.msrb.mxu2 %v9914_v19  ;;  %v12320_v19 = vld [vmem:[#allocation17 + $0x334] sm:$0xf0] }
 0x83d   :  { %v9846_v48 = vor.u32 %v12321_v61, %v9843_v50  ;;  %v12304_v61 = vld [vmem:[#allocation17 + $0x2b4] sm:$0xf0]  ;;  %v9774_v50 = vor.u32 %v12302_v4, %v9771_v12  ;;  %v10177_v12 = vld [vmem:[#allocation17 + $0x1e0] sm:$0xf] }
 0x83e   :  { %9678 = vmatmul.msk.bf16.vlgmr.msra.gmra.mxu0 %vm3593_vm4, %v3697_v45  ;;  %9676 = vmatmul.msk.bf16.vlgmr.msra.gmra.mxu1 %vm3593_vm4, %v3592_v42  ;;  %v9862_v42 = vor.u32 %v12325_v58, %v9859_v51  ;;  %v12308_v58 = vld [vmem:[#allocation17 + $0x2d4] sm:$0xf0]  ;;  %v9849_v51 = vld [vmem:[#allocation17 + $0x348] sm:$0xf] }
 0x83f   :  { %4153 = vmatpush.bf16.msrb.mxu0 %v9926_v54  ;;  %4114 = vmatpush.bf16.msrb.mxu1 %v9794_v24  ;;  %v9699_v54 = vld [vmem:[#allocation17 + $0x230] sm:$0xf0]  ;;  %v12317_v24 = vld [vmem:[#allocation17 + $0x324] sm:$0xf]  ;;  %v9850_v27 = vor.u32 %v12324_v57, %v9849_v51  ;;  %v12282_v51 = vld [vmem:[#allocation17 + $0x20c] sm:$0xf] }
 0x840   :  { %4141 = vmatpush.bf16.msra.mxu3 %v9782_v38  ;;  %v9702_v38 = vor.u32 %v12285_v28, %v9699_v54  ;;  %4181 = vmatpush.bf16.msrb.mxu2 %v9898_v59  ;;  %v12326_v54 = vld [vmem:[#allocation17 + $0x36c] sm:$0xf]  ;;  %v9691_v57 = vld [vmem:[#allocation17 + $0x218] sm:$0xf0] }
 0x841   :  { %v9694_v4 = vor.u32 %v12282_v51, %v9691_v57  ;;  %v10081_v51 = vld [vmem:[#allocation17 + $0x120] sm:$0xf]  ;;  %v12237_v57 = vld [vmem:[#allocation17 + $0xa4] sm:$0xf] }
 0x843   :  { %4154 = vmatpush.bf16.msrb.mxu0 %v9910_v35  ;;  %4115 = vmatpush.bf16.msrb.mxu1 %v9778_v31  ;;  %v12310_v35 = vld [vmem:[#allocation17 + $0x2ec] sm:$0xf]  ;;  %v9830_v31 = vor.u32 %v12317_v24, %v9827_v20 }
 0x844   :  { %4142 = vmatpush.bf16.msra.mxu3 %v9766_v32  ;;  %v9882_v32 = vor.u32 %v12332_v62, %v9881_v3  ;;  %v12322_v20 = vld [vmem:[#allocation17 + $0x34c] sm:$0xf]  ;;  %v9753_v3 = vld [vmem:[#allocation17 + $0x288] sm:$0xf]  ;;  %v12300_v62 = vld [vmem:[#allocation17 + $0x294] sm:$0xf0] }
 0x846   :  { %4182 = vmatpush.bf16.msrb.mxu2 %v9882_v32  ;;  %v9737_v32 = vld [vmem:[#allocation17 + $0x268] sm:$0xf] }
 0x847   :  { %4155 = vmatpush.bf16.msrb.mxu0 %v9894_v1  ;;  %4116 = vmatpush.bf16.msrb.mxu1 %v9762_v16  ;;  %v12312_v1 = vld [vmem:[#allocation17 + $0x2f4] sm:$0xf0]  ;;  %v9806_v16 = vor.u32 %v12310_v35, %v9803_v26  ;;  %v12298_v26 = vld [vmem:[#allocation17 + $0x28c] sm:$0xf] }
 0x848   :  { %4143 = vmatpush.bf16.msra.mxu3 %v9750_v23  ;;  %v9682_v23 = vor.u32 %v12283_v60, %v9681_v36  ;;  %v9802_v17 = vor.u32 %v12312_v1, %v9801_v37  ;;  %v12316_v35 = vld [vmem:[#allocation17 + $0x314] sm:$0xf0]  ;;  %v12294_v60 = vld [vmem:[#allocation17 + $0x26c] sm:$0xf]  ;;  %v9739_v37 = vld [vmem:[#allocation17 + $0x278] sm:$0xf0] }
 0x849   :  { %9677 = vmatmul.msk.bf16.vlgmr.msrb.gmra.mxu3 %vm3593_vm4, %v3697_v45  ;;  %v12281_v45 = vld [vmem:[#allocation17 + $0x204] sm:$0xf]  ;;  %v12296_v36 = vld [vmem:[#allocation17 + $0x274] sm:$0xf0]  ;;  %v9742_v1 = vor.u32 %v12294_v60, %v9739_v37  ;;  %v10033_v37 = vld [vmem:[#allocation17 + $0xc0] sm:$0xf] }
 0x84a   :  { %v9686_v41 = vor.u32 %v12281_v45, %v9683_v34  ;;  %4183 = vmatpush.bf16.msrb.mxu2 %v9866_v63  ;;  %v9817_v45 = vld [vmem:[#allocation17 + $0x308] sm:$0xf]  ;;  %v9754_v34 = vor.u32 %v12300_v62, %v9753_v3  ;;  %v10131_v3 = vld [vmem:[#allocation17 + $0x190] sm:$0xf0] }
 0x84b   :  { %4156 = vmatpush.bf16.msrb.mxu0 %v9878_v47  ;;  %4117 = vmatpush.bf16.msrb.mxu1 %v9746_v44  ;;  %v9785_v47 = vld [vmem:[#allocation17 + $0x2c8] sm:$0xf]  ;;  %v9790_v44 = vor.u32 %v12306_v30, %v9787_v13  ;;  %v9818_v0 = vor.u32 %v12316_v35, %v9817_v45  ;;  %v9723_v13 = vld [vmem:[#allocation17 + $0x258] sm:$0xf0]  ;;  %v12247_v35 = vld [vmem:[#allocation17 + $0xec] sm:$0xf0] }
 0x84c   :  { %4144 = vmatpush.bf16.msra.mxu3 %v9734_v46  ;;  %v9918_v46 = vor.u32 %v12338_v40, %v9915_v22  ;;  %v9786_v29 = vor.u32 %v12308_v58, %v9785_v47  ;;  %v12286_v40 = vld [vmem:[#allocation17 + $0x22c] sm:$0xf]  ;;  %v9689_v47 = vld [vmem:[#allocation17 + $0x208] sm:$0xf]  ;;  %v12284_v58 = vld [vmem:[#allocation17 + $0x214] sm:$0xf0] }
 0x84e   :  { %4184 = vmatpush.bf16.msrb.mxu2 %v9850_v27 }
 0x84f   :  { %4157 = vmatpush.bf16.msrb.mxu0 %v9862_v42  ;;  %4118 = vmatpush.bf16.msrb.mxu1 %v9730_v2  ;;  %v9769_v42 = vld [vmem:[#allocation17 + $0x2a8] sm:$0xf] }
 0x850   :  { %4145 = vmatpush.bf16.msra.mxu3 %v9718_v39  ;;  %v9833_v2 = vld [vmem:[#allocation17 + $0x328] sm:$0xf]  ;;  %v9770_v14 = vor.u32 %v12304_v61, %v9769_v42  ;;  %v12330_v39 = vld [vmem:[#allocation17 + $0x38c] sm:$0xf] }
 0x851   :  { %v9834_v11 = vor.u32 %v12320_v19, %v9833_v2  ;;  %v9886_v28 = vor.u32 %v12330_v39, %v9883_v5  ;;  %v12275_v19 = vld [vmem:[#allocation17 + $0x1cc] sm:$0xf0] }
 0x853   :  { %4158 = vmatpush.bf16.msrb.mxu0 %v9846_v48  ;;  %4119 = vmatpush.bf16.msrb.mxu1 %v9714_v52  ;;  %v9867_v48 = vld [vmem:[#allocation17 + $0x378] sm:$0xf0] }
 0x854   :  { %4146 = vmatpush.bf16.msra.mxu3 %v9702_v38  ;;  %4185 = vmatpush.bf16.msrb.mxu2 %v9834_v11  ;;  %v9870_v24 = vor.u32 %v12326_v54, %v9867_v48  ;;  %v9851_v52 = vld [vmem:[#allocation17 + $0x358] sm:$0xf0]  ;;  %v9838_v38 = vor.u32 %v12318_v33, %v9835_v55  ;;  %v10145_v11 = vld [vmem:[#allocation17 + $0x1a0] sm:$0xf]  ;;  %v12269_v54 = vld [vmem:[#allocation17 + $0x1a4] sm:$0xf] }
 0x855   :  { %v9854_v59 = vor.u32 %v12322_v20, %v9851_v52  ;;  %v10147_v48 = vld [vmem:[#allocation17 + $0x1b0] sm:$0xf0]  ;;  %v12267_v55 = vld [vmem:[#allocation17 + $0x18c] sm:$0xf0] }
 0x856   :  { %v10150_v52 = vor.u32 %v12269_v54, %v10147_v48  ;;  %v10185_v54 = vld [vmem:[#allocation17 + $0x1e8] sm:$0xf]  ;;  %v12280_v48 = vld [vmem:[#allocation17 + $0x1f4] sm:$0xf0] }
 0x857   :  { %4159 = vmatpush.bf16.msrb.mxu0 %v9830_v31  ;;  %4120 = vmatpush.bf16.msrb.mxu1 %v9698_v8  ;;  %v9755_v31 = vld [vmem:[#allocation17 + $0x298] sm:$0xf0] }
 0x858   :  { %4147 = vmatpush.bf16.msra.mxu3 %v9686_v41  ;;  %v9758_v9 = vor.u32 %v12298_v26, %v9755_v31  ;;  %v9819_v8 = vld [vmem:[#allocation17 + $0x318] sm:$0xf0]  ;;  %4186 = vmatpush.bf16.msrb.mxu2 %v9818_v0  ;;  %v9738_v41 = vor.u32 %v12296_v36, %v9737_v32  ;;  %v10113_v26 = vld [vmem:[#allocation17 + $0x160] sm:$0xf]  ;;  %v12263_v31 = vld [vmem:[#allocation17 + $0x16c] sm:$0xf0] }
 0x859   :  { %v9822_v10 = vor.u32 %v12314_v43, %v9819_v8  ;;  %v12245_v0 = vld [vmem:[#allocation17 + $0xe4] sm:$0xf]  ;;  %v10051_v43 = vld [vmem:[#allocation17 + $0xf0] sm:$0xf0] }
 0x85a   :  { %v12261_v8 = vld [vmem:[#allocation17 + $0x164] sm:$0xf] }
 0x85b   :  { %4160 = vmatpush.bf16.msrb.mxu0 %v9814_v53  ;;  %4121 = vmatpush.bf16.msrb.mxu1 %v9682_v23  ;;  %v9726_v53 = vor.u32 %v12290_v15, %v9723_v13  ;;  %v9705_v23 = vld [vmem:[#allocation17 + $0x228] sm:$0xf]  ;;  %v10097_v15 = vld [vmem:[#allocation17 + $0x140] sm:$0xf]  ;;  %v12241_v13 = vld [vmem:[#allocation17 + $0xc4] sm:$0xf] }
 0x85c   :  { %4192 = vmatpush.bf16.msrb.mxu3 %v9806_v16  ;;  %v12292_v16 = vld [vmem:[#allocation17 + $0x254] sm:$0xf0] }
 0x85d   :  { %v9722_v30 = vor.u32 %v12292_v16, %v9721_v18  ;;  %v10054_v18 = vor.u32 %v12245_v0, %v10051_v43  ;;  %v12274_v0 = vld [vmem:[#allocation17 + $0x1cc] sm:$0xf]  ;;  %v10171_v43 = vld [vmem:[#allocation17 + $0x1d8] sm:$0xf0] }
 0x85f   :  { %4205 = vmatpush.bf16.msra.mxu0 %v9934_v7  ;;  %4166 = vmatpush.bf16.msra.mxu1 %v9802_v17  ;;  %v12288_v7 = vld [vmem:[#allocation17 + $0x234] sm:$0xf0]  ;;  %v9707_v17 = vld [vmem:[#allocation17 + $0x238] sm:$0xf0] }
 0x860   :  { %4193 = vmatpush.bf16.msrb.mxu3 %v9790_v44  ;;  %v9706_v22 = vor.u32 %v12288_v7, %v9705_v23  ;;  %v9710_v63 = vor.u32 %v12286_v40, %v9707_v17  ;;  %v9690_v44 = vor.u32 %v12284_v58, %v9689_v47  ;;  %v12257_v23 = vld [vmem:[#allocation17 + $0x144] sm:$0xf]  ;;  %v10099_v7 = vld [vmem:[#allocation17 + $0x150] sm:$0xf0]  ;;  %v10017_v17 = vld [vmem:[#allocation17 + $0xa0] sm:$0xf] }
 0x861   :  { %v10102_v58 = vor.u32 %v12257_v23, %v10099_v7  ;;  %v9953_v7 = vld [vmem:[#allocation17 + $0x20] sm:$0xf] }
 0x863   :  { %4206 = vmatpush.bf16.msra.mxu0 %v9918_v46  ;;  %4167 = vmatpush.bf16.msra.mxu1 %v9786_v29  ;;  %v12279_v46 = vld [vmem:[#allocation17 + $0x1ec] sm:$0xf0]  ;;  %v10179_v29 = vld [vmem:[#allocation17 + $0x1f0] sm:$0xf0] }
 0x864   :  { %4194 = vmatpush.bf16.msrb.mxu3 %v9774_v50  ;;  %v10178_v42 = vor.u32 %v12279_v46, %v10177_v12  ;;  %v10182_v61 = vor.u32 %v12277_v49, %v10179_v29  ;;  %v10161_v50 = vld [vmem:[#allocation17 + $0x1c0] sm:$0xf]  ;;  %v10019_v12 = vld [vmem:[#allocation17 + $0xb0] sm:$0xf0]  ;;  %v12253_v46 = vld [vmem:[#allocation17 + $0x124] sm:$0xf] }
 0x865   :  { %v10162_v39 = vor.u32 %v12275_v19, %v10161_v50  ;;  %v10083_v49 = vld [vmem:[#allocation17 + $0x130] sm:$0xf0]  ;;  %v12235_v50 = vld [vmem:[#allocation17 + $0x8c] sm:$0xf0]  ;;  %v10022_v19 = vor.u32 %v12237_v57, %v10019_v12 }
 0x867   :  { %4207 = vmatpush.bf16.msra.mxu0 %v9902_v56  ;;  %4168 = vmatpush.bf16.msra.mxu1 %v9770_v14  ;;  %v12273_v56 = vld [vmem:[#allocation17 + $0x1c4] sm:$0xf]  ;;  %v10163_v14 = vld [vmem:[#allocation17 + $0x1d0] sm:$0xf0] }
 0x868   :  { %4195 = vmatpush.bf16.msrb.mxu3 %v9758_v9  ;;  %v10166_v5 = vor.u32 %v12273_v56, %v10163_v14  ;;  %v10086_v56 = vor.u32 %v12253_v46, %v10083_v49  ;;  %v12251_v14 = vld [vmem:[#allocation17 + $0x10c] sm:$0xf0]  ;;  %v12217_v49 = vld [vmem:[#allocation17 + $0x4] sm:$0xf] }
 0x869   :  { %v12219_v46 = vld [vmem:[#allocation17 + $0xc] sm:$0xf0] }
 0x86b   :  { %4208 = vmatpush.bf16.msra.mxu0 %v9886_v28  ;;  %4169 = vmatpush.bf16.msra.mxu1 %v9754_v34  ;;  %v12271_v28 = vld [vmem:[#allocation17 + $0x1ac] sm:$0xf0]  ;;  %v10049_v34 = vld [vmem:[#allocation17 + $0xe0] sm:$0xf] }
 0x86c   :  { %4196 = vmatpush.bf16.msrb.mxu3 %v9742_v1  ;;  %v10146_v20 = vor.u32 %v12271_v28, %v10145_v11  ;;  %v10050_v60 = vor.u32 %v12247_v35, %v10049_v34  ;;  %v12243_v1 = vld [vmem:[#allocation17 + $0xcc] sm:$0xf0]  ;;  %v12249_v11 = vld [vmem:[#allocation17 + $0x104] sm:$0xf]  ;;  %v10067_v28 = vld [vmem:[#allocation17 + $0x110] sm:$0xf0] }
 0x86d   :  { %v10034_v40 = vor.u32 %v12243_v1, %v10033_v37  ;;  %v12229_v34 = vld [vmem:[#allocation17 + $0x64] sm:$0xf]  ;;  %v9987_v35 = vld [vmem:[#allocation17 + $0x70] sm:$0xf0]  ;;  %v10174_v1 = vor.u32 %v12274_v0, %v10171_v43  ;;  %v10025_v0 = vld [vmem:[#allocation17 + $0xa8] sm:$0xf] }
 0x86e   :  { %v12240_v43 = vld [vmem:[#allocation17 + $0xb4] sm:$0xf0] }
 0x86f   :  { %4209 = vmatpush.bf16.msra.mxu0 %v9870_v24  ;;  %4170 = vmatpush.bf16.msra.mxu1 %v9738_v41  ;;  %v10114_v41 = vor.u32 %v12263_v31, %v10113_v26  ;;  %v10169_v26 = vld [vmem:[#allocation17 + $0x1c8] sm:$0xf]  ;;  %v12276_v31 = vld [vmem:[#allocation17 + $0x1d4] sm:$0xf0] }
 0x870   :  { %4197 = vmatpush.bf16.msrb.mxu3 %v9726_v53  ;;  %v10035_v53 = vld [vmem:[#allocation17 + $0xd0] sm:$0xf0]  ;;  %v10170_v37 = vor.u32 %v12276_v31, %v10169_v26 }
 0x871   :  { %v10038_v47 = vor.u32 %v12241_v13, %v10035_v53  ;;  %v12270_v13 = vld [vmem:[#allocation17 + $0x1ac] sm:$0xf] }
 0x873   :  { %4210 = vmatpush.bf16.msra.mxu0 %v9854_v59  ;;  %4171 = vmatpush.bf16.msra.mxu1 %v9722_v30  ;;  %v10129_v59 = vld [vmem:[#allocation17 + $0x180] sm:$0xf]  ;;  %v12259_v30 = vld [vmem:[#allocation17 + $0x14c] sm:$0xf0] }
 0x874   :  { %4198 = vmatpush.bf16.msrb.mxu3 %v9710_v63  ;;  %v10130_v62 = vor.u32 %v12267_v55, %v10129_v59  ;;  %v12239_v63 = vld [vmem:[#allocation17 + $0xac] sm:$0xf0]  ;;  %v10070_v55 = vor.u32 %v12249_v11, %v10067_v28  ;;  %v10123_v11 = vld [vmem:[#allocation17 + $0x178] sm:$0xf0] }
 0x877   :  { %4211 = vmatpush.bf16.msra.mxu0 %v9838_v38  ;;  %4172 = vmatpush.bf16.msra.mxu1 %v9706_v22  ;;  %v12265_v38 = vld [vmem:[#allocation17 + $0x184] sm:$0xf]  ;;  %v10098_v22 = vor.u32 %v12259_v30, %v10097_v15  ;;  %v10153_v15 = vld [vmem:[#allocation17 + $0x1a8] sm:$0xf]  ;;  %v12272_v30 = vld [vmem:[#allocation17 + $0x1b4] sm:$0xf0] }
 0x878   :  { %4199 = vmatpush.bf16.msrb.mxu3 %v9694_v4  ;;  %v10134_v45 = vor.u32 %v12265_v38, %v10131_v3  ;;  %v9985_v38 = vld [vmem:[#allocation17 + $0x60] sm:$0xf]  ;;  %v12231_v3 = vld [vmem:[#allocation17 + $0x6c] sm:$0xf0] }
 0x87b   :  { %4212 = vmatpush.bf16.msra.mxu0 %v9822_v10  ;;  %4173 = vmatpush.bf16.msra.mxu1 %v9690_v44  ;;  %v10115_v10 = vld [vmem:[#allocation17 + $0x170] sm:$0xf0]  ;;  %v12255_v44 = vld [vmem:[#allocation17 + $0x12c] sm:$0xf0] }
 0x87c   :  { %v10118_v16 = vor.u32 %v12261_v8, %v10115_v10  ;;  %v9986_v8 = vor.u32 %v12231_v3, %v9985_v38  ;;  %v12242_v38 = vld [vmem:[#allocation17 + $0xcc] sm:$0xf]  ;;  %v10043_v3 = vld [vmem:[#allocation17 + $0xd8] sm:$0xf0] }
 0x87d   :  { %v10046_v31 = vor.u32 %v12242_v38, %v10043_v3  ;;  %v12403_v38 = vld [vmem:[#allocation17 + $0x5cc] sm:$0xf0] }
 0x8ba   :  { %v14738_v21 = vpop.f32.mrf.mxu3 }
 0x8bb   :  { %v3723_v27 = vpop.f32.mrf.mxu0  ;;  %v14740_v9 = vpop.f32.mrf.mxu1 }
 0x8bc   :  { %v3728_v2 = vpack.c.bf16 %v3723_v27, %v3723_v27  ;;  %v10018_v27 = vor.u32 %v12239_v63, %v10017_v17  ;;  %v14748_v10 = vpack.c.bf16 %v14740_v9, %v14740_v9  ;;  %v10155_v9 = vld [vmem:[#allocation17 + $0x1b8] sm:$0xf0]  ;;  %v12221_v63 = vld [vmem:[#allocation17 + $0x24] sm:$0xf] }
 0x8bd   :  { %v10158_v17 = vor.u32 %v12270_v13, %v10155_v9  ;;  %v12236_v13 = vld [vmem:[#allocation17 + $0x94] sm:$0xf0]  ;;  %v10073_v9 = vld [vmem:[#allocation17 + $0x108] sm:$0xf] }
 0x8be   :  { %4135 = vmatmul.bf16.vlgmr.msra.gmra.mxu2 %v3728_v2  ;;  %4161 = vmatmul.bf16.vlgmr.msrb.gmra.mxu0 %v3728_v2 }
 0x8bf   :  { %4551 = vmatpush.bf16.msra.mxu2 %v10178_v42  ;;  %4577 = vmatpush.bf16.msrb.mxu0 %v10182_v61  ;;  %v10082_v42 = vor.u32 %v12255_v44, %v10081_v51  ;;  %v10001_v61 = vld [vmem:[#allocation17 + $0x80] sm:$0xf]  ;;  %v12266_v51 = vld [vmem:[#allocation17 + $0x18c] sm:$0xf]  ;;  %v10139_v44 = vld [vmem:[#allocation17 + $0x198] sm:$0xf0] }
 0x8c2   :  { %v3615_v24 = vpop.f32.mrf.mxu3 }
 0x8c3   :  { %4552 = vmatpush.bf16.msra.mxu2 %v10162_v39  ;;  %4578 = vmatpush.bf16.msrb.mxu0 %v10166_v5  ;;  %v3725_v33 = vpop.f32.mrf.mxu0  ;;  %v3628_v4 = vpop.f32.mrf.mxu1  ;;  %v12233_v39 = vld [vmem:[#allocation17 + $0x84] sm:$0xf]  ;;  %v10003_v5 = vld [vmem:[#allocation17 + $0x90] sm:$0xf0]  ;;  %v12278_v24 = vld [vmem:[#allocation17 + $0x1ec] sm:$0xf] }
 0x8c4   :  { %v10006_v33 = vor.u32 %v12233_v39, %v10003_v5  ;;  %v9937_v4 = vld [vmem:[#allocation17] sm:$0xf]  ;;  %v12262_v5 = vld [vmem:[#allocation17 + $0x16c] sm:$0xf] }
 0x8c5   :  { %v9938_v39 = vor.u32 %v12219_v46, %v9937_v4  ;;  %v9995_v4 = vld [vmem:[#allocation17 + $0x78] sm:$0xf0] }
 0x8c7   :  { %4553 = vmatpush.bf16.msra.mxu2 %v10146_v20  ;;  %4579 = vmatpush.bf16.msrb.mxu0 %v10150_v52  ;;  %v10187_v20 = vld [vmem:[#allocation17 + $0x1f8] sm:$0xf0]  ;;  %v10002_v52 = vor.u32 %v12235_v50, %v10001_v61  ;;  %v10057_v61 = vld [vmem:[#allocation17 + $0xe8] sm:$0xf]  ;;  %v12248_v50 = vld [vmem:[#allocation17 + $0xf4] sm:$0xf0] }
 0x8cb   :  { %4554 = vmatpush.bf16.msra.mxu2 %v10130_v62  ;;  %4580 = vmatpush.bf16.msrb.mxu0 %v10134_v45  ;;  %v10186_v62 = vor.u32 %v12280_v48, %v10185_v54  ;;  %v10190_v45 = vor.u32 %v12278_v24, %v10187_v20  ;;  %v10058_v54 = vor.u32 %v12248_v50, %v10057_v61  ;;  %v10041_v20 = vld [vmem:[#allocation17 + $0xc8] sm:$0xf] }
 0x8cc   :  { %v3710_v32 = vpop.f32.mrf.mxu3 }
 0x8cd   :  { %v14742_v36 = vpack.c.bf16 %v3710_v32, %v3710_v32  ;;  %v9990_v32 = vor.u32 %v12229_v34, %v9987_v35  ;;  %v14756_v34 = vpack.c.bf16 %v14738_v21, %v14738_v21  ;;  %v12254_v21 = vld [vmem:[#allocation17 + $0x12c] sm:$0xf] }
 0x8ce   :  { %4187 = vmatmul.bf16.vlgmr.msrb.gmra.mxu2 %v3728_v2  ;;  %4213 = vmatmul.bf16.vlgmr.msra.gmra.mxu0 %v3728_v2  ;;  %v10065_v2 = vld [vmem:[#allocation17 + $0x100] sm:$0xf] }
 0x8cf   :  { %4122 = vmatmul.bf16.vlgmr.msrb.gmra.mxu1 %v14742_v36  ;;  %4148 = vmatmul.bf16.vlgmr.msra.gmra.mxu3 %v14742_v36  ;;  %v10066_v59 = vor.u32 %v12251_v14, %v10065_v2  ;;  %v10121_v2 = vld [vmem:[#allocation17 + $0x168] sm:$0xf]  ;;  %v10059_v14 = vld [vmem:[#allocation17 + $0xf8] sm:$0xf0] }
 0x8d0   :  { %4538 = vmatpush.bf16.msrb.mxu1 %v10050_v60  ;;  %4555 = vmatpush.bf16.msra.mxu2 %v10114_v41  ;;  %v9969_v60 = vld [vmem:[#allocation17 + $0x40] sm:$0xf]  ;;  %v12227_v41 = vld [vmem:[#allocation17 + $0x4c] sm:$0xf0] }
 0x8d1   :  { %4564 = vmatpush.bf16.msra.mxu3 %v10054_v18  ;;  %4581 = vmatpush.bf16.msrb.mxu0 %v10118_v16  ;;  %v12225_v18 = vld [vmem:[#allocation17 + $0x44] sm:$0xf]  ;;  %v9971_v16 = vld [vmem:[#allocation17 + $0x50] sm:$0xf0]  ;;  %v9970_v53 = vor.u32 %v12227_v41, %v9969_v60  ;;  %v12256_v60 = vld [vmem:[#allocation17 + $0x134] sm:$0xf0] }
 0x8d2   :  { %v9974_v23 = vor.u32 %v12225_v18, %v9971_v16  ;;  %v12238_v41 = vld [vmem:[#allocation17 + $0xac] sm:$0xf]  ;;  %v10026_v18 = vor.u32 %v12240_v43, %v10025_v0  ;;  %v12375_v0 = vld [vmem:[#allocation17 + $0x4ec] sm:$0xf0] }
 0x8d4   :  { %v3712_v29 = vpop.f32.mrf.mxu3  ;;  %4539 = vmatpush.bf16.msrb.mxu1 %v10034_v40  ;;  %4556 = vmatpush.bf16.msra.mxu2 %v10098_v22  ;;  %v12223_v40 = vld [vmem:[#allocation17 + $0x2c] sm:$0xf0]  ;;  %v10154_v22 = vor.u32 %v12272_v30, %v10153_v15  ;;  %v10009_v30 = vld [vmem:[#allocation17 + $0x88] sm:$0xf] }
 0x8d5   :  { %4565 = vmatpush.bf16.msra.mxu3 %v10038_v47  ;;  %4582 = vmatpush.bf16.msrb.mxu0 %v10102_v58  ;;  %v9955_v47 = vld [vmem:[#allocation17 + $0x30] sm:$0xf0]  ;;  %v12268_v58 = vld [vmem:[#allocation17 + $0x194] sm:$0xf0]  ;;  %v9954_v57 = vor.u32 %v12223_v40, %v9953_v7  ;;  %v12234_v7 = vld [vmem:[#allocation17 + $0x8c] sm:$0xf] }
 0x8d6   :  { %v9958_v12 = vor.u32 %v12221_v63, %v9955_v47  ;;  %v9939_v29 = vld [vmem:[#allocation17 + $0x10] sm:$0xf0]  ;;  %v10011_v40 = vld [vmem:[#allocation17 + $0x98] sm:$0xf0]  ;;  %v10010_v63 = vor.u32 %v12236_v13, %v10009_v30  ;;  %v12391_v30 = vld [vmem:[#allocation17 + $0x56c] sm:$0xf0] }
 0x8d7   :  { %v9942_v28 = vor.u32 %v12217_v49, %v9939_v29  ;;  %v9977_v49 = vld [vmem:[#allocation17 + $0x48] sm:$0xf]  ;;  %v12228_v29 = vld [vmem:[#allocation17 + $0x54] sm:$0xf0] }
 0x8d8   :  { %4540 = vmatpush.bf16.msrb.mxu1 %v10018_v27  ;;  %4557 = vmatpush.bf16.msra.mxu2 %v10082_v42  ;;  %v10142_v42 = vor.u32 %v12266_v51, %v10139_v44  ;;  %v12232_v51 = vld [vmem:[#allocation17 + $0x74] sm:$0xf0]  ;;  %v9978_v61 = vor.u32 %v12228_v29, %v9977_v49  ;;  %v10405_v29 = vld [vmem:[#allocation17 + $0x5b0] sm:$0xf0] }
 0x8d9   :  { %4566 = vmatpush.bf16.msra.mxu3 %v10022_v19  ;;  %4583 = vmatpush.bf16.msrb.mxu0 %v10086_v56  ;;  %v12264_v19 = vld [vmem:[#allocation17 + $0x174] sm:$0xf0]  ;;  %v12246_v56 = vld [vmem:[#allocation17 + $0xec] sm:$0xf] }
 0x8da   :  { %v10122_v48 = vor.u32 %v12264_v19, %v10121_v2  ;;  %v10062_v24 = vor.u32 %v12246_v56, %v10059_v14  ;;  %v9961_v2 = vld [vmem:[#allocation17 + $0x28] sm:$0xf]  ;;  %v12224_v19 = vld [vmem:[#allocation17 + $0x34] sm:$0xf0]  ;;  %v12222_v56 = vld [vmem:[#allocation17 + $0x2c] sm:$0xf] }
 0x8db   :  { %v9963_v14 = vld [vmem:[#allocation17 + $0x38] sm:$0xf0] }
 0x8dc   :  { %4541 = vmatpush.bf16.msrb.mxu1 %v10002_v52  ;;  %4558 = vmatpush.bf16.msra.mxu2 %v10066_v59  ;;  %v12244_v52 = vld [vmem:[#allocation17 + $0xd4] sm:$0xf0]  ;;  %v10105_v59 = vld [vmem:[#allocation17 + $0x148] sm:$0xf] }
 0x8dd   :  { %4567 = vmatpush.bf16.msra.mxu3 %v10006_v33  ;;  %4584 = vmatpush.bf16.msrb.mxu0 %v10070_v55  ;;  %v10126_v33 = vor.u32 %v12262_v5, %v10123_v11  ;;  %v12260_v55 = vld [vmem:[#allocation17 + $0x154] sm:$0xf0]  ;;  %v10042_v35 = vor.u32 %v12244_v52, %v10041_v20  ;;  %v9966_v5 = vor.u32 %v12222_v56, %v9963_v14  ;;  %v9945_v11 = vld [vmem:[#allocation17 + $0x8] sm:$0xf]  ;;  %v10435_v52 = vld [vmem:[#allocation17 + $0x5e0] sm:$0xf] }
 0x8de   :  { %v10106_v26 = vor.u32 %v12260_v55, %v10105_v59  ;;  %v12407_v59 = vld [vmem:[#allocation17 + $0x5ec] sm:$0xf0]  ;;  %v10419_v55 = vld [vmem:[#allocation17 + $0x5c0] sm:$0xf] }
 0x8df   :  { %4174 = vmatmul.bf16.vlgmr.msra.gmra.mxu1 %v14742_v36  ;;  %4200 = vmatmul.bf16.vlgmr.msrb.gmra.mxu3 %v14742_v36  ;;  %v10137_v36 = vld [vmem:[#allocation17 + $0x188] sm:$0xf]  ;;  %v10420_v3 = vor.u32 %v12403_v38, %v10419_v55  ;;  %v10243_v56 = vld [vmem:[#allocation17 + $0x460] sm:$0xf]  ;;  %v12359_v14 = vld [vmem:[#allocation17 + $0x46c] sm:$0xf0] }
 0x8e0   :  { %4603 = vmatpush.bf16.msrb.mxu2 %v10186_v62  ;;  %4542 = vmatpush.bf16.msrb.mxu1 %v9986_v8  ;;  %v10138_v27 = vor.u32 %v12268_v58, %v10137_v36  ;;  %v12258_v62 = vld [vmem:[#allocation17 + $0x14c] sm:$0xf]  ;;  %v10089_v8 = vld [vmem:[#allocation17 + $0x128] sm:$0xf]  ;;  %v10014_v36 = vor.u32 %v12234_v7, %v10011_v40  ;;  %v12401_v7 = vld [vmem:[#allocation17 + $0x5c4] sm:$0xf] }
 0x8e1   :  { %4629 = vmatpush.bf16.msra.mxu0 %v10190_v45  ;;  %4559 = vmatmul.bf16.vlgmr.msra.gmra.mxu2 %v14748_v10  ;;  %v10107_v45 = vld [vmem:[#allocation17 + $0x158] sm:$0xf0]  ;;  %v10090_v16 = vor.u32 %v12256_v60, %v10089_v8  ;;  %v9993_v58 = vld [vmem:[#allocation17 + $0x68] sm:$0xf]  ;;  %v10387_v8 = vld [vmem:[#allocation17 + $0x580] sm:$0xf] }
 0x8e2   :  { %4568 = vmatpush.bf16.msra.mxu3 %v9990_v32  ;;  %4585 = vmatmul.bf16.vlgmr.msrb.gmra.mxu0 %v14748_v10  ;;  %v10110_v32 = vor.u32 %v12258_v62, %v10107_v45  ;;  %v10403_v45 = vld [vmem:[#allocation17 + $0x5a0] sm:$0xf] }
 0x8e4   :  { %4604 = vmatpush.bf16.msrb.mxu2 %v10170_v37  ;;  %4543 = vmatpush.bf16.msrb.mxu1 %v9970_v53  ;;  %v10027_v37 = vld [vmem:[#allocation17 + $0xb8] sm:$0xf0] }
 0x8e5   :  { %4630 = vmatpush.bf16.msra.mxu0 %v10174_v1  ;;  %v10091_v1 = vld [vmem:[#allocation17 + $0x138] sm:$0xf0]  ;;  %v10030_v15 = vor.u32 %v12238_v41, %v10027_v37  ;;  %v10291_v37 = vld [vmem:[#allocation17 + $0x4c0] sm:$0xf] }
 0x8e6   :  { %4569 = vmatpush.bf16.msra.mxu3 %v9974_v23  ;;  %v10094_v53 = vor.u32 %v12254_v21, %v10091_v1  ;;  %v12252_v23 = vld [vmem:[#allocation17 + $0x114] sm:$0xf0]  ;;  %v12371_v21 = vld [vmem:[#allocation17 + $0x4cc] sm:$0xf0]  ;;  %v12405_v1 = vld [vmem:[#allocation17 + $0x5e4] sm:$0xf] }
 0x8e7   :  { %v10074_v47 = vor.u32 %v12252_v23, %v10073_v9  ;;  %v12367_v23 = vld [vmem:[#allocation17 + $0x4ac] sm:$0xf0] }
 0x8e8   :  { %4605 = vmatpush.bf16.msrb.mxu2 %v10154_v22  ;;  %4544 = vmatpush.bf16.msrb.mxu1 %v9954_v57  ;;  %v12250_v22 = vld [vmem:[#allocation17 + $0x10c] sm:$0xf] }
 0x8e9   :  { %4631 = vmatpush.bf16.msra.mxu0 %v10158_v17  ;;  %v10075_v17 = vld [vmem:[#allocation17 + $0x118] sm:$0xf0]  ;;  %v12230_v57 = vld [vmem:[#allocation17 + $0x6c] sm:$0xf] }
 0x8ea   :  { %4570 = vmatpush.bf16.msra.mxu3 %v9958_v12  ;;  %v10078_v44 = vor.u32 %v12250_v22, %v10075_v17  ;;  %v9994_v12 = vor.u32 %v12232_v51, %v9993_v58  ;;  %v9998_v46 = vor.u32 %v12230_v57, %v9995_v4  ;;  %v10421_v22 = vld [vmem:[#allocation17 + $0x5d0] sm:$0xf0]  ;;  %v10259_v4 = vld [vmem:[#allocation17 + $0x480] sm:$0xf] }
 0x8eb   :  { %v10424_v17 = vor.u32 %v12401_v7, %v10421_v22  ;;  %v10261_v22 = vld [vmem:[#allocation17 + $0x490] sm:$0xf0] }
 0x8ec   :  { %4606 = vmatpush.bf16.msrb.mxu2 %v10138_v27  ;;  %4545 = vmatpush.bf16.msrb.mxu1 %v9938_v39  ;;  %v12226_v27 = vld [vmem:[#allocation17 + $0x4c] sm:$0xf]  ;;  %v9962_v39 = vor.u32 %v12224_v19, %v9961_v2  ;;  %v10309_v19 = vld [vmem:[#allocation17 + $0x4f0] sm:$0xf0] }
 0x8ed   :  { %4632 = vmatpush.bf16.msra.mxu0 %v10142_v42  ;;  %v9979_v42 = vld [vmem:[#allocation17 + $0x58] sm:$0xf0] }
 0x8ee   :  { %4571 = vmatpush.bf16.msra.mxu3 %v9942_v28  ;;  %v9982_v50 = vor.u32 %v12226_v27, %v9979_v42  ;;  %v12220_v28 = vld [vmem:[#allocation17 + $0x14] sm:$0xf0]  ;;  %v10339_v42 = vld [vmem:[#allocation17 + $0x520] sm:$0xf] }
 0x8ef   :  { %4546 = vmatmul.bf16.vlgmr.msrb.gmra.mxu1 %v14756_v34 }
 0x8f0   :  { %4590 = vmatpush.bf16.msra.mxu1 %v10058_v54  ;;  %4607 = vmatpush.bf16.msrb.mxu2 %v10122_v48  ;;  %v12218_v54 = vld [vmem:[#allocation17 + $0xc] sm:$0xf]  ;;  %v9947_v48 = vld [vmem:[#allocation17 + $0x18] sm:$0xf0] }
 0x8f1   :  { %4633 = vmatpush.bf16.msra.mxu0 %v10126_v33  ;;  %4572 = vmatmul.bf16.vlgmr.msra.gmra.mxu3 %v14756_v34  ;;  %v9950_v20 = vor.u32 %v12218_v54, %v9947_v48  ;;  %v10436_v33 = vor.u32 %v12407_v59, %v10435_v52  ;;  %v10389_v54 = vld [vmem:[#allocation17 + $0x590] sm:$0xf0]  ;;  %v10323_v52 = vld [vmem:[#allocation17 + $0x500] sm:$0xf]  ;;  %v12379_v59 = vld [vmem:[#allocation17 + $0x50c] sm:$0xf0] }
 0x8f2   :  { %4616 = vmatpush.bf16.msrb.mxu3 %v10062_v24  ;;  %v9946_v24 = vor.u32 %v12220_v28, %v9945_v11  ;;  %v10244_v11 = vor.u32 %v12359_v14, %v10243_v56  ;;  %v12393_v28 = vld [vmem:[#allocation17 + $0x584] sm:$0xf]  ;;  %v10324_v38 = vor.u32 %v12379_v59, %v10323_v52  ;;  %v10245_v56 = vld [vmem:[#allocation17 + $0x470] sm:$0xf0]  ;;  %v12372_v52 = vld [vmem:[#allocation17 + $0x4d4] sm:$0xf0] }
 0x8f3   :  { %v12406_v59 = vld [vmem:[#allocation17 + $0x5ec] sm:$0xf] }
 0x8f4   :  { %4591 = vmatpush.bf16.msra.mxu1 %v10042_v35  ;;  %4608 = vmatpush.bf16.msrb.mxu2 %v10106_v26  ;;  %v12399_v35 = vld [vmem:[#allocation17 + $0x5ac] sm:$0xf0]  ;;  %v10307_v26 = vld [vmem:[#allocation17 + $0x4e0] sm:$0xf] }
 0x8f5   :  { %4634 = vmatpush.bf16.msra.mxu0 %v10110_v32  ;;  %v12395_v32 = vld [vmem:[#allocation17 + $0x58c] sm:$0xf0] }
 0x8f6   :  { %4617 = vmatpush.bf16.msrb.mxu3 %v10046_v31  ;;  %v10404_v31 = vor.u32 %v12399_v35, %v10403_v45  ;;  %v10388_v41 = vor.u32 %v12395_v32, %v10387_v8  ;;  %v10443_v45 = vld [vmem:[#allocation17 + $0x5e8] sm:$0xf]  ;;  %v12408_v35 = vld [vmem:[#allocation17 + $0x5f4] sm:$0xf0]  ;;  %v10373_v8 = vld [vmem:[#allocation17 + $0x570] sm:$0xf0] }
 0x8f7   :  { %v12365_v32 = vld [vmem:[#allocation17 + $0x4a4] sm:$0xf] }
 0x8f8   :  { %4592 = vmatpush.bf16.msra.mxu1 %v10026_v18  ;;  %4609 = vmatpush.bf16.msrb.mxu2 %v10090_v16  ;;  %v10292_v18 = vor.u32 %v12371_v21, %v10291_v37  ;;  %v10437_v16 = vld [vmem:[#allocation17 + $0x5f0] sm:$0xf0]  ;;  %v10427_v21 = vld [vmem:[#allocation17 + $0x5c8] sm:$0xf] }
 0x8f9   :  { %4635 = vmatpush.bf16.msra.mxu0 %v10094_v53  ;;  %v10440_v13 = vor.u32 %v12405_v1, %v10437_v16  ;;  %v10275_v53 = vld [vmem:[#allocation17 + $0x4a0] sm:$0xf]  ;;  %v12404_v1 = vld [vmem:[#allocation17 + $0x5d4] sm:$0xf0] }
 0x8fa   :  { %4618 = vmatpush.bf16.msrb.mxu3 %v10030_v15  ;;  %v10371_v15 = vld [vmem:[#allocation17 + $0x560] sm:$0xf]  ;;  %v10276_v40 = vor.u32 %v12367_v23, %v10275_v53  ;;  %v10428_v16 = vor.u32 %v12404_v1, %v10427_v21  ;;  %v10357_v23 = vld [vmem:[#allocation17 + $0x550] sm:$0xf0]  ;;  %v12349_v21 = vld [vmem:[#allocation17 + $0x424] sm:$0xf] }
 0x8fb   :  { %v10372_v9 = vor.u32 %v12391_v30, %v10371_v15  ;;  %v10211_v15 = vld [vmem:[#allocation17 + $0x420] sm:$0xf]  ;;  %v12351_v30 = vld [vmem:[#allocation17 + $0x42c] sm:$0xf0]  ;;  %v10213_v1 = vld [vmem:[#allocation17 + $0x430] sm:$0xf0] }
 0x8fc   :  { %4593 = vmatpush.bf16.msra.mxu1 %v10010_v63  ;;  %4610 = vmatpush.bf16.msrb.mxu2 %v10074_v47  ;;  %v10355_v47 = vld [vmem:[#allocation17 + $0x540] sm:$0xf]  ;;  %v10212_v53 = vor.u32 %v12351_v30, %v10211_v15  ;;  %v10363_v15 = vld [vmem:[#allocation17 + $0x548] sm:$0xf]  ;;  %v12388_v30 = vld [vmem:[#allocation17 + $0x554] sm:$0xf0] }
 0x8fd   :  { %4636 = vmatpush.bf16.msra.mxu0 %v10078_v44 }
 0x8fe   :  { %4619 = vmatpush.bf16.msrb.mxu3 %v10014_v36  ;;  %v12387_v36 = vld [vmem:[#allocation17 + $0x54c] sm:$0xf0] }
 0x8ff   :  { %4611 = vmatmul.bf16.vlgmr.msrb.gmra.mxu2 %v14748_v10  ;;  %v10356_v51 = vor.u32 %v12387_v36, %v10355_v47  ;;  %v12400_v36 = vld [vmem:[#allocation17 + $0x5b4] sm:$0xf0] }
 0x900   :  { %4667 = vmatpush.bf16.msra.mxu2 %v14731_v6  ;;  %4594 = vmatpush.bf16.msra.mxu1 %v9994_v12  ;;  %v12363_v12 = vld [vmem:[#allocation17 + $0x48c] sm:$0xf0] }
 0x901   :  { %4637 = vmatmul.bf16.vlgmr.msra.gmra.mxu0 %v14748_v10  ;;  %v4643_v10 = vld [vmem:[#allocation16 + $0x2] sm:$0x1]  ;;  %v10260_v49 = vor.u32 %v12363_v12, %v10259_v4 }
 0x902   :  { %4620 = vmatpush.bf16.msrb.mxu3 %v9998_v46  ;;  %5073 = vmatpush.bf16.msrb.mxu0 %v10436_v33  ;;  %v12397_v46 = vld [vmem:[#allocation17 + $0x5a4] sm:$0xf] }
 0x903   :  { %v10408_v27 = vor.u32 %v12397_v46, %v10405_v29  ;;  %v12369_v33 = vld [vmem:[#allocation17 + $0x4c4] sm:$0xf]  ;;  %v10341_v29 = vld [vmem:[#allocation17 + $0x530] sm:$0xf0] }
 0x904   :  { %4595 = vmatpush.bf16.msra.mxu1 %v9978_v61  ;;  %5099 = vmatpush.bf16.msrb.mxu2 %v10440_v13  ;;  %v12383_v61 = vld [vmem:[#allocation17 + $0x52c] sm:$0xf0]  ;;  %v12385_v13 = vld [vmem:[#allocation17 + $0x544] sm:$0xf] }
 0x905   :  { %v10340_v2 = vor.u32 %v12383_v61, %v10339_v42  ;;  %v10360_v7 = vor.u32 %v12385_v13, %v10357_v23  ;;  %v10315_v61 = vld [vmem:[#allocation17 + $0x4e8] sm:$0xf]  ;;  %v10364_v13 = vor.u32 %v12388_v30, %v10363_v15  ;;  %v12364_v23 = vld [vmem:[#allocation17 + $0x494] sm:$0xf0]  ;;  %v12382_v15 = vld [vmem:[#allocation17 + $0x52c] sm:$0xf] }
 0x906   :  { %4621 = vmatpush.bf16.msrb.mxu3 %v9982_v50  ;;  %5074 = vmatpush.bf16.msrb.mxu0 %v10420_v3  ;;  %v12373_v50 = vld [vmem:[#allocation17 + $0x4e4] sm:$0xf]  ;;  %v10293_v3 = vld [vmem:[#allocation17 + $0x4d0] sm:$0xf0] }
 0x908   :  { %4596 = vmatpush.bf16.msra.mxu1 %v9962_v39  ;;  %5100 = vmatpush.bf16.msrb.mxu2 %v10424_v17  ;;  %v10411_v17 = vld [vmem:[#allocation17 + $0x5a8] sm:$0xf] }
 0x909   :  { %v10412_v12 = vor.u32 %v12400_v36, %v10411_v17  ;;  %v10413_v17 = vld [vmem:[#allocation17 + $0x5b8] sm:$0xf0] }
 0x90a   :  { %4622 = vmatpush.bf16.msrb.mxu3 %v9966_v5  ;;  %5075 = vmatpush.bf16.msrb.mxu0 %v10404_v31  ;;  %v10312_v5 = vor.u32 %v12373_v50, %v10309_v19  ;;  %v10444_v31 = vor.u32 %v12408_v35, %v10443_v45  ;;  %v12376_v50 = vld [vmem:[#allocation17 + $0x4f4] sm:$0xf0]  ;;  %v12357_v19 = vld [vmem:[#allocation17 + $0x464] sm:$0xf]  ;;  %v10229_v35 = vld [vmem:[#allocation17 + $0x450] sm:$0xf0] }
 0x90b   :  { %v10248_v14 = vor.u32 %v12357_v19, %v10245_v56  ;;  %v12353_v45 = vld [vmem:[#allocation17 + $0x444] sm:$0xf]  ;;  %v12360_v19 = vld [vmem:[#allocation17 + $0x474] sm:$0xf0]  ;;  %v12394_v56 = vld [vmem:[#allocation17 + $0x58c] sm:$0xf] }
 0x90c   :  { %4597 = vmatpush.bf16.msra.mxu1 %v9946_v24  ;;  %5101 = vmatpush.bf16.msrb.mxu2 %v10408_v27 }
 0x90e   :  { %4623 = vmatpush.bf16.msrb.mxu3 %v9950_v20  ;;  %5076 = vmatpush.bf16.msrb.mxu0 %v10388_v41  ;;  %v10392_v20 = vor.u32 %v12393_v28, %v10389_v54  ;;  %v12377_v28 = vld [vmem:[#allocation17 + $0x504] sm:$0xf]  ;;  %v10325_v54 = vld [vmem:[#allocation17 + $0x510] sm:$0xf0] }
 0x90f   :  { %4598 = vmatmul.bf16.vlgmr.msra.gmra.mxu1 %v14756_v34  ;;  %10192 = vmatmul.msk.bf16.vlgmr.msra.gmra.mxu2 %vm3593_vm4, %v4643_v10 }
 0x910   :  { %4654 = vmatpush.bf16.msrb.mxu1 %v14724_v25  ;;  %5102 = vmatpush.bf16.msrb.mxu2 %v10392_v20  ;;  %v10328_v20 = vor.u32 %v12377_v28, %v10325_v54  ;;  %v10331_v28 = vld [vmem:[#allocation17 + $0x508] sm:$0xf]  ;;  %v12380_v54 = vld [vmem:[#allocation17 + $0x514] sm:$0xf0] }
 0x911   :  { %4624 = vmatmul.bf16.vlgmr.msrb.gmra.mxu3 %v14756_v34  ;;  %v10308_v34 = vor.u32 %v12375_v0, %v10307_v26  ;;  %v10296_v26 = vor.u32 %v12369_v33, %v10293_v3  ;;  %v10227_v0 = vld [vmem:[#allocation17 + $0x440] sm:$0xf]  ;;  %v10445_v3 = vld [vmem:[#allocation17 + $0x5f8] sm:$0xf0] }
 0x912   :  { %5077 = vmatpush.bf16.msrb.mxu0 %v10372_v9 }
 0x913   :  { %5060 = vmatpush.bf16.msra.mxu3 %v10308_v34  ;;  %v12389_v34 = vld [vmem:[#allocation17 + $0x564] sm:$0xf] }
 0x914   :  { %5086 = vmatpush.bf16.msra.mxu1 %v10312_v5  ;;  %v10376_v41 = vor.u32 %v12389_v34, %v10373_v8  ;;  %v12396_v5 = vld [vmem:[#allocation17 + $0x594] sm:$0xf0] }
 0x915   :  { %v12392_v34 = vld [vmem:[#allocation17 + $0x574] sm:$0xf0] }
 0x916   :  { %5078 = vmatpush.bf16.msrb.mxu0 %v10356_v51  ;;  %5103 = vmatpush.bf16.msrb.mxu2 %v10376_v41  ;;  %v12347_v51 = vld [vmem:[#allocation17 + $0x40c] sm:$0xf0] }
 0x917   :  { %5061 = vmatpush.bf16.msra.mxu3 %v10292_v18 }
 0x918   :  { %5087 = vmatpush.bf16.msra.mxu1 %v10296_v26 }
 0x91a   :  { %5079 = vmatpush.bf16.msrb.mxu0 %v10340_v2  ;;  %5104 = vmatpush.bf16.msrb.mxu2 %v10360_v7  ;;  %v10316_v2 = vor.u32 %v12376_v50, %v10315_v61  ;;  %v12398_v7 = vld [vmem:[#allocation17 + $0x5ac] sm:$0xf]  ;;  %v10317_v61 = vld [vmem:[#allocation17 + $0x4f8] sm:$0xf0] }
 0x91b   :  { %5062 = vmatpush.bf16.msra.mxu3 %v10276_v40  ;;  %v12361_v40 = vld [vmem:[#allocation17 + $0x484] sm:$0xf] }
 0x91c   :  { %v10264_v47 = vor.u32 %v12361_v40, %v10261_v22 }
 0x91e   :  { %5080 = vmatpush.bf16.msrb.mxu0 %v10324_v38 }
 0x91f   :  { %10191 = vmatmul.msk.bf16.vlgmr.msrb.gmra.mxu1 %vm3593_vm4, %v4643_v10  ;;  %5063 = vmatpush.bf16.msra.mxu3 %v10260_v49  ;;  %v12381_v49 = vld [vmem:[#allocation17 + $0x524] sm:$0xf] }
 0x920   :  { %v10344_v42 = vor.u32 %v12381_v49, %v10341_v29  ;;  %v12374_v49 = vld [vmem:[#allocation17 + $0x4ec] sm:$0xf] }
 0x921   :  { %v10320_v50 = vor.u32 %v12374_v49, %v10317_v61  ;;  %v10221_v49 = vld [vmem:[#allocation17 + $0x438] sm:$0xf0] }
 0x922   :  { %5125 = vmatpush.bf16.msra.mxu0 %v10444_v31  ;;  %5105 = vmatpush.bf16.msrb.mxu2 %v10344_v42  ;;  %v10448_v31 = vor.u32 %v12406_v59, %v10445_v3  ;;  %v12356_v59 = vld [vmem:[#allocation17 + $0x454] sm:$0xf0]  ;;  %v10205_v61 = vld [vmem:[#allocation17 + $0x418] sm:$0xf0] }
 0x923   :  { %5064 = vmatpush.bf16.msra.mxu3 %v10244_v11 }
 0x926   :  { %5126 = vmatpush.bf16.msra.mxu0 %v10428_v16  ;;  %5106 = vmatpush.bf16.msrb.mxu2 %v10328_v20  ;;  %v10216_v16 = vor.u32 %v12349_v21, %v10213_v1  ;;  %v10301_v20 = vld [vmem:[#allocation17 + $0x4d8] sm:$0xf0]  ;;  %v12362_v21 = vld [vmem:[#allocation17 + $0x48c] sm:$0xf] }
 0x92a   :  { %5127 = vmatpush.bf16.msra.mxu0 %v10412_v12  ;;  %5151 = vmatpush.bf16.msra.mxu2 %v10448_v31  ;;  %v10347_v12 = vld [vmem:[#allocation17 + $0x528] sm:$0xf] }
 0x93b   :  { %v14768_v62 = vpop.f32.mrf.mxu0 }
 0x941   :  { %v4136_v43 = vpop.f32.mrf.mxu2 }
 0x943   :  { %v4164_v60 = vpop.f32.mrf.mxu0 }
 0x944   :  { %v10277_v60 = vld [vmem:[#allocation17 + $0x4b0] sm:$0xf0] }
 0x945   :  { %v10280_v37 = vor.u32 %v12365_v32, %v10277_v60  ;;  %v10283_v32 = vld [vmem:[#allocation17 + $0x4a8] sm:$0xf]  ;;  %v12402_v60 = vld [vmem:[#allocation17 + $0x5cc] sm:$0xf] }
 0x947   :  { %5088 = vmatpush.bf16.msra.mxu1 %v10280_v37  ;;  %v10429_v37 = vld [vmem:[#allocation17 + $0x5d8] sm:$0xf0] }
 0x949   :  { %v4138_v63 = vpop.f32.mrf.mxu2 }
 0x94b   :  { %v14772_v57 = vpop.f32.mrf.mxu0  ;;  %5089 = vmatpush.bf16.msra.mxu1 %v10264_v47  ;;  %v10197_v47 = vld [vmem:[#allocation17 + $0x410] sm:$0xf0] }
 0x94c   :  { %v4123_v58 = vpop.f32.mrf.mxu1 }
 0x94d   :  { %v14770_v44 = vadd.f32 %v4136_v43, %v4123_v58  ;;  %v10195_v58 = vld [vmem:[#allocation17 + $0x400] sm:$0xf] }
 0x94e   :  { %v10196_v46 = vor.u32 %v12347_v51, %v10195_v58  ;;  %v10416_v58 = vor.u32 %v12398_v7, %v10413_v17  ;;  %v10253_v7 = vld [vmem:[#allocation17 + $0x478] sm:$0xf0] }
 0x94f   :  { %5090 = vmatpush.bf16.msra.mxu1 %v10248_v14  ;;  %v10333_v17 = vld [vmem:[#allocation17 + $0x518] sm:$0xf0] }
 0x951   :  { %v4188_v24 = vpop.f32.mrf.mxu2 }
 0x952   :  { %v4149_v39 = vpop.f32.mrf.mxu3 }
 0x953   :  { %v14775_v48 = vadd.f32 %v14768_v62, %v4149_v39  ;;  %v4216_v55 = vpop.f32.mrf.mxu0  ;;  %v12355_v62 = vld [vmem:[#allocation17 + $0x44c] sm:$0xf0]  ;;  %v10395_v39 = vld [vmem:[#allocation17 + $0x588] sm:$0xf] }
 0x954   :  { %v4125_v10 = vpop.f32.mrf.mxu1  ;;  %v10228_v43 = vor.u32 %v12355_v62, %v10227_v0  ;;  %v10396_v11 = vor.u32 %v12396_v5, %v10395_v39  ;;  %v10232_v0 = vor.u32 %v12353_v45, %v10229_v35  ;;  %v10379_v62 = vld [vmem:[#allocation17 + $0x568] sm:$0xf]  ;;  %v10397_v5 = vld [vmem:[#allocation17 + $0x598] sm:$0xf0] }
 0x955   :  { %v10299_v10 = vld [vmem:[#allocation17 + $0x4c8] sm:$0xf]  ;;  %v10381_v45 = vld [vmem:[#allocation17 + $0x578] sm:$0xf0] }
 0x956   :  { %5065 = vmatpush.bf16.msra.mxu3 %v10228_v43  ;;  %5128 = vmatpush.bf16.msra.mxu0 %v10396_v11  ;;  %v10300_v38 = vor.u32 %v12372_v52, %v10299_v10  ;;  %v10380_v43 = vor.u32 %v12392_v34, %v10379_v62  ;;  %v10400_v11 = vor.u32 %v12394_v56, %v10397_v5  ;;  %v10235_v52 = vld [vmem:[#allocation17 + $0x448] sm:$0xf]  ;;  %v10285_v62 = vld [vmem:[#allocation17 + $0x4b8] sm:$0xf0] }
 0x957   :  { %5091 = vmatpush.bf16.msra.mxu1 %v10232_v0  ;;  %v12366_v0 = vld [vmem:[#allocation17 + $0x4ac] sm:$0xf] }
 0x958   :  { %v10288_v34 = vor.u32 %v12366_v0, %v10285_v62  ;;  %v10661_v62 = vld [vmem:[#allocation17 + $0x7a0] sm:$0xf] }
 0x959   :  { %v4190_v9 = vpop.f32.mrf.mxu2 }
 0x95a   :  { %v4151_v18 = vpop.f32.mrf.mxu3  ;;  %5066 = vmatpush.bf16.msra.mxu3 %v10212_v53  ;;  %5129 = vmatpush.bf16.msra.mxu0 %v10380_v43  ;;  %v10267_v53 = vld [vmem:[#allocation17 + $0x488] sm:$0xf] }
 0x95b   :  { %v10432_v18 = vor.u32 %v12402_v60, %v10429_v37  ;;  %5092 = vmatpush.bf16.msra.mxu1 %v10216_v16  ;;  %v10268_v22 = vor.u32 %v12364_v23, %v10267_v53  ;;  %v12348_v16 = vld [vmem:[#allocation17 + $0x414] sm:$0xf0]  ;;  %v12358_v23 = vld [vmem:[#allocation17 + $0x46c] sm:$0xf] }
 0x95c   :  { %v4175_v63 = vpop.f32.mrf.mxu1 }
 0x95d   :  { %v14777_v4 = vadd.f32 %v4188_v24, %v4175_v63  ;;  %5152 = vmatpush.bf16.msra.mxu2 %v10432_v18  ;;  %v12345_v63 = vld [vmem:[#allocation17 + $0x404] sm:$0xf]  ;;  %v10203_v18 = vld [vmem:[#allocation17 + $0x408] sm:$0xf] }
 0x95e   :  { %5067 = vmatpush.bf16.msra.mxu3 %v10196_v46  ;;  %5130 = vmatpush.bf16.msra.mxu0 %v10364_v13  ;;  %v10200_v51 = vor.u32 %v12345_v63, %v10197_v47  ;;  %v12384_v46 = vld [vmem:[#allocation17 + $0x534] sm:$0xf0] }
 0x95f   :  { %v14779_v27 = vpop.f32.mrf.mxu0  ;;  %v10348_v42 = vor.u32 %v12384_v46, %v10347_v12  ;;  %v12350_v46 = vld [vmem:[#allocation17 + $0x42c] sm:$0xf] }
 0x960   :  { %5093 = vmatpush.bf16.msra.mxu1 %v10200_v51 }
 0x961   :  { %5153 = vmatpush.bf16.msra.mxu2 %v10416_v58  ;;  %v10237_v58 = vld [vmem:[#allocation17 + $0x458] sm:$0xf0] }
 0x962   :  { %5112 = vmatpush.bf16.msrb.mxu3 %v10316_v2  ;;  %v4201_v24 = vpop.f32.mrf.mxu3  ;;  %v10251_v2 = vld [vmem:[#allocation17 + $0x468] sm:$0xf]  ;;  %5131 = vmatpush.bf16.msra.mxu0 %v10348_v42  ;;  %v12346_v42 = vld [vmem:[#allocation17 + $0x40c] sm:$0xf] }
 0x963   :  { %v14782_v33 = vadd.f32 %v14772_v57, %v4201_v24  ;;  %v12368_v57 = vld [vmem:[#allocation17 + $0x4b4] sm:$0xf0]  ;;  %v10252_v39 = vor.u32 %v12360_v19, %v10251_v2  ;;  %v12370_v24 = vld [vmem:[#allocation17 + $0x4cc] sm:$0xf]  ;;  %v10208_v2 = vor.u32 %v12346_v42, %v10205_v61  ;;  %v10517_v61 = vld [vmem:[#allocation17 + $0x680] sm:$0xf] }
 0x964   :  { %v4560_v55 = vpop.f32.mrf.mxu2  ;;  %v4177_v26 = vpop.f32.mrf.mxu1  ;;  %v10284_v41 = vor.u32 %v12368_v57, %v10283_v32  ;;  %5138 = vmatpush.bf16.msrb.mxu1 %v10320_v50  ;;  %v10304_v10 = vor.u32 %v12370_v24, %v10301_v20  ;;  %v12352_v32 = vld [vmem:[#allocation17 + $0x434] sm:$0xf0]  ;;  %v12386_v57 = vld [vmem:[#allocation17 + $0x54c] sm:$0xf] }
 0x965   :  { %5154 = vmatpush.bf16.msra.mxu2 %v10400_v11 }
 0x966   :  { %5113 = vmatpush.bf16.msrb.mxu3 %v10300_v38  ;;  %v12390_v38 = vld [vmem:[#allocation17 + $0x56c] sm:$0xf] }
 0x967   :  { %v4588_v8 = vpop.f32.mrf.mxu0  ;;  %v10384_v31 = vor.u32 %v12390_v38, %v10381_v45  ;;  %v12471_v38 = vld [vmem:[#allocation17 + $0x7ec] sm:$0xf0]  ;;  %v12469_v45 = vld [vmem:[#allocation17 + $0x7e4] sm:$0xf] }
 0x968   :  { %5139 = vmatpush.bf16.msrb.mxu1 %v10304_v10  ;;  %v10219_v8 = vld [vmem:[#allocation17 + $0x428] sm:$0xf] }
 0x969   :  { %5155 = vmatpush.bf16.msra.mxu2 %v10384_v31  ;;  %v10220_v60 = vor.u32 %v12352_v32, %v10219_v8  ;;  %v12439_v31 = vld [vmem:[#allocation17 + $0x6ec] sm:$0xf0] }
 0x96a   :  { %5114 = vmatpush.bf16.msrb.mxu3 %v10284_v41  ;;  %v4203_v9 = vpop.f32.mrf.mxu3  ;;  %v10365_v41 = vld [vmem:[#allocation17 + $0x558] sm:$0xf0] }
 0x96b   :  { %v10368_v37 = vor.u32 %v12386_v57, %v10365_v41  ;;  %v10349_v9 = vld [vmem:[#allocation17 + $0x538] sm:$0xf0]  ;;  %v12465_v57 = vld [vmem:[#allocation17 + $0x7c4] sm:$0xf]  ;;  %v10679_v41 = vld [vmem:[#allocation17 + $0x7d0] sm:$0xf0] }
 0x96c   :  { %v4562_v40 = vpop.f32.mrf.mxu2  ;;  %v4547_v36 = vpop.f32.mrf.mxu1  ;;  %5140 = vmatpush.bf16.msrb.mxu1 %v10288_v34  ;;  %v10352_v53 = vor.u32 %v12382_v15, %v10349_v9  ;;  %v12463_v34 = vld [vmem:[#allocation17 + $0x7ac] sm:$0xf0] }
 0x96d   :  { %v4548_v29 = vadd.f32 %v4547_v36, %v14770_v44  ;;  %v10332_v44 = vor.u32 %v12380_v54, %v10331_v28  ;;  %5156 = vmatpush.bf16.msra.mxu2 %v10368_v37  ;;  %v10256_v40 = vor.u32 %v12358_v23, %v10253_v7  ;;  %v12354_v36 = vld [vmem:[#allocation17 + $0x44c] sm:$0xf]  ;;  %v10549_v37 = vld [vmem:[#allocation17 + $0x6c0] sm:$0xf]  ;;  %v12459_v15 = vld [vmem:[#allocation17 + $0x78c] sm:$0xf0] }
 0x96e   :  { %5115 = vmatpush.bf16.msrb.mxu3 %v10268_v22  ;;  %v12378_v22 = vld [vmem:[#allocation17 + $0x50c] sm:$0xf]  ;;  %v10240_v51 = vor.u32 %v12354_v36, %v10237_v58  ;;  %v12455_v23 = vld [vmem:[#allocation17 + $0x76c] sm:$0xf0]  ;;  %v10597_v58 = vld [vmem:[#allocation17 + $0x720] sm:$0xf] }
 0x96f   :  { %v14785_v14 = vadd.f32 %v4560_v55, %v4548_v29  ;;  %5132 = vmatpush.bf16.msra.mxu0 %v10332_v44  ;;  %v10236_v55 = vor.u32 %v12356_v59, %v10235_v52  ;;  %v10336_v63 = vor.u32 %v12378_v22, %v10333_v17  ;;  %v10224_v29 = vor.u32 %v12350_v46, %v10221_v49  ;;  %v12451_v22 = vld [vmem:[#allocation17 + $0x74c] sm:$0xf0]  ;;  %v5169_v17 = vld [vmem:[#allocation16 + $0x3] sm:$0x1]  ;;  %v12457_v46 = vld [vmem:[#allocation17 + $0x784] sm:$0xf] }
 0x970   :  { %v12431_v36 = vld [vmem:[#allocation17 + $0x6ac] sm:$0xf0]  ;;  %v10647_v49 = vld [vmem:[#allocation17 + $0x790] sm:$0xf0] }
 0x971   :  { %5157 = vmatpush.bf16.msra.mxu2 %v10352_v53  ;;  %v10629_v53 = vld [vmem:[#allocation17 + $0x760] sm:$0xf]  ;;  %v10650_v42 = vor.u32 %v12457_v46, %v10647_v49  ;;  %v12411_v49 = vld [vmem:[#allocation17 + $0x60c] sm:$0xf0] }
 0x972   :  { %5116 = vmatpush.bf16.msrb.mxu3 %v10252_v39  ;;  %v10630_v7 = vor.u32 %v12455_v23, %v10629_v53  ;;  %v10653_v53 = vld [vmem:[#allocation17 + $0x788] sm:$0xf]  ;;  %v12460_v23 = vld [vmem:[#allocation17 + $0x794] sm:$0xf0]  ;;  %v10453_v46 = vld [vmem:[#allocation17 + $0x600] sm:$0xf] }
 0x974   :  { %v4573_v3 = vpop.f32.mrf.mxu3  ;;  %v4549_v26 = vpop.f32.mrf.mxu1 }
 0x975   :  { %v4574_v35 = vadd.f32 %v4573_v3, %v14775_v48  ;;  %v10269_v48 = vld [vmem:[#allocation17 + $0x498] sm:$0xf0]  ;;  %5158 = vmatpush.bf16.msra.mxu2 %v10336_v63  ;;  %v10565_v26 = vld [vmem:[#allocation17 + $0x6e0] sm:$0xf] }
 0x976   :  { %5117 = vmatpush.bf16.msrb.mxu3 %v10236_v55  ;;  %v10272_v1 = vor.u32 %v12362_v21, %v10269_v48  ;;  %v12467_v55 = vld [vmem:[#allocation17 + $0x7cc] sm:$0xf0]  ;;  %v10566_v32 = vor.u32 %v12439_v31, %v10565_v26  ;;  %v12433_v26 = vld [vmem:[#allocation17 + $0x6c4] sm:$0xf]  ;;  %v10551_v31 = vld [vmem:[#allocation17 + $0x6d0] sm:$0xf0] }
 0x977   :  { %v14789_v43 = vadd.f32 %v14779_v27, %v4574_v35  ;;  %v10204_v27 = vor.u32 %v12348_v16, %v10203_v18  ;;  %v10695_v35 = vld [vmem:[#allocation17 + $0x7f0] sm:$0xf0]  ;;  %v12435_v21 = vld [vmem:[#allocation17 + $0x6cc] sm:$0xf0]  ;;  %v10682_v18 = vor.u32 %v12465_v57, %v10679_v41  ;;  %v10645_v16 = vld [vmem:[#allocation17 + $0x780] sm:$0xf] }
 0x978   :  { %5141 = vmatpush.bf16.msrb.mxu1 %v10272_v1  ;;  %v10698_v8 = vor.u32 %v12469_v45, %v10695_v35  ;;  %v10550_v48 = vor.u32 %v12435_v21, %v10549_v37  ;;  %v10662_v1 = vor.u32 %v12463_v34, %v10661_v62  ;;  %v12468_v45 = vld [vmem:[#allocation17 + $0x7d4] sm:$0xf0]  ;;  %v10554_v62 = vor.u32 %v12433_v26, %v10551_v31  ;;  %v10615_v34 = vld [vmem:[#allocation17 + $0x750] sm:$0xf0]  ;;  %v12419_v57 = vld [vmem:[#allocation17 + $0x64c] sm:$0xf0] }
 0x979   :  { %v10669_v41 = vld [vmem:[#allocation17 + $0x7a8] sm:$0xf]  ;;  %v12464_v37 = vld [vmem:[#allocation17 + $0x7b4] sm:$0xf0]  ;;  %v10671_v26 = vld [vmem:[#allocation17 + $0x7b8] sm:$0xf0] }
 0x97a   :  { %5118 = vmatpush.bf16.msrb.mxu3 %v10220_v60  ;;  %v10670_v21 = vor.u32 %v12464_v37, %v10669_v41 }
 0x97c   :  { %v4575_v13 = vpop.f32.mrf.mxu3  ;;  %5142 = vmatpush.bf16.msrb.mxu1 %v10256_v40  ;;  %v10613_v40 = vld [vmem:[#allocation17 + $0x740] sm:$0xf] }
 0x97d   :  { %v10663_v13 = vld [vmem:[#allocation17 + $0x7b0] sm:$0xf0]  ;;  %v10614_v63 = vor.u32 %v12451_v22, %v10613_v40  ;;  %v12425_v40 = vld [vmem:[#allocation17 + $0x684] sm:$0xf] }
 0x97e   :  { %v4638_v30 = vpop.f32.mrf.mxu0  ;;  %5119 = vmatpush.bf16.msrb.mxu3 %v10204_v27  ;;  %v10646_v27 = vor.u32 %v12459_v15, %v10645_v16  ;;  %v10599_v15 = vld [vmem:[#allocation17 + $0x730] sm:$0xf0] }
 0x97f   :  { %v10519_v22 = vld [vmem:[#allocation17 + $0x690] sm:$0xf0] }
 0x980   :  { %5143 = vmatpush.bf16.msrb.mxu1 %v10240_v51 }
 0x982   :  { %v4612_v47 = vpop.f32.mrf.mxu2 }
 0x984   :  { %5144 = vmatpush.bf16.msrb.mxu1 %v10224_v29 }
 0x986   :  { %v4640_v12 = vpop.f32.mrf.mxu0 }
 0x987   :  { %v12447_v12 = vld [vmem:[#allocation17 + $0x72c] sm:$0xf0] }
 0x988   :  { %5145 = vmatpush.bf16.msrb.mxu1 %v10208_v2  ;;  %v10598_v29 = vor.u32 %v12447_v12, %v10597_v58  ;;  %v10581_v2 = vld [vmem:[#allocation17 + $0x700] sm:$0xf]  ;;  %v10703_v58 = vld [vmem:[#allocation17 + $0x7f8] sm:$0xf0] }
 0x98a   :  { %v4614_v50 = vpop.f32.mrf.mxu2 }
 0x98b   :  { %v12427_v50 = vld [vmem:[#allocation17 + $0x68c] sm:$0xf0] }
 0x98c   :  { %v4599_v19 = vpop.f32.mrf.mxu1 }
 0x98d   :  { %v4600_v56 = vadd.f32 %v4599_v19, %v14777_v4  ;;  %v10693_v4 = vld [vmem:[#allocation17 + $0x7e0] sm:$0xf]  ;;  %v10518_v19 = vor.u32 %v12427_v50, %v10517_v61  ;;  %v12440_v61 = vld [vmem:[#allocation17 + $0x6f4] sm:$0xf0]  ;;  %v10637_v50 = vld [vmem:[#allocation17 + $0x768] sm:$0xf] }
 0x98e   :  { %v10694_v3 = vor.u32 %v12471_v38, %v10693_v4  ;;  %v10501_v38 = vld [vmem:[#allocation17 + $0x660] sm:$0xf] }
 0x98f   :  { %v14792_v39 = vadd.f32 %v4612_v47, %v4600_v56  ;;  %v10533_v47 = vld [vmem:[#allocation17 + $0x6a0] sm:$0xf]  ;;  %v12443_v56 = vld [vmem:[#allocation17 + $0x70c] sm:$0xf0] }
 0x990   :  { %v10534_v51 = vor.u32 %v12431_v36, %v10533_v47  ;;  %v10583_v47 = vld [vmem:[#allocation17 + $0x710] sm:$0xf0]  ;;  %v12470_v36 = vld [vmem:[#allocation17 + $0x7ec] sm:$0xf] }
 0x991   :  { %v10706_v12 = vor.u32 %v12470_v36, %v10703_v58  ;;  %v10509_v58 = vld [vmem:[#allocation17 + $0x668] sm:$0xf] }
 0x992   :  { %v4669_v11 = vpop.f32.mrf.mxu2 }
 0x993   :  { %v4674_v54 = vpack.c.bf16 %v4669_v11, %v4669_v11  ;;  %v10701_v11 = vld [vmem:[#allocation17 + $0x7e8] sm:$0xf] }
 0x994   :  { %v4625_v5 = vpop.f32.mrf.mxu3  ;;  %v4601_v24 = vpop.f32.mrf.mxu1 }
 0x995   :  { %v4626_v28 = vadd.f32 %v4625_v5, %v14782_v33  ;;  %5081 = vmatmul.bf16.vlgmr.msrb.gmra.mxu0 %v4674_v54  ;;  %5107 = vmatmul.bf16.vlgmr.msrb.gmra.mxu2 %v4674_v54  ;;  %v10677_v33 = vld [vmem:[#allocation17 + $0x7c0] sm:$0xf]  ;;  %v10582_v5 = vor.u32 %v12443_v56, %v10581_v2  ;;  %v12437_v24 = vld [vmem:[#allocation17 + $0x6e4] sm:$0xf] }
 0x996   :  { %5193 = vmatpush.bf16.msrb.mxu0 %v14731_v6  ;;  %5599 = vmatpush.bf16.msrb.mxu2 %v10694_v3  ;;  %v10678_v0 = vor.u32 %v12467_v55, %v10677_v33  ;;  %v12423_v3 = vld [vmem:[#allocation17 + $0x66c] sm:$0xf0]  ;;  %v10685_v55 = vld [vmem:[#allocation17 + $0x7c8] sm:$0xf]  ;;  %v12421_v56 = vld [vmem:[#allocation17 + $0x664] sm:$0xf] }
 0x997   :  { %v14795_v44 = vadd.f32 %v4638_v30, %v4626_v28  ;;  %v12461_v30 = vld [vmem:[#allocation17 + $0x7a4] sm:$0xf]  ;;  %v12472_v28 = vld [vmem:[#allocation17 + $0x7f4] sm:$0xf0]  ;;  %v10502_v33 = vor.u32 %v12423_v3, %v10501_v38  ;;  %v10686_v35 = vor.u32 %v12468_v45, %v10685_v55 }
 0x998   :  { %v10666_v9 = vor.u32 %v12461_v30, %v10663_v13  ;;  %v10469_v13 = vld [vmem:[#allocation17 + $0x620] sm:$0xf]  ;;  %v12452_v38 = vld [vmem:[#allocation17 + $0x754] sm:$0xf0]  ;;  %v12417_v3 = vld [vmem:[#allocation17 + $0x644] sm:$0xf] }
 0x99a   :  { %v4671_v10 = vpop.f32.mrf.mxu2  ;;  %5600 = vmatpush.bf16.msrb.mxu2 %v10678_v0  ;;  %v12449_v0 = vld [vmem:[#allocation17 + $0x744] sm:$0xf] }
 0x99b   :  { %v12453_v10 = vld [vmem:[#allocation17 + $0x764] sm:$0xf] }
 0x99c   :  { %v4627_v20 = vpop.f32.mrf.mxu3  ;;  %v4656_v52 = vpop.f32.mrf.mxu1 }
 0x99d   :  { %v4673_v59 = vpack.c.bf16 %v4656_v52, %v4656_v52  ;;  %v10567_v20 = vld [vmem:[#allocation17 + $0x6f0] sm:$0xf0] }
 0x99e   :  { %5601 = vmatpush.bf16.msrb.mxu2 %v10662_v1  ;;  %v10570_v52 = vor.u32 %v12437_v24, %v10567_v20  ;;  %v10535_v1 = vld [vmem:[#allocation17 + $0x6b0] sm:$0xf0]  ;;  %v10687_v24 = vld [vmem:[#allocation17 + $0x7d8] sm:$0xf0] }
 0x99f   :  { %5068 = vmatmul.bf16.vlgmr.msra.gmra.mxu3 %v4673_v59  ;;  %5094 = vmatmul.bf16.vlgmr.msra.gmra.mxu1 %v4673_v59 }
 0x9a0   :  { %5180 = vmatpush.bf16.msra.mxu3 %v14724_v25  ;;  %5586 = vmatpush.bf16.msra.mxu1 %v10566_v32  ;;  %v10485_v32 = vld [vmem:[#allocation17 + $0x640] sm:$0xf] }
 0x9a2   :  { %5602 = vmatpush.bf16.msrb.mxu2 %v10646_v27  ;;  %v12415_v27 = vld [vmem:[#allocation17 + $0x62c] sm:$0xf0] }
 0x9a4   :  { %v4658_v60 = vpop.f32.mrf.mxu1  ;;  %5587 = vmatpush.bf16.msra.mxu1 %v10550_v48  ;;  %v12429_v48 = vld [vmem:[#allocation17 + $0x6a4] sm:$0xf] }
 0x9a5   :  { %5133 = vmatmul.bf16.vlgmr.msra.gmra.mxu0 %v4674_v54  ;;  %5159 = vmatmul.bf16.vlgmr.msra.gmra.mxu2 %v4674_v54  ;;  %v10702_v54 = vor.u32 %v12472_v28, %v10701_v11  ;;  %v10486_v60 = vor.u32 %v12419_v57, %v10485_v32  ;;  %v10538_v16 = vor.u32 %v12429_v48, %v10535_v1  ;;  %v12448_v32 = vld [vmem:[#allocation17 + $0x734] sm:$0xf0]  ;;  %v12413_v57 = vld [vmem:[#allocation17 + $0x624] sm:$0xf]  ;;  %v10655_v48 = vld [vmem:[#allocation17 + $0x798] sm:$0xf0] }
 0x9a6   :  { %5625 = vmatpush.bf16.msra.mxu0 %v10698_v8  ;;  %5603 = vmatpush.bf16.msrb.mxu2 %v10630_v7  ;;  %v10618_v8 = vor.u32 %v12449_v0, %v10615_v34  ;;  %v10654_v7 = vor.u32 %v12460_v23, %v10653_v53  ;;  %v10541_v0 = vld [vmem:[#allocation17 + $0x6a8] sm:$0xf]  ;;  %v10455_v53 = vld [vmem:[#allocation17 + $0x610] sm:$0xf0] }
 0x9a7   :  { %v10605_v34 = vld [vmem:[#allocation17 + $0x728] sm:$0xf] }
 0x9a8   :  { %5588 = vmatpush.bf16.msra.mxu1 %v10534_v51  ;;  %v10606_v41 = vor.u32 %v12448_v32, %v10605_v34  ;;  %v10591_v34 = vld [vmem:[#allocation17 + $0x718] sm:$0xf0] }
 0x9aa   :  { %5626 = vmatpush.bf16.msra.mxu0 %v10682_v18  ;;  %5604 = vmatpush.bf16.msrb.mxu2 %v10614_v63  ;;  %v12445_v18 = vld [vmem:[#allocation17 + $0x724] sm:$0xf]  ;;  %v10522_v63 = vor.u32 %v12425_v40, %v10519_v22  ;;  %v12438_v40 = vld [vmem:[#allocation17 + $0x6ec] sm:$0xf]  ;;  %v10575_v22 = vld [vmem:[#allocation17 + $0x6f8] sm:$0xf0] }
 0x9ab   :  { %v10602_v30 = vor.u32 %v12445_v18, %v10599_v15  ;;  %v12428_v15 = vld [vmem:[#allocation17 + $0x694] sm:$0xf0] }
 0x9ac   :  { %5589 = vmatpush.bf16.msra.mxu1 %v10518_v19  ;;  %v12456_v19 = vld [vmem:[#allocation17 + $0x774] sm:$0xf0] }
 0x9ad   :  { %v10638_v11 = vor.u32 %v12456_v19, %v10637_v50  ;;  %v10623_v50 = vld [vmem:[#allocation17 + $0x758] sm:$0xf0]  ;;  %v12420_v19 = vld [vmem:[#allocation17 + $0x654] sm:$0xf0] }
 0x9ae   :  { %5627 = vmatpush.bf16.msra.mxu0 %v10666_v9  ;;  %5605 = vmatpush.bf16.msrb.mxu2 %v10598_v29  ;;  %v10470_v9 = vor.u32 %v12415_v27, %v10469_v13  ;;  %v10454_v29 = vor.u32 %v12411_v49, %v10453_v46  ;;  %v12444_v27 = vld [vmem:[#allocation17 + $0x714] sm:$0xf0]  ;;  %v12434_v49 = vld [vmem:[#allocation17 + $0x6cc] sm:$0xf] }
 0x9af   :  { %5120 = vmatmul.bf16.vlgmr.msrb.gmra.mxu3 %v4673_v59  ;;  %5146 = vmatmul.bf16.vlgmr.msrb.gmra.mxu1 %v4673_v59  ;;  %v10631_v59 = vld [vmem:[#allocation17 + $0x770] sm:$0xf0] }
 0x9b0   :  { %v10634_v4 = vor.u32 %v12453_v10, %v10631_v59  ;;  %5612 = vmatpush.bf16.msrb.mxu3 %v10570_v52  ;;  %5590 = vmatpush.bf16.msra.mxu1 %v10502_v33  ;;  %v10557_v10 = vld [vmem:[#allocation17 + $0x6c8] sm:$0xf]  ;;  %v12436_v52 = vld [vmem:[#allocation17 + $0x6d4] sm:$0xf0]  ;;  %v10487_v33 = vld [vmem:[#allocation17 + $0x650] sm:$0xf0] }
 0x9b1   :  { %v10621_v59 = vld [vmem:[#allocation17 + $0x748] sm:$0xf]  ;;  %v10490_v45 = vor.u32 %v12417_v3, %v10487_v33 }
 0x9b2   :  { %5628 = vmatpush.bf16.msra.mxu0 %v10650_v42  ;;  %5606 = vmatpush.bf16.msrb.mxu2 %v10582_v5  ;;  %v10573_v42 = vld [vmem:[#allocation17 + $0x6e8] sm:$0xf]  ;;  %v10503_v5 = vld [vmem:[#allocation17 + $0x670] sm:$0xf0]  ;;  %v10622_v55 = vor.u32 %v12452_v38, %v10621_v59 }
 0x9b3   :  { %v10574_v2 = vor.u32 %v12440_v61, %v10573_v42  ;;  %v10506_v28 = vor.u32 %v12421_v56, %v10503_v5  ;;  %v12450_v42 = vld [vmem:[#allocation17 + $0x74c] sm:$0xf]  ;;  %v10477_v59 = vld [vmem:[#allocation17 + $0x628] sm:$0xf] }
 0x9b4   :  { %5613 = vmatpush.bf16.msrb.mxu3 %v10554_v62  ;;  %5591 = vmatpush.bf16.msra.mxu1 %v10486_v60  ;;  %v12432_v62 = vld [vmem:[#allocation17 + $0x6b4] sm:$0xf0]  ;;  %v10471_v60 = vld [vmem:[#allocation17 + $0x630] sm:$0xf0]  ;;  %v10626_v5 = vor.u32 %v12450_v42, %v10623_v50 }
 0x9b5   :  { %10450 = vmatmul.msk.bf16.vlgmr.msrb.gmra.mxu0 %vm3593_vm4, %v5169_v17  ;;  %v10474_v37 = vor.u32 %v12413_v57, %v10471_v60  ;;  %v10461_v60 = vld [vmem:[#allocation17 + $0x608] sm:$0xf] }
 0x9b6   :  { %5651 = vmatpush.bf16.msra.mxu2 %v10702_v54  ;;  %5629 = vmatpush.bf16.msra.mxu0 %v10634_v4  ;;  %v12466_v54 = vld [vmem:[#allocation17 + $0x7cc] sm:$0xf]  ;;  %v10558_v4 = vor.u32 %v12436_v52, %v10557_v10  ;;  %v10607_v52 = vld [vmem:[#allocation17 + $0x738] sm:$0xf0] }
 0x9b7   :  { %v10690_v20 = vor.u32 %v12466_v54, %v10687_v24  ;;  %v10543_v54 = vld [vmem:[#allocation17 + $0x6b8] sm:$0xf0]  ;;  %v12446_v24 = vld [vmem:[#allocation17 + $0x72c] sm:$0xf] }
 0x9b8   :  { %5614 = vmatpush.bf16.msrb.mxu3 %v10538_v16  ;;  %5592 = vmatpush.bf16.msra.mxu1 %v10470_v9  ;;  %v10525_v16 = vld [vmem:[#allocation17 + $0x688] sm:$0xf]  ;;  %v12409_v9 = vld [vmem:[#allocation17 + $0x604] sm:$0xf]  ;;  %v10610_v3 = vor.u32 %v12446_v24, %v10607_v52  ;;  %v10919_v24 = vld [vmem:[#allocation17 + $0x9a0] sm:$0xf] }
 0x9b9   :  { %v10526_v13 = vor.u32 %v12428_v15, %v10525_v16  ;;  %v12499_v52 = vld [vmem:[#allocation17 + $0x8cc] sm:$0xf0] }
 0x9ba   :  { %5652 = vmatpush.bf16.msra.mxu2 %v10686_v35  ;;  %5630 = vmatpush.bf16.msra.mxu0 %v10618_v8  ;;  %v12462_v35 = vld [vmem:[#allocation17 + $0x7ac] sm:$0xf]  ;;  %v10542_v8 = vor.u32 %v12432_v62, %v10541_v0 }
 0x9bb   :  { %v10674_v31 = vor.u32 %v12462_v35, %v10671_v26  ;;  %v12426_v35 = vld [vmem:[#allocation17 + $0x68c] sm:$0xf]  ;;  %v10527_v26 = vld [vmem:[#allocation17 + $0x698] sm:$0xf0] }
 0x9bc   :  { %5615 = vmatpush.bf16.msrb.mxu3 %v10522_v63  ;;  %5593 = vmatpush.bf16.msra.mxu1 %v10454_v29  ;;  %v10578_v63 = vor.u32 %v12438_v40, %v10575_v22  ;;  %v10559_v29 = vld [vmem:[#allocation17 + $0x6d8] sm:$0xf0]  ;;  %v10530_v62 = vor.u32 %v12426_v35, %v10527_v26  ;;  %v10903_v26 = vld [vmem:[#allocation17 + $0x980] sm:$0xf] }
 0x9bd   :  { %v10562_v61 = vor.u32 %v12434_v49, %v10559_v29 }
 0x9be   :  { %5653 = vmatpush.bf16.msra.mxu2 %v10670_v21  ;;  %5631 = vmatpush.bf16.msra.mxu0 %v10602_v30  ;;  %v12458_v21 = vld [vmem:[#allocation17 + $0x78c] sm:$0xf]  ;;  %v10589_v30 = vld [vmem:[#allocation17 + $0x708] sm:$0xf] }
 0x9bf   :  { %10449 = vmatmul.msk.bf16.vlgmr.msra.gmra.mxu3 %vm3593_vm4, %v5169_v17  ;;  %v12441_v17 = vld [vmem:[#allocation17 + $0x704] sm:$0xf]  ;;  %v10658_v1 = vor.u32 %v12458_v21, %v10655_v48  ;;  %v10590_v23 = vor.u32 %v12444_v27, %v10589_v30  ;;  %v12422_v48 = vld [vmem:[#allocation17 + $0x66c] sm:$0xf] }
 0x9c0   :  { %v10586_v51 = vor.u32 %v12441_v17, %v10583_v47  ;;  %5638 = vmatpush.bf16.msrb.mxu1 %v10574_v2  ;;  %5616 = vmatpush.bf16.msrb.mxu3 %v10506_v28  ;;  %v12454_v17 = vld [vmem:[#allocation17 + $0x76c] sm:$0xf]  ;;  %v10639_v47 = vld [vmem:[#allocation17 + $0x778] sm:$0xf0]  ;;  %v10493_v2 = vld [vmem:[#allocation17 + $0x648] sm:$0xf] }
 0x9c1   :  { %v10642_v36 = vor.u32 %v12454_v17, %v10639_v47  ;;  %v12430_v28 = vld [vmem:[#allocation17 + $0x6ac] sm:$0xf]  ;;  %v10463_v17 = vld [vmem:[#allocation17 + $0x618] sm:$0xf0] }
 0x9c2   :  { %5654 = vmatpush.bf16.msra.mxu2 %v10654_v7  ;;  %5632 = vmatpush.bf16.msra.mxu0 %v10586_v51  ;;  %v10458_v7 = vor.u32 %v12409_v9, %v10455_v53  ;;  %v12424_v51 = vld [vmem:[#allocation17 + $0x674] sm:$0xf0]  ;;  %v10546_v10 = vor.u32 %v12430_v28, %v10543_v54  ;;  %v12418_v30 = vld [vmem:[#allocation17 + $0x64c] sm:$0xf]  ;;  %v10479_v53 = vld [vmem:[#allocation17 + $0x638] sm:$0xf0] }
 0x9c3   :  { %v12414_v9 = vld [vmem:[#allocation17 + $0x62c] sm:$0xf]  ;;  %v12503_v28 = vld [vmem:[#allocation17 + $0x8ec] sm:$0xf0] }
 0x9c4   :  { %5639 = vmatpush.bf16.msrb.mxu1 %v10558_v4  ;;  %5617 = vmatpush.bf16.msrb.mxu3 %v10490_v45  ;;  %v12416_v4 = vld [vmem:[#allocation17 + $0x634] sm:$0xf0]  ;;  %v10482_v40 = vor.u32 %v12414_v9, %v10479_v53  ;;  %v10921_v9 = vld [vmem:[#allocation17 + $0x9b0] sm:$0xf0] }
 0x9c5   :  { %v10478_v33 = vor.u32 %v12416_v4, %v10477_v59  ;;  %v12527_v59 = vld [vmem:[#allocation17 + $0x9ac] sm:$0xf0]  ;;  %v12533_v4 = vld [vmem:[#allocation17 + $0x9e4] sm:$0xf] }
 0x9c6   :  { %5677 = vmatpush.bf16.msrb.mxu0 %v10706_v12  ;;  %5655 = vmatpush.bf16.msra.mxu2 %v10638_v11  ;;  %v10510_v12 = vor.u32 %v12424_v51, %v10509_v58  ;;  %v10494_v11 = vor.u32 %v12420_v19, %v10493_v2  ;;  %v10951_v2 = vld [vmem:[#allocation17 + $0x9e0] sm:$0xf]  ;;  %v12535_v19 = vld [vmem:[#allocation17 + $0x9ec] sm:$0xf0]  ;;  %v10920_v35 = vor.u32 %v12527_v59, %v10919_v24  ;;  %v10889_v24 = vld [vmem:[#allocation17 + $0x970] sm:$0xf0] }
 0x9c8   :  { %5640 = vmatpush.bf16.msrb.mxu1 %v10542_v8  ;;  %5618 = vmatpush.bf16.msrb.mxu3 %v10474_v37 }
 0x9ca   :  { %5678 = vmatpush.bf16.msrb.mxu0 %v10690_v20  ;;  %5656 = vmatpush.bf16.msra.mxu2 %v10622_v55 }
 0x9cc   :  { %5641 = vmatpush.bf16.msrb.mxu1 %v10526_v13  ;;  %5619 = vmatpush.bf16.msrb.mxu3 %v10458_v7  ;;  %v10495_v13 = vld [vmem:[#allocation17 + $0x658] sm:$0xf0] }
 0x9cd   :  { %v10498_v27 = vor.u32 %v12418_v30, %v10495_v13  ;;  %v10775_v30 = vld [vmem:[#allocation17 + $0x880] sm:$0xf]  ;;  %v12491_v13 = vld [vmem:[#allocation17 + $0x88c] sm:$0xf0] }
 0x9ce   :  { %5679 = vmatpush.bf16.msrb.mxu0 %v10674_v31  ;;  %5657 = vmatpush.bf16.msra.mxu2 %v10606_v41  ;;  %v12442_v31 = vld [vmem:[#allocation17 + $0x70c] sm:$0xf]  ;;  %v12412_v41 = vld [vmem:[#allocation17 + $0x614] sm:$0xf0] }
 0x9cf   :  { %v10594_v57 = vor.u32 %v12442_v31, %v10591_v34  ;;  %v12523_v31 = vld [vmem:[#allocation17 + $0x98c] sm:$0xf0] }
 0x9d0   :  { %5664 = vmatpush.bf16.msra.mxu3 %v10578_v63  ;;  %5642 = vmatpush.bf16.msrb.mxu1 %v10510_v12  ;;  %v12519_v34 = vld [vmem:[#allocation17 + $0x96c] sm:$0xf0] }
 0x9d2   :  { %5680 = vmatpush.bf16.msrb.mxu0 %v10658_v1  ;;  %5658 = vmatpush.bf16.msra.mxu2 %v10590_v23  ;;  %v10511_v1 = vld [vmem:[#allocation17 + $0x678] sm:$0xf0] }
 0x9d3   :  { %v10514_v16 = vor.u32 %v12422_v48, %v10511_v1  ;;  %v10871_v48 = vld [vmem:[#allocation17 + $0x940] sm:$0xf]  ;;  %v12515_v1 = vld [vmem:[#allocation17 + $0x94c] sm:$0xf0] }
 0x9d4   :  { %5665 = vmatpush.bf16.msra.mxu3 %v10562_v61  ;;  %5643 = vmatpush.bf16.msrb.mxu1 %v10494_v11  ;;  %v12531_v11 = vld [vmem:[#allocation17 + $0x9cc] sm:$0xf0] }
 0x9d6   :  { %5681 = vmatpush.bf16.msrb.mxu0 %v10642_v36 }
 0x9d8   :  { %5666 = vmatpush.bf16.msra.mxu3 %v10546_v10  ;;  %5644 = vmatpush.bf16.msrb.mxu1 %v10478_v33  ;;  %v10807_v10 = vld [vmem:[#allocation17 + $0x8c0] sm:$0xf] }
 0x9d9   :  { %v10808_v33 = vor.u32 %v12499_v52, %v10807_v10  ;;  %v12493_v10 = vld [vmem:[#allocation17 + $0x8a4] sm:$0xf]  ;;  %v10793_v52 = vld [vmem:[#allocation17 + $0x8b0] sm:$0xf0] }
 0x9da   :  { %5682 = vmatpush.bf16.msrb.mxu0 %v10626_v5  ;;  %v10952_v5 = vor.u32 %v12535_v19, %v10951_v2  ;;  %v10959_v2 = vld [vmem:[#allocation17 + $0x9e8] sm:$0xf]  ;;  %v10796_v59 = vor.u32 %v12493_v10, %v10793_v52  ;;  %v12516_v10 = vld [vmem:[#allocation17 + $0x954] sm:$0xf0] }
 0x9dc   :  { %5667 = vmatpush.bf16.msra.mxu3 %v10530_v62  ;;  %v10887_v62 = vld [vmem:[#allocation17 + $0x960] sm:$0xf] }
 0x9de   :  { %5683 = vmatpush.bf16.msrb.mxu0 %v10610_v3 }
 0x9e0   :  { %5668 = vmatpush.bf16.msra.mxu3 %v10514_v16 }
 0x9e2   :  { %5684 = vmatpush.bf16.msrb.mxu0 %v10594_v57  ;;  %v10791_v57 = vld [vmem:[#allocation17 + $0x8a0] sm:$0xf] }
 0x9e4   :  { %5669 = vmatpush.bf16.msra.mxu3 %v10498_v27  ;;  %v10776_v27 = vor.u32 %v12491_v13, %v10775_v30  ;;  %v12504_v30 = vld [vmem:[#allocation17 + $0x8f4] sm:$0xf0] }
 0x9e8   :  { %5670 = vmatpush.bf16.msra.mxu3 %v10482_v40  ;;  %v12501_v40 = vld [vmem:[#allocation17 + $0x8e4] sm:$0xf] }
 0xa12   :  { %v14801_v18 = vpop.f32.mrf.mxu0 }
 0xa18   :  { %v5108_v46 = vpop.f32.mrf.mxu2 }
 0xa1a   :  { %v5084_v56 = vpop.f32.mrf.mxu0 }
 0xa1b   :  { %v10935_v56 = vld [vmem:[#allocation17 + $0x9c0] sm:$0xf] }
 0xa1c   :  { %v5095_v20 = vpop.f32.mrf.mxu1  ;;  %v10936_v54 = vor.u32 %v12531_v11, %v10935_v56  ;;  %v12536_v56 = vld [vmem:[#allocation17 + $0x9f4] sm:$0xf0]  ;;  %v12483_v11 = vld [vmem:[#allocation17 + $0x84c] sm:$0xf0] }
 0xa1d   :  { %v5109_v38 = vadd.f32 %v5108_v46, %v5095_v20 }
 0xa1f   :  { %v14804_v55 = vadd.f32 %v5109_v38, %v14789_v43  ;;  %v10462_v43 = vor.u32 %v12412_v41, %v10461_v60  ;;  %v10953_v38 = vld [vmem:[#allocation17 + $0x9f0] sm:$0xf0]  ;;  %v12495_v60 = vld [vmem:[#allocation17 + $0x8ac] sm:$0xf0]  ;;  %v12529_v41 = vld [vmem:[#allocation17 + $0x9c4] sm:$0xf] }
 0xa20   :  { %v5110_v45 = vpop.f32.mrf.mxu2 }
 0xa21   :  { %5645 = vmatpush.bf16.msrb.mxu1 %v10462_v43  ;;  %v10956_v45 = vor.u32 %v12533_v4, %v10953_v38  ;;  %v10937_v43 = vld [vmem:[#allocation17 + $0x9d0] sm:$0xf0]  ;;  %v10943_v4 = vld [vmem:[#allocation17 + $0x9c8] sm:$0xf]  ;;  %v12532_v38 = vld [vmem:[#allocation17 + $0x9d4] sm:$0xf0] }
 0xa22   :  { %v5069_v0 = vpop.f32.mrf.mxu3  ;;  %v5134_v32 = vpop.f32.mrf.mxu0  ;;  %v10940_v16 = vor.u32 %v12529_v41, %v10937_v43  ;;  %v12509_v43 = vld [vmem:[#allocation17 + $0x924] sm:$0xf] }
 0xa23   :  { %v5083_v8 = vadd.f32 %v14801_v18, %v5069_v0  ;;  %v10904_v0 = vor.u32 %v12523_v31, %v10903_v26  ;;  %v10873_v31 = vld [vmem:[#allocation17 + $0x950] sm:$0xf0] }
 0xa24   :  { %v5097_v37 = vpop.f32.mrf.mxu1 }
 0xa25   :  { %v14808_v21 = vadd.f32 %v5083_v8, %v14785_v14  ;;  %v12410_v14 = vld [vmem:[#allocation17 + $0x60c] sm:$0xf]  ;;  %v5695_v8 = vld [vmem:[#allocation16 + $0x4] sm:$0x1]  ;;  %v10792_v37 = vor.u32 %v12495_v60, %v10791_v57  ;;  %v10711_v60 = vld [vmem:[#allocation17 + $0x800] sm:$0xf] }
 0xa26   :  { %v10466_v47 = vor.u32 %v12410_v14, %v10463_v17  ;;  %v10825_v14 = vld [vmem:[#allocation17 + $0x8f0] sm:$0xf0]  ;;  %v12528_v57 = vld [vmem:[#allocation17 + $0x9b4] sm:$0xf0] }
 0xa27   :  { %v10828_v17 = vor.u32 %v12501_v40, %v10825_v14  ;;  %v12505_v40 = vld [vmem:[#allocation17 + $0x904] sm:$0xf] }
 0xa28   :  { %v5160_v15 = vpop.f32.mrf.mxu2  ;;  %5671 = vmatpush.bf16.msra.mxu3 %v10466_v47  ;;  %v10759_v47 = vld [vmem:[#allocation17 + $0x860] sm:$0xf] }
 0xa2a   :  { %v5071_v18 = vpop.f32.mrf.mxu3  ;;  %v5136_v23 = vpop.f32.mrf.mxu0 }
 0xa2b   :  { %v12525_v18 = vld [vmem:[#allocation17 + $0x9a4] sm:$0xf]  ;;  %v10855_v23 = vld [vmem:[#allocation17 + $0x920] sm:$0xf] }
 0xa2c   :  { %v5147_v7 = vpop.f32.mrf.mxu1  ;;  %v10924_v53 = vor.u32 %v12525_v18, %v10921_v9  ;;  %v12485_v18 = vld [vmem:[#allocation17 + $0x864] sm:$0xf] }
 0xa2d   :  { %v5161_v22 = vadd.f32 %v5160_v15, %v5147_v7  ;;  %v10872_v15 = vor.u32 %v12515_v1, %v10871_v48  ;;  %v12511_v7 = vld [vmem:[#allocation17 + $0x92c] sm:$0xf0]  ;;  %v10857_v48 = vld [vmem:[#allocation17 + $0x930] sm:$0xf0] }
 0xa2f   :  { %v14811_v63 = vadd.f32 %v5161_v22, %v14795_v44  ;;  %v10856_v22 = vor.u32 %v12511_v7, %v10855_v23  ;;  %v12524_v23 = vld [vmem:[#allocation17 + $0x994] sm:$0xf0] }
 0xa30   :  { %v5162_v36 = vpop.f32.mrf.mxu2 }
 0xa31   :  { %v12487_v36 = vld [vmem:[#allocation17 + $0x86c] sm:$0xf0] }
 0xa32   :  { %v5121_v58 = vpop.f32.mrf.mxu3  ;;  %v5195_v12 = vpop.f32.mrf.mxu0 }
 0xa33   :  { %v5135_v51 = vadd.f32 %v5134_v32, %v5121_v58  ;;  %v5200_v46 = vpack.c.bf16 %v5195_v12, %v5195_v12  ;;  %v10888_v32 = vor.u32 %v12519_v34, %v10887_v62  ;;  %v12521_v58 = vld [vmem:[#allocation17 + $0x984] sm:$0xf]  ;;  %v10905_v12 = vld [vmem:[#allocation17 + $0x990] sm:$0xf0] }
 0xa34   :  { %v5149_v49 = vpop.f32.mrf.mxu1  ;;  %v12489_v62 = vld [vmem:[#allocation17 + $0x884] sm:$0xf]  ;;  %v10777_v34 = vld [vmem:[#allocation17 + $0x890] sm:$0xf0] }
 0xa35   :  { %v14814_v29 = vadd.f32 %v5135_v51, %v14792_v39  ;;  %5607 = vmatmul.bf16.vlgmr.msrb.gmra.mxu2 %v5200_v46  ;;  %5633 = vmatmul.bf16.vlgmr.msra.gmra.mxu0 %v5200_v46  ;;  %v10823_v39 = vld [vmem:[#allocation17 + $0x8e0] sm:$0xf]  ;;  %v10760_v51 = vor.u32 %v12487_v36, %v10759_v47  ;;  %v12507_v49 = vld [vmem:[#allocation17 + $0x90c] sm:$0xf0]  ;;  %v12500_v47 = vld [vmem:[#allocation17 + $0x8d4] sm:$0xf0] }
 0xa36   :  { %5719 = vmatpush.bf16.msrb.mxu2 %v14731_v6  ;;  %6125 = vmatpush.bf16.msra.mxu0 %v10952_v5  ;;  %v10824_v20 = vor.u32 %v12503_v28, %v10823_v39  ;;  %v10743_v5 = vld [vmem:[#allocation17 + $0x840] sm:$0xf]  ;;  %v10960_v39 = vor.u32 %v12536_v56, %v10959_v2  ;;  %v12534_v36 = vld [vmem:[#allocation17 + $0x9ec] sm:$0xf]  ;;  %v10799_v2 = vld [vmem:[#allocation17 + $0x8a8] sm:$0xf] }
 0xa37   :  { %v10744_v28 = vor.u32 %v12483_v11, %v10743_v5  ;;  %v12530_v56 = vld [vmem:[#allocation17 + $0x9cc] sm:$0xf]  ;;  %v10945_v11 = vld [vmem:[#allocation17 + $0x9d8] sm:$0xf0] }
 0xa3a   :  { %v5123_v42 = vpop.f32.mrf.mxu3  ;;  %v5197_v61 = vpop.f32.mrf.mxu0  ;;  %6126 = vmatpush.bf16.msra.mxu0 %v10936_v54  ;;  %v12517_v54 = vld [vmem:[#allocation17 + $0x964] sm:$0xf] }
 0xa3b   :  { %v10908_v42 = vor.u32 %v12521_v58, %v10905_v12  ;;  %v12481_v12 = vld [vmem:[#allocation17 + $0x844] sm:$0xf] }
 0xa3e   :  { %6127 = vmatpush.bf16.msra.mxu0 %v10920_v35  ;;  %v12513_v35 = vld [vmem:[#allocation17 + $0x944] sm:$0xf] }
 0xa42   :  { %v5182_v44 = vpop.f32.mrf.mxu3  ;;  %6128 = vmatpush.bf16.msra.mxu0 %v10904_v0  ;;  %v10876_v0 = vor.u32 %v12513_v35, %v10873_v31  ;;  %v12473_v35 = vld [vmem:[#allocation17 + $0x804] sm:$0xf] }
 0xa43   :  { %v5199_v50 = vpack.c.bf16 %v5182_v44, %v5182_v44  ;;  %v12497_v44 = vld [vmem:[#allocation17 + $0x8c4] sm:$0xf] }
 0xa45   :  { %5594 = vmatmul.bf16.vlgmr.msra.gmra.mxu1 %v5199_v50  ;;  %5620 = vmatmul.bf16.vlgmr.msrb.gmra.mxu3 %v5199_v50 }
 0xa46   :  { %5659 = vmatmul.bf16.vlgmr.msra.gmra.mxu2 %v5200_v46  ;;  %5685 = vmatmul.bf16.vlgmr.msrb.gmra.mxu0 %v5200_v46  ;;  %v10839_v46 = vld [vmem:[#allocation17 + $0x900] sm:$0xf] }
 0xa47   :  { %5706 = vmatpush.bf16.msra.mxu1 %v14724_v25  ;;  %6112 = vmatpush.bf16.msrb.mxu3 %v10824_v20  ;;  %v10840_v61 = vor.u32 %v12507_v49, %v10839_v46  ;;  %v10892_v20 = vor.u32 %v12517_v54, %v10889_v24  ;;  %v10745_v46 = vld [vmem:[#allocation17 + $0x850] sm:$0xf0]  ;;  %v10948_v54 = vor.u32 %v12530_v56, %v10945_v11 }
 0xa48   :  { %6151 = vmatpush.bf16.msra.mxu2 %v10956_v45  ;;  %6129 = vmatpush.bf16.msra.mxu0 %v10888_v32  ;;  %v12479_v45 = vld [vmem:[#allocation17 + $0x82c] sm:$0xf0]  ;;  %v10927_v32 = vld [vmem:[#allocation17 + $0x9a8] sm:$0xf] }
 0xa49   :  { %v10928_v41 = vor.u32 %v12528_v57, %v10927_v32  ;;  %v10833_v57 = vld [vmem:[#allocation17 + $0x8f8] sm:$0xf0] }
 0xa4a   :  { %v5184_v3 = vpop.f32.mrf.mxu3 }
 0xa4b   :  { %6113 = vmatpush.bf16.msrb.mxu3 %v10808_v33  ;;  %v10944_v3 = vor.u32 %v12532_v38, %v10943_v4  ;;  %v10727_v33 = vld [vmem:[#allocation17 + $0x820] sm:$0xf]  ;;  %v10783_v4 = vld [vmem:[#allocation17 + $0x888] sm:$0xf]  ;;  %v12492_v38 = vld [vmem:[#allocation17 + $0x894] sm:$0xf0] }
 0xa4c   :  { %6152 = vmatpush.bf16.msra.mxu2 %v10940_v16  ;;  %6130 = vmatpush.bf16.msra.mxu0 %v10872_v15  ;;  %v10728_v26 = vor.u32 %v12479_v45, %v10727_v33  ;;  %v10860_v16 = vor.u32 %v12509_v43, %v10857_v48  ;;  %v10831_v15 = vld [vmem:[#allocation17 + $0x8e8] sm:$0xf]  ;;  %v10784_v33 = vor.u32 %v12492_v38, %v10783_v4  ;;  %v10929_v45 = vld [vmem:[#allocation17 + $0x9b8] sm:$0xf0]  ;;  %v12522_v43 = vld [vmem:[#allocation17 + $0x98c] sm:$0xf] }
 0xa4d   :  { %v10832_v13 = vor.u32 %v12504_v30, %v10831_v15  ;;  %v10847_v30 = vld [vmem:[#allocation17 + $0x908] sm:$0xf]  ;;  %v12486_v38 = vld [vmem:[#allocation17 + $0x86c] sm:$0xf] }
 0xa4f   :  { %6114 = vmatpush.bf16.msrb.mxu3 %v10792_v37  ;;  %v12475_v37 = vld [vmem:[#allocation17 + $0x80c] sm:$0xf0] }
 0xa50   :  { %6153 = vmatpush.bf16.msra.mxu2 %v10924_v53  ;;  %6131 = vmatpush.bf16.msra.mxu0 %v10856_v22  ;;  %v10712_v1 = vor.u32 %v12475_v37, %v10711_v60  ;;  %v10911_v53 = vld [vmem:[#allocation17 + $0x988] sm:$0xf]  ;;  %v10841_v22 = vld [vmem:[#allocation17 + $0x910] sm:$0xf0]  ;;  %v12488_v37 = vld [vmem:[#allocation17 + $0x874] sm:$0xf0] }
 0xa51   :  { %v10912_v7 = vor.u32 %v12524_v23, %v10911_v53  ;;  %v10844_v14 = vor.u32 %v12505_v40, %v10841_v22  ;;  %v12484_v40 = vld [vmem:[#allocation17 + $0x854] sm:$0xf0]  ;;  %v12518_v22 = vld [vmem:[#allocation17 + $0x96c] sm:$0xf] }
 0xa53   :  { %6115 = vmatpush.bf16.msrb.mxu3 %v10776_v27  ;;  %v10761_v27 = vld [vmem:[#allocation17 + $0x870] sm:$0xf0] }
 0xa54   :  { %6154 = vmatpush.bf16.msra.mxu2 %v10908_v42  ;;  %6132 = vmatpush.bf16.msra.mxu0 %v10840_v61  ;;  %v10764_v9 = vor.u32 %v12485_v18, %v10761_v27  ;;  %v10748_v42 = vor.u32 %v12481_v12, %v10745_v46  ;;  %v10895_v61 = vld [vmem:[#allocation17 + $0x968] sm:$0xf]  ;;  %v12498_v18 = vld [vmem:[#allocation17 + $0x8cc] sm:$0xf]  ;;  %v12480_v46 = vld [vmem:[#allocation17 + $0x834] sm:$0xf0] }
 0xa55   :  { %5646 = vmatmul.bf16.vlgmr.msrb.gmra.mxu1 %v5199_v50  ;;  %5672 = vmatmul.bf16.vlgmr.msra.gmra.mxu3 %v5199_v50  ;;  %v10809_v50 = vld [vmem:[#allocation17 + $0x8d0] sm:$0xf0]  ;;  %v10735_v12 = vld [vmem:[#allocation17 + $0x828] sm:$0xf] }
 0xa56   :  { %10708 = vmatmul.msk.bf16.vlgmr.msrb.gmra.mxu2 %vm3593_vm4, %v5695_v8  ;;  %6138 = vmatpush.bf16.msrb.mxu1 %v10828_v17  ;;  %v10812_v19 = vor.u32 %v12497_v44, %v10809_v50  ;;  %v10815_v17 = vld [vmem:[#allocation17 + $0x8c8] sm:$0xf]  ;;  %v12520_v44 = vld [vmem:[#allocation17 + $0x974] sm:$0xf0] }
 0xa57   :  { %6116 = vmatpush.bf16.msrb.mxu3 %v10760_v51  ;;  %v10816_v58 = vor.u32 %v12500_v47, %v10815_v17  ;;  %v10961_v51 = vld [vmem:[#allocation17 + $0x9f8] sm:$0xf0]  ;;  %v10896_v50 = vor.u32 %v12520_v44, %v10895_v61 }
 0xa58   :  { %6177 = vmatpush.bf16.msrb.mxu0 %v10960_v39  ;;  %6155 = vmatpush.bf16.msra.mxu2 %v10892_v20  ;;  %v10964_v49 = vor.u32 %v12534_v36, %v10961_v51  ;;  %v12477_v39 = vld [vmem:[#allocation17 + $0x824] sm:$0xf]  ;;  %v10879_v20 = vld [vmem:[#allocation17 + $0x948] sm:$0xf]  ;;  %v10897_v17 = vld [vmem:[#allocation17 + $0x978] sm:$0xf0] }
 0xa59   :  { %v10880_v52 = vor.u32 %v12516_v10, %v10879_v20  ;;  %v10900_v47 = vor.u32 %v12518_v22, %v10897_v17  ;;  %v12494_v36 = vld [vmem:[#allocation17 + $0x8ac] sm:$0xf]  ;;  %v10881_v61 = vld [vmem:[#allocation17 + $0x958] sm:$0xf0] }
 0xa5a   :  { %6139 = vmatpush.bf16.msrb.mxu1 %v10812_v19  ;;  %v12496_v19 = vld [vmem:[#allocation17 + $0x8b4] sm:$0xf0]  ;;  %v10865_v10 = vld [vmem:[#allocation17 + $0x938] sm:$0xf0] }
 0xa5b   :  { %6117 = vmatpush.bf16.msrb.mxu3 %v10744_v28  ;;  %v10800_v5 = vor.u32 %v12496_v19, %v10799_v2  ;;  %v10729_v28 = vld [vmem:[#allocation17 + $0x830] sm:$0xf0]  ;;  %v12490_v2 = vld [vmem:[#allocation17 + $0x88c] sm:$0xf]  ;;  %v10785_v19 = vld [vmem:[#allocation17 + $0x898] sm:$0xf0] }
 0xa5c   :  { %6178 = vmatpush.bf16.msrb.mxu0 %v10944_v3  ;;  %6156 = vmatpush.bf16.msra.mxu2 %v10876_v0  ;;  %v10732_v24 = vor.u32 %v12477_v39, %v10729_v28  ;;  %v12526_v3 = vld [vmem:[#allocation17 + $0x9ac] sm:$0xf]  ;;  %v10719_v28 = vld [vmem:[#allocation17 + $0x808] sm:$0xf] }
 0xa5d   :  { %v10932_v31 = vor.u32 %v12526_v3, %v10929_v45  ;;  %v10769_v3 = vld [vmem:[#allocation17 + $0x878] sm:$0xf0]  ;;  %v12506_v45 = vld [vmem:[#allocation17 + $0x90c] sm:$0xf] }
 0xa5e   :  { %6140 = vmatpush.bf16.msrb.mxu1 %v10796_v59 }
 0xa5f   :  { %6118 = vmatpush.bf16.msrb.mxu3 %v10728_v26  ;;  %v10713_v26 = vld [vmem:[#allocation17 + $0x810] sm:$0xf0] }
 0xa60   :  { %6179 = vmatpush.bf16.msrb.mxu0 %v10928_v41  ;;  %6157 = vmatpush.bf16.msra.mxu2 %v10860_v16  ;;  %v10716_v0 = vor.u32 %v12473_v35, %v10713_v26  ;;  %v10767_v41 = vld [vmem:[#allocation17 + $0x868] sm:$0xf]  ;;  %v10849_v35 = vld [vmem:[#allocation17 + $0x918] sm:$0xf0] }
 0xa61   :  { %v10768_v48 = vor.u32 %v12488_v37, %v10767_v41  ;;  %v10852_v26 = vor.u32 %v12506_v45, %v10849_v35  ;;  %v12478_v41 = vld [vmem:[#allocation17 + $0x82c] sm:$0xf]  ;;  %v10737_v37 = vld [vmem:[#allocation17 + $0x838] sm:$0xf0]  ;;  %v11145_v45 = vld [vmem:[#allocation17 + $0xb60] sm:$0xf] }
 0xa62   :  { %v12583_v35 = vld [vmem:[#allocation17 + $0xb6c] sm:$0xf0] }
 0xa63   :  { %6119 = vmatpush.bf16.msrb.mxu3 %v10712_v1  ;;  %v10913_v1 = vld [vmem:[#allocation17 + $0x998] sm:$0xf0] }
 0xa64   :  { %6180 = vmatpush.bf16.msrb.mxu0 %v10912_v7  ;;  %6158 = vmatpush.bf16.msra.mxu2 %v10844_v14  ;;  %v10916_v15 = vor.u32 %v12522_v43, %v10913_v1  ;;  %v10751_v7 = vld [vmem:[#allocation17 + $0x848] sm:$0xf]  ;;  %v10740_v43 = vor.u32 %v12478_v41, %v10737_v37  ;;  %v10721_v1 = vld [vmem:[#allocation17 + $0x818] sm:$0xf0]  ;;  %v12575_v41 = vld [vmem:[#allocation17 + $0xb2c] sm:$0xf0] }
 0xa65   :  { %10707 = vmatmul.msk.bf16.vlgmr.msra.gmra.mxu1 %vm3593_vm4, %v5695_v8  ;;  %v10780_v8 = vor.u32 %v12489_v62, %v10777_v34  ;;  %v10863_v62 = vld [vmem:[#allocation17 + $0x928] sm:$0xf]  ;;  %v12512_v34 = vld [vmem:[#allocation17 + $0x934] sm:$0xf0]  ;;  %v10752_v14 = vor.u32 %v12484_v40, %v10751_v7  ;;  %v12585_v37 = vld [vmem:[#allocation17 + $0xb84] sm:$0xf] }
 0xa66   :  { %v10864_v32 = vor.u32 %v12512_v34, %v10863_v62  ;;  %v12482_v34 = vld [vmem:[#allocation17 + $0x84c] sm:$0xf] }
 0xa67   :  { %6141 = vmatpush.bf16.msrb.mxu1 %v10780_v8  ;;  %6164 = vmatpush.bf16.msra.mxu3 %v10832_v13  ;;  %v12502_v8 = vld [vmem:[#allocation17 + $0x8ec] sm:$0xf]  ;;  %v12508_v13 = vld [vmem:[#allocation17 + $0x914] sm:$0xf0] }
 0xa68   :  { %6203 = vmatpush.bf16.msrb.mxu2 %v10964_v49  ;;  %6181 = vmatpush.bf16.msrb.mxu0 %v10896_v50  ;;  %v10836_v60 = vor.u32 %v12502_v8, %v10833_v57  ;;  %v10848_v27 = vor.u32 %v12508_v13, %v10847_v30  ;;  %v12514_v49 = vld [vmem:[#allocation17 + $0x94c] sm:$0xf]  ;;  %v10753_v8 = vld [vmem:[#allocation17 + $0x858] sm:$0xf0] }
 0xa69   :  { %v10884_v50 = vor.u32 %v12514_v49, %v10881_v61  ;;  %v12567_v49 = vld [vmem:[#allocation17 + $0xaec] sm:$0xf0]  ;;  %v11177_v61 = vld [vmem:[#allocation17 + $0xba0] sm:$0xf] }
 0xa6b   :  { %6142 = vmatpush.bf16.msrb.mxu1 %v10764_v9  ;;  %6165 = vmatpush.bf16.msra.mxu3 %v10816_v58  ;;  %v10817_v9 = vld [vmem:[#allocation17 + $0x8d8] sm:$0xf0] }
 0xa6c   :  { %6204 = vmatpush.bf16.msrb.mxu2 %v10948_v54  ;;  %6182 = vmatpush.bf16.msrb.mxu0 %v10880_v52  ;;  %v10820_v23 = vor.u32 %v12498_v18, %v10817_v9  ;;  %v10801_v58 = vld [vmem:[#allocation17 + $0x8b8] sm:$0xf0]  ;;  %v12476_v54 = vld [vmem:[#allocation17 + $0x814] sm:$0xf0] }
 0xa6d   :  { %v10804_v51 = vor.u32 %v12494_v36, %v10801_v58  ;;  %v10720_v20 = vor.u32 %v12476_v54, %v10719_v28  ;;  %v11193_v58 = vld [vmem:[#allocation17 + $0xbc0] sm:$0xf] }
 0xa6f   :  { %6143 = vmatpush.bf16.msrb.mxu1 %v10748_v42  ;;  %6166 = vmatpush.bf16.msra.mxu3 %v10800_v5  ;;  %v10736_v42 = vor.u32 %v12480_v46, %v10735_v12  ;;  %v10788_v5 = vor.u32 %v12490_v2, %v10785_v19  ;;  %v12597_v12 = vld [vmem:[#allocation17 + $0xbe4] sm:$0xf]  ;;  %v11081_v46 = vld [vmem:[#allocation17 + $0xae0] sm:$0xf] }
 0xa70   :  { %6205 = vmatpush.bf16.msrb.mxu2 %v10932_v31  ;;  %6183 = vmatpush.bf16.msrb.mxu0 %v10864_v32  ;;  %v11082_v2 = vor.u32 %v12567_v49, %v11081_v46  ;;  %v12593_v19 = vld [vmem:[#allocation17 + $0xbc4] sm:$0xf]  ;;  %v11067_v49 = vld [vmem:[#allocation17 + $0xad0] sm:$0xf0] }
 0xa71   :  { %v12561_v46 = vld [vmem:[#allocation17 + $0xac4] sm:$0xf] }
 0xa73   :  { %6144 = vmatpush.bf16.msrb.mxu1 %v10732_v24  ;;  %6167 = vmatpush.bf16.msra.mxu3 %v10784_v33  ;;  %v12510_v24 = vld [vmem:[#allocation17 + $0x92c] sm:$0xf]  ;;  %v10772_v33 = vor.u32 %v12486_v38, %v10769_v3  ;;  %v11179_v38 = vld [vmem:[#allocation17 + $0xbb0] sm:$0xf0] }
 0xa74   :  { %6206 = vmatpush.bf16.msrb.mxu2 %v10916_v15  ;;  %6184 = vmatpush.bf16.msrb.mxu0 %v10848_v27  ;;  %v10868_v4 = vor.u32 %v12510_v24, %v10865_v10  ;;  %v12587_v10 = vld [vmem:[#allocation17 + $0xb8c] sm:$0xf0] }
 0xa77   :  { %6145 = vmatpush.bf16.msrb.mxu1 %v10716_v0  ;;  %6168 = vmatpush.bf16.msra.mxu3 %v10768_v48  ;;  %v12474_v48 = vld [vmem:[#allocation17 + $0x80c] sm:$0xf] }
 0xa78   :  { %6207 = vmatpush.bf16.msrb.mxu2 %v10900_v47  ;;  %v12599_v47 = vld [vmem:[#allocation17 + $0xbec] sm:$0xf0] }
 0xa7b   :  { %6190 = vmatpush.bf16.msra.mxu1 %v10836_v60  ;;  %6169 = vmatpush.bf16.msra.mxu3 %v10752_v14 }
 0xa7c   :  { %6208 = vmatpush.bf16.msrb.mxu2 %v10884_v50 }
 0xa7f   :  { %6191 = vmatpush.bf16.msra.mxu1 %v10820_v23  ;;  %6170 = vmatpush.bf16.msra.mxu3 %v10736_v42 }
 0xa80   :  { %6209 = vmatpush.bf16.msrb.mxu2 %v10868_v4  ;;  %v12589_v4 = vld [vmem:[#allocation17 + $0xba4] sm:$0xf] }
 0xa83   :  { %6192 = vmatpush.bf16.msra.mxu1 %v10804_v51  ;;  %6171 = vmatpush.bf16.msra.mxu3 %v10720_v20  ;;  %v12595_v51 = vld [vmem:[#allocation17 + $0xbcc] sm:$0xf0]  ;;  %v11161_v20 = vld [vmem:[#allocation17 + $0xb80] sm:$0xf] }
 0xa84   :  { %6210 = vmatpush.bf16.msrb.mxu2 %v10852_v26  ;;  %v11194_v42 = vor.u32 %v12595_v51, %v11193_v58  ;;  %v11162_v3 = vor.u32 %v12587_v10, %v11161_v20  ;;  %v11146_v26 = vor.u32 %v12583_v35, %v11145_v45  ;;  %v11201_v51 = vld [vmem:[#allocation17 + $0xbc8] sm:$0xf]  ;;  %v11115_v10 = vld [vmem:[#allocation17 + $0xb30] sm:$0xf0]  ;;  %v12588_v35 = vld [vmem:[#allocation17 + $0xb94] sm:$0xf0] }
 0xa85   :  { %v11169_v45 = vld [vmem:[#allocation17 + $0xb88] sm:$0xf] }
 0xa87   :  { %6193 = vmatpush.bf16.msra.mxu1 %v10788_v5  ;;  %v11195_v5 = vld [vmem:[#allocation17 + $0xbd0] sm:$0xf0] }
 0xa88   :  { %v11198_v24 = vor.u32 %v12593_v19, %v11195_v5  ;;  %v12547_v19 = vld [vmem:[#allocation17 + $0xa4c] sm:$0xf0]  ;;  %v11185_v5 = vld [vmem:[#allocation17 + $0xba8] sm:$0xf] }
 0xa8b   :  { %6194 = vmatpush.bf16.msra.mxu1 %v10772_v33  ;;  %v11182_v33 = vor.u32 %v12589_v4, %v11179_v38  ;;  %v10985_v38 = vld [vmem:[#allocation17 + $0xa20] sm:$0xf] }
 0xab2   :  { %v14820_v59 = vpop.f32.mrf.mxu0 }
 0xab8   :  { %v5608_v16 = vpop.f32.mrf.mxu2 }
 0xaba   :  { %v5636_v53 = vpop.f32.mrf.mxu0 }
 0xac0   :  { %v5610_v44 = vpop.f32.mrf.mxu2 }
 0xac1   :  { %v12591_v44 = vld [vmem:[#allocation17 + $0xbac] sm:$0xf0] }
 0xac2   :  { %v5595_v56 = vpop.f32.mrf.mxu1  ;;  %v11178_v54 = vor.u32 %v12591_v44, %v11177_v61  ;;  %v11070_v61 = vor.u32 %v12561_v46, %v11067_v49  ;;  %v11131_v44 = vld [vmem:[#allocation17 + $0xb50] sm:$0xf0]  ;;  %v11187_v46 = vld [vmem:[#allocation17 + $0xbb8] sm:$0xf0] }
 0xac3   :  { %v5609_v11 = vadd.f32 %v5608_v16, %v5595_v56  ;;  %v5686_v39 = vpop.f32.mrf.mxu0 }
 0xac5   :  { %v14823_v52 = vadd.f32 %v5609_v11, %v14808_v21  ;;  %v10756_v21 = vor.u32 %v12482_v34, %v10753_v8  ;;  %v11065_v11 = vld [vmem:[#allocation17 + $0xac0] sm:$0xf] }
 0xac6   :  { %v11049_v8 = vld [vmem:[#allocation17 + $0xaa0] sm:$0xf] }
 0xac7   :  { %6195 = vmatpush.bf16.msra.mxu1 %v10756_v21  ;;  %v11113_v21 = vld [vmem:[#allocation17 + $0xb20] sm:$0xf] }
 0xac8   :  { %v5621_v31 = vpop.f32.mrf.mxu3 }
 0xac9   :  { %v5635_v0 = vadd.f32 %v14820_v59, %v5621_v31  ;;  %v5660_v62 = vpop.f32.mrf.mxu2  ;;  %v10724_v59 = vor.u32 %v12474_v48, %v10721_v1  ;;  %v11129_v31 = vld [vmem:[#allocation17 + $0xb40] sm:$0xf]  ;;  %v11114_v48 = vor.u32 %v12575_v41, %v11113_v21  ;;  %v11219_v21 = vld [vmem:[#allocation17 + $0xbf8] sm:$0xf0] }
 0xaca   :  { %v5597_v32 = vpop.f32.mrf.mxu1 }
 0xacb   :  { %v14827_v57 = vadd.f32 %v5635_v0, %v14804_v55  ;;  %v5688_v60 = vpop.f32.mrf.mxu0  ;;  %6196 = vmatpush.bf16.msra.mxu1 %v10740_v43  ;;  %v12579_v0 = vld [vmem:[#allocation17 + $0xb4c] sm:$0xf0]  ;;  %v11163_v43 = vld [vmem:[#allocation17 + $0xb90] sm:$0xf0] }
 0xacc   :  { %v11130_v34 = vor.u32 %v12579_v0, %v11129_v31  ;;  %v12559_v32 = vld [vmem:[#allocation17 + $0xaac] sm:$0xf0]  ;;  %v11166_v1 = vor.u32 %v12585_v37, %v11163_v43  ;;  %v12553_v31 = vld [vmem:[#allocation17 + $0xa84] sm:$0xf]  ;;  %v11035_v0 = vld [vmem:[#allocation17 + $0xa90] sm:$0xf0] }
 0xacd   :  { %v11050_v60 = vor.u32 %v12559_v32, %v11049_v8  ;;  %v11099_v8 = vld [vmem:[#allocation17 + $0xb10] sm:$0xf0]  ;;  %v12598_v32 = vld [vmem:[#allocation17 + $0xbec] sm:$0xf]  ;;  %v10969_v37 = vld [vmem:[#allocation17 + $0xa00] sm:$0xf] }
 0xace   :  { %v11222_v41 = vor.u32 %v12598_v32, %v11219_v21  ;;  %v12539_v43 = vld [vmem:[#allocation17 + $0xa0c] sm:$0xf0]  ;;  %v11025_v21 = vld [vmem:[#allocation17 + $0xa68] sm:$0xf] }
 0xacf   :  { %6197 = vmatpush.bf16.msra.mxu1 %v10724_v59  ;;  %v11097_v59 = vld [vmem:[#allocation17 + $0xb00] sm:$0xf] }
 0xad0   :  { %v5623_v16 = vpop.f32.mrf.mxu3 }
 0xad1   :  { %v5662_v15 = vpop.f32.mrf.mxu2  ;;  %v11033_v16 = vld [vmem:[#allocation17 + $0xa80] sm:$0xf] }
 0xad2   :  { %v5647_v30 = vpop.f32.mrf.mxu1  ;;  %v12555_v15 = vld [vmem:[#allocation17 + $0xa8c] sm:$0xf0] }
 0xad3   :  { %v5661_v13 = vadd.f32 %v5660_v62, %v5647_v30  ;;  %v6221_v62 = vld [vmem:[#allocation16 + $0x5] sm:$0x1]  ;;  %v11034_v30 = vor.u32 %v12555_v15, %v11033_v16  ;;  %v11153_v15 = vld [vmem:[#allocation17 + $0xb68] sm:$0xf] }
 0xad4   :  { %v12568_v16 = vld [vmem:[#allocation17 + $0xaf4] sm:$0xf0] }
 0xad5   :  { %v14830_v18 = vadd.f32 %v5661_v13, %v14814_v29  ;;  %v11209_v29 = vld [vmem:[#allocation17 + $0xbe0] sm:$0xf]  ;;  %v12571_v13 = vld [vmem:[#allocation17 + $0xb0c] sm:$0xf0] }
 0xad6   :  { %v11210_v36 = vor.u32 %v12599_v47, %v11209_v29  ;;  %v11017_v47 = vld [vmem:[#allocation17 + $0xa60] sm:$0xf] }
 0xad8   :  { %v5673_v55 = vpop.f32.mrf.mxu3 }
 0xad9   :  { %v5687_v27 = vadd.f32 %v5686_v39, %v5673_v55  ;;  %v5721_v9 = vpop.f32.mrf.mxu2  ;;  %v12563_v39 = vld [vmem:[#allocation17 + $0xacc] sm:$0xf0]  ;;  %v11098_v55 = vor.u32 %v12571_v13, %v11097_v59  ;;  %v12549_v13 = vld [vmem:[#allocation17 + $0xa64] sm:$0xf] }
 0xada   :  { %v5726_v53 = vpack.c.bf16 %v5721_v9, %v5721_v9  ;;  %v5649_v23 = vpop.f32.mrf.mxu1  ;;  %v11066_v28 = vor.u32 %v12563_v39, %v11065_v11  ;;  %v12600_v9 = vld [vmem:[#allocation17 + $0xbf4] sm:$0xf0] }
 0xadb   :  { %v14833_v7 = vadd.f32 %v5687_v27, %v14811_v63  ;;  %v11211_v63 = vld [vmem:[#allocation17 + $0xbf0] sm:$0xf0]  ;;  %v11217_v27 = vld [vmem:[#allocation17 + $0xbe8] sm:$0xf]  ;;  %v12565_v23 = vld [vmem:[#allocation17 + $0xae4] sm:$0xf] }
 0xadc   :  { %6133 = vmatmul.bf16.vlgmr.msra.gmra.mxu0 %v5726_v53  ;;  %6159 = vmatmul.bf16.vlgmr.msra.gmra.mxu2 %v5726_v53  ;;  %v11214_v50 = vor.u32 %v12597_v12, %v11211_v63  ;;  %v12596_v12 = vld [vmem:[#allocation17 + $0xbd4] sm:$0xf0] }
 0xadd   :  { %6245 = vmatpush.bf16.msra.mxu0 %v14731_v6  ;;  %6651 = vmatpush.bf16.msra.mxu2 %v11210_v36  ;;  %v12551_v36 = vld [vmem:[#allocation17 + $0xa6c] sm:$0xf0]  ;;  %v11202_v63 = vor.u32 %v12596_v12, %v11201_v51  ;;  %v12592_v11 = vld [vmem:[#allocation17 + $0xbb4] sm:$0xf0] }
 0xade   :  { %v11018_v58 = vor.u32 %v12551_v36, %v11017_v47  ;;  %v11186_v39 = vor.u32 %v12592_v11, %v11185_v5  ;;  %v12580_v47 = vld [vmem:[#allocation17 + $0xb54] sm:$0xf0]  ;;  %v12545_v36 = vld [vmem:[#allocation17 + $0xa44] sm:$0xf] }
 0xae0   :  { %v5675_v40 = vpop.f32.mrf.mxu3 }
 0xae1   :  { %v5723_v22 = vpop.f32.mrf.mxu2  ;;  %6652 = vmatpush.bf16.msra.mxu2 %v11194_v42  ;;  %v11083_v40 = vld [vmem:[#allocation17 + $0xaf0] sm:$0xf0]  ;;  %v12577_v42 = vld [vmem:[#allocation17 + $0xb44] sm:$0xf] }
 0xae2   :  { %v5708_v14 = vpop.f32.mrf.mxu1  ;;  %v12581_v22 = vld [vmem:[#allocation17 + $0xb64] sm:$0xf] }
 0xae3   :  { %v5725_v17 = vpack.c.bf16 %v5708_v14, %v5708_v14  ;;  %v11086_v14 = vor.u32 %v12565_v23, %v11083_v40  ;;  %v11203_v23 = vld [vmem:[#allocation17 + $0xbd8] sm:$0xf0] }
 0xae5   :  { %6120 = vmatmul.bf16.vlgmr.msrb.gmra.mxu3 %v5725_v17  ;;  %6146 = vmatmul.bf16.vlgmr.msrb.gmra.mxu1 %v5725_v17 }
 0xae6   :  { %6232 = vmatpush.bf16.msrb.mxu3 %v14724_v25  ;;  %6638 = vmatpush.bf16.msrb.mxu1 %v11082_v2  ;;  %v11001_v2 = vld [vmem:[#allocation17 + $0xa40] sm:$0xf] }
 0xae7   :  { %6653 = vmatpush.bf16.msra.mxu2 %v11178_v54  ;;  %v11051_v54 = vld [vmem:[#allocation17 + $0xab0] sm:$0xf0] }
 0xaea   :  { %v5710_v56 = vpop.f32.mrf.mxu1  ;;  %6639 = vmatpush.bf16.msrb.mxu1 %v11066_v28  ;;  %v12557_v28 = vld [vmem:[#allocation17 + $0xaa4] sm:$0xf] }
 0xaeb   :  { %6654 = vmatpush.bf16.msra.mxu2 %v11162_v3  ;;  %v11002_v56 = vor.u32 %v12547_v19, %v11001_v2  ;;  %v11054_v20 = vor.u32 %v12557_v28, %v11051_v54  ;;  %v12543_v3 = vld [vmem:[#allocation17 + $0xa2c] sm:$0xf0]  ;;  %v12576_v2 = vld [vmem:[#allocation17 + $0xb34] sm:$0xf0]  ;;  %v12541_v19 = vld [vmem:[#allocation17 + $0xa24] sm:$0xf] }
 0xaec   :  { %6185 = vmatmul.bf16.vlgmr.msrb.gmra.mxu0 %v5726_v53  ;;  %6211 = vmatmul.bf16.vlgmr.msrb.gmra.mxu2 %v5726_v53  ;;  %v11218_v53 = vor.u32 %v12600_v9, %v11217_v27  ;;  %v11171_v28 = vld [vmem:[#allocation17 + $0xb98] sm:$0xf0] }
 0xaed   :  { %6677 = vmatpush.bf16.msrb.mxu0 %v11214_v50  ;;  %v11134_v50 = vor.u32 %v12577_v42, %v11131_v44  ;;  %v11057_v42 = vld [vmem:[#allocation17 + $0xaa8] sm:$0xf] }
 0xaee   :  { %6640 = vmatpush.bf16.msrb.mxu1 %v11050_v60  ;;  %v11121_v44 = vld [vmem:[#allocation17 + $0xb28] sm:$0xf] }
 0xaef   :  { %6655 = vmatpush.bf16.msra.mxu2 %v11146_v26  ;;  %v11170_v26 = vor.u32 %v12588_v35, %v11169_v45  ;;  %v11122_v5 = vor.u32 %v12576_v2, %v11121_v44  ;;  %v10971_v45 = vld [vmem:[#allocation17 + $0xa10] sm:$0xf0]  ;;  %v12540_v2 = vld [vmem:[#allocation17 + $0xa14] sm:$0xf0] }
 0xaf1   :  { %6678 = vmatpush.bf16.msrb.mxu0 %v11198_v24  ;;  %v12573_v24 = vld [vmem:[#allocation17 + $0xb24] sm:$0xf] }
 0xaf2   :  { %6641 = vmatpush.bf16.msrb.mxu1 %v11034_v30  ;;  %v11118_v4 = vor.u32 %v12573_v24, %v11115_v10  ;;  %v12584_v30 = vld [vmem:[#allocation17 + $0xb74] sm:$0xf0] }
 0xaf3   :  { %6656 = vmatpush.bf16.msra.mxu2 %v11130_v34  ;;  %v11038_v34 = vor.u32 %v12553_v31, %v11035_v0  ;;  %v11154_v27 = vor.u32 %v12584_v30, %v11153_v15  ;;  %v12556_v10 = vld [vmem:[#allocation17 + $0xa94] sm:$0xf0]  ;;  %v12566_v31 = vld [vmem:[#allocation17 + $0xaec] sm:$0xf]  ;;  %v11091_v0 = vld [vmem:[#allocation17 + $0xaf8] sm:$0xf0] }
 0xaf4   :  { %v11139_v15 = vld [vmem:[#allocation17 + $0xb58] sm:$0xf0]  ;;  %v12548_v30 = vld [vmem:[#allocation17 + $0xa54] sm:$0xf0] }
 0xaf5   :  { %6172 = vmatmul.bf16.vlgmr.msra.gmra.mxu3 %v5725_v17  ;;  %6198 = vmatmul.bf16.vlgmr.msra.gmra.mxu1 %v5725_v17  ;;  %v11147_v17 = vld [vmem:[#allocation17 + $0xb70] sm:$0xf0] }
 0xaf6   :  { %6679 = vmatpush.bf16.msrb.mxu0 %v11182_v33  ;;  %v11150_v29 = vor.u32 %v12581_v22, %v11147_v17  ;;  %6664 = vmatpush.bf16.msra.mxu3 %v11086_v14  ;;  %v10986_v33 = vor.u32 %v12543_v3, %v10985_v38  ;;  %v11073_v22 = vld [vmem:[#allocation17 + $0xac8] sm:$0xf]  ;;  %v12564_v14 = vld [vmem:[#allocation17 + $0xad4] sm:$0xf0] }
 0xaf7   :  { %6657 = vmatpush.bf16.msra.mxu2 %v11114_v48  ;;  %6642 = vmatpush.bf16.msrb.mxu1 %v11018_v58  ;;  %v10970_v48 = vor.u32 %v12539_v43, %v10969_v37  ;;  %v11137_v17 = vld [vmem:[#allocation17 + $0xb48] sm:$0xf]  ;;  %v11003_v58 = vld [vmem:[#allocation17 + $0xa50] sm:$0xf0]  ;;  %v12572_v3 = vld [vmem:[#allocation17 + $0xb14] sm:$0xf0] }
 0xaf8   :  { %v11138_v51 = vor.u32 %v12580_v47, %v11137_v17  ;;  %v11006_v12 = vor.u32 %v12545_v36, %v11003_v58  ;;  %v12562_v43 = vld [vmem:[#allocation17 + $0xacc] sm:$0xf]  ;;  %v10993_v17 = vld [vmem:[#allocation17 + $0xa28] sm:$0xf] }
 0xafa   :  { %6680 = vmatpush.bf16.msrb.mxu0 %v11166_v1  ;;  %6665 = vmatpush.bf16.msra.mxu3 %v11070_v61  ;;  %v11089_v1 = vld [vmem:[#allocation17 + $0xae8] sm:$0xf]  ;;  %v12560_v61 = vld [vmem:[#allocation17 + $0xab4] sm:$0xf0] }
 0xafb   :  { %6658 = vmatpush.bf16.msra.mxu2 %v11098_v55  ;;  %6643 = vmatpush.bf16.msrb.mxu1 %v11002_v56  ;;  %v11090_v59 = vor.u32 %v12568_v16, %v11089_v1  ;;  %v11019_v55 = vld [vmem:[#allocation17 + $0xa70] sm:$0xf0]  ;;  %v12578_v1 = vld [vmem:[#allocation17 + $0xb4c] sm:$0xf] }
 0xafc   :  { %10966 = vmatmul.msk.bf16.vlgmr.msra.gmra.mxu0 %vm3593_vm4, %v6221_v62  ;;  %v11022_v9 = vor.u32 %v12549_v13, %v11019_v55  ;;  %v10987_v56 = vld [vmem:[#allocation17 + $0xa30] sm:$0xf0]  ;;  %v11142_v55 = vor.u32 %v12578_v1, %v11139_v15  ;;  %v12663_v15 = vld [vmem:[#allocation17 + $0xdec] sm:$0xf0] }
 0xafd   :  { %v10990_v11 = vor.u32 %v12541_v19, %v10987_v56 }
 0xafe   :  { %6681 = vmatpush.bf16.msrb.mxu0 %v11150_v29  ;;  %6666 = vmatpush.bf16.msra.mxu3 %v11054_v20  ;;  %v11074_v29 = vor.u32 %v12564_v14, %v11073_v22  ;;  %v11041_v20 = vld [vmem:[#allocation17 + $0xa88] sm:$0xf]  ;;  %v11123_v14 = vld [vmem:[#allocation17 + $0xb38] sm:$0xf0] }
 0xaff   :  { %6703 = vmatpush.bf16.msrb.mxu2 %v11218_v53  ;;  %6644 = vmatpush.bf16.msrb.mxu1 %v10986_v33  ;;  %v12594_v53 = vld [vmem:[#allocation17 + $0xbcc] sm:$0xf]  ;;  %v11042_v38 = vor.u32 %v12556_v10, %v11041_v20  ;;  %v12537_v33 = vld [vmem:[#allocation17 + $0xa04] sm:$0xf]  ;;  %v11011_v20 = vld [vmem:[#allocation17 + $0xa58] sm:$0xf0] }
 0xb00   :  { %v11206_v40 = vor.u32 %v12594_v53, %v11203_v23  ;;  %v11059_v53 = vld [vmem:[#allocation17 + $0xab8] sm:$0xf0]  ;;  %v12574_v23 = vld [vmem:[#allocation17 + $0xb2c] sm:$0xf] }
 0xb01   :  { %v11126_v47 = vor.u32 %v12574_v23, %v11123_v14  ;;  %v12627_v14 = vld [vmem:[#allocation17 + $0xccc] sm:$0xf0] }
 0xb02   :  { %6682 = vmatpush.bf16.msrb.mxu0 %v11134_v50  ;;  %6667 = vmatpush.bf16.msra.mxu3 %v11038_v34  ;;  %v11058_v50 = vor.u32 %v12560_v61, %v11057_v42  ;;  %v11094_v34 = vor.u32 %v12566_v31, %v11091_v0  ;;  %v11107_v42 = vld [vmem:[#allocation17 + $0xb18] sm:$0xf0]  ;;  %v12538_v31 = vld [vmem:[#allocation17 + $0xa0c] sm:$0xf] }
 0xb03   :  { %6704 = vmatpush.bf16.msrb.mxu2 %v11202_v63  ;;  %6645 = vmatpush.bf16.msrb.mxu1 %v10970_v48  ;;  %v12590_v63 = vld [vmem:[#allocation17 + $0xbac] sm:$0xf]  ;;  %v11075_v48 = vld [vmem:[#allocation17 + $0xad8] sm:$0xf0] }
 0xb04   :  { %v11190_v49 = vor.u32 %v12590_v63, %v11187_v46  ;;  %v11078_v16 = vor.u32 %v12562_v43, %v11075_v48  ;;  %v12570_v63 = vld [vmem:[#allocation17 + $0xb0c] sm:$0xf]  ;;  %v10979_v0 = vld [vmem:[#allocation17 + $0xa18] sm:$0xf0] }
 0xb05   :  { %10965 = vmatmul.msk.bf16.vlgmr.msrb.gmra.mxu3 %vm3593_vm4, %v6221_v62  ;;  %v12569_v62 = vld [vmem:[#allocation17 + $0xb04] sm:$0xf]  ;;  %v11110_v44 = vor.u32 %v12570_v63, %v11107_v42  ;;  %v11419_v63 = vld [vmem:[#allocation17 + $0xd80] sm:$0xf] }
 0xb06   :  { %6683 = vmatpush.bf16.msrb.mxu0 %v11118_v4  ;;  %v11102_v60 = vor.u32 %v12569_v62, %v11099_v8  ;;  %6668 = vmatpush.bf16.msra.mxu3 %v11022_v9  ;;  %v11105_v4 = vld [vmem:[#allocation17 + $0xb08] sm:$0xf]  ;;  %v12582_v62 = vld [vmem:[#allocation17 + $0xb6c] sm:$0xf]  ;;  %v11155_v8 = vld [vmem:[#allocation17 + $0xb78] sm:$0xf0] }
 0xb07   :  { %6705 = vmatpush.bf16.msrb.mxu2 %v11186_v39  ;;  %6690 = vmatpush.bf16.msra.mxu1 %v11090_v59  ;;  %v12586_v39 = vld [vmem:[#allocation17 + $0xb8c] sm:$0xf]  ;;  %v11106_v35 = vor.u32 %v12572_v3, %v11105_v4  ;;  %v11158_v32 = vor.u32 %v12582_v62, %v11155_v8  ;;  %v11009_v59 = vld [vmem:[#allocation17 + $0xa48] sm:$0xf]  ;;  %v10995_v3 = vld [vmem:[#allocation17 + $0xa38] sm:$0xf0] }
 0xb08   :  { %v11174_v54 = vor.u32 %v12586_v39, %v11171_v28  ;;  %v12558_v9 = vld [vmem:[#allocation17 + $0xaac] sm:$0xf] }
 0xb09   :  { %v11062_v22 = vor.u32 %v12558_v9, %v11059_v53  ;;  %v11435_v53 = vld [vmem:[#allocation17 + $0xda0] sm:$0xf] }
 0xb0a   :  { %6684 = vmatpush.bf16.msrb.mxu0 %v11102_v60  ;;  %6669 = vmatpush.bf16.msra.mxu3 %v11006_v12  ;;  %v12552_v60 = vld [vmem:[#allocation17 + $0xa74] sm:$0xf0]  ;;  %v11043_v12 = vld [vmem:[#allocation17 + $0xa98] sm:$0xf0] }
 0xb0b   :  { %6706 = vmatpush.bf16.msrb.mxu2 %v11170_v26  ;;  %6691 = vmatpush.bf16.msra.mxu1 %v11074_v29  ;;  %v10974_v26 = vor.u32 %v12537_v33, %v10971_v45  ;;  %v12544_v29 = vld [vmem:[#allocation17 + $0xa34] sm:$0xf0] }
 0xb0c   :  { %v10994_v36 = vor.u32 %v12544_v29, %v10993_v17  ;;  %v12655_v17 = vld [vmem:[#allocation17 + $0xdac] sm:$0xf0]  ;;  %v12661_v29 = vld [vmem:[#allocation17 + $0xde4] sm:$0xf] }
 0xb0e   :  { %6729 = vmatpush.bf16.msra.mxu0 %v11222_v41  ;;  %6670 = vmatpush.bf16.msra.mxu3 %v10990_v11  ;;  %v11026_v41 = vor.u32 %v12552_v60, %v11025_v21  ;;  %v11027_v11 = vld [vmem:[#allocation17 + $0xa78] sm:$0xf0] }
 0xb0f   :  { %6707 = vmatpush.bf16.msrb.mxu2 %v11154_v27  ;;  %6692 = vmatpush.bf16.msra.mxu1 %v11058_v50  ;;  %v11010_v27 = vor.u32 %v12548_v30, %v11009_v59  ;;  %v10977_v50 = vld [vmem:[#allocation17 + $0xa08] sm:$0xf]  ;;  %v11451_v59 = vld [vmem:[#allocation17 + $0xdc0] sm:$0xf] }
 0xb10   :  { %v10978_v56 = vor.u32 %v12540_v2, %v10977_v50  ;;  %v12647_v50 = vld [vmem:[#allocation17 + $0xd6c] sm:$0xf0]  ;;  %v6747_v2 = vld [vmem:[#allocation16 + $0x6] sm:$0x1] }
 0xb12   :  { %6730 = vmatpush.bf16.msra.mxu0 %v11206_v40  ;;  %6671 = vmatpush.bf16.msra.mxu3 %v10974_v26 }
 0xb13   :  { %6708 = vmatpush.bf16.msrb.mxu2 %v11138_v51  ;;  %6693 = vmatpush.bf16.msra.mxu1 %v11042_v38  ;;  %v12554_v51 = vld [vmem:[#allocation17 + $0xa8c] sm:$0xf] }
 0xb14   :  { %v12542_v38 = vld [vmem:[#allocation17 + $0xa2c] sm:$0xf] }
 0xb16   :  { %6731 = vmatpush.bf16.msra.mxu0 %v11190_v49  ;;  %6716 = vmatpush.bf16.msrb.mxu3 %v11094_v34  ;;  %v11046_v49 = vor.u32 %v12554_v51, %v11043_v12  ;;  %v10982_v34 = vor.u32 %v12538_v31, %v10979_v0  ;;  %v11436_v12 = vor.u32 %v12655_v17, %v11435_v53  ;;  %v11371_v31 = vld [vmem:[#allocation17 + $0xd20] sm:$0xf]  ;;  %v12639_v0 = vld [vmem:[#allocation17 + $0xd2c] sm:$0xf0]  ;;  %v12664_v53 = vld [vmem:[#allocation17 + $0xdf4] sm:$0xf0] }
 0xb17   :  { %6709 = vmatpush.bf16.msrb.mxu2 %v11122_v5  ;;  %6694 = vmatpush.bf16.msra.mxu1 %v11026_v41  ;;  %v12550_v5 = vld [vmem:[#allocation17 + $0xa6c] sm:$0xf] }
 0xb18   :  { %v11030_v39 = vor.u32 %v12550_v5, %v11027_v11  ;;  %v12623_v5 = vld [vmem:[#allocation17 + $0xcac] sm:$0xf0]  ;;  %v12657_v11 = vld [vmem:[#allocation17 + $0xdc4] sm:$0xf] }
 0xb1a   :  { %6732 = vmatpush.bf16.msra.mxu0 %v11174_v54  ;;  %6717 = vmatpush.bf16.msrb.mxu3 %v11078_v16  ;;  %v12546_v54 = vld [vmem:[#allocation17 + $0xa4c] sm:$0xf] }
 0xb1b   :  { %6710 = vmatpush.bf16.msrb.mxu2 %v11106_v35  ;;  %6695 = vmatpush.bf16.msra.mxu1 %v11010_v27  ;;  %v11014_v4 = vor.u32 %v12546_v54, %v11011_v20  ;;  %v10998_v35 = vor.u32 %v12542_v38, %v10995_v3  ;;  %v12631_v27 = vld [vmem:[#allocation17 + $0xcec] sm:$0xf0]  ;;  %v11387_v54 = vld [vmem:[#allocation17 + $0xd40] sm:$0xf] }
 0xb1c   :  { %v12643_v20 = vld [vmem:[#allocation17 + $0xd4c] sm:$0xf0]  ;;  %v11291_v38 = vld [vmem:[#allocation17 + $0xc80] sm:$0xf] }
 0xb1d   :  { %v12619_v3 = vld [vmem:[#allocation17 + $0xc8c] sm:$0xf0] }
 0xb1e   :  { %6733 = vmatpush.bf16.msra.mxu0 %v11158_v32  ;;  %6718 = vmatpush.bf16.msrb.mxu3 %v11062_v22  ;;  %v11323_v22 = vld [vmem:[#allocation17 + $0xcc0] sm:$0xf] }
 0xb1f   :  { %6696 = vmatpush.bf16.msra.mxu1 %v10994_v36 }
 0xb22   :  { %6734 = vmatpush.bf16.msra.mxu0 %v11142_v55  ;;  %6719 = vmatpush.bf16.msrb.mxu3 %v11046_v49  ;;  %v11339_v55 = vld [vmem:[#allocation17 + $0xce0] sm:$0xf]  ;;  %v12651_v49 = vld [vmem:[#allocation17 + $0xd8c] sm:$0xf0] }
 0xb23   :  { %6697 = vmatpush.bf16.msra.mxu1 %v10978_v56  ;;  %v11340_v23 = vor.u32 %v12631_v27, %v11339_v55  ;;  %v11420_v42 = vor.u32 %v12651_v49, %v11419_v63  ;;  %v11307_v56 = vld [vmem:[#allocation17 + $0xca0] sm:$0xf]  ;;  %v11325_v55 = vld [vmem:[#allocation17 + $0xcd0] sm:$0xf0]  ;;  %v11475_v27 = vld [vmem:[#allocation17 + $0xde8] sm:$0xf] }
 0xb24   :  { %v11459_v63 = vld [vmem:[#allocation17 + $0xdc8] sm:$0xf]  ;;  %v12660_v49 = vld [vmem:[#allocation17 + $0xdd4] sm:$0xf0] }
 0xb26   :  { %6735 = vmatpush.bf16.msra.mxu0 %v11126_v47  ;;  %6720 = vmatpush.bf16.msrb.mxu3 %v11030_v39  ;;  %v11469_v47 = vld [vmem:[#allocation17 + $0xdf0] sm:$0xf0]  ;;  %v11308_v39 = vor.u32 %v12623_v5, %v11307_v56 }
 0xb27   :  { %v11472_v51 = vor.u32 %v12661_v29, %v11469_v47  ;;  %v12645_v29 = vld [vmem:[#allocation17 + $0xd64] sm:$0xf]  ;;  %v11405_v47 = vld [vmem:[#allocation17 + $0xd70] sm:$0xf0] }
 0xb28   :  { %v11389_v56 = vld [vmem:[#allocation17 + $0xd50] sm:$0xf0] }
 0xb2a   :  { %6736 = vmatpush.bf16.msra.mxu0 %v11110_v44  ;;  %6721 = vmatpush.bf16.msrb.mxu3 %v11014_v4  ;;  %v11403_v44 = vld [vmem:[#allocation17 + $0xd60] sm:$0xf]  ;;  %v11388_v4 = vor.u32 %v12643_v20, %v11387_v54  ;;  %v11443_v54 = vld [vmem:[#allocation17 + $0xda8] sm:$0xf]  ;;  %v12656_v20 = vld [vmem:[#allocation17 + $0xdb4] sm:$0xf0] }
 0xb2e   :  { %6722 = vmatpush.bf16.msrb.mxu3 %v10998_v35  ;;  %v11437_v35 = vld [vmem:[#allocation17 + $0xdb0] sm:$0xf0] }
 0xb32   :  { %6723 = vmatpush.bf16.msrb.mxu3 %v10982_v34  ;;  %v12629_v34 = vld [vmem:[#allocation17 + $0xce4] sm:$0xf] }
 0xb59   :  { %v14839_v24 = vpop.f32.mrf.mxu0 }
 0xb5f   :  { %v14841_v37 = vpop.f32.mrf.mxu2 }
 0xb61   :  { %v6136_v13 = vpop.f32.mrf.mxu0 }
 0xb62   :  { %v14843_v40 = vpop.f32.mrf.mxu1  ;;  %v12659_v13 = vld [vmem:[#allocation17 + $0xdcc] sm:$0xf0] }
 0xb63   :  { %v11452_v9 = vor.u32 %v12659_v13, %v11451_v59  ;;  %v12625_v13 = vld [vmem:[#allocation17 + $0xcc4] sm:$0xf] }
 0xb67   :  { %v6162_v58 = vpop.f32.mrf.mxu2 }
 0xb68   :  { %v14845_v46 = vpop.f32.mrf.mxu3  ;;  %v11324_v58 = vor.u32 %v12627_v14, %v11323_v22  ;;  %v12611_v22 = vld [vmem:[#allocation17 + $0xc4c] sm:$0xf0]  ;;  %v11476_v14 = vor.u32 %v12664_v53, %v11475_v27  ;;  %v11261_v27 = vld [vmem:[#allocation17 + $0xc50] sm:$0xf0] }
 0xb69   :  { %v14847_v61 = vpop.f32.mrf.mxu0 }
 0xb6a   :  { %v6149_v19 = vpop.f32.mrf.mxu1 }
 0xb6b   :  { %v11404_v19 = vor.u32 %v12647_v50, %v11403_v44  ;;  %v11243_v44 = vld [vmem:[#allocation17 + $0xc20] sm:$0xf]  ;;  %v12607_v50 = vld [vmem:[#allocation17 + $0xc2c] sm:$0xf0] }
 0xb6f   :  { %v6212_v28 = vpop.f32.mrf.mxu2 }
 0xb70   :  { %v6123_v10 = vpop.f32.mrf.mxu3 }
 0xb71   :  { %v6188_v33 = vpop.f32.mrf.mxu0 }
 0xb72   :  { %v6199_v45 = vpop.f32.mrf.mxu1  ;;  %v12653_v33 = vld [vmem:[#allocation17 + $0xda4] sm:$0xf] }
 0xb73   :  { %v6213_v26 = vadd.f32 %v6212_v28, %v6199_v45  ;;  %v11453_v28 = vld [vmem:[#allocation17 + $0xdd0] sm:$0xf0]  ;;  %v11292_v45 = vor.u32 %v12619_v3, %v11291_v38  ;;  %v12603_v38 = vld [vmem:[#allocation17 + $0xc0c] sm:$0xf0]  ;;  %v12637_v3 = vld [vmem:[#allocation17 + $0xd24] sm:$0xf] }
 0xb74   :  { %v11456_v10 = vor.u32 %v12657_v11, %v11453_v28  ;;  %v12617_v11 = vld [vmem:[#allocation17 + $0xc84] sm:$0xf] }
 0xb75   :  { %v14850_v62 = vadd.f32 %v6213_v26, %v14833_v7  ;;  %v11467_v7 = vld [vmem:[#allocation17 + $0xde0] sm:$0xf]  ;;  %v11440_v26 = vor.u32 %v12653_v33, %v11437_v35  ;;  %v11373_v33 = vld [vmem:[#allocation17 + $0xd30] sm:$0xf0] }
 0xb76   :  { %v11468_v30 = vor.u32 %v12663_v15, %v11467_v7  ;;  %v11355_v7 = vld [vmem:[#allocation17 + $0xd00] sm:$0xf]  ;;  %v12635_v15 = vld [vmem:[#allocation17 + $0xd0c] sm:$0xf0]  ;;  %v11376_v35 = vor.u32 %v12637_v3, %v11373_v33  ;;  %v12630_v3 = vld [vmem:[#allocation17 + $0xcec] sm:$0xf] }
 0xb77   :  { %v6214_v8 = vpop.f32.mrf.mxu2 }
 0xb78   :  { %v14852_v32 = vpop.f32.mrf.mxu3  ;;  %v11372_v8 = vor.u32 %v12639_v0, %v11371_v31  ;;  %v12632_v31 = vld [vmem:[#allocation17 + $0xcf4] sm:$0xf0] }
 0xb79   :  { %v6247_v21 = vpop.f32.mrf.mxu0 }
 0xb7a   :  { %v6252_v60 = vpack.c.bf16 %v6247_v21, %v6247_v21  ;;  %v6201_v41 = vpop.f32.mrf.mxu1  ;;  %v11341_v21 = vld [vmem:[#allocation17 + $0xcf0] sm:$0xf0] }
 0xb7b   :  { %v11275_v41 = vld [vmem:[#allocation17 + $0xc60] sm:$0xf] }
 0xb7c   :  { %6659 = vmatmul.bf16.vlgmr.msra.gmra.mxu2 %v6252_v60  ;;  %6685 = vmatmul.bf16.vlgmr.msrb.gmra.mxu0 %v6252_v60 }
 0xb7d   :  { %6771 = vmatpush.bf16.msra.mxu2 %v14731_v6  ;;  %7177 = vmatpush.bf16.msrb.mxu0 %v11468_v30  ;;  %v11356_v30 = vor.u32 %v12635_v15, %v11355_v7  ;;  %v11331_v7 = vld [vmem:[#allocation17 + $0xcc8] sm:$0xf]  ;;  %v12628_v15 = vld [vmem:[#allocation17 + $0xcd4] sm:$0xf0] }
 0xb80   :  { %v6175_v43 = vpop.f32.mrf.mxu3 }
 0xb81   :  { %v6249_v48 = vpop.f32.mrf.mxu0  ;;  %7178 = vmatpush.bf16.msrb.mxu0 %v11452_v9  ;;  %v12615_v43 = vld [vmem:[#allocation17 + $0xc6c] sm:$0xf0]  ;;  %v11328_v9 = vor.u32 %v12625_v13, %v11325_v55  ;;  %v11477_v13 = vld [vmem:[#allocation17 + $0xdf8] sm:$0xf0]  ;;  %v12609_v55 = vld [vmem:[#allocation17 + $0xc44] sm:$0xf] }
 0xb82   :  { %v12649_v48 = vld [vmem:[#allocation17 + $0xd84] sm:$0xf]  ;;  %v11264_v53 = vor.u32 %v12609_v55, %v11261_v27  ;;  %v11413_v27 = vld [vmem:[#allocation17 + $0xd78] sm:$0xf0] }
 0xb85   :  { %7179 = vmatpush.bf16.msrb.mxu0 %v11436_v12 }
 0xb88   :  { %v6234_v1 = vpop.f32.mrf.mxu3 }
 0xb89   :  { %v6251_v16 = vpack.c.bf16 %v6234_v1, %v6234_v1  ;;  %7180 = vmatpush.bf16.msrb.mxu0 %v11420_v42  ;;  %v11276_v1 = vor.u32 %v12615_v43, %v11275_v41  ;;  %v11460_v42 = vor.u32 %v12660_v49, %v11459_v63  ;;  %v12652_v41 = vld [vmem:[#allocation17 + $0xd94] sm:$0xf0] }
 0xb8b   :  { %6646 = vmatmul.bf16.vlgmr.msrb.gmra.mxu1 %v6251_v16  ;;  %6672 = vmatmul.bf16.vlgmr.msra.gmra.mxu3 %v6251_v16 }
 0xb8c   :  { %6711 = vmatmul.bf16.vlgmr.msrb.gmra.mxu2 %v6252_v60  ;;  %6737 = vmatmul.bf16.vlgmr.msra.gmra.mxu0 %v6252_v60  ;;  %v11344_v60 = vor.u32 %v12629_v34, %v11341_v21  ;;  %v12613_v34 = vld [vmem:[#allocation17 + $0xc64] sm:$0xf] }
 0xb8d   :  { %6758 = vmatpush.bf16.msrb.mxu1 %v14724_v25  ;;  %7164 = vmatpush.bf16.msra.mxu3 %v11340_v23  ;;  %v11259_v23 = vld [vmem:[#allocation17 + $0xc40] sm:$0xf] }
 0xb8e   :  { %7203 = vmatpush.bf16.msrb.mxu2 %v11472_v51  ;;  %7181 = vmatpush.bf16.msrb.mxu0 %v11404_v19  ;;  %v11260_v17 = vor.u32 %v12611_v22, %v11259_v23  ;;  %v11309_v51 = vld [vmem:[#allocation17 + $0xcb0] sm:$0xf0]  ;;  %v11244_v19 = vor.u32 %v12607_v50, %v11243_v44  ;;  %v11411_v23 = vld [vmem:[#allocation17 + $0xd68] sm:$0xf]  ;;  %v12648_v22 = vld [vmem:[#allocation17 + $0xd74] sm:$0xf0] }
 0xb8f   :  { %v12644_v44 = vld [vmem:[#allocation17 + $0xd54] sm:$0xf0] }
 0xb90   :  { %v6236_v36 = vpop.f32.mrf.mxu3 }
 0xb91   :  { %7165 = vmatpush.bf16.msra.mxu3 %v11324_v58  ;;  %v11408_v36 = vor.u32 %v12645_v29, %v11405_v47  ;;  %v12621_v58 = vld [vmem:[#allocation17 + $0xca4] sm:$0xf]  ;;  %v12624_v29 = vld [vmem:[#allocation17 + $0xcb4] sm:$0xf0]  ;;  %v12658_v47 = vld [vmem:[#allocation17 + $0xdcc] sm:$0xf] }
 0xb92   :  { %7204 = vmatpush.bf16.msrb.mxu2 %v11456_v10  ;;  %7182 = vmatpush.bf16.msrb.mxu0 %v11388_v4  ;;  %v11312_v12 = vor.u32 %v12621_v58, %v11309_v51  ;;  %v11227_v10 = vld [vmem:[#allocation17 + $0xc00] sm:$0xf]  ;;  %v11444_v4 = vor.u32 %v12656_v20, %v11443_v54  ;;  %v11461_v58 = vld [vmem:[#allocation17 + $0xdd8] sm:$0xf0]  ;;  %v12605_v51 = vld [vmem:[#allocation17 + $0xc24] sm:$0xf] }
 0xb93   :  { %v11464_v63 = vor.u32 %v12658_v47, %v11461_v58  ;;  %v11229_v54 = vld [vmem:[#allocation17 + $0xc10] sm:$0xf0]  ;;  %v12642_v47 = vld [vmem:[#allocation17 + $0xd4c] sm:$0xf]  ;;  %v11397_v58 = vld [vmem:[#allocation17 + $0xd58] sm:$0xf0] }
 0xb95   :  { %7166 = vmatpush.bf16.msra.mxu3 %v11308_v39  ;;  %v11293_v39 = vld [vmem:[#allocation17 + $0xc90] sm:$0xf0] }
 0xb96   :  { %7205 = vmatpush.bf16.msrb.mxu2 %v11440_v26  ;;  %7183 = vmatpush.bf16.msrb.mxu0 %v11372_v8  ;;  %v11296_v28 = vor.u32 %v12617_v11, %v11293_v39  ;;  %v11347_v26 = vld [vmem:[#allocation17 + $0xce8] sm:$0xf]  ;;  %v11277_v8 = vld [vmem:[#allocation17 + $0xc70] sm:$0xf0]  ;;  %v11445_v39 = vld [vmem:[#allocation17 + $0xdb8] sm:$0xf0] }
 0xb97   :  { %v11348_v0 = vor.u32 %v12632_v31, %v11347_v26  ;;  %v11280_v21 = vor.u32 %v12613_v34, %v11277_v8  ;;  %v11283_v26 = vld [vmem:[#allocation17 + $0xc68] sm:$0xf]  ;;  %v12616_v31 = vld [vmem:[#allocation17 + $0xc74] sm:$0xf0]  ;;  %v11429_v8 = vld [vmem:[#allocation17 + $0xd98] sm:$0xf0] }
 0xb98   :  { %v11284_v34 = vor.u32 %v12616_v31, %v11283_v26 }
 0xb99   :  { %7167 = vmatpush.bf16.msra.mxu3 %v11292_v45  ;;  %v11228_v45 = vor.u32 %v12603_v38, %v11227_v10  ;;  %v12640_v38 = vld [vmem:[#allocation17 + $0xd34] sm:$0xf0] }
 0xb9a   :  { %7184 = vmatpush.bf16.msrb.mxu0 %v11356_v30  ;;  %v11332_v30 = vor.u32 %v12628_v15, %v11331_v7 }
 0xb9b   :  { %6698 = vmatmul.bf16.vlgmr.msra.gmra.mxu1 %v6251_v16  ;;  %6724 = vmatmul.bf16.vlgmr.msrb.gmra.mxu3 %v6251_v16  ;;  %v11421_v16 = vld [vmem:[#allocation17 + $0xd90] sm:$0xf0] }
 0xb9c   :  { %11224 = vmatmul.msk.bf16.vlgmr.msra.gmra.mxu2 %vm3593_vm4, %v6747_v2  ;;  %7190 = vmatpush.bf16.msra.mxu1 %v11344_v60  ;;  %v11424_v59 = vor.u32 %v12649_v48, %v11421_v16  ;;  %v11427_v60 = vld [vmem:[#allocation17 + $0xd88] sm:$0xf]  ;;  %v12633_v48 = vld [vmem:[#allocation17 + $0xd04] sm:$0xf] }
 0xb9d   :  { %7168 = vmatpush.bf16.msra.mxu3 %v11276_v1  ;;  %v11428_v43 = vor.u32 %v12652_v41, %v11427_v60  ;;  %v11357_v1 = vld [vmem:[#allocation17 + $0xd10] sm:$0xf0]  ;;  %v11363_v41 = vld [vmem:[#allocation17 + $0xd08] sm:$0xf] }
 0xb9e   :  { %7206 = vmatpush.bf16.msrb.mxu2 %v11424_v59  ;;  %7229 = vmatpush.bf16.msra.mxu0 %v11476_v14  ;;  %v11360_v16 = vor.u32 %v12633_v48, %v11357_v1  ;;  %v12662_v59 = vld [vmem:[#allocation17 + $0xdec] sm:$0xf]  ;;  %v11412_v14 = vor.u32 %v12648_v22, %v11411_v23  ;;  %v11317_v23 = vld [vmem:[#allocation17 + $0xcb8] sm:$0xf0] }
 0xb9f   :  { %v12626_v48 = vld [vmem:[#allocation17 + $0xccc] sm:$0xf] }
 0xba0   :  { %7191 = vmatpush.bf16.msra.mxu1 %v11328_v9  ;;  %v11480_v9 = vor.u32 %v12662_v59, %v11477_v13  ;;  %v11267_v59 = vld [vmem:[#allocation17 + $0xc48] sm:$0xf]  ;;  %v12646_v13 = vld [vmem:[#allocation17 + $0xd6c] sm:$0xf] }
 0xba1   :  { %7169 = vmatpush.bf16.msra.mxu3 %v11260_v17  ;;  %v11315_v17 = vld [vmem:[#allocation17 + $0xca8] sm:$0xf] }
 0xba2   :  { %7207 = vmatpush.bf16.msrb.mxu2 %v11408_v36  ;;  %7230 = vmatpush.bf16.msra.mxu0 %v11460_v42  ;;  %v11316_v36 = vor.u32 %v12624_v29, %v11315_v17  ;;  %v11395_v42 = vld [vmem:[#allocation17 + $0xd48] sm:$0xf]  ;;  %v12608_v29 = vld [vmem:[#allocation17 + $0xc34] sm:$0xf0] }
 0xba3   :  { %v11396_v50 = vor.u32 %v12644_v44, %v11395_v42  ;;  %v11251_v17 = vld [vmem:[#allocation17 + $0xc28] sm:$0xf] }
 0xba4   :  { %7192 = vmatpush.bf16.msra.mxu1 %v11312_v12  ;;  %v11245_v12 = vld [vmem:[#allocation17 + $0xc30] sm:$0xf0] }
 0xba5   :  { %7170 = vmatpush.bf16.msra.mxu3 %v11244_v19  ;;  %v11248_v49 = vor.u32 %v12605_v51, %v11245_v12  ;;  %v11299_v19 = vld [vmem:[#allocation17 + $0xc88] sm:$0xf]  ;;  %v11400_v12 = vor.u32 %v12642_v47, %v11397_v58  ;;  %v12723_v58 = vld [vmem:[#allocation17 + $0xfcc] sm:$0xf0] }
 0xba6   :  { %7231 = vmatpush.bf16.msra.mxu0 %v11444_v4  ;;  %v11379_v4 = vld [vmem:[#allocation17 + $0xd28] sm:$0xf] }
 0xba7   :  { %v11380_v33 = vor.u32 %v12640_v38, %v11379_v4  ;;  %v11285_v4 = vld [vmem:[#allocation17 + $0xc78] sm:$0xf0] }
 0xba8   :  { %7193 = vmatpush.bf16.msra.mxu1 %v11296_v28  ;;  %v12601_v28 = vld [vmem:[#allocation17 + $0xc04] sm:$0xf] }
 0xba9   :  { %7171 = vmatpush.bf16.msra.mxu3 %v11228_v45  ;;  %v11232_v10 = vor.u32 %v12601_v28, %v11229_v54  ;;  %v11349_v45 = vld [vmem:[#allocation17 + $0xcf8] sm:$0xf0]  ;;  %v6161_v28 = vadd.f32 %v14841_v37, %v14843_v40  ;;  %v12610_v37 = vld [vmem:[#allocation17 + $0xc4c] sm:$0xf] }
 0xbaa   :  { %7232 = vmatpush.bf16.msra.mxu0 %v11428_v43  ;;  %v12636_v43 = vld [vmem:[#allocation17 + $0xd14] sm:$0xf0]  ;;  %v11269_v40 = vld [vmem:[#allocation17 + $0xc58] sm:$0xf0] }
 0xbab   :  { %11223 = vmatmul.msk.bf16.vlgmr.msrb.gmra.mxu1 %vm3593_vm4, %v6747_v2  ;;  %v12641_v2 = vld [vmem:[#allocation17 + $0xd44] sm:$0xf]  ;;  %v11364_v1 = vor.u32 %v12636_v43, %v11363_v41  ;;  %v11253_v41 = vld [vmem:[#allocation17 + $0xc38] sm:$0xf0] }
 0xbac   :  { %v11392_v5 = vor.u32 %v12641_v2, %v11389_v56  ;;  %7194 = vmatpush.bf16.msra.mxu1 %v11280_v21  ;;  %v12620_v56 = vld [vmem:[#allocation17 + $0xc94] sm:$0xf0] }
 0xbad   :  { %7216 = vmatpush.bf16.msrb.mxu3 %v11348_v0  ;;  %v11300_v11 = vor.u32 %v12620_v56, %v11299_v19  ;;  %v12650_v0 = vld [vmem:[#allocation17 + $0xd8c] sm:$0xf] }
 0xbae   :  { %7208 = vmatpush.bf16.msrb.mxu2 %v11392_v5  ;;  %7233 = vmatpush.bf16.msra.mxu0 %v11412_v14  ;;  %v12654_v5 = vld [vmem:[#allocation17 + $0xdac] sm:$0xf]  ;;  %v11432_v60 = vor.u32 %v12650_v0, %v11429_v8  ;;  %v6135_v14 = vadd.f32 %v14839_v24, %v14845_v46  ;;  %v11235_v24 = vld [vmem:[#allocation17 + $0xc08] sm:$0xf]  ;;  %v12604_v46 = vld [vmem:[#allocation17 + $0xc14] sm:$0xf0] }
 0xbaf   :  { %v11448_v20 = vor.u32 %v12654_v5, %v11445_v39  ;;  %v12638_v5 = vld [vmem:[#allocation17 + $0xd2c] sm:$0xf]  ;;  %v11381_v39 = vld [vmem:[#allocation17 + $0xd38] sm:$0xf0] }
 0xbb0   :  { %7195 = vmatpush.bf16.msra.mxu1 %v11264_v53  ;;  %v12622_v53 = vld [vmem:[#allocation17 + $0xcac] sm:$0xf] }
 0xbb1   :  { %7217 = vmatpush.bf16.msrb.mxu3 %v11332_v30  ;;  %v12612_v30 = vld [vmem:[#allocation17 + $0xc54] sm:$0xf0]  ;;  %v11320_v22 = vor.u32 %v12622_v53, %v11317_v23 }
 0xbb2   :  { %7209 = vmatpush.bf16.msrb.mxu2 %v11376_v35  ;;  %7234 = vmatpush.bf16.msra.mxu0 %v11396_v50  ;;  %v11352_v35 = vor.u32 %v12630_v3, %v11349_v45  ;;  %v11268_v55 = vor.u32 %v12612_v30, %v11267_v59  ;;  %v6216_v50 = vadd.f32 %v6135_v14, %v14823_v52  ;;  %v12634_v52 = vld [vmem:[#allocation17 + $0xd0c] sm:$0xf]  ;;  %v11365_v3 = vld [vmem:[#allocation17 + $0xd18] sm:$0xf0] }
 0xbb4   :  { %7196 = vmatpush.bf16.msra.mxu1 %v11248_v49  ;;  %v11301_v49 = vld [vmem:[#allocation17 + $0xc98] sm:$0xf0] }
 0xbb5   :  { %7218 = vmatpush.bf16.msrb.mxu3 %v11316_v36  ;;  %v11252_v36 = vor.u32 %v12608_v29, %v11251_v17  ;;  %v11725_v17 = vld [vmem:[#allocation17 + $0xfe0] sm:$0xf]  ;;  %v12727_v29 = vld [vmem:[#allocation17 + $0xfec] sm:$0xf0] }
 0xbb6   :  { %7210 = vmatpush.bf16.msrb.mxu2 %v11360_v16  ;;  %7235 = vmatpush.bf16.msra.mxu0 %v11380_v33  ;;  %v11333_v16 = vld [vmem:[#allocation17 + $0xcd8] sm:$0xf0]  ;;  %v11368_v33 = vor.u32 %v12634_v52, %v11365_v3  ;;  %v11726_v47 = vor.u32 %v12727_v29, %v11725_v17  ;;  %v11695_v52 = vld [vmem:[#allocation17 + $0xfb0] sm:$0xf0]  ;;  %v11533_v29 = vld [vmem:[#allocation17 + $0xe60] sm:$0xf] }
 0xbb7   :  { %v11336_v15 = vor.u32 %v12626_v48, %v11333_v16  ;;  %v12602_v48 = vld [vmem:[#allocation17 + $0xc0c] sm:$0xf] }
 0xbb8   :  { %7197 = vmatpush.bf16.msra.mxu1 %v11232_v10  ;;  %v12614_v10 = vld [vmem:[#allocation17 + $0xc6c] sm:$0xf] }
 0xbb9   :  { %7219 = vmatpush.bf16.msrb.mxu3 %v11300_v11  ;;  %v11236_v11 = vor.u32 %v12604_v46, %v11235_v24  ;;  %v11288_v38 = vor.u32 %v12614_v10, %v11285_v4  ;;  %v11711_v46 = vld [vmem:[#allocation17 + $0xfd0] sm:$0xf0]  ;;  %v11677_v10 = vld [vmem:[#allocation17 + $0xf80] sm:$0xf]  ;;  %v12715_v4 = vld [vmem:[#allocation17 + $0xf8c] sm:$0xf0] }
 0xbba   :  { %7255 = vmatpush.bf16.msra.mxu2 %v11480_v9  ;;  %7236 = vmatpush.bf16.msra.mxu0 %v11364_v1  ;;  %v11416_v9 = vor.u32 %v12646_v13, %v11413_v27  ;;  %v11237_v1 = vld [vmem:[#allocation17 + $0xc18] sm:$0xf0]  ;;  %v11678_v3 = vor.u32 %v12715_v4, %v11677_v10  ;;  %v11631_v4 = vld [vmem:[#allocation17 + $0xf30] sm:$0xf0] }
 0xbbc   :  { %7242 = vmatpush.bf16.msrb.mxu1 %v11352_v35  ;;  %v6217_v35 = vadd.f32 %v6161_v28, %v14827_v57  ;;  %v6187_v57 = vadd.f32 %v14847_v61, %v14852_v32 }
 0xbbd   :  { %7220 = vmatpush.bf16.msrb.mxu3 %v11284_v34  ;;  %v11272_v34 = vor.u32 %v12610_v37, %v11269_v40  ;;  %v12707_v37 = vld [vmem:[#allocation17 + $0xf4c] sm:$0xf0]  ;;  %v7273_v40 = vld [vmem:[#allocation16 + $0x7] sm:$0x1] }
 0xbbe   :  { %7256 = vmatpush.bf16.msra.mxu2 %v11464_v63  ;;  %v12618_v63 = vld [vmem:[#allocation17 + $0xc8c] sm:$0xf]  ;;  %v6218_v59 = vadd.f32 %v6187_v57, %v14830_v18 }
 0xbbf   :  { %v11304_v44 = vor.u32 %v12618_v63, %v11301_v49  ;;  %v12695_v63 = vld [vmem:[#allocation17 + $0xeec] sm:$0xf0] }
 0xbc0   :  { %7243 = vmatpush.bf16.msrb.mxu1 %v11336_v15 }
 0xbc1   :  { %7221 = vmatpush.bf16.msrb.mxu3 %v11268_v55 }
 0xbc2   :  { %7257 = vmatpush.bf16.msra.mxu2 %v11448_v20  ;;  %v11384_v20 = vor.u32 %v12638_v5, %v11381_v39  ;;  %v11581_v5 = vld [vmem:[#allocation17 + $0xec0] sm:$0xf] }
 0xbc4   :  { %7244 = vmatpush.bf16.msrb.mxu1 %v11320_v22 }
 0xbc5   :  { %7222 = vmatpush.bf16.msrb.mxu3 %v11252_v36  ;;  %v11709_v36 = vld [vmem:[#allocation17 + $0xfc0] sm:$0xf] }
 0xbc6   :  { %7258 = vmatpush.bf16.msra.mxu2 %v11432_v60  ;;  %v12606_v60 = vld [vmem:[#allocation17 + $0xc2c] sm:$0xf]  ;;  %v11710_v49 = vor.u32 %v12723_v58, %v11709_v36  ;;  %v11717_v58 = vld [vmem:[#allocation17 + $0xfc8] sm:$0xf] }
 0xbc7   :  { %v11256_v43 = vor.u32 %v12606_v60, %v11253_v41  ;;  %v11629_v60 = vld [vmem:[#allocation17 + $0xf20] sm:$0xf] }
 0xbc8   :  { %7245 = vmatpush.bf16.msrb.mxu1 %v11304_v44  ;;  %v12719_v44 = vld [vmem:[#allocation17 + $0xfac] sm:$0xf0] }
 0xbc9   :  { %7223 = vmatpush.bf16.msrb.mxu3 %v11236_v11  ;;  %v12691_v11 = vld [vmem:[#allocation17 + $0xecc] sm:$0xf0] }
 0xbca   :  { %7259 = vmatpush.bf16.msra.mxu2 %v11416_v9  ;;  %v11582_v39 = vor.u32 %v12691_v11, %v11581_v5  ;;  %v12720_v5 = vld [vmem:[#allocation17 + $0xfb4] sm:$0xf0] }
 0xbcc   :  { %7246 = vmatpush.bf16.msrb.mxu1 %v11288_v38  ;;  %v12717_v38 = vld [vmem:[#allocation17 + $0xfa4] sm:$0xf] }
 0xbce   :  { %7260 = vmatpush.bf16.msra.mxu2 %v11400_v12  ;;  %v11597_v12 = vld [vmem:[#allocation17 + $0xee0] sm:$0xf] }
 0xbd0   :  { %7247 = vmatpush.bf16.msrb.mxu1 %v11272_v34  ;;  %v11565_v34 = vld [vmem:[#allocation17 + $0xea0] sm:$0xf] }
 0xbd2   :  { %7261 = vmatpush.bf16.msra.mxu2 %v11384_v20 }
 0xbd4   :  { %7248 = vmatpush.bf16.msrb.mxu1 %v11256_v43  ;;  %v12703_v43 = vld [vmem:[#allocation17 + $0xf2c] sm:$0xf0] }
 0xbd5   :  { %v11630_v57 = vor.u32 %v12703_v43, %v11629_v60  ;;  %v11735_v60 = vld [vmem:[#allocation17 + $0xff8] sm:$0xf0] }
 0xbd6   :  { %7262 = vmatpush.bf16.msra.mxu2 %v11368_v33  ;;  %v11698_v33 = vor.u32 %v12717_v38, %v11695_v52  ;;  %v11501_v52 = vld [vmem:[#allocation17 + $0xe20] sm:$0xf] }
 0xbf9   :  { %v14858_v2 = vpop.f32.mrf.mxu0 }
 0xbff   :  { %v6660_v21 = vpop.f32.mrf.mxu2 }
 0xc01   :  { %v6688_v7 = vpop.f32.mrf.mxu0 }
 0xc02   :  { %v11240_v7 = vor.u32 %v12602_v48, %v11237_v1  ;;  %v12713_v48 = vld [vmem:[#allocation17 + $0xf84] sm:$0xf]  ;;  %v11679_v1 = vld [vmem:[#allocation17 + $0xf90] sm:$0xf0] }
 0xc04   :  { %7249 = vmatpush.bf16.msrb.mxu1 %v11240_v7  ;;  %v12683_v7 = vld [vmem:[#allocation17 + $0xe8c] sm:$0xf0] }
 0xc07   :  { %v6662_v51 = vpop.f32.mrf.mxu2 }
 0xc08   :  { %v6647_v42 = vpop.f32.mrf.mxu1  ;;  %v12725_v51 = vld [vmem:[#allocation17 + $0xfe4] sm:$0xf] }
 0xc09   :  { %v6661_v19 = vadd.f32 %v6660_v21, %v6647_v42  ;;  %v6738_v56 = vpop.f32.mrf.mxu0  ;;  %v11693_v42 = vld [vmem:[#allocation17 + $0xfa0] sm:$0xf] }
 0xc0a   :  { %v11694_v28 = vor.u32 %v12719_v44, %v11693_v42  ;;  %v11647_v44 = vld [vmem:[#allocation17 + $0xf50] sm:$0xf0] }
 0xc0b   :  { %v14865_v54 = vadd.f32 %v6661_v19, %v6216_v50  ;;  %v11598_v19 = vor.u32 %v12695_v63, %v11597_v12  ;;  %v12689_v12 = vld [vmem:[#allocation17 + $0xec4] sm:$0xf]  ;;  %v11583_v63 = vld [vmem:[#allocation17 + $0xed0] sm:$0xf0] }
 0xc0c   :  { %v11586_v42 = vor.u32 %v12689_v12, %v11583_v63  ;;  %v11703_v12 = vld [vmem:[#allocation17 + $0xfb8] sm:$0xf0] }
 0xc0e   :  { %v6673_v45 = vpop.f32.mrf.mxu3 }
 0xc0f   :  { %v6687_v26 = vadd.f32 %v14858_v2, %v6673_v45  ;;  %v6712_v31 = vpop.f32.mrf.mxu2  ;;  %v11661_v45 = vld [vmem:[#allocation17 + $0xf60] sm:$0xf] }
 0xc10   :  { %v6649_v0 = vpop.f32.mrf.mxu1 }
 0xc11   :  { %v14869_v8 = vadd.f32 %v6687_v26, %v6217_v35  ;;  %v6740_v21 = vpop.f32.mrf.mxu0  ;;  %v12711_v35 = vld [vmem:[#allocation17 + $0xf6c] sm:$0xf0] }
 0xc12   :  { %v11662_v26 = vor.u32 %v12711_v35, %v11661_v45  ;;  %v12687_v21 = vld [vmem:[#allocation17 + $0xeac] sm:$0xf0]  ;;  %v11685_v45 = vld [vmem:[#allocation17 + $0xf88] sm:$0xf]  ;;  %v12716_v35 = vld [vmem:[#allocation17 + $0xf94] sm:$0xf0] }
 0xc13   :  { %v11566_v41 = vor.u32 %v12687_v21, %v11565_v34  ;;  %v11615_v34 = vld [vmem:[#allocation17 + $0xf10] sm:$0xf0]  ;;  %v12726_v21 = vld [vmem:[#allocation17 + $0xfec] sm:$0xf] }
 0xc14   :  { %v11738_v43 = vor.u32 %v12726_v21, %v11735_v60  ;;  %v11541_v60 = vld [vmem:[#allocation17 + $0xe68] sm:$0xf] }
 0xc16   :  { %v6675_v2 = vpop.f32.mrf.mxu3 }
 0xc17   :  { %v6714_v16 = vpop.f32.mrf.mxu2  ;;  %v11682_v2 = vor.u32 %v12713_v48, %v11679_v1  ;;  %v11485_v48 = vld [vmem:[#allocation17 + $0xe00] sm:$0xf]  ;;  %v12667_v1 = vld [vmem:[#allocation17 + $0xe0c] sm:$0xf0] }
 0xc18   :  { %v6699_v15 = vpop.f32.mrf.mxu1  ;;  %v11549_v16 = vld [vmem:[#allocation17 + $0xe80] sm:$0xf] }
 0xc19   :  { %v6713_v30 = vadd.f32 %v6712_v31, %v6699_v15  ;;  %v11645_v31 = vld [vmem:[#allocation17 + $0xf40] sm:$0xf] }
 0xc1a   :  { %v11646_v0 = vor.u32 %v12707_v37, %v11645_v31  ;;  %v11613_v15 = vld [vmem:[#allocation17 + $0xf00] sm:$0xf]  ;;  %v12681_v31 = vld [vmem:[#allocation17 + $0xe84] sm:$0xf]  ;;  %v11551_v37 = vld [vmem:[#allocation17 + $0xe90] sm:$0xf0] }
 0xc1b   :  { %v14874_v13 = vadd.f32 %v6713_v30, %v6218_v59  ;;  %v11550_v59 = vor.u32 %v12683_v7, %v11549_v16  ;;  %v12699_v30 = vld [vmem:[#allocation17 + $0xf0c] sm:$0xf0]  ;;  %v12696_v16 = vld [vmem:[#allocation17 + $0xef4] sm:$0xf0]  ;;  %v11669_v7 = vld [vmem:[#allocation17 + $0xf68] sm:$0xf] }
 0xc1e   :  { %v6725_v55 = vpop.f32.mrf.mxu3 }
 0xc1f   :  { %v6739_v27 = vadd.f32 %v6738_v56, %v6725_v55  ;;  %v6773_v9 = vpop.f32.mrf.mxu2  ;;  %v12721_v56 = vld [vmem:[#allocation17 + $0xfc4] sm:$0xf]  ;;  %v11614_v55 = vor.u32 %v12699_v30, %v11613_v15 }
 0xc20   :  { %v6778_v53 = vpack.c.bf16 %v6773_v9, %v6773_v9  ;;  %v6701_v23 = vpop.f32.mrf.mxu1  ;;  %v11714_v20 = vor.u32 %v12721_v56, %v11711_v46  ;;  %v12728_v9 = vld [vmem:[#allocation17 + $0xff4] sm:$0xf0]  ;;  %v12675_v56 = vld [vmem:[#allocation17 + $0xe4c] sm:$0xf0]  ;;  %v11701_v46 = vld [vmem:[#allocation17 + $0xfa8] sm:$0xf] }
 0xc21   :  { %v14877_v22 = vadd.f32 %v6739_v27, %v14850_v62  ;;  %v11727_v62 = vld [vmem:[#allocation17 + $0xff0] sm:$0xf0]  ;;  %v11733_v27 = vld [vmem:[#allocation17 + $0xfe8] sm:$0xf]  ;;  %v12693_v23 = vld [vmem:[#allocation17 + $0xee4] sm:$0xf]  ;;  %v11702_v11 = vor.u32 %v12720_v5, %v11701_v46 }
 0xc22   :  { %7185 = vmatmul.bf16.vlgmr.msrb.gmra.mxu0 %v6778_v53  ;;  %7211 = vmatmul.bf16.vlgmr.msrb.gmra.mxu2 %v6778_v53  ;;  %v11730_v50 = vor.u32 %v12725_v51, %v11727_v62  ;;  %v12724_v51 = vld [vmem:[#allocation17 + $0xfd4] sm:$0xf0]  ;;  %v12677_v30 = vld [vmem:[#allocation17 + $0xe64] sm:$0xf] }
 0xc23   :  { %7297 = vmatpush.bf16.msrb.mxu0 %v14731_v6  ;;  %7703 = vmatpush.bf16.msrb.mxu2 %v11726_v47  ;;  %v12679_v47 = vld [vmem:[#allocation17 + $0xe6c] sm:$0xf0]  ;;  %v11718_v62 = vor.u32 %v12724_v51, %v11717_v58 }
 0xc24   :  { %v11534_v36 = vor.u32 %v12679_v47, %v11533_v29  ;;  %v12708_v29 = vld [vmem:[#allocation17 + $0xf54] sm:$0xf0]  ;;  %v12673_v47 = vld [vmem:[#allocation17 + $0xe44] sm:$0xf] }
 0xc26   :  { %v6727_v61 = vpop.f32.mrf.mxu3 }
 0xc27   :  { %v6775_v32 = vpop.f32.mrf.mxu2  ;;  %7704 = vmatpush.bf16.msrb.mxu2 %v11710_v49  ;;  %v11599_v61 = vld [vmem:[#allocation17 + $0xef0] sm:$0xf0]  ;;  %v12705_v49 = vld [vmem:[#allocation17 + $0xf44] sm:$0xf] }
 0xc28   :  { %v6760_v14 = vpop.f32.mrf.mxu1  ;;  %v12709_v32 = vld [vmem:[#allocation17 + $0xf64] sm:$0xf] }
 0xc29   :  { %v6777_v18 = vpack.c.bf16 %v6760_v14, %v6760_v14  ;;  %v11602_v14 = vor.u32 %v12693_v23, %v11599_v61  ;;  %v11719_v23 = vld [vmem:[#allocation17 + $0xfd8] sm:$0xf0] }
 0xc2b   :  { %7172 = vmatmul.bf16.vlgmr.msra.gmra.mxu3 %v6777_v18  ;;  %7198 = vmatmul.bf16.vlgmr.msra.gmra.mxu1 %v6777_v18 }
 0xc2c   :  { %7284 = vmatpush.bf16.msra.mxu3 %v14724_v25  ;;  %7690 = vmatpush.bf16.msra.mxu1 %v11598_v19  ;;  %v11517_v19 = vld [vmem:[#allocation17 + $0xe40] sm:$0xf] }
 0xc2d   :  { %7705 = vmatpush.bf16.msrb.mxu2 %v11694_v28  ;;  %v11567_v28 = vld [vmem:[#allocation17 + $0xeb0] sm:$0xf0] }
 0xc30   :  { %v6762_v24 = vpop.f32.mrf.mxu1  ;;  %7691 = vmatpush.bf16.msra.mxu1 %v11582_v39  ;;  %v12685_v39 = vld [vmem:[#allocation17 + $0xea4] sm:$0xf] }
 0xc31   :  { %7706 = vmatpush.bf16.msrb.mxu2 %v11678_v3  ;;  %v11518_v24 = vor.u32 %v12675_v56, %v11517_v19  ;;  %v11570_v10 = vor.u32 %v12685_v39, %v11567_v28  ;;  %v12671_v3 = vld [vmem:[#allocation17 + $0xe2c] sm:$0xf0]  ;;  %v12704_v19 = vld [vmem:[#allocation17 + $0xf34] sm:$0xf0]  ;;  %v12669_v56 = vld [vmem:[#allocation17 + $0xe24] sm:$0xf] }
 0xc32   :  { %7237 = vmatmul.bf16.vlgmr.msra.gmra.mxu0 %v6778_v53  ;;  %7263 = vmatmul.bf16.vlgmr.msra.gmra.mxu2 %v6778_v53  ;;  %v11734_v53 = vor.u32 %v12728_v9, %v11733_v27  ;;  %v11687_v39 = vld [vmem:[#allocation17 + $0xf98] sm:$0xf0] }
 0xc33   :  { %7729 = vmatpush.bf16.msra.mxu0 %v11730_v50  ;;  %v11650_v50 = vor.u32 %v12705_v49, %v11647_v44  ;;  %v11573_v49 = vld [vmem:[#allocation17 + $0xea8] sm:$0xf] }
 0xc34   :  { %7692 = vmatpush.bf16.msra.mxu1 %v11566_v41  ;;  %v11637_v44 = vld [vmem:[#allocation17 + $0xf28] sm:$0xf] }
 0xc35   :  { %7707 = vmatpush.bf16.msrb.mxu2 %v11662_v26  ;;  %v11686_v26 = vor.u32 %v12716_v35, %v11685_v45  ;;  %v11638_v46 = vor.u32 %v12704_v19, %v11637_v44  ;;  %v11487_v45 = vld [vmem:[#allocation17 + $0xe10] sm:$0xf0]  ;;  %v11623_v44 = vld [vmem:[#allocation17 + $0xf18] sm:$0xf0] }
 0xc37   :  { %7730 = vmatpush.bf16.msra.mxu0 %v11714_v20  ;;  %v12701_v20 = vld [vmem:[#allocation17 + $0xf24] sm:$0xf] }
 0xc38   :  { %7693 = vmatpush.bf16.msra.mxu1 %v11550_v59  ;;  %v11634_v38 = vor.u32 %v12701_v20, %v11631_v4  ;;  %v12712_v59 = vld [vmem:[#allocation17 + $0xf74] sm:$0xf0] }
 0xc39   :  { %7708 = vmatpush.bf16.msrb.mxu2 %v11646_v0  ;;  %v11554_v0 = vor.u32 %v12681_v31, %v11551_v37  ;;  %v11670_v27 = vor.u32 %v12712_v59, %v11669_v7  ;;  %v12684_v4 = vld [vmem:[#allocation17 + $0xe94] sm:$0xf0]  ;;  %v12694_v31 = vld [vmem:[#allocation17 + $0xeec] sm:$0xf]  ;;  %v11607_v37 = vld [vmem:[#allocation17 + $0xef8] sm:$0xf0] }
 0xc3a   :  { %v11655_v7 = vld [vmem:[#allocation17 + $0xf58] sm:$0xf0]  ;;  %v12676_v59 = vld [vmem:[#allocation17 + $0xe54] sm:$0xf0] }
 0xc3b   :  { %7224 = vmatmul.bf16.vlgmr.msrb.gmra.mxu3 %v6777_v18  ;;  %7250 = vmatmul.bf16.vlgmr.msrb.gmra.mxu1 %v6777_v18  ;;  %v11663_v18 = vld [vmem:[#allocation17 + $0xf70] sm:$0xf0] }
 0xc3c   :  { %7731 = vmatpush.bf16.msra.mxu0 %v11698_v33  ;;  %v11666_v17 = vor.u32 %v12709_v32, %v11663_v18  ;;  %7716 = vmatpush.bf16.msrb.mxu3 %v11602_v14  ;;  %v11502_v33 = vor.u32 %v12671_v3, %v11501_v52  ;;  %v11589_v32 = vld [vmem:[#allocation17 + $0xec8] sm:$0xf]  ;;  %v12692_v14 = vld [vmem:[#allocation17 + $0xed4] sm:$0xf0] }
 0xc3d   :  { %7709 = vmatpush.bf16.msrb.mxu2 %v11630_v57  ;;  %7694 = vmatpush.bf16.msra.mxu1 %v11534_v36  ;;  %v11486_v57 = vor.u32 %v12667_v1, %v11485_v48  ;;  %v11653_v18 = vld [vmem:[#allocation17 + $0xf48] sm:$0xf]  ;;  %v11519_v36 = vld [vmem:[#allocation17 + $0xe50] sm:$0xf0]  ;;  %v12700_v3 = vld [vmem:[#allocation17 + $0xf14] sm:$0xf0] }
 0xc3e   :  { %v11654_v58 = vor.u32 %v12708_v29, %v11653_v18  ;;  %v11522_v51 = vor.u32 %v12673_v47, %v11519_v36  ;;  %v12690_v1 = vld [vmem:[#allocation17 + $0xecc] sm:$0xf]  ;;  %v11509_v18 = vld [vmem:[#allocation17 + $0xe28] sm:$0xf] }
 0xc40   :  { %7732 = vmatpush.bf16.msra.mxu0 %v11682_v2  ;;  %7717 = vmatpush.bf16.msrb.mxu3 %v11586_v42  ;;  %v11605_v2 = vld [vmem:[#allocation17 + $0xee8] sm:$0xf]  ;;  %v12688_v42 = vld [vmem:[#allocation17 + $0xeb4] sm:$0xf0] }
 0xc41   :  { %7710 = vmatpush.bf16.msrb.mxu2 %v11614_v55  ;;  %7695 = vmatpush.bf16.msra.mxu1 %v11518_v24  ;;  %v11606_v15 = vor.u32 %v12696_v16, %v11605_v2  ;;  %v11535_v55 = vld [vmem:[#allocation17 + $0xe70] sm:$0xf0]  ;;  %v12706_v2 = vld [vmem:[#allocation17 + $0xf4c] sm:$0xf] }
 0xc42   :  { %11482 = vmatmul.msk.bf16.vlgmr.msrb.gmra.mxu0 %vm3593_vm4, %v7273_v40  ;;  %v11538_v9 = vor.u32 %v12677_v30, %v11535_v55  ;;  %v11503_v24 = vld [vmem:[#allocation17 + $0xe30] sm:$0xf0]  ;;  %v11658_v55 = vor.u32 %v12706_v2, %v11655_v7 }
 0xc43   :  { %v11506_v5 = vor.u32 %v12669_v56, %v11503_v24  ;;  %v11493_v24 = vld [vmem:[#allocation17 + $0xe08] sm:$0xf] }
 0xc44   :  { %7733 = vmatpush.bf16.msra.mxu0 %v11666_v17  ;;  %7718 = vmatpush.bf16.msrb.mxu3 %v11570_v10  ;;  %v11590_v17 = vor.u32 %v12692_v14, %v11589_v32  ;;  %v11557_v10 = vld [vmem:[#allocation17 + $0xe88] sm:$0xf]  ;;  %v11639_v14 = vld [vmem:[#allocation17 + $0xf38] sm:$0xf0] }
 0xc45   :  { %7755 = vmatpush.bf16.msra.mxu2 %v11734_v53  ;;  %7696 = vmatpush.bf16.msra.mxu1 %v11502_v33  ;;  %v12722_v53 = vld [vmem:[#allocation17 + $0xfcc] sm:$0xf]  ;;  %v11558_v52 = vor.u32 %v12684_v4, %v11557_v10  ;;  %v12665_v33 = vld [vmem:[#allocation17 + $0xe04] sm:$0xf] }
 0xc46   :  { %v11722_v61 = vor.u32 %v12722_v53, %v11719_v23  ;;  %v11575_v53 = vld [vmem:[#allocation17 + $0xeb8] sm:$0xf0]  ;;  %v12702_v23 = vld [vmem:[#allocation17 + $0xf2c] sm:$0xf] }
 0xc47   :  { %v11642_v47 = vor.u32 %v12702_v23, %v11639_v14  ;;  %v12787_v23 = vld [vmem:[#allocation17 + $0x11cc] sm:$0xf0]  ;;  %v11969_v14 = vld [vmem:[#allocation17 + $0x11d0] sm:$0xf0] }
 0xc48   :  { %7734 = vmatpush.bf16.msra.mxu0 %v11650_v50  ;;  %7719 = vmatpush.bf16.msrb.mxu3 %v11554_v0  ;;  %v11574_v50 = vor.u32 %v12688_v42, %v11573_v49  ;;  %v11610_v0 = vor.u32 %v12694_v31, %v11607_v37 }
 0xc49   :  { %7756 = vmatpush.bf16.msra.mxu2 %v11718_v62  ;;  %7697 = vmatpush.bf16.msra.mxu1 %v11486_v57  ;;  %v12718_v62 = vld [vmem:[#allocation17 + $0xfac] sm:$0xf]  ;;  %v11591_v57 = vld [vmem:[#allocation17 + $0xed8] sm:$0xf0] }
 0xc4a   :  { %v11706_v63 = vor.u32 %v12718_v62, %v11703_v12  ;;  %v11594_v16 = vor.u32 %v12690_v1, %v11591_v57  ;;  %v12682_v62 = vld [vmem:[#allocation17 + $0xe8c] sm:$0xf]  ;;  %v11559_v12 = vld [vmem:[#allocation17 + $0xe98] sm:$0xf0] }
 0xc4b   :  { %11481 = vmatmul.msk.bf16.vlgmr.msra.gmra.mxu3 %vm3593_vm4, %v7273_v40  ;;  %v12697_v40 = vld [vmem:[#allocation17 + $0xf04] sm:$0xf]  ;;  %v11562_v42 = vor.u32 %v12682_v62, %v11559_v12  ;;  %v11855_v62 = vld [vmem:[#allocation17 + $0x10e0] sm:$0xf]  ;;  %v12759_v12 = vld [vmem:[#allocation17 + $0x10ec] sm:$0xf0] }
 0xc4c   :  { %7735 = vmatpush.bf16.msra.mxu0 %v11634_v38  ;;  %v11618_v41 = vor.u32 %v12697_v40, %v11615_v34  ;;  %7720 = vmatpush.bf16.msrb.mxu3 %v11538_v9  ;;  %v11621_v38 = vld [vmem:[#allocation17 + $0xf08] sm:$0xf]  ;;  %v12710_v40 = vld [vmem:[#allocation17 + $0xf6c] sm:$0xf]  ;;  %v11671_v34 = vld [vmem:[#allocation17 + $0xf78] sm:$0xf0] }
 0xc4d   :  { %7757 = vmatpush.bf16.msra.mxu2 %v11702_v11  ;;  %7742 = vmatpush.bf16.msrb.mxu1 %v11606_v15  ;;  %v12714_v11 = vld [vmem:[#allocation17 + $0xf8c] sm:$0xf]  ;;  %v11622_v35 = vor.u32 %v12700_v3, %v11621_v38  ;;  %v11674_v21 = vor.u32 %v12710_v40, %v11671_v34  ;;  %v11525_v15 = vld [vmem:[#allocation17 + $0xe48] sm:$0xf]  ;;  %v11495_v40 = vld [vmem:[#allocation17 + $0xe18] sm:$0xf0] }
 0xc4e   :  { %v11690_v28 = vor.u32 %v12714_v11, %v11687_v39  ;;  %v12686_v9 = vld [vmem:[#allocation17 + $0xeac] sm:$0xf] }
 0xc4f   :  { %v11578_v32 = vor.u32 %v12686_v9, %v11575_v53  ;;  %v12678_v39 = vld [vmem:[#allocation17 + $0xe6c] sm:$0xf]  ;;  %v11967_v53 = vld [vmem:[#allocation17 + $0x11c0] sm:$0xf] }
 0xc50   :  { %7736 = vmatpush.bf16.msra.mxu0 %v11618_v41  ;;  %7721 = vmatpush.bf16.msrb.mxu3 %v11522_v51  ;;  %v12680_v41 = vld [vmem:[#allocation17 + $0xe74] sm:$0xf0]  ;;  %v12674_v38 = vld [vmem:[#allocation17 + $0xe4c] sm:$0xf] }
 0xc51   :  { %7758 = vmatpush.bf16.msra.mxu2 %v11686_v26  ;;  %7743 = vmatpush.bf16.msrb.mxu1 %v11590_v17  ;;  %v11490_v26 = vor.u32 %v12665_v33, %v11487_v45  ;;  %v12672_v17 = vld [vmem:[#allocation17 + $0xe34] sm:$0xf0]  ;;  %v12670_v33 = vld [vmem:[#allocation17 + $0xe2c] sm:$0xf]  ;;  %v11511_v45 = vld [vmem:[#allocation17 + $0xe38] sm:$0xf0] }
 0xc52   :  { %v11510_v36 = vor.u32 %v12672_v17, %v11509_v18  ;;  %v11514_v31 = vor.u32 %v12670_v33, %v11511_v45  ;;  %v11951_v18 = vld [vmem:[#allocation17 + $0x11a0] sm:$0xf]  ;;  %v12783_v17 = vld [vmem:[#allocation17 + $0x11ac] sm:$0xf0]  ;;  %v11921_v33 = vld [vmem:[#allocation17 + $0x1170] sm:$0xf0] }
 0xc54   :  { %7781 = vmatpush.bf16.msrb.mxu0 %v11738_v43  ;;  %7722 = vmatpush.bf16.msrb.mxu3 %v11506_v5  ;;  %v11542_v43 = vor.u32 %v12680_v41, %v11541_v60 }
 0xc55   :  { %7759 = vmatpush.bf16.msra.mxu2 %v11670_v27  ;;  %7744 = vmatpush.bf16.msrb.mxu1 %v11574_v50  ;;  %v11526_v27 = vor.u32 %v12676_v59, %v11525_v15  ;;  %v11983_v15 = vld [vmem:[#allocation17 + $0x11e0] sm:$0xf]  ;;  %v12791_v59 = vld [vmem:[#allocation17 + $0x11ec] sm:$0xf0] }
 0xc58   :  { %7782 = vmatpush.bf16.msrb.mxu0 %v11722_v61  ;;  %7723 = vmatpush.bf16.msrb.mxu3 %v11490_v26 }
 0xc59   :  { %7760 = vmatpush.bf16.msra.mxu2 %v11654_v58  ;;  %7745 = vmatpush.bf16.msrb.mxu1 %v11558_v52  ;;  %v11527_v52 = vld [vmem:[#allocation17 + $0xe58] sm:$0xf0] }
 0xc5a   :  { %v11530_v3 = vor.u32 %v12674_v38, %v11527_v52  ;;  %v11919_v38 = vld [vmem:[#allocation17 + $0x1160] sm:$0xf] }
 0xc5c   :  { %7783 = vmatpush.bf16.msrb.mxu0 %v11706_v63  ;;  %7768 = vmatpush.bf16.msra.mxu3 %v11610_v0  ;;  %v12698_v63 = vld [vmem:[#allocation17 + $0xf0c] sm:$0xf] }
 0xc5d   :  { %7761 = vmatpush.bf16.msra.mxu2 %v11638_v46  ;;  %7746 = vmatpush.bf16.msrb.mxu1 %v11542_v43  ;;  %v11626_v56 = vor.u32 %v12698_v63, %v11623_v44  ;;  %v12668_v46 = vld [vmem:[#allocation17 + $0xe14] sm:$0xf0]  ;;  %v12757_v63 = vld [vmem:[#allocation17 + $0x10e4] sm:$0xf] }
 0xc60   :  { %7784 = vmatpush.bf16.msrb.mxu0 %v11690_v28  ;;  %7769 = vmatpush.bf16.msra.mxu3 %v11594_v16  ;;  %v11543_v28 = vld [vmem:[#allocation17 + $0xe78] sm:$0xf0] }
 0xc61   :  { %7762 = vmatpush.bf16.msra.mxu2 %v11622_v35  ;;  %7747 = vmatpush.bf16.msrb.mxu1 %v11526_v27  ;;  %v11546_v10 = vor.u32 %v12678_v39, %v11543_v28  ;;  %v11985_v27 = vld [vmem:[#allocation17 + $0x11f0] sm:$0xf0] }
 0xc64   :  { %7785 = vmatpush.bf16.msrb.mxu0 %v11674_v21  ;;  %7770 = vmatpush.bf16.msra.mxu3 %v11578_v32  ;;  %v11968_v32 = vor.u32 %v12787_v23, %v11967_v53  ;;  %v11791_v53 = vld [vmem:[#allocation17 + $0x1060] sm:$0xf]  ;;  %v12743_v23 = vld [vmem:[#allocation17 + $0x106c] sm:$0xf0] }
 0xc65   :  { %7748 = vmatpush.bf16.msrb.mxu1 %v11510_v36  ;;  %v11952_v36 = vor.u32 %v12783_v17, %v11951_v18  ;;  %v11871_v17 = vld [vmem:[#allocation17 + $0x1100] sm:$0xf] }
 0xc68   :  { %7786 = vmatpush.bf16.msrb.mxu0 %v11658_v55  ;;  %7771 = vmatpush.bf16.msra.mxu3 %v11562_v42  ;;  %v11984_v55 = vor.u32 %v12791_v59, %v11983_v15  ;;  %v11857_v42 = vld [vmem:[#allocation17 + $0x10f0] sm:$0xf0]  ;;  %v11887_v59 = vld [vmem:[#allocation17 + $0x1120] sm:$0xf] }
 0xc69   :  { %v11860_v44 = vor.u32 %v12757_v63, %v11857_v42  ;;  %v11809_v15 = vld [vmem:[#allocation17 + $0x1090] sm:$0xf0]  ;;  %v11993_v42 = vld [vmem:[#allocation17 + $0x11f8] sm:$0xf0] }
 0xc6c   :  { %7787 = vmatpush.bf16.msrb.mxu0 %v11642_v47  ;;  %7772 = vmatpush.bf16.msra.mxu3 %v11546_v10  ;;  %v11953_v47 = vld [vmem:[#allocation17 + $0x11b0] sm:$0xf0]  ;;  %v12753_v10 = vld [vmem:[#allocation17 + $0x10c4] sm:$0xf] }
 0xc70   :  { %7788 = vmatpush.bf16.msrb.mxu0 %v11626_v56  ;;  %7773 = vmatpush.bf16.msra.mxu3 %v11530_v3  ;;  %v12777_v56 = vld [vmem:[#allocation17 + $0x1184] sm:$0xf] }
 0xc71   :  { %v12773_v3 = vld [vmem:[#allocation17 + $0x1164] sm:$0xf] }
 0xc74   :  { %7774 = vmatpush.bf16.msra.mxu3 %v11514_v31  ;;  %v12751_v31 = vld [vmem:[#allocation17 + $0x10ac] sm:$0xf0] }
 0xc9f   :  { %v14883_v20 = vpop.f32.mrf.mxu0 }
 0xca5   :  { %v7212_v48 = vpop.f32.mrf.mxu2 }
 0xca7   :  { %v7188_v30 = vpop.f32.mrf.mxu0 }
 0xca8   :  { %v7199_v61 = vpop.f32.mrf.mxu1  ;;  %v12789_v30 = vld [vmem:[#allocation17 + $0x11e4] sm:$0xf] }
 0xca9   :  { %v7213_v29 = vadd.f32 %v7212_v48, %v7199_v61  ;;  %v12785_v61 = vld [vmem:[#allocation17 + $0x11c4] sm:$0xf] }
 0xcab   :  { %v14886_v58 = vadd.f32 %v7213_v29, %v14869_v8  ;;  %v11494_v8 = vor.u32 %v12668_v46, %v11493_v24  ;;  %v11972_v29 = vor.u32 %v12785_v61, %v11969_v14  ;;  %v11937_v46 = vld [vmem:[#allocation17 + $0x1190] sm:$0xf0]  ;;  %v12741_v61 = vld [vmem:[#allocation17 + $0x1064] sm:$0xf] }
 0xcac   :  { %v11940_v39 = vor.u32 %v12777_v56, %v11937_v46  ;;  %v11793_v14 = vld [vmem:[#allocation17 + $0x1070] sm:$0xf0]  ;;  %v12737_v56 = vld [vmem:[#allocation17 + $0x1044] sm:$0xf] }
 0xcad   :  { %v7214_v51 = vpop.f32.mrf.mxu2  ;;  %7749 = vmatpush.bf16.msrb.mxu1 %v11494_v8  ;;  %v12755_v8 = vld [vmem:[#allocation17 + $0x10cc] sm:$0xf0]  ;;  %v11796_v18 = vor.u32 %v12741_v61, %v11793_v14  ;;  %v11847_v61 = vld [vmem:[#allocation17 + $0x10c8] sm:$0xf]  ;;  %v12754_v14 = vld [vmem:[#allocation17 + $0x10cc] sm:$0xf] }
 0xcae   :  { %v7173_v49 = vpop.f32.mrf.mxu3 }
 0xcaf   :  { %v7187_v50 = vadd.f32 %v14883_v20, %v7173_v49  ;;  %v7238_v19 = vpop.f32.mrf.mxu0  ;;  %v11856_v49 = vor.u32 %v12759_v12, %v11855_v62  ;;  %v12792_v62 = vld [vmem:[#allocation17 + $0x11f4] sm:$0xf0] }
 0xcb0   :  { %v7201_v5 = vpop.f32.mrf.mxu1 }
 0xcb1   :  { %v14890_v11 = vadd.f32 %v7187_v50, %v14865_v54  ;;  %v12666_v54 = vld [vmem:[#allocation17 + $0xe0c] sm:$0xf]  ;;  %v11935_v50 = vld [vmem:[#allocation17 + $0x1180] sm:$0xf] }
 0xcb2   :  { %v11498_v34 = vor.u32 %v12666_v54, %v11495_v40  ;;  %v11839_v5 = vld [vmem:[#allocation17 + $0x10c0] sm:$0xf]  ;;  %v11825_v40 = vld [vmem:[#allocation17 + $0x10b0] sm:$0xf0] }
 0xcb3   :  { %v11840_v28 = vor.u32 %v12755_v8, %v11839_v5  ;;  %v11975_v8 = vld [vmem:[#allocation17 + $0x11c8] sm:$0xf] }
 0xcb4   :  { %7775 = vmatpush.bf16.msra.mxu3 %v11498_v34 }
 0xcb5   :  { %v7264_v4 = vpop.f32.mrf.mxu2 }
 0xcb6   :  { %v7175_v20 = vpop.f32.mrf.mxu3 }
 0xcb7   :  { %v7240_v35 = vpop.f32.mrf.mxu0  ;;  %v12775_v20 = vld [vmem:[#allocation17 + $0x116c] sm:$0xf0] }
 0xcb8   :  { %v7251_v26 = vpop.f32.mrf.mxu1  ;;  %v11920_v45 = vor.u32 %v12775_v20, %v11919_v38  ;;  %v11924_v35 = vor.u32 %v12773_v3, %v11921_v33  ;;  %v11759_v38 = vld [vmem:[#allocation17 + $0x1020] sm:$0xf]  ;;  %v12733_v33 = vld [vmem:[#allocation17 + $0x1024] sm:$0xf] }
 0xcb9   :  { %v7265_v37 = vadd.f32 %v7264_v4, %v7251_v26  ;;  %v11841_v4 = vld [vmem:[#allocation17 + $0x10d0] sm:$0xf0]  ;;  %v11823_v26 = vld [vmem:[#allocation17 + $0x10a0] sm:$0xf] }
 0xcba   :  { %v11844_v52 = vor.u32 %v12753_v10, %v11841_v4  ;;  %v11824_v54 = vor.u32 %v12751_v31, %v11823_v26  ;;  %v11977_v4 = vld [vmem:[#allocation17 + $0x11d8] sm:$0xf0]  ;;  %v11959_v31 = vld [vmem:[#allocation17 + $0x11a8] sm:$0xf] }
 0xcbb   :  { %v14893_v0 = vadd.f32 %v7265_v37, %v14877_v22  ;;  %v12749_v37 = vld [vmem:[#allocation17 + $0x10a4] sm:$0xf] }
 0xcbc   :  { %v11828_v34 = vor.u32 %v12749_v37, %v11825_v40  ;;  %v12784_v37 = vld [vmem:[#allocation17 + $0x11b4] sm:$0xf0] }
 0xcbd   :  { %v7266_v21 = vpop.f32.mrf.mxu2  ;;  %v11960_v40 = vor.u32 %v12784_v37, %v11959_v31  ;;  %v11895_v37 = vld [vmem:[#allocation17 + $0x1128] sm:$0xf] }
 0xcbe   :  { %v7225_v60 = vpop.f32.mrf.mxu3  ;;  %v11903_v21 = vld [vmem:[#allocation17 + $0x1140] sm:$0xf] }
 0xcbf   :  { %v7239_v41 = vadd.f32 %v7238_v19, %v7225_v60  ;;  %v7299_v43 = vpop.f32.mrf.mxu0  ;;  %v12779_v19 = vld [vmem:[#allocation17 + $0x118c] sm:$0xf0] }
 0xcc0   :  { %v7304_v48 = vpack.c.bf16 %v7299_v43, %v7299_v43  ;;  %v7253_v1 = vpop.f32.mrf.mxu1  ;;  %v11936_v24 = vor.u32 %v12779_v19, %v11935_v50  ;;  %v12771_v60 = vld [vmem:[#allocation17 + $0x114c] sm:$0xf0] }
 0xcc1   :  { %v14896_v57 = vadd.f32 %v7239_v41, %v14874_v13  ;;  %v11988_v13 = vor.u32 %v12789_v30, %v11985_v27  ;;  %v12769_v41 = vld [vmem:[#allocation17 + $0x1144] sm:$0xf]  ;;  %v11904_v43 = vor.u32 %v12771_v60, %v11903_v21  ;;  %v12767_v30 = vld [vmem:[#allocation17 + $0x112c] sm:$0xf0]  ;;  %v11743_v21 = vld [vmem:[#allocation17 + $0x1000] sm:$0xf] }
 0xcc2   :  { %7711 = vmatmul.bf16.vlgmr.msrb.gmra.mxu2 %v7304_v48  ;;  %7737 = vmatmul.bf16.vlgmr.msra.gmra.mxu0 %v7304_v48  ;;  %v11888_v27 = vor.u32 %v12767_v30, %v11887_v59  ;;  %v12739_v19 = vld [vmem:[#allocation17 + $0x104c] sm:$0xf0] }
 0xcc3   :  { %7823 = vmatpush.bf16.msrb.mxu2 %v14731_v6  ;;  %8229 = vmatpush.bf16.msra.mxu0 %v11984_v55  ;;  %v7799_v6 = vld [vmem:[#allocation16 + $0x8] sm:$0x1]  ;;  %v12731_v60 = vld [vmem:[#allocation17 + $0x100c] sm:$0xf0] }
 0xcc6   :  { %v7227_v2 = vpop.f32.mrf.mxu3 }
 0xcc7   :  { %v7301_v16 = vpop.f32.mrf.mxu0  ;;  %8230 = vmatpush.bf16.msra.mxu0 %v11968_v32  ;;  %v11807_v2 = vld [vmem:[#allocation17 + $0x1080] sm:$0xf]  ;;  %v11792_v32 = vor.u32 %v12743_v23, %v11791_v53 }
 0xcc8   :  { %v12747_v16 = vld [vmem:[#allocation17 + $0x108c] sm:$0xf0] }
 0xccb   :  { %8231 = vmatpush.bf16.msra.mxu0 %v11952_v36  ;;  %v11873_v36 = vld [vmem:[#allocation17 + $0x1110] sm:$0xf0] }
 0xcce   :  { %v7286_v22 = vpop.f32.mrf.mxu3 }
 0xccf   :  { %v7303_v7 = vpack.c.bf16 %v7286_v22, %v7286_v22  ;;  %8232 = vmatpush.bf16.msra.mxu0 %v11936_v24  ;;  %v12745_v22 = vld [vmem:[#allocation17 + $0x1084] sm:$0xf]  ;;  %v11777_v24 = vld [vmem:[#allocation17 + $0x1050] sm:$0xf0] }
 0xcd0   :  { %v11812_v55 = vor.u32 %v12745_v22, %v11809_v15  ;;  %v11780_v5 = vor.u32 %v12737_v56, %v11777_v24  ;;  %v12760_v22 = vld [vmem:[#allocation17 + $0x10f4] sm:$0xf0]  ;;  %v11865_v15 = vld [vmem:[#allocation17 + $0x10f8] sm:$0xf0]  ;;  %v11911_v24 = vld [vmem:[#allocation17 + $0x1148] sm:$0xf] }
 0xcd1   :  { %7698 = vmatmul.bf16.vlgmr.msra.gmra.mxu1 %v7303_v7  ;;  %7724 = vmatmul.bf16.vlgmr.msrb.gmra.mxu3 %v7303_v7 }
 0xcd2   :  { %7763 = vmatmul.bf16.vlgmr.msra.gmra.mxu2 %v7304_v48  ;;  %7789 = vmatmul.bf16.vlgmr.msrb.gmra.mxu0 %v7304_v48  ;;  %v11905_v48 = vld [vmem:[#allocation17 + $0x1150] sm:$0xf0] }
 0xcd3   :  { %7810 = vmatpush.bf16.msra.mxu1 %v14724_v25  ;;  %8255 = vmatpush.bf16.msra.mxu2 %v11988_v13  ;;  %v12781_v25 = vld [vmem:[#allocation17 + $0x11a4] sm:$0xf]  ;;  %v11908_v1 = vor.u32 %v12769_v41, %v11905_v48 }
 0xcd4   :  { %v11956_v51 = vor.u32 %v12781_v25, %v11953_v47  ;;  %8216 = vmatpush.bf16.msrb.mxu3 %v11856_v49  ;;  %8233 = vmatpush.bf16.msra.mxu0 %v11920_v45  ;;  %v12765_v13 = vld [vmem:[#allocation17 + $0x1124] sm:$0xf]  ;;  %v12790_v49 = vld [vmem:[#allocation17 + $0x11ec] sm:$0xf]  ;;  %v11761_v45 = vld [vmem:[#allocation17 + $0x1030] sm:$0xf0] }
 0xcd5   :  { %v12761_v25 = vld [vmem:[#allocation17 + $0x1104] sm:$0xf]  ;;  %v11996_v50 = vor.u32 %v12790_v49, %v11993_v42  ;;  %v12752_v49 = vld [vmem:[#allocation17 + $0x10b4] sm:$0xf0] }
 0xcd6   :  { %v7288_v9 = vpop.f32.mrf.mxu3  ;;  %v11876_v12 = vor.u32 %v12761_v25, %v11873_v36  ;;  %v12729_v48 = vld [vmem:[#allocation17 + $0x1004] sm:$0xf]  ;;  %v12776_v36 = vld [vmem:[#allocation17 + $0x1174] sm:$0xf0] }
 0xcd7   :  { %8256 = vmatpush.bf16.msra.mxu2 %v11972_v29  ;;  %v11889_v9 = vld [vmem:[#allocation17 + $0x1130] sm:$0xf0]  ;;  %v12763_v29 = vld [vmem:[#allocation17 + $0x110c] sm:$0xf0] }
 0xcd8   :  { %8217 = vmatpush.bf16.msrb.mxu3 %v11840_v28  ;;  %8234 = vmatpush.bf16.msra.mxu0 %v11904_v43  ;;  %v11872_v47 = vor.u32 %v12763_v29, %v11871_v17  ;;  %v12786_v28 = vld [vmem:[#allocation17 + $0x11cc] sm:$0xf]  ;;  %v11744_v43 = vor.u32 %v12731_v60, %v11743_v21  ;;  %v11849_v17 = vld [vmem:[#allocation17 + $0x10d8] sm:$0xf0] }
 0xcd9   :  { %v11980_v20 = vor.u32 %v12786_v28, %v11977_v4  ;;  %v11852_v25 = vor.u32 %v12754_v14, %v11849_v17  ;;  %v11815_v4 = vld [vmem:[#allocation17 + $0x1088] sm:$0xf]  ;;  %v11897_v21 = vld [vmem:[#allocation17 + $0x1138] sm:$0xf0] }
 0xcda   :  { %v11785_v14 = vld [vmem:[#allocation17 + $0x1058] sm:$0xf0] }
 0xcdb   :  { %8257 = vmatpush.bf16.msra.mxu2 %v11956_v51  ;;  %v11991_v51 = vld [vmem:[#allocation17 + $0x11e8] sm:$0xf] }
 0xcdc   :  { %8218 = vmatpush.bf16.msrb.mxu3 %v11824_v54  ;;  %8235 = vmatpush.bf16.msra.mxu0 %v11888_v27  ;;  %v11992_v63 = vor.u32 %v12792_v62, %v11991_v51  ;;  %v12782_v54 = vld [vmem:[#allocation17 + $0x11ac] sm:$0xf]  ;;  %v12780_v27 = vld [vmem:[#allocation17 + $0x1194] sm:$0xf0] }
 0xcdd   :  { %v12774_v51 = vld [vmem:[#allocation17 + $0x116c] sm:$0xf] }
 0xcdf   :  { %8258 = vmatpush.bf16.msra.mxu2 %v11940_v39  ;;  %v12788_v39 = vld [vmem:[#allocation17 + $0x11d4] sm:$0xf0] }
 0xce0   :  { %8236 = vmatpush.bf16.msra.mxu0 %v11872_v47  ;;  %v11976_v10 = vor.u32 %v12788_v39, %v11975_v8  ;;  %v11927_v47 = vld [vmem:[#allocation17 + $0x1168] sm:$0xf]  ;;  %v11913_v39 = vld [vmem:[#allocation17 + $0x1158] sm:$0xf0] }
 0xce1   :  { %7750 = vmatmul.bf16.vlgmr.msrb.gmra.mxu1 %v7303_v7  ;;  %7776 = vmatmul.bf16.vlgmr.msra.gmra.mxu3 %v7303_v7  ;;  %v11808_v7 = vor.u32 %v12747_v16, %v11807_v2  ;;  %v11863_v2 = vld [vmem:[#allocation17 + $0x10e8] sm:$0xf]  ;;  %v11928_v62 = vor.u32 %v12776_v36, %v11927_v47  ;;  %v12736_v47 = vld [vmem:[#allocation17 + $0x1034] sm:$0xf0]  ;;  %v12734_v36 = vld [vmem:[#allocation17 + $0x102c] sm:$0xf] }
 0xce2   :  { %11740 = vmatmul.msk.bf16.vlgmr.msrb.gmra.mxu2 %vm3593_vm4, %v7799_v6  ;;  %8242 = vmatpush.bf16.msrb.mxu1 %v11860_v44  ;;  %v11775_v44 = vld [vmem:[#allocation17 + $0x1040] sm:$0xf]  ;;  %v11864_v59 = vor.u32 %v12760_v22, %v11863_v2  ;;  %v11879_v22 = vld [vmem:[#allocation17 + $0x1108] sm:$0xf] }
 0xce3   :  { %8259 = vmatpush.bf16.msra.mxu2 %v11924_v35  ;;  %8219 = vmatpush.bf16.msrb.mxu3 %v11808_v7  ;;  %v11776_v46 = vor.u32 %v12739_v19, %v11775_v44  ;;  %v11764_v35 = vor.u32 %v12733_v33, %v11761_v45  ;;  %v12758_v7 = vld [vmem:[#allocation17 + $0x10ec] sm:$0xf]  ;;  %v11833_v19 = vld [vmem:[#allocation17 + $0x10b8] sm:$0xf0] }
 0xce4   :  { %8281 = vmatpush.bf16.msrb.mxu0 %v11992_v63  ;;  %v11868_v30 = vor.u32 %v12758_v7, %v11865_v15  ;;  %v11831_v63 = vld [vmem:[#allocation17 + $0x10a8] sm:$0xf]  ;;  %v11817_v33 = vld [vmem:[#allocation17 + $0x1098] sm:$0xf0]  ;;  %v12764_v7 = vld [vmem:[#allocation17 + $0x1114] sm:$0xf0] }
 0xce5   :  { %v11832_v44 = vor.u32 %v12752_v49, %v11831_v63  ;;  %v12732_v63 = vld [vmem:[#allocation17 + $0x1014] sm:$0xf0]  ;;  %v12730_v49 = vld [vmem:[#allocation17 + $0x100c] sm:$0xf] }
 0xce6   :  { %8243 = vmatpush.bf16.msrb.mxu1 %v11844_v52  ;;  %v12735_v52 = vld [vmem:[#allocation17 + $0x102c] sm:$0xf0] }
 0xce7   :  { %8260 = vmatpush.bf16.msra.mxu2 %v11908_v1  ;;  %8220 = vmatpush.bf16.msrb.mxu3 %v11792_v32  ;;  %v11760_v3 = vor.u32 %v12735_v52, %v11759_v38  ;;  %v11745_v1 = vld [vmem:[#allocation17 + $0x1010] sm:$0xf0]  ;;  %v12756_v32 = vld [vmem:[#allocation17 + $0x10d4] sm:$0xf0]  ;;  %v12746_v52 = vld [vmem:[#allocation17 + $0x108c] sm:$0xf] }
 0xce8   :  { %8282 = vmatpush.bf16.msrb.mxu0 %v11976_v10  ;;  %v11748_v16 = vor.u32 %v12729_v48, %v11745_v1  ;;  %v12748_v38 = vld [vmem:[#allocation17 + $0x1094] sm:$0xf0]  ;;  %v11820_v31 = vor.u32 %v12746_v52, %v11817_v33  ;;  %v12742_v1 = vld [vmem:[#allocation17 + $0x106c] sm:$0xf] }
 0xce9   :  { %v12744_v48 = vld [vmem:[#allocation17 + $0x1074] sm:$0xf0] }
 0xcea   :  { %8244 = vmatpush.bf16.msrb.mxu1 %v11828_v34  ;;  %v11961_v34 = vld [vmem:[#allocation17 + $0x11b8] sm:$0xf0] }
 0xceb   :  { %8221 = vmatpush.bf16.msrb.mxu3 %v11776_v46  ;;  %v11964_v41 = vor.u32 %v12782_v54, %v11961_v34  ;;  %v12772_v46 = vld [vmem:[#allocation17 + $0x1154] sm:$0xf0] }
 0xcec   :  { %8283 = vmatpush.bf16.msrb.mxu0 %v11960_v40  ;;  %v11912_v8 = vor.u32 %v12772_v46, %v11911_v24  ;;  %v12768_v54 = vld [vmem:[#allocation17 + $0x1134] sm:$0xf0]  ;;  %v12766_v40 = vld [vmem:[#allocation17 + $0x112c] sm:$0xf] }
 0xced   :  { %v11896_v34 = vor.u32 %v12768_v54, %v11895_v37 }
 0xcee   :  { %8245 = vmatpush.bf16.msrb.mxu1 %v11812_v55  ;;  %v11943_v55 = vld [vmem:[#allocation17 + $0x1188] sm:$0xf] }
 0xcef   :  { %8222 = vmatpush.bf16.msrb.mxu3 %v11760_v3  ;;  %v11816_v3 = vor.u32 %v12748_v38, %v11815_v4 }
 0xcf1   :  { %11739 = vmatmul.msk.bf16.vlgmr.msra.gmra.mxu1 %vm3593_vm4, %v7799_v6  ;;  %v11892_v6 = vor.u32 %v12765_v13, %v11889_v9  ;;  %v12778_v13 = vld [vmem:[#allocation17 + $0x118c] sm:$0xf]  ;;  %v11944_v9 = vor.u32 %v12780_v27, %v11943_v55  ;;  %v11881_v55 = vld [vmem:[#allocation17 + $0x1118] sm:$0xf0] }
 0xcf2   :  { %8246 = vmatpush.bf16.msrb.mxu1 %v11796_v18  ;;  %v11848_v18 = vor.u32 %v12756_v32, %v11847_v61 }
 0xcf3   :  { %8261 = vmatpush.bf16.msra.mxu2 %v11892_v6  ;;  %8223 = vmatpush.bf16.msrb.mxu3 %v11744_v43  ;;  %v11945_v6 = vld [vmem:[#allocation17 + $0x1198] sm:$0xf0]  ;;  %v11799_v43 = vld [vmem:[#allocation17 + $0x1068] sm:$0xf] }
 0xcf4   :  { %v11948_v23 = vor.u32 %v12778_v13, %v11945_v6  ;;  %8284 = vmatpush.bf16.msrb.mxu0 %v11944_v9  ;;  %v11800_v2 = vor.u32 %v12744_v48, %v11799_v43  ;;  %v11783_v6 = vld [vmem:[#allocation17 + $0x1048] sm:$0xf] }
 0xcf6   :  { %8247 = vmatpush.bf16.msrb.mxu1 %v11780_v5  ;;  %v12770_v5 = vld [vmem:[#allocation17 + $0x114c] sm:$0xf] }
 0xcf7   :  { %8262 = vmatpush.bf16.msra.mxu2 %v11876_v12  ;;  %8268 = vmatpush.bf16.msra.mxu3 %v11864_v59  ;;  %v11929_v12 = vld [vmem:[#allocation17 + $0x1178] sm:$0xf0]  ;;  %v11916_v10 = vor.u32 %v12770_v5, %v11913_v39  ;;  %v11880_v59 = vor.u32 %v12764_v7, %v11879_v22 }
 0xcf8   :  { %v11932_v42 = vor.u32 %v12774_v51, %v11929_v12  ;;  %8285 = vmatpush.bf16.msrb.mxu0 %v11928_v62  ;;  %v11769_v51 = vld [vmem:[#allocation17 + $0x1038] sm:$0xf0]  ;;  %v11751_v62 = vld [vmem:[#allocation17 + $0x1008] sm:$0xf] }
 0xcf9   :  { %v11772_v12 = vor.u32 %v12734_v36, %v11769_v51 }
 0xcfa   :  { %8248 = vmatpush.bf16.msrb.mxu1 %v11764_v35 }
 0xcfb   :  { %8307 = vmatpush.bf16.msrb.mxu2 %v11996_v50  ;;  %8269 = vmatpush.bf16.msra.mxu3 %v11848_v18  ;;  %v12750_v50 = vld [vmem:[#allocation17 + $0x10ac] sm:$0xf] }
 0xcfc   :  { %v11836_v56 = vor.u32 %v12750_v50, %v11833_v19  ;;  %8286 = vmatpush.bf16.msrb.mxu0 %v11912_v8 }
 0xcfe   :  { %8249 = vmatpush.bf16.msrb.mxu1 %v11748_v16  ;;  %v11801_v16 = vld [vmem:[#allocation17 + $0x1078] sm:$0xf0] }
 0xcff   :  { %8308 = vmatpush.bf16.msrb.mxu2 %v11980_v20  ;;  %8270 = vmatpush.bf16.msra.mxu3 %v11832_v44  ;;  %v11804_v15 = vor.u32 %v12742_v1, %v11801_v16 }
 0xd00   :  { %8287 = vmatpush.bf16.msrb.mxu0 %v11896_v34 }
 0xd02   :  { %8294 = vmatpush.bf16.msra.mxu1 %v11868_v30  ;;  %v12762_v30 = vld [vmem:[#allocation17 + $0x110c] sm:$0xf] }
 0xd03   :  { %8309 = vmatpush.bf16.msrb.mxu2 %v11964_v41  ;;  %8271 = vmatpush.bf16.msra.mxu3 %v11816_v3  ;;  %v11900_v41 = vor.u32 %v12766_v40, %v11897_v21  ;;  %v11884_v13 = vor.u32 %v12762_v30, %v11881_v55 }
 0xd04   :  { %8288 = vmatpush.bf16.msrb.mxu0 %v11880_v59 }
 0xd06   :  { %8295 = vmatpush.bf16.msra.mxu1 %v11852_v25  ;;  %v11767_v25 = vld [vmem:[#allocation17 + $0x1028] sm:$0xf] }
 0xd07   :  { %8310 = vmatpush.bf16.msrb.mxu2 %v11948_v23  ;;  %8272 = vmatpush.bf16.msra.mxu3 %v11800_v2  ;;  %v12738_v23 = vld [vmem:[#allocation17 + $0x104c] sm:$0xf] }
 0xd0a   :  { %8296 = vmatpush.bf16.msra.mxu1 %v11836_v56 }
 0xd0b   :  { %8311 = vmatpush.bf16.msrb.mxu2 %v11932_v42  ;;  %v11753_v42 = vld [vmem:[#allocation17 + $0x1018] sm:$0xf0] }
 0xd0c   :  { %v11756_v19 = vor.u32 %v12730_v49, %v11753_v42 }
 0xd0e   :  { %8297 = vmatpush.bf16.msra.mxu1 %v11820_v31 }
 0xd0f   :  { %8312 = vmatpush.bf16.msrb.mxu2 %v11916_v10 }
 0xd12   :  { %8298 = vmatpush.bf16.msra.mxu1 %v11804_v15 }
 0xd13   :  { %8313 = vmatpush.bf16.msrb.mxu2 %v11900_v41 }
 0xd17   :  { %8314 = vmatpush.bf16.msrb.mxu2 %v11884_v13 }
 0xd3f   :  { %v14902_v26 = vpop.f32.mrf.mxu0 }
 0xd45   :  { %v7712_v53 = vpop.f32.mrf.mxu2 }
 0xd47   :  { %v7740_v29 = vpop.f32.mrf.mxu0 }
 0xd48   :  { %v11788_v29 = vor.u32 %v12738_v23, %v11785_v14 }
 0xd4a   :  { %8299 = vmatpush.bf16.msra.mxu1 %v11788_v29 }
 0xd4d   :  { %v7714_v28 = vpop.f32.mrf.mxu2 }
 0xd4e   :  { %v7699_v20 = vpop.f32.mrf.mxu1  ;;  %8300 = vmatpush.bf16.msra.mxu1 %v11772_v12 }
 0xd4f   :  { %v7713_v45 = vadd.f32 %v7712_v53, %v7699_v20  ;;  %v14904_v35 = vpop.f32.mrf.mxu0  ;;  %v12740_v53 = vld [vmem:[#allocation17 + $0x1054] sm:$0xf0] }
 0xd50   :  { %v11784_v32 = vor.u32 %v12740_v53, %v11783_v6 }
 0xd51   :  { %v14907_v60 = vadd.f32 %v7713_v45, %v14890_v11 }
 0xd52   :  { %8273 = vmatpush.bf16.msra.mxu3 %v11784_v32  ;;  %8301 = vmatpush.bf16.msra.mxu1 %v11756_v19 }
 0xd54   :  { %v7725_v27 = vpop.f32.mrf.mxu3 }
 0xd55   :  { %v7739_v11 = vadd.f32 %v14902_v26, %v7725_v27  ;;  %v7764_v9 = vpop.f32.mrf.mxu2  ;;  %v11768_v26 = vor.u32 %v12736_v47, %v11767_v25 }
 0xd56   :  { %v7701_v61 = vpop.f32.mrf.mxu1 }
 0xd57   :  { %v7795_v18 = vadd.f32 %v7739_v11, %v14886_v58  ;;  %v7792_v17 = vpop.f32.mrf.mxu0  ;;  %8274 = vmatpush.bf16.msra.mxu3 %v11768_v26  ;;  %v11752_v58 = vor.u32 %v12732_v63, %v11751_v62 }
 0xd5b   :  { %8275 = vmatpush.bf16.msra.mxu3 %v11752_v58 }
 0xd5c   :  { %v7727_v44 = vpop.f32.mrf.mxu3 }
 0xd5d   :  { %v7766_v50 = vpop.f32.mrf.mxu2 }
 0xd5e   :  { %v7751_v56 = vpop.f32.mrf.mxu1 }
 0xd5f   :  { %v7765_v24 = vadd.f32 %v7764_v9, %v7751_v56 }
 0xd61   :  { %v14912_v46 = vadd.f32 %v7765_v24, %v14896_v57 }
 0xd64   :  { %v7777_v5 = vpop.f32.mrf.mxu3 }
 0xd65   :  { %v7791_v8 = vadd.f32 %v14904_v35, %v7777_v5  ;;  %v7825_v39 = vpop.f32.mrf.mxu2  ;;  %v8324_v35 = vld [vmem:[#allocation19] sm:$0xf] }
 0xd66   :  { %v7830_v28 = vpack.c.bf16 %v7825_v39, %v7825_v39  ;;  %v7753_v10 = vpop.f32.mrf.mxu1  ;;  %v8326_v1 = vperm.slane %v8324_v35, 0  ;;  %v8328_v19 = vperm.slane %v8324_v35, 2 }
 0xd67   :  { %v7797_v4 = vadd.f32 %v7791_v8, %v14893_v0  ;;  %v8327_v0 = vperm.slane %v8324_v35, 1 }
 0xd68   :  { %8237 = vmatmul.bf16.vlgmr.msra.gmra.mxu0 %v7830_v28  ;;  %8263 = vmatmul.bf16.vlgmr.msra.gmra.mxu2 %v7830_v28 }
 0xd6c   :  { %v7779_v38 = vpop.f32.mrf.mxu3 }
 0xd6d   :  { %v7827_v52 = vpop.f32.mrf.mxu2 }
 0xd6e   :  { %v7812_v20 = vpop.f32.mrf.mxu1 }
 0xd6f   :  { %v7829_v3 = vpack.c.bf16 %v7812_v20, %v7812_v20 }
 0xd71   :  { %8224 = vmatmul.bf16.vlgmr.msrb.gmra.mxu3 %v7829_v3  ;;  %8250 = vmatmul.bf16.vlgmr.msrb.gmra.mxu1 %v7829_v3 }
 0xd76   :  { %v7814_v57 = vpop.f32.mrf.mxu1 }
 0xd78   :  { %8289 = vmatmul.bf16.vlgmr.msrb.gmra.mxu0 %v7830_v28  ;;  %8315 = vmatmul.bf16.vlgmr.msrb.gmra.mxu2 %v7830_v28 }
 0xd81   :  { %8276 = vmatmul.bf16.vlgmr.msra.gmra.mxu3 %v7829_v3  ;;  %8302 = vmatmul.bf16.vlgmr.msra.gmra.mxu1 %v7829_v3 }
 0xde5   :  { %v8238_v33 = vpop.f32.mrf.mxu0 }
 0xdeb   :  { %v8264_v45 = vpop.f32.mrf.mxu2 }
 0xded   :  { %v8240_v31 = vpop.f32.mrf.mxu0 }
 0xdee   :  { %v8251_v37 = vpop.f32.mrf.mxu1 }
 0xdef   :  { %v8265_v54 = vadd.f32 %v8264_v45, %v8251_v37 }
 0xdf1   :  { %v8321_v40 = vadd.f32 %v8265_v54, %v7795_v18  ;;  %v8329_v18 = vperm.slane %v8324_v35, 3 }
 0xdf3   :  { %v14916_v34 = vadd.f32 %v8327_v0, %v8321_v40  ;;  %v8266_v21 = vpop.f32.mrf.mxu2 }
 0xdf4   :  { %v8225_v41 = vpop.f32.mrf.mxu3 }
 0xdf5   :  { %v14919_v43 = vmul.f32 0.70710677, %v14916_v34  ;;  %v8239_v48 = vadd.f32 %v8238_v33, %v8225_v41  ;;  %v8290_v2 = vpop.f32.mrf.mxu0 }
 0xdf6   :  { %v8253_v16 = vpop.f32.mrf.mxu1 }
 0xdf7   :  { %v8386_v22 = vmul.f32 %v14919_v43, %v14919_v43  ;;  %v8320_v7 = vadd.f32 %v8239_v48, %v14907_v60 }
 0xdf9   :  { %v14924_v15 = vmin.f32 %v8386_v22, 16.0  ;;  %v14926_v59 = vadd.f32 %v8326_v1, %v8320_v7 }
 0xdfb   :  { %v8388_v30 = vmul.f32 2.1237322e-06, %v14924_v15  ;;  %v8399_v55 = vmul.f32 3.8918573e-05, %v14924_v15  ;;  %v8316_v27 = vpop.f32.mrf.mxu2  ;;  %v14931_v13 = vmul.f32 0.70710677, %v14926_v59 }
 0xdfc   :  { %v8227_v11 = vpop.f32.mrf.mxu3 }
 0xdfd   :  { %v8389_v9 = vadd.f32 0.00028619796, %v8388_v30  ;;  %v8400_v6 = vadd.f32 0.001143296, %v8399_v55  ;;  %v8292_v53 = vpop.f32.mrf.mxu0  ;;  %v8346_v23 = vmul.f32 %v14931_v13, %v14931_v13 }
 0xdfe   :  { %v8303_v60 = vpop.f32.mrf.mxu1 }
 0xdff   :  { %v8390_v61 = vmul.f32 %v8389_v9, %v14924_v15  ;;  %v8401_v32 = vmul.f32 %v8400_v6, %v14924_v15  ;;  %v8317_v14 = vadd.f32 %v8316_v27, %v8303_v60  ;;  %v14937_v17 = vmin.f32 %v8346_v23, 16.0 }
 0xe01   :  { %v8391_v29 = vadd.f32 0.0036580483, %v8390_v61  ;;  %v8402_v25 = vadd.f32 0.014752088, %v8401_v32  ;;  %v8323_v47 = vadd.f32 %v8317_v14, %v7797_v4  ;;  %v8348_v36 = vmul.f32 2.1237322e-06, %v14937_v17 }
 0xe02   :  { %v8359_v26 = vmul.f32 3.8918573e-05, %v14937_v17 }
 0xe03   :  { %v8392_v51 = vmul.f32 %v8391_v29, %v14924_v15  ;;  %v8403_v62 = vmul.f32 %v8402_v25, %v14924_v15  ;;  %v14943_v12 = vadd.f32 %v8329_v18, %v8323_v47  ;;  %v8318_v63 = vpop.f32.mrf.mxu2  ;;  %v8349_v49 = vadd.f32 0.00028619796, %v8348_v36 }
 0xe04   :  { %v8360_v42 = vadd.f32 0.001143296, %v8359_v26  ;;  %v8277_v44 = vpop.f32.mrf.mxu3 }
 0xe05   :  { %v8404_v50 = vadd.f32 0.112945676, %v8403_v62  ;;  %v8291_v58 = vadd.f32 %v8290_v2, %v8277_v44  ;;  %v8350_v56 = vmul.f32 %v8349_v49, %v14937_v17  ;;  %v14948_v5 = vmul.f32 0.70710677, %v14943_v12 }
 0xe06   :  { %v8361_v24 = vmul.f32 %v8360_v42, %v14937_v17  ;;  %v8305_v8 = vpop.f32.mrf.mxu1  ;;  %v8393_v39 = vadd.f32 0.05243302, %v8392_v51 }
 0xe07   :  { %v8405_v28 = vmul.f32 %v8404_v50, %v14924_v15  ;;  %v8322_v10 = vadd.f32 %v8291_v58, %v14912_v46  ;;  %v8466_v38 = vmul.f32 %v14948_v5, %v14948_v5  ;;  %v8351_v20 = vadd.f32 0.0036580483, %v8350_v56 }
 0xe08   :  { %v8362_v4 = vadd.f32 0.014752088, %v8361_v24  ;;  %v8394_v45 = vmul.f32 %v8393_v39, %v14924_v15 }
 0xe09   :  { %v8406_v52 = vadd.f32 0.4994258, %v8405_v28  ;;  %v14954_v3 = vadd.f32 %v8328_v19, %v8322_v10  ;;  %v14957_v33 = vmin.f32 %v8466_v38, 16.0  ;;  %v8352_v40 = vmul.f32 %v8351_v20, %v14937_v17 }
 0xe0a   :  { %v8363_v57 = vmul.f32 %v8362_v4, %v14937_v17  ;;  %v8395_v2 = vadd.f32 0.18741608, %v8394_v45 }
 0xe0b   :  { %v8407_v35 = vmul.f32 %v8406_v52, %v14924_v15  ;;  %v14962_v31 = vmul.f32 0.70710677, %v14954_v3  ;;  %v8468_v37 = vmul.f32 2.1237322e-06, %v14957_v33  ;;  %v8479_v21 = vmul.f32 3.8918573e-05, %v14957_v33 }
 0xe0c   :  { %v8364_v46 = vadd.f32 0.112945676, %v8363_v57  ;;  %v8279_v54 = vpop.f32.mrf.mxu3  ;;  %v8353_v7 = vadd.f32 0.05243302, %v8352_v40  ;;  %v8396_v11 = vmul.f32 %v8395_v2, %v14924_v15 }
 0xe0d   :  { %v8408_v0 = vadd.f32 1.0, %v8407_v35  ;;  %v8426_v41 = vmul.f32 %v14962_v31, %v14962_v31  ;;  %v8469_v1 = vadd.f32 0.00028619796, %v8468_v37  ;;  %v8480_v30 = vadd.f32 0.001143296, %v8479_v21 }
 0xe0e   :  { %v8365_v48 = vmul.f32 %v8364_v46, %v14937_v17  ;;  %v8354_v32 = vmul.f32 %v8353_v7, %v14937_v17  ;;  %v8397_v47 = vadd.f32 1.1283791, %v8396_v11  ;;  %v8642_v11 = vld [vmem:[#allocation22 + $0xf0] sm:$0xff] }
 0xe0f   :  { %12863 = vrcp.f32 %v8408_v0  ;;  %v8470_v22 = vmul.f32 %v8469_v1, %v14957_v33  ;;  %v14971_v55 = vmin.f32 %v8426_v41, 16.0  ;;  %v8481_v9 = vmul.f32 %v8480_v30, %v14957_v33 }
 0xe10   :  { %v8366_v16 = vadd.f32 0.4994258, %v8365_v48  ;;  %v8418_v62 = vand.u32 2147483647, %v8408_v0  ;;  %v8420_v63 = vand.u32 2147483648, %v8408_v0  ;;  %v8398_v19 = vmul.f32 %v8397_v47, %v14919_v43 }
 0xe11   :  { %v8428_v6 = vmul.f32 2.1237322e-06, %v14971_v55  ;;  %v8439_v53 = vmul.f32 3.8918573e-05, %v14971_v55  ;;  %v8471_v60 = vadd.f32 0.0036580483, %v8470_v22  ;;  %vm8414_vm2 = vweird.f32 %v8408_v0 }
 0xe12   :  { %v8367_v27 = vmul.f32 %v8366_v16, %v14937_v17  ;;  %v8482_v14 = vadd.f32 0.014752088, %v8481_v9  ;;  %v8355_v49 = vadd.f32 0.18741608, %v8354_v32  ;;  %vm8419_vm5 = vcmp.eq.f32.partialorder %v8418_v62, 8.507059e+37  ;;  %v8641_v32 = vld [vmem:[#allocation22 + $0xe8] sm:$0xff] }
 0xe13   :  { %v8429_v18 = vadd.f32 0.00028619796, %v8428_v6  ;;  %v8440_v29 = vadd.f32 0.001143296, %v8439_v53  ;;  %v8472_v42 = vmul.f32 %v8471_v60, %v14957_v33  ;;  %v8421_v10 = vor.u32 1.1754944e-38, %v8420_v63  ;;  %v8627_v53 = vld [vmem:[#allocation22 + $0x78] sm:$0xff] }
 0xe14   :  { %v14978_v23 = vadd.f32 1.0, %v8367_v27  ;;  %v8483_v36 = vmul.f32 %v8482_v14, %v14957_v33  ;;  %v8356_v4 = vmul.f32 %v8355_v49, %v14937_v17  ;;  %v8339_v22 = vmul.f32 0.5, %v14916_v34  ;;  %v8643_v27 = vld [vmem:[#allocation22 + $0xf8] sm:$0xff]  ;;  %8680 = vmatpush.msrb.mxu1 %v8627_v53 }
 0xe15   :  { %v12864_v61 = vpop.eup %12863  ;;  %v8430_v26 = vmul.f32 %v8429_v18, %v14971_v55  ;;  %v8441_v51 = vmul.f32 %v8440_v29, %v14971_v55  ;;  %v8473_v20 = vadd.f32 0.05243302, %v8472_v42  ;;  %8700 = vmatpush.msra.mxu2 %v8643_v27  ;;  %v8626_v29 = vld [vmem:[#allocation22 + $0x70] sm:$0xff]  ;;  %v8639_v62 = vld [vmem:[#allocation22 + $0xd8] sm:$0xff]  ;;  %v8624_v42 = vld [vmem:[#allocation22 + $0x60] sm:$0xff] }
 0xe16   :  { %v8410_v25 = vmul.f32 %v12864_v61, %v8408_v0  ;;  %12865 = vrcp.f32 %v14978_v23  ;;  %vm8415_vm14 = vweird.f32 %v12864_v61  ;;  %v8484_v50 = vadd.f32 0.112945676, %v8483_v36  ;;  %8681 = vmatpush.msrb.mxu1 %v8626_v29  ;;  %v8640_v36 = vld [vmem:[#allocation22 + $0xe0] sm:$0xff] }
 0xe17   :  { %v8442_v58 = vadd.f32 0.014752088, %v8441_v51  ;;  %v8431_v56 = vadd.f32 0.0036580483, %v8430_v26  ;;  %vm8416_vm13 = vmor %vm8414_vm2, %vm8415_vm14  ;;  %v8380_v54 = vand.u32 2147483648, %v14978_v23  ;;  %v8474_v1 = vmul.f32 %v8473_v20, %v14957_v33  ;;  %8701 = vmatpush.msra.mxu2 %v8642_v11  ;;  %v8625_v26 = vld [vmem:[#allocation22 + $0x68] sm:$0xff] }
 0xe18   :  { %v8411_v15 = vsub.f32 1.0, %v8410_v25  ;;  %v8485_v39 = vmul.f32 %v8484_v50, %v14957_v33  ;;  %v8357_v21 = vadd.f32 1.1283791, %v8356_v4  ;;  %v8378_v17 = vand.u32 2147483647, %v14978_v23  ;;  %8682 = vmatpush.msrb.mxu1 %v8625_v26  ;;  %v8658_v26 = vld [vmem:[#allocation22 + $0x170] sm:$0xff] }
 0xe19   :  { %v8443_v28 = vmul.f32 %v8442_v58, %v14971_v55  ;;  %v8432_v46 = vmul.f32 %v8431_v56, %v14971_v55  ;;  %vm8374_vm12 = vweird.f32 %v14978_v23  ;;  %v8381_v6 = vor.u32 1.1754944e-38, %v8380_v54  ;;  %8702 = vmatpush.msra.mxu2 %v8641_v32  ;;  %v8638_v56 = vld [vmem:[#allocation22 + $0xd0] sm:$0xff] }
 0xe1a   :  { %v8412_v44 = vmul.f32 %v12864_v61, %v8411_v15  ;;  %v8486_v57 = vadd.f32 0.4994258, %v8485_v39  ;;  %v8358_v60 = vmul.f32 %v8357_v21, %v14931_v13  ;;  %vm8379_vm15 = vcmp.eq.f32.partialorder %v8378_v17, 8.507059e+37  ;;  %v15008_v13 = vld [vmem:[#allocation20] sm:$0x3]  ;;  %8683 = vmatpush.msrb.mxu1 %v8624_v42  ;;  %v8634_v17 = vld [vmem:[#allocation22 + $0xb0] sm:$0xff] }
 0xe1b   :  { %v8444_v45 = vadd.f32 0.112945676, %v8443_v28  ;;  %v8433_v30 = vadd.f32 0.05243302, %v8432_v46  ;;  %v8475_v18 = vadd.f32 0.18741608, %v8474_v1  ;;  %8703 = vmatpush.msra.mxu2 %v8640_v36 }
 0xe1c   :  { %v12866_v24 = vpop.eup %12865  ;;  %v8413_v8 = vadd.f32 %v12864_v61, %v8412_v44  ;;  %v8487_v0 = vmul.f32 %v8486_v57, %v14957_v33  ;;  %v8338_v44 = vmul.f32 0.5, %v14926_v59  ;;  %v8637_v28 = vld [vmem:[#allocation22 + $0xc8] sm:$0xff]  ;;  %v8636_v57 = vld [vmem:[#allocation22 + $0xc0] sm:$0xff]  ;;  %v8635_v46 = vld [vmem:[#allocation22 + $0xb8] sm:$0xff]  ;;  %v8340_v29 = vmul.f32 0.5, %v14954_v3 }
 0xe1d   :  { %v8370_v38 = vmul.f32 %v12866_v24, %v14978_v23  ;;  %v8445_v40 = vmul.f32 %v8444_v45, %v14971_v55  ;;  %vm8375_vm6 = vweird.f32 %v12866_v24  ;;  %v8434_v47 = vmul.f32 %v8433_v30, %v14971_v55  ;;  %8704 = vmatpush.msra.mxu2 %v8639_v62  ;;  %v8618_v30 = vld [vmem:[#allocation22 + $0x30] sm:$0xff]  ;;  %v8672_v36 = vld [vmem:[#allocation22 + $0x1e0] sm:$0xff]  ;;  %v8671_v3 = vld [vmem:[#allocation22 + $0x1d8] sm:$0xff] }
 0xe1e   :  { %v8417_v52 = vsel %vm8416_vm13, %v12864_v61, %v8413_v8  ;;  %v14997_v2 = vadd.f32 1.0, %v8487_v0  ;;  %vm8376_vm0 = vmor %vm8374_vm12, %vm8375_vm6  ;;  %v8476_v49 = vmul.f32 %v8475_v18, %v14957_v33  ;;  %v8622_v33 = vld [vmem:[#allocation22 + $0x50] sm:$0xff]  ;;  %v8620_v0 = vld [vmem:[#allocation22 + $0x40] sm:$0xff]  ;;  %vm8760_vm13 = vcmask 74752  }
 0xe1f   :  { %v8422_v43 = vsel %vm8419_vm5, %v8421_v10, %v8417_v52  ;;  %v8371_v35 = vsub.f32 1.0, %v8370_v38  ;;  %v8446_v16 = vadd.f32 0.4994258, %v8445_v40  ;;  %8705 = vmatpush.msra.mxu2 %v8638_v56  ;;  %v8675_v18 = vld [vmem:[#allocation22 + $0x1f8] sm:$0xff]  ;;  %v8670_v62 = vld [vmem:[#allocation22 + $0x1d0] sm:$0xff]  ;;  %v8649_v56 = vld [vmem:[#allocation22 + $0x128] sm:$0xff] }
 0xe20   :  { %v8423_v37 = vmul.f32 %v8422_v43, %v8398_v19  ;;  %12867 = vrcp.f32 %v14997_v2  ;;  %v8435_v19 = vadd.f32 0.18741608, %v8434_v47  ;;  %v8477_v10 = vadd.f32 1.1283791, %v8476_v49  ;;  %v8621_v43 = vld [vmem:[#allocation22 + $0x48] sm:$0xff]  ;;  %v8655_v42 = vld [vmem:[#allocation22 + $0x158] sm:$0xff] }
 0xe21   :  { %v8372_v41 = vmul.f32 %v12866_v24, %v8371_v35  ;;  %v8447_v34 = vmul.f32 %v8446_v16, %v14971_v55  ;;  %v8500_v4 = vand.u32 2147483648, %v14997_v2  ;;  %v8498_v59 = vand.u32 2147483647, %v14997_v2  ;;  %8706 = vmatpush.msra.mxu2 %v8637_v28  ;;  %v8669_v49 = vld [vmem:[#allocation22 + $0x1c8] sm:$0xff]  ;;  %v8668_v28 = vld [vmem:[#allocation22 + $0x1c0] sm:$0xff] }
 0xe22   :  { %v11998_v48 = vclamps-f32 %v8423_v37, 1.0  ;;  %v8436_v20 = vmul.f32 %v8435_v19, %v14971_v55  ;;  %vm8494_vm1 = vweird.f32 %v14997_v2  ;;  %v8478_v37 = vmul.f32 %v8477_v10, %v14948_v5  ;;  %v8619_v5 = vld [vmem:[#allocation22 + $0x38] sm:$0xff]  ;;  %v8650_v19 = vld [vmem:[#allocation22 + $0x130] sm:$0xff]  ;;  %v8616_v10 = vld [vmem:[#allocation22 + $0x20] sm:$0xff] }
 0xe23   :  { %v8373_v7 = vadd.f32 %v12866_v24, %v8372_v41  ;;  %v15005_v15 = vadd.f32 1.0, %v8447_v34  ;;  %v8501_v55 = vor.u32 1.1754944e-38, %v8500_v4  ;;  %8707 = vmatpush.msra.mxu2 %v8636_v57  ;;  %vm8499_vm8 = vcmp.eq.f32.partialorder %v8498_v59, 8.507059e+37  ;;  %v8630_v4 = vld [vmem:[#allocation22 + $0x90] sm:$0xff]  ;;  %v8629_v59 = vld [vmem:[#allocation22 + $0x88] sm:$0xff] }
 0xe24   :  { %v8507_v9 = vadd.f32 1.0, %v11998_v48  ;;  %v8437_v21 = vadd.f32 1.1283791, %v8436_v20  ;;  %v8646_v20 = vld [vmem:[#allocation22 + $0x110] sm:$0xff] }
 0xe25   :  { %v8377_v61 = vsel %vm8376_vm0, %v12866_v24, %v8373_v7  ;;  %12869 = vrcp.f32 %v15005_v15  ;;  %v8623_v24 = vld [vmem:[#allocation22 + $0x58] sm:$0xff]  ;;  %v8460_v41 = vand.u32 2147483648, %v15005_v15  ;;  %8708 = vmatpush.msra.mxu2 %v8635_v46  ;;  %vm8454_vm4 = vweird.f32 %v15005_v15  ;;  %v8666_v57 = vld [vmem:[#allocation22 + $0x1b0] sm:$0xff]  ;;  %v8665_v46 = vld [vmem:[#allocation22 + $0x1a8] sm:$0xff] }
 0xe26   :  { %v8511_v23 = vmul.f32 %v8507_v9, %v8339_v22  ;;  %v8382_v14 = vsel %vm8379_vm15, %v8381_v6, %v8377_v61  ;;  %v12868_v63 = vpop.eup %12867  ;;  %8684 = vmatpush.msrb.mxu1 %v8623_v24  ;;  %v8633_v22 = vld [vmem:[#allocation22 + $0xa8] sm:$0xff]  ;;  %v8632_v9 = vld [vmem:[#allocation22 + $0xa0] sm:$0xff]  ;;  %v8438_v6 = vmul.f32 %v8437_v21, %v14962_v31  ;;  %v8674_v31 = vld [vmem:[#allocation22 + $0x1f0] sm:$0xff] }
 0xe27   :  { %v8383_v25 = vmul.f32 %v8382_v14, %v8358_v60  ;;  %v8490_v58 = vmul.f32 %v12868_v63, %v14997_v2  ;;  %vm8495_vm3 = vweird.f32 %v12868_v63  ;;  %v8458_v2 = vand.u32 2147483647, %v15005_v15  ;;  %8709 = vmatpush.msra.mxu2 %v8634_v17  ;;  %v8617_v24 = vld [vmem:[#allocation22 + $0x28] sm:$0xff]  ;;  %v8663_v21 = vld [vmem:[#allocation22 + $0x198] sm:$0xff] }
 0xe28   :  { %12003 = vmatpush.msk.msra.mxu0 %vm8519_vm11, %v8511_v23  ;;  %8685 = vmatpush.msrb.mxu1 %v8622_v33  ;;  %vm8496_vm7 = vmor %vm8494_vm1, %vm8495_vm3  ;;  %v8461_v11 = vor.u32 1.1754944e-38, %v8460_v41  ;;  %v8341_v60 = vmul.f32 0.5, %v14943_v12  ;;  %v8659_v12 = vld [vmem:[#allocation22 + $0x178] sm:$0xff]  ;;  %v8662_v41 = vld [vmem:[#allocation22 + $0x190] sm:$0xff] }
 0xe29   :  { %v11997_v51 = vclamps-f32 %v8383_v25, 1.0  ;;  %12004 = vmatmul.msk.f32.vlgmr.msra.gmra.mxu0 %vm8515_vm10, %v15008_v13  ;;  %v8491_v39 = vsub.f32 1.0, %v8490_v58  ;;  %vm8459_vm2 = vcmp.eq.f32.partialorder %v8458_v2, 8.507059e+37  ;;  %8710 = vmatpush.msra.mxu2 %v8633_v22  ;;  %v8651_v58 = vld [vmem:[#allocation22 + $0x138] sm:$0xff]  ;;  %v8661_v17 = vld [vmem:[#allocation22 + $0x188] sm:$0xff] }
 0xe2a   :  { %8686 = vmatpush.msrb.mxu1 %v8621_v43  ;;  %v8647_v33 = vld [vmem:[#allocation22 + $0x118] sm:$0xff]  ;;  %v8628_v43 = vld [vmem:[#allocation22 + $0x80] sm:$0xff] }
 0xe2b   :  { %v8506_v50 = vadd.f32 1.0, %v11997_v51  ;;  %v12870_v38 = vpop.eup %12869  ;;  %v8492_v52 = vmul.f32 %v12868_v63, %v8491_v39  ;;  %8711 = vmatpush.msra.mxu2 %v8632_v9  ;;  %v8657_v51 = vld [vmem:[#allocation22 + $0x168] sm:$0xff]  ;;  %v8648_v39 = vld [vmem:[#allocation22 + $0x120] sm:$0xff] }
 0xe2c   :  { %v8450_v45 = vmul.f32 %v12870_v38, %v15005_v15  ;;  %8687 = vmatpush.msrb.mxu1 %v8620_v0  ;;  %vm8455_vm9 = vweird.f32 %v12870_v38  ;;  %v8673_v15 = vld [vmem:[#allocation22 + $0x1e8] sm:$0xff]  ;;  %v8644_v0 = vld [vmem:[#allocation22 + $0x100] sm:$0xff] }
 0xe2d   :  { %v8510_v8 = vmul.f32 %v8506_v50, %v8338_v44  ;;  %v8493_v35 = vadd.f32 %v12868_v63, %v8492_v52  ;;  %vm8456_vm14 = vmor %vm8454_vm4, %vm8455_vm9  ;;  %v8654_v44 = vld [vmem:[#allocation22 + $0x150] sm:$0xff]  ;;  %v8653_v50 = vld [vmem:[#allocation22 + $0x148] sm:$0xff] }
 0xe2e   :  { %v8451_v54 = vsub.f32 1.0, %v8450_v45  ;;  %8688 = vmatpush.msrb.mxu1 %v8619_v5  ;;  %v8615_v52 = vld [vmem:[#allocation22 + $0x18] sm:$0xff]  ;;  %v8614_v45 = vld [vmem:[#allocation22 + $0x10] sm:$0xff] }
 0xe2f   :  { %12001 = vmatpush.msk.msrb.mxu3 %vm8519_vm11, %v8510_v8  ;;  %v8497_v40 = vsel %vm8496_vm7, %v12868_v63, %v8493_v35  ;;  %v8656_v63 = vld [vmem:[#allocation22 + $0x160] sm:$0xff]  ;;  %v8631_v8 = vld [vmem:[#allocation22 + $0x98] sm:$0xff]  ;;  %v8645_v35 = vld [vmem:[#allocation22 + $0x108] sm:$0xff] }
 0xe30   :  { %12002 = vmatmul.msk.f32.vlgmr.msrb.gmra.mxu3 %vm8515_vm10, %v15008_v13  ;;  %v8502_v48 = vsel %vm8499_vm8, %v8501_v55, %v8497_v40  ;;  %v8452_v1 = vmul.f32 %v12870_v38, %v8451_v54  ;;  %8689 = vmatpush.msrb.mxu1 %v8618_v30  ;;  %v8612_v55 = vld [vmem:[#allocation22] sm:$0xff] }
 0xe31   :  { %v8503_v16 = vmul.f32 %v8502_v48, %v8478_v37  ;;  %8712 = vmatpush.msra.mxu2 %v8631_v8  ;;  %v8613_v37 = vld [vmem:[#allocation22 + $0x8] sm:$0xff]  ;;  %v8664_v40 = vld [vmem:[#allocation22 + $0x1a0] sm:$0xff] }
 0xe32   :  { %v8453_v7 = vadd.f32 %v12870_v38, %v8452_v1  ;;  %8690 = vmatpush.msrb.mxu1 %v8617_v24  ;;  %v8660_v48 = vld [vmem:[#allocation22 + $0x180] sm:$0xff] }
 0xe33   :  { %v12000_v27 = vclamps-f32 %v8503_v16, 1.0  ;;  %8713 = vmatpush.msra.mxu2 %v8630_v4  ;;  %v12818_v16 = vld [vmem:[#allocation23] ss:$0 sm:$0xff] }
 0xe34   :  { %v8457_v53 = vsel %vm8456_vm14, %v12870_v38, %v8453_v7  ;;  %v8667_v38 = vld [vmem:[#allocation22 + $0x1b8] sm:$0xff]  ;;  %8691 = vmatpush.msrb.mxu1 %v8616_v10 }
 0xe35   :  { %v8509_v61 = vadd.f32 1.0, %v12000_v27  ;;  %v8462_v34 = vsel %vm8459_vm2, %v8461_v11, %v8457_v53  ;;  %8714 = vmatpush.msra.mxu2 %v8629_v59 }
 0xe36   :  { %v8463_v32 = vmul.f32 %v8462_v34, %v8438_v6  ;;  %8692 = vmatpush.msrb.mxu1 %v8615_v52 }
 0xe37   :  { %v8513_v23 = vmul.f32 %v8509_v61, %v8341_v60  ;;  %8715 = vmatpush.msra.mxu2 %v8628_v43 }
 0xe38   :  { %v11999_v14 = vclamps-f32 %v8463_v32, 1.0  ;;  %8693 = vmatpush.msrb.mxu1 %v8614_v45 }
 0xe39   :  { %12007 = vmatpush.msk.msrb.mxu0 %vm8519_vm11, %v8513_v23 }
 0xe3a   :  { %v8508_v25 = vadd.f32 1.0, %v11999_v14  ;;  %12008 = vmatmul.msk.f32.vlgmr.msrb.gmra.mxu0 %vm8515_vm10, %v15008_v13  ;;  %8694 = vmatpush.msrb.mxu1 %v8613_v37 }
 0xe3b   :  { %8740 = vmatpush.msra.mxu0 %v8675_v18 }
 0xe3c   :  { %v8512_v47 = vmul.f32 %v8508_v25, %v8340_v29  ;;  %8695 = vmatpush.msrb.mxu1 %v8612_v55 }
 0xe3d   :  { %8741 = vmatpush.msra.mxu0 %v8674_v31 }
 0xe3e   :  { %12005 = vmatpush.msk.msra.mxu3 %vm8519_vm11, %v8512_v47 }
 0xe3f   :  { %12006 = vmatmul.msk.f32.vlgmr.msra.gmra.mxu3 %vm8515_vm10, %v15008_v13  ;;  %8742 = vmatpush.msra.mxu0 %v8673_v15  ;;  %v8652_v13 = vld [vmem:[#allocation22 + $0x140] sm:$0xff] }
 0xe40   :  { %8720 = vmatpush.msrb.mxu3 %v8659_v12 }
 0xe41   :  { %8743 = vmatpush.msra.mxu0 %v8672_v36 }
 0xe42   :  { %8721 = vmatpush.msrb.mxu3 %v8658_v26 }
 0xe43   :  { %8744 = vmatpush.msra.mxu0 %v8671_v3 }
 0xe44   :  { %8722 = vmatpush.msrb.mxu3 %v8657_v51 }
 0xe45   :  { %8745 = vmatpush.msra.mxu0 %v8670_v62 }
 0xe46   :  { %8723 = vmatpush.msrb.mxu3 %v8656_v63 }
 0xe47   :  { %8746 = vmatpush.msra.mxu0 %v8669_v49 }
 0xe48   :  { %8724 = vmatpush.msrb.mxu3 %v8655_v42 }
 0xe49   :  { %8747 = vmatpush.msra.mxu0 %v8668_v28 }
 0xe4a   :  { %8725 = vmatpush.msrb.mxu3 %v8654_v44 }
 0xe4b   :  { %8748 = vmatpush.msra.mxu0 %v8667_v38 }
 0xe4c   :  { %8726 = vmatpush.msrb.mxu3 %v8653_v50 }
 0xe4d   :  { %8749 = vmatpush.msra.mxu0 %v8666_v57 }
 0xe4e   :  { %8727 = vmatpush.msrb.mxu3 %v8652_v13 }
 0xe4f   :  { %8750 = vmatpush.msra.mxu0 %v8665_v46 }
 0xe50   :  { %8728 = vmatpush.msrb.mxu3 %v8651_v58 }
 0xe51   :  { %8751 = vmatpush.msra.mxu0 %v8664_v40 }
 0xe52   :  { %8729 = vmatpush.msrb.mxu3 %v8650_v19 }
 0xe53   :  { %8752 = vmatpush.msra.mxu0 %v8663_v21 }
 0xe54   :  { %8730 = vmatpush.msrb.mxu3 %v8649_v56 }
 0xe55   :  { %8753 = vmatpush.msra.mxu0 %v8662_v41 }
 0xe56   :  { %8731 = vmatpush.msrb.mxu3 %v8648_v39 }
 0xe57   :  { %8754 = vmatpush.msra.mxu0 %v8661_v17 }
 0xe58   :  { %8732 = vmatpush.msrb.mxu3 %v8647_v33 }
 0xe59   :  { %8755 = vmatpush.msra.mxu0 %v8660_v48 }
 0xe5a   :  { %8733 = vmatpush.msrb.mxu3 %v8646_v20 }
 0xe5c   :  { %8734 = vmatpush.msrb.mxu3 %v8645_v35 }
 0xe5e   :  { %8735 = vmatpush.msrb.mxu3 %v8644_v0 }
 0xea6   :  { %v8569_v54 = vpop.f32.mrf.mxu0 }
 0xea7   :  { %8716 = vmatmul.f32.vlgmr.msra.gmra.mxu2 %v8569_v54 }
 0xeb3   :  { %v8549_v1 = vpop.f32.mrf.mxu3 }
 0xeb4   :  { %8696 = vmatmul.f32.vlgmr.msrb.gmra.mxu1 %v8549_v1 }
 0xeb7   :  { %v8609_v2 = vpop.f32.mrf.mxu0 }
 0xeb8   :  { %8756 = vmatmul.f32.vlgmr.msra.gmra.mxu0 %v8609_v2 }
 0xec2   :  { %v8589_v5 = vpop.f32.mrf.mxu3 }
 0xec3   :  { %8736 = vmatmul.f32.vlgmr.msrb.gmra.mxu3 %v8589_v5 }
 0xf2a   :  { %v8717_v30 = vpop.f32.mrf.mxu2 }
 0xf31   :  { %v8697_v22 = vpop.f32.mrf.mxu1 }
 0xf32   :  { %v8698_v7 = vadd.f32 %v12818_v16, %v8697_v22 }
 0xf34   :  { %v8718_v27 = vadd.f32 %v8717_v30, %v8698_v7 }
 0xf35   :  { %v8757_v9 = vpop.f32.mrf.mxu0 }
 0xf46   :  { %v8737_v11 = vpop.f32.mrf.mxu3 }
 0xf47   :  { %v8738_v6 = vadd.f32 %v8737_v11, %v8718_v27 }
 0xf49   :  { %v8758_v53 = vadd.f32 %v8757_v9, %v8738_v6 }
 0xf4b   :  { %8761 = vst.msk [vmem:[#allocation25] sm:$0x3] %vm8760_vm13, %v8758_v53 }
 0xf4c   :  { %8772 = dma.vmem_to_hbm [thread:$0]  %s8768_s22, 32, %s8770_s24, [#allocation4]  }
 0xf4d   :  { %13247 = dma.done.wait [#allocation4], 32  }
 0xf4e   :  { %13248 = vsyncadd [#allocation4], 4294967264 }
 0xf4f   :  { %8777 = vsyncpa [#allocation3], 1 }
 0xf50   :  { %8778 = vsyncpa [#allocation6], 1 }
 0xf51   :  { %8779 = vsyncpa [#allocation9], 1 }
 0xf52   :  { %8780 = vsyncpa [#allocation12], 1 }
 0xf53   :  { %8781 = vsyncpa [#allocation15], 1 }
 0xf54   :  { %8782 = vsyncpa [#allocation18], 1 }
 0xf55   :  { %8783 = vsyncpa [#allocation21], 1 }
 0xf56   :  { %8784 = vsyncpa [#allocation24], 1 }
 0xf57   :  { %8785 = vsyncpa [#allocation4], 1 }

</bundles_post_ra>
